<compile_context>
chip_gen: v6e
topology: v6e:2x2x1
jax: 0.10.0
libtpu: 0.0.40
codegen_flags: <defaults>
</compile_context>

<pallas_src>
import jax
import jax.numpy as jnp
from jax import lax
from jax.experimental import pallas as pl
from jax.experimental.pallas import tpu as pltpu

IN_SIZE = 100      # pose feature size per player (PyTorch input_size)
IN_PAD = 128       # lane-aligned padded feature size
HID = 128          # rnn_size
OUT_SIZE = 3       # fc output


def fencing_kernel(x_ref,              # (S, 2B, IN_PAD)  rows [0:B]=left, [B:2B]=right
                   wp_ref,             # (IN_PAD + HID, 4H)  fused [W_ih_p^T(pad); W_hh_p^T]
                   bp_ref,             # (1, 4H)
                   wst_ref,            # (HID, 4H)  W_ih_sum^T rows for h_left
                   wsb_ref,            # (HID, 4H)  W_ih_sum^T rows for h_right
                   wsh_ref,            # (HID, 4H)  W_hh_sum^T
                   bs_ref,             # (1, 4H)
                   wfc_ref,            # (HID, OUT_SIZE)
                   bfc_ref,            # (1, OUT_SIZE)
                   out_ref):           # (B, OUT_SIZE)
    S, two_b, _ = x_ref.shape
    B = two_b // 2

    # Hoisted bias broadcasts (JAX does not CSE broadcast_in_dim inside the loop).
    bp = jnp.broadcast_to(bp_ref[...], (two_b, 4 * HID))
    bs = jnp.broadcast_to(bs_ref[...], (B, 4 * HID))

    def gates_to_hc(g, c):
        """PyTorch LSTM gate order: i, f, g, o."""
        i = jax.nn.sigmoid(g[:, 0 * HID:1 * HID])
        f = jax.nn.sigmoid(g[:, 1 * HID:2 * HID])
        gg = jnp.tanh(g[:, 2 * HID:3 * HID])
        o = jax.nn.sigmoid(g[:, 3 * HID:4 * HID])
        c_new = f * c + i * gg
        h_new = o * jnp.tanh(c_new)
        return h_new, c_new

    def step(t, carry):
        h_p, c_p, h_s, c_s = carry

        # ---- player LSTM: left & right stacked on the batch (sublane) dim ----
        x_t = x_ref[t]                                        # (2B, IN_PAD)
        xh = jnp.concatenate([x_t, h_p], axis=-1)             # (2B, IN_PAD + HID)
        g_p = jnp.dot(xh, wp_ref[...],
                      preferred_element_type=jnp.float32) + bp
        h_p, c_p = gates_to_hc(g_p, c_p)

        # ---- sum LSTM on [h_left, h_right] without materializing the concat ----
        h_l = h_p[:B]                                         # (B, HID)
        h_r = h_p[B:]                                         # (B, HID)
        g_s = (jnp.dot(h_l, wst_ref[...], preferred_element_type=jnp.float32)
               + jnp.dot(h_r, wsb_ref[...], preferred_element_type=jnp.float32)
               + jnp.dot(h_s, wsh_ref[...], preferred_element_type=jnp.float32)
               + bs)
        h_s, c_s = gates_to_hc(g_s, c_s)
        return (h_p, c_p, h_s, c_s)

    zero_p = jnp.zeros((two_b, HID), jnp.float32)
    zero_s = jnp.zeros((B, HID), jnp.float32)
    _, _, h_s, _ = lax.fori_loop(0, S, step,
                                 (zero_p, zero_p, zero_s, zero_s),
                                 unroll=(S <= 16))

    # dropout (eval mode, identity) -> fc -> log_softmax   (one-time (B,3) masked store)
    res = (jnp.dot(h_s, wfc_ref[...], preferred_element_type=jnp.float32)
           + bfc_ref[...])                                    # (B, OUT_SIZE)
    m = jnp.max(res, axis=1, keepdims=True)
    lse = m + jnp.log(jnp.sum(jnp.exp(res - m), axis=1, keepdims=True))
    out_ref[...] = res - lse


@jax.jit
def fencing_forward(frames_pose_tensor, packed_params):
    """frames_pose_tensor: (B, S, 2, IN_SIZE) float32 (matches the PyTorch call)."""
    B, S, P, F = frames_pose_tensor.shape
    (wp, bp, wst, wsb, wsh, bs, wfc_t, bfc) = packed_params

    # (B, S, 2, IN) -> (S, 2, B, IN) -> (S, 2B, IN) -> pad features to 128 lanes.
    x = jnp.transpose(frames_pose_tensor, (1, 2, 0, 3)).reshape(S, P * B, F)
    x = jnp.pad(x, ((0, 0), (0, 0), (0, IN_PAD - F)))

    full = lambda shape: pl.BlockSpec(shape, lambda i: (0,) * len(shape))

    grid_spec = pltpu.PrefetchScalarGridSpec(
        num_scalar_prefetch=0,
        grid=(1,),                     # single invocation; time loop lives in-kernel
        in_specs=[
            full((S, 2 * B, IN_PAD)),          # x (stacked, padded, time-major)
            full((IN_PAD + HID, 4 * HID)),     # fused player weights
            full((1, 4 * HID)),                # player bias
            full((HID, 4 * HID)),              # W_ih_sum^T (left half)
            full((HID, 4 * HID)),              # W_ih_sum^T (right half)
            full((HID, 4 * HID)),              # W_hh_sum^T
            full((1, 4 * HID)),                # sum bias
            full((HID, OUT_SIZE)),             # fc weight^T
            full((1, OUT_SIZE)),               # fc bias
        ],
        out_specs=pl.BlockSpec((B, OUT_SIZE), lambda i: (0, 0)),
        scratch_shapes=[],
    )

    return pl.pallas_call(
        fencing_kernel,
        out_shape=jax.ShapeDtypeStruct((B, OUT_SIZE), jnp.float32),
        grid_spec=grid_spec,
        compiler_params=pltpu.CompilerParams(
            dimension_semantics=("arbitrary",)),
    )(x, wp, bp, wst, wsb, wsh, bs, wfc_t, bfc)


def init_raw_params(key):
    """PyTorch-shaped parameters (deterministic)."""
    ks = jax.random.split(key, 10)
    u = lambda k, shape, bound: jax.random.uniform(
        k, shape, jnp.float32, minval=-bound, maxval=bound)
    bnd = 1.0 / jnp.sqrt(HID)
    wih_p = u(ks[0], (4 * HID, IN_SIZE), bnd)   # rnn_player.weight_ih_l0
    whh_p = u(ks[1], (4 * HID, HID), bnd)       # rnn_player.weight_hh_l0
    bih_p = u(ks[2], (4 * HID,), bnd)
    bhh_p = u(ks[3], (4 * HID,), bnd)
    wih_s = u(ks[4], (4 * HID, 2 * HID), bnd)   # rnn_sum.weight_ih_l0
    whh_s = u(ks[5], (4 * HID, HID), bnd)       # rnn_sum.weight_hh_l0
    bih_s = u(ks[6], (4 * HID,), bnd)
    bhh_s = u(ks[7], (4 * HID,), bnd)
    wfc = u(ks[8], (OUT_SIZE, HID), bnd)        # fc.weight
    bfc = u(ks[9], (OUT_SIZE,), bnd)            # fc.bias
    return (wih_p, whh_p, bih_p, bhh_p, wih_s, whh_s, bih_s, bhh_s, wfc, bfc)


def pack_params(raw):
    """Host-side repack: transpose, pad IN to 128, fuse [W_ih; W_hh], merge biases."""
    (wih_p, whh_p, bih_p, bhh_p, wih_s, whh_s, bih_s, bhh_s, wfc, bfc) = raw
    wih_p_t = jnp.pad(wih_p.T, ((0, IN_PAD - IN_SIZE), (0, 0)))   # (128, 4H)
    wp = jnp.concatenate([wih_p_t, whh_p.T], axis=0)              # (256, 4H)
    bp = (bih_p + bhh_p)[None, :]
    wih_s_t = wih_s.T                                             # (256, 4H)
    wst = wih_s_t[:HID]                                           # acts on h_left
    wsb = wih_s_t[HID:]                                           # acts on h_right
    wsh = whh_s.T
    bs = (bih_s + bhh_s)[None, :]
    return (wp, bp, wst, wsb, wsh, bs, wfc.T, bfc[None, :])


def reference_forward(frames_pose_tensor, raw):
    """Pure-JAX (lax.scan) reference mirroring the PyTorch module."""
    (wih_p, whh_p, bih_p, bhh_p, wih_s, whh_s, bih_s, bhh_s, wfc, bfc) = raw
    x = jnp.transpose(frames_pose_tensor, (1, 0, 2, 3))   # (S, B, 2, IN)
    x_left, x_right = x[:, :, 0, :], x[:, :, 1, :]
    B = frames_pose_tensor.shape[0]

    def cell(x_t, h, c, wih, whh, bih, bhh):
        g = x_t @ wih.T + h @ whh.T + bih + bhh
        i = jax.nn.sigmoid(g[:, :HID])
        f = jax.nn.sigmoid(g[:, HID:2 * HID])
        gg = jnp.tanh(g[:, 2 * HID:3 * HID])
        o = jax.nn.sigmoid(g[:, 3 * HID:])
        c_new = f * c + i * gg
        return o * jnp.tanh(c_new), c_new

    def step(carry, xs):
        hl, cl, hr, cr, hs, cs = carry
        xl_t, xr_t = xs
        hl, cl = cell(xl_t, hl, cl, wih_p, whh_p, bih_p, bhh_p)
        hr, cr = cell(xr_t, hr, cr, wih_p, whh_p, bih_p, bhh_p)
        hs, cs = cell(jnp.concatenate([hl, hr], axis=-1), hs, cs,
                      wih_s, whh_s, bih_s, bhh_s)
        return (hl, cl, hr, cr, hs, cs), None

    z = jnp.zeros((B, HID), jnp.float32)
    carry, _ = lax.scan(step, (z, z, z, z, z, z), (x_left, x_right))
    h_last = carry[4]
    res = h_last @ wfc.T + bfc
    return jax.nn.log_softmax(res, axis=1)


if __name__ == "__main__":
    key = jax.random.PRNGKey(0)
    k_data, k_param = jax.random.split(key)

    B, S = 2, 8
    frames = jax.random.normal(k_data, (B, S, 2, IN_SIZE), jnp.float32)
    raw = init_raw_params(k_param)
    packed = pack_params(raw)

    out = jax.block_until_ready(fencing_forward(frames, packed))
    ref = jax.block_until_ready(reference_forward(frames, raw))

    assert out.shape == (B, OUT_SIZE)
    assert jnp.allclose(out, ref, atol=2e-3, rtol=2e-3), (out, ref)

    print("KERNEL_OK")
</pallas_src>

<mosaic_0001>
module attributes {stable_mosaic.version = 11 : i64} {
  func.func @fencing_kernel(%arg0: i32, %arg1: memref<8x4x128xf32, #tpu.memory_space<vmem>>, %arg2: memref<256x512xf32, #tpu.memory_space<vmem>>, %arg3: memref<1x512xf32, #tpu.memory_space<vmem>>, %arg4: memref<128x512xf32, #tpu.memory_space<vmem>>, %arg5: memref<128x512xf32, #tpu.memory_space<vmem>>, %arg6: memref<128x512xf32, #tpu.memory_space<vmem>>, %arg7: memref<1x512xf32, #tpu.memory_space<vmem>>, %arg8: memref<128x3xf32, #tpu.memory_space<vmem>>, %arg9: memref<1x3xf32, #tpu.memory_space<vmem>>, %arg10: memref<2x3xf32, #tpu.memory_space<vmem>>) attributes {dimension_semantics = [#tpu.dimension_semantics<arbitrary>], iteration_bounds = array<i64: 1>, scalar_prefetch = 0 : i64, scratch_operands = 0 : i64, tpu.core_type = #tpu.core_type<tc>, window_params = [{pipeline_mode = #tpu.pipeline_mode<synchronous>, transform_indices = @transform_0, window_bounds = array<i64: 8, 4, 128>}, {pipeline_mode = #tpu.pipeline_mode<synchronous>, transform_indices = @transform_1, window_bounds = array<i64: 256, 512>}, {pipeline_mode = #tpu.pipeline_mode<synchronous>, transform_indices = @transform_2, window_bounds = array<i64: 1, 512>}, {pipeline_mode = #tpu.pipeline_mode<synchronous>, transform_indices = @transform_3, window_bounds = array<i64: 128, 512>}, {pipeline_mode = #tpu.pipeline_mode<synchronous>, transform_indices = @transform_4, window_bounds = array<i64: 128, 512>}, {pipeline_mode = #tpu.pipeline_mode<synchronous>, transform_indices = @transform_5, window_bounds = array<i64: 128, 512>}, {pipeline_mode = #tpu.pipeline_mode<synchronous>, transform_indices = @transform_6, window_bounds = array<i64: 1, 512>}, {pipeline_mode = #tpu.pipeline_mode<synchronous>, transform_indices = @transform_7, window_bounds = array<i64: 128, 3>}, {pipeline_mode = #tpu.pipeline_mode<synchronous>, transform_indices = @transform_8, window_bounds = array<i64: 1, 3>}, {pipeline_mode = #tpu.pipeline_mode<synchronous>, transform_indices = @transform_9, window_bounds = array<i64: 2, 3>}]} {
    %c0 = arith.constant 0 : index
    %c0_0 = arith.constant 0 : index
    %0 = vector.load %arg3[%c0, %c0_0] : memref<1x512xf32, #tpu.memory_space<vmem>>, vector<1x512xf32>
    %1 = vector.shape_cast %0 : vector<1x512xf32> to vector<1x512xf32>
    %2 = vector.broadcast %1 : vector<1x512xf32> to vector<4x512xf32>
    %c0_1 = arith.constant 0 : index
    %c0_2 = arith.constant 0 : index
    %3 = vector.load %arg7[%c0_1, %c0_2] : memref<1x512xf32, #tpu.memory_space<vmem>>, vector<1x512xf32>
    %4 = vector.shape_cast %3 : vector<1x512xf32> to vector<1x512xf32>
    %5 = vector.broadcast %4 : vector<1x512xf32> to vector<2x512xf32>
    %cst = arith.constant 0.000000e+00 : f32
    %6 = vector.broadcast %cst : f32 to vector<4x128xf32>
    %cst_3 = arith.constant 0.000000e+00 : f32
    %7 = vector.broadcast %cst_3 : f32 to vector<2x128xf32>
    %c0_i32 = arith.constant 0 : i32
    %8 = arith.index_cast %c0_i32 : i32 to index
    %c0_4 = arith.constant 0 : index
    %c0_5 = arith.constant 0 : index
    %9 = vector.load %arg1[%8, %c0_4, %c0_5] : memref<8x4x128xf32, #tpu.memory_space<vmem>>, vector<1x4x128xf32>
    %10 = vector.shape_cast %9 : vector<1x4x128xf32> to vector<4x128xf32>
    %11 = tpu.concatenate %10, %6 in 1 : vector<4x128xf32>, vector<4x128xf32> -> vector<4x256xf32>
    %c0_6 = arith.constant 0 : index
    %c0_7 = arith.constant 0 : index
    %12 = vector.load %arg2[%c0_6, %c0_7] : memref<256x512xf32, #tpu.memory_space<vmem>>, vector<256x512xf32>
    %cst_8 = arith.constant dense<0.000000e+00> : vector<4x512xf32>
    %13 = tpu.matmul %11, %12, %cst_8 {dimension_numbers = #tpu.dot_dimension_numbers<[1], [0], [0], [1], [0, 0, 1, 1], [], []>} : vector<4x256xf32>, vector<256x512xf32>, vector<4x512xf32> -> vector<4x512xf32>
    %14 = arith.addf %13, %2 : vector<4x512xf32>
    %15 = vector.extract_strided_slice %14 {offsets = [0, 0], sizes = [4, 128], strides = [1, 1]} : vector<4x512xf32> to vector<4x128xf32>
    %16 = arith.negf %15 : vector<4x128xf32>
    %17 = math.exp %16 : vector<4x128xf32>
    %cst_9 = arith.constant 1.000000e+00 : f32
    %18 = vector.broadcast %cst_9 : f32 to vector<4x128xf32>
    %19 = arith.addf %18, %17 : vector<4x128xf32>
    %20 = arith.divf %18, %19 : vector<4x128xf32>
    %21 = vector.extract_strided_slice %14 {offsets = [0, 128], sizes = [4, 128], strides = [1, 1]} : vector<4x512xf32> to vector<4x128xf32>
    %22 = arith.negf %21 : vector<4x128xf32>
    %23 = math.exp %22 : vector<4x128xf32>
    %cst_10 = arith.constant 1.000000e+00 : f32
    %24 = vector.broadcast %cst_10 : f32 to vector<4x128xf32>
    %25 = arith.addf %24, %23 : vector<4x128xf32>
    %26 = arith.divf %24, %25 : vector<4x128xf32>
    %27 = vector.extract_strided_slice %14 {offsets = [0, 256], sizes = [4, 128], strides = [1, 1]} : vector<4x512xf32> to vector<4x128xf32>
    %28 = math.tanh %27 : vector<4x128xf32>
    %29 = vector.extract_strided_slice %14 {offsets = [0, 384], sizes = [4, 128], strides = [1, 1]} : vector<4x512xf32> to vector<4x128xf32>
    %30 = arith.negf %29 : vector<4x128xf32>
    %31 = math.exp %30 : vector<4x128xf32>
    %cst_11 = arith.constant 1.000000e+00 : f32
    %32 = vector.broadcast %cst_11 : f32 to vector<4x128xf32>
    %33 = arith.addf %32, %31 : vector<4x128xf32>
    %34 = arith.divf %32, %33 : vector<4x128xf32>
    %35 = arith.mulf %26, %6 : vector<4x128xf32>
    %36 = arith.mulf %20, %28 : vector<4x128xf32>
    %37 = arith.addf %35, %36 : vector<4x128xf32>
    %38 = math.tanh %37 : vector<4x128xf32>
    %39 = arith.mulf %34, %38 : vector<4x128xf32>
    %40 = vector.extract_strided_slice %39 {offsets = [0, 0], sizes = [2, 128], strides = [1, 1]} : vector<4x128xf32> to vector<2x128xf32>
    %41 = vector.extract_strided_slice %39 {offsets = [2, 0], sizes = [2, 128], strides = [1, 1]} : vector<4x128xf32> to vector<2x128xf32>
    %c0_12 = arith.constant 0 : index
    %c0_13 = arith.constant 0 : index
    %42 = vector.load %arg4[%c0_12, %c0_13] : memref<128x512xf32, #tpu.memory_space<vmem>>, vector<128x512xf32>
    %cst_14 = arith.constant dense<0.000000e+00> : vector<2x512xf32>
    %43 = tpu.matmul %40, %42, %cst_14 {dimension_numbers = #tpu.dot_dimension_numbers<[1], [0], [0], [1], [0, 0, 1, 1], [], []>} : vector<2x128xf32>, vector<128x512xf32>, vector<2x512xf32> -> vector<2x512xf32>
    %c0_15 = arith.constant 0 : index
    %c0_16 = arith.constant 0 : index
    %44 = vector.load %arg5[%c0_15, %c0_16] : memref<128x512xf32, #tpu.memory_space<vmem>>, vector<128x512xf32>
    %cst_17 = arith.constant dense<0.000000e+00> : vector<2x512xf32>
    %45 = tpu.matmul %41, %44, %cst_17 {dimension_numbers = #tpu.dot_dimension_numbers<[1], [0], [0], [1], [0, 0, 1, 1], [], []>} : vector<2x128xf32>, vector<128x512xf32>, vector<2x512xf32> -> vector<2x512xf32>
    %46 = arith.addf %43, %45 : vector<2x512xf32>
    %c0_18 = arith.constant 0 : index
    %c0_19 = arith.constant 0 : index
    %47 = vector.load %arg6[%c0_18, %c0_19] : memref<128x512xf32, #tpu.memory_space<vmem>>, vector<128x512xf32>
    %cst_20 = arith.constant dense<0.000000e+00> : vector<2x512xf32>
    %48 = tpu.matmul %7, %47, %cst_20 {dimension_numbers = #tpu.dot_dimension_numbers<[1], [0], [0], [1], [0, 0, 1, 1], [], []>} : vector<2x128xf32>, vector<128x512xf32>, vector<2x512xf32> -> vector<2x512xf32>
    %49 = arith.addf %46, %48 : vector<2x512xf32>
    %50 = arith.addf %49, %5 : vector<2x512xf32>
    %51 = vector.extract_strided_slice %50 {offsets = [0, 0], sizes = [2, 128], strides = [1, 1]} : vector<2x512xf32> to vector<2x128xf32>
    %52 = arith.negf %51 : vector<2x128xf32>
    %53 = math.exp %52 : vector<2x128xf32>
    %cst_21 = arith.constant 1.000000e+00 : f32
    %54 = vector.broadcast %cst_21 : f32 to vector<2x128xf32>
    %55 = arith.addf %54, %53 : vector<2x128xf32>
    %56 = arith.divf %54, %55 : vector<2x128xf32>
    %57 = vector.extract_strided_slice %50 {offsets = [0, 128], sizes = [2, 128], strides = [1, 1]} : vector<2x512xf32> to vector<2x128xf32>
    %58 = arith.negf %57 : vector<2x128xf32>
    %59 = math.exp %58 : vector<2x128xf32>
    %cst_22 = arith.constant 1.000000e+00 : f32
    %60 = vector.broadcast %cst_22 : f32 to vector<2x128xf32>
    %61 = arith.addf %60, %59 : vector<2x128xf32>
    %62 = arith.divf %60, %61 : vector<2x128xf32>
    %63 = vector.extract_strided_slice %50 {offsets = [0, 256], sizes = [2, 128], strides = [1, 1]} : vector<2x512xf32> to vector<2x128xf32>
    %64 = math.tanh %63 : vector<2x128xf32>
    %65 = vector.extract_strided_slice %50 {offsets = [0, 384], sizes = [2, 128], strides = [1, 1]} : vector<2x512xf32> to vector<2x128xf32>
    %66 = arith.negf %65 : vector<2x128xf32>
    %67 = math.exp %66 : vector<2x128xf32>
    %cst_23 = arith.constant 1.000000e+00 : f32
    %68 = vector.broadcast %cst_23 : f32 to vector<2x128xf32>
    %69 = arith.addf %68, %67 : vector<2x128xf32>
    %70 = arith.divf %68, %69 : vector<2x128xf32>
    %71 = arith.mulf %62, %7 : vector<2x128xf32>
    %72 = arith.mulf %56, %64 : vector<2x128xf32>
    %73 = arith.addf %71, %72 : vector<2x128xf32>
    %74 = math.tanh %73 : vector<2x128xf32>
    %75 = arith.mulf %70, %74 : vector<2x128xf32>
    %c1_i32 = arith.constant 1 : i32
    %76 = arith.index_cast %c1_i32 : i32 to index
    %c0_24 = arith.constant 0 : index
    %c0_25 = arith.constant 0 : index
    %77 = vector.load %arg1[%76, %c0_24, %c0_25] : memref<8x4x128xf32, #tpu.memory_space<vmem>>, vector<1x4x128xf32>
    %78 = vector.shape_cast %77 : vector<1x4x128xf32> to vector<4x128xf32>
    %79 = tpu.concatenate %78, %39 in 1 : vector<4x128xf32>, vector<4x128xf32> -> vector<4x256xf32>
    %c0_26 = arith.constant 0 : index
    %c0_27 = arith.constant 0 : index
    %80 = vector.load %arg2[%c0_26, %c0_27] : memref<256x512xf32, #tpu.memory_space<vmem>>, vector<256x512xf32>
    %cst_28 = arith.constant dense<0.000000e+00> : vector<4x512xf32>
    %81 = tpu.matmul %79, %80, %cst_28 {dimension_numbers = #tpu.dot_dimension_numbers<[1], [0], [0], [1], [0, 0, 1, 1], [], []>} : vector<4x256xf32>, vector<256x512xf32>, vector<4x512xf32> -> vector<4x512xf32>
    %82 = arith.addf %81, %2 : vector<4x512xf32>
    %83 = vector.extract_strided_slice %82 {offsets = [0, 0], sizes = [4, 128], strides = [1, 1]} : vector<4x512xf32> to vector<4x128xf32>
    %84 = arith.negf %83 : vector<4x128xf32>
    %85 = math.exp %84 : vector<4x128xf32>
    %cst_29 = arith.constant 1.000000e+00 : f32
    %86 = vector.broadcast %cst_29 : f32 to vector<4x128xf32>
    %87 = arith.addf %86, %85 : vector<4x128xf32>
    %88 = arith.divf %86, %87 : vector<4x128xf32>
    %89 = vector.extract_strided_slice %82 {offsets = [0, 128], sizes = [4, 128], strides = [1, 1]} : vector<4x512xf32> to vector<4x128xf32>
    %90 = arith.negf %89 : vector<4x128xf32>
    %91 = math.exp %90 : vector<4x128xf32>
    %cst_30 = arith.constant 1.000000e+00 : f32
    %92 = vector.broadcast %cst_30 : f32 to vector<4x128xf32>
    %93 = arith.addf %92, %91 : vector<4x128xf32>
    %94 = arith.divf %92, %93 : vector<4x128xf32>
    %95 = vector.extract_strided_slice %82 {offsets = [0, 256], sizes = [4, 128], strides = [1, 1]} : vector<4x512xf32> to vector<4x128xf32>
    %96 = math.tanh %95 : vector<4x128xf32>
    %97 = vector.extract_strided_slice %82 {offsets = [0, 384], sizes = [4, 128], strides = [1, 1]} : vector<4x512xf32> to vector<4x128xf32>
    %98 = arith.negf %97 : vector<4x128xf32>
    %99 = math.exp %98 : vector<4x128xf32>
    %cst_31 = arith.constant 1.000000e+00 : f32
    %100 = vector.broadcast %cst_31 : f32 to vector<4x128xf32>
    %101 = arith.addf %100, %99 : vector<4x128xf32>
    %102 = arith.divf %100, %101 : vector<4x128xf32>
    %103 = arith.mulf %94, %37 : vector<4x128xf32>
    %104 = arith.mulf %88, %96 : vector<4x128xf32>
    %105 = arith.addf %103, %104 : vector<4x128xf32>
    %106 = math.tanh %105 : vector<4x128xf32>
    %107 = arith.mulf %102, %106 : vector<4x128xf32>
    %108 = vector.extract_strided_slice %107 {offsets = [0, 0], sizes = [2, 128], strides = [1, 1]} : vector<4x128xf32> to vector<2x128xf32>
    %109 = vector.extract_strided_slice %107 {offsets = [2, 0], sizes = [2, 128], strides = [1, 1]} : vector<4x128xf32> to vector<2x128xf32>
    %c0_32 = arith.constant 0 : index
    %c0_33 = arith.constant 0 : index
    %110 = vector.load %arg4[%c0_32, %c0_33] : memref<128x512xf32, #tpu.memory_space<vmem>>, vector<128x512xf32>
    %cst_34 = arith.constant dense<0.000000e+00> : vector<2x512xf32>
    %111 = tpu.matmul %108, %110, %cst_34 {dimension_numbers = #tpu.dot_dimension_numbers<[1], [0], [0], [1], [0, 0, 1, 1], [], []>} : vector<2x128xf32>, vector<128x512xf32>, vector<2x512xf32> -> vector<2x512xf32>
    %c0_35 = arith.constant 0 : index
    %c0_36 = arith.constant 0 : index
    %112 = vector.load %arg5[%c0_35, %c0_36] : memref<128x512xf32, #tpu.memory_space<vmem>>, vector<128x512xf32>
    %cst_37 = arith.constant dense<0.000000e+00> : vector<2x512xf32>
    %113 = tpu.matmul %109, %112, %cst_37 {dimension_numbers = #tpu.dot_dimension_numbers<[1], [0], [0], [1], [0, 0, 1, 1], [], []>} : vector<2x128xf32>, vector<128x512xf32>, vector<2x512xf32> -> vector<2x512xf32>
    %114 = arith.addf %111, %113 : vector<2x512xf32>
    %c0_38 = arith.constant 0 : index
    %c0_39 = arith.constant 0 : index
    %115 = vector.load %arg6[%c0_38, %c0_39] : memref<128x512xf32, #tpu.memory_space<vmem>>, vector<128x512xf32>
    %cst_40 = arith.constant dense<0.000000e+00> : vector<2x512xf32>
    %116 = tpu.matmul %75, %115, %cst_40 {dimension_numbers = #tpu.dot_dimension_numbers<[1], [0], [0], [1], [0, 0, 1, 1], [], []>} : vector<2x128xf32>, vector<128x512xf32>, vector<2x512xf32> -> vector<2x512xf32>
    %117 = arith.addf %114, %116 : vector<2x512xf32>
    %118 = arith.addf %117, %5 : vector<2x512xf32>
    %119 = vector.extract_strided_slice %118 {offsets = [0, 0], sizes = [2, 128], strides = [1, 1]} : vector<2x512xf32> to vector<2x128xf32>
    %120 = arith.negf %119 : vector<2x128xf32>
    %121 = math.exp %120 : vector<2x128xf32>
    %cst_41 = arith.constant 1.000000e+00 : f32
    %122 = vector.broadcast %cst_41 : f32 to vector<2x128xf32>
    %123 = arith.addf %122, %121 : vector<2x128xf32>
    %124 = arith.divf %122, %123 : vector<2x128xf32>
    %125 = vector.extract_strided_slice %118 {offsets = [0, 128], sizes = [2, 128], strides = [1, 1]} : vector<2x512xf32> to vector<2x128xf32>
    %126 = arith.negf %125 : vector<2x128xf32>
    %127 = math.exp %126 : vector<2x128xf32>
    %cst_42 = arith.constant 1.000000e+00 : f32
    %128 = vector.broadcast %cst_42 : f32 to vector<2x128xf32>
    %129 = arith.addf %128, %127 : vector<2x128xf32>
    %130 = arith.divf %128, %129 : vector<2x128xf32>
    %131 = vector.extract_strided_slice %118 {offsets = [0, 256], sizes = [2, 128], strides = [1, 1]} : vector<2x512xf32> to vector<2x128xf32>
    %132 = math.tanh %131 : vector<2x128xf32>
    %133 = vector.extract_strided_slice %118 {offsets = [0, 384], sizes = [2, 128], strides = [1, 1]} : vector<2x512xf32> to vector<2x128xf32>
    %134 = arith.negf %133 : vector<2x128xf32>
    %135 = math.exp %134 : vector<2x128xf32>
    %cst_43 = arith.constant 1.000000e+00 : f32
    %136 = vector.broadcast %cst_43 : f32 to vector<2x128xf32>
    %137 = arith.addf %136, %135 : vector<2x128xf32>
    %138 = arith.divf %136, %137 : vector<2x128xf32>
    %139 = arith.mulf %130, %73 : vector<2x128xf32>
    %140 = arith.mulf %124, %132 : vector<2x128xf32>
    %141 = arith.addf %139, %140 : vector<2x128xf32>
    %142 = math.tanh %141 : vector<2x128xf32>
    %143 = arith.mulf %138, %142 : vector<2x128xf32>
    %c2_i32 = arith.constant 2 : i32
    %144 = arith.index_cast %c2_i32 : i32 to index
    %c0_44 = arith.constant 0 : index
    %c0_45 = arith.constant 0 : index
    %145 = vector.load %arg1[%144, %c0_44, %c0_45] : memref<8x4x128xf32, #tpu.memory_space<vmem>>, vector<1x4x128xf32>
    %146 = vector.shape_cast %145 : vector<1x4x128xf32> to vector<4x128xf32>
    %147 = tpu.concatenate %146, %107 in 1 : vector<4x128xf32>, vector<4x128xf32> -> vector<4x256xf32>
    %c0_46 = arith.constant 0 : index
    %c0_47 = arith.constant 0 : index
    %148 = vector.load %arg2[%c0_46, %c0_47] : memref<256x512xf32, #tpu.memory_space<vmem>>, vector<256x512xf32>
    %cst_48 = arith.constant dense<0.000000e+00> : vector<4x512xf32>
    %149 = tpu.matmul %147, %148, %cst_48 {dimension_numbers = #tpu.dot_dimension_numbers<[1], [0], [0], [1], [0, 0, 1, 1], [], []>} : vector<4x256xf32>, vector<256x512xf32>, vector<4x512xf32> -> vector<4x512xf32>
    %150 = arith.addf %149, %2 : vector<4x512xf32>
    %151 = vector.extract_strided_slice %150 {offsets = [0, 0], sizes = [4, 128], strides = [1, 1]} : vector<4x512xf32> to vector<4x128xf32>
    %152 = arith.negf %151 : vector<4x128xf32>
    %153 = math.exp %152 : vector<4x128xf32>
    %cst_49 = arith.constant 1.000000e+00 : f32
    %154 = vector.broadcast %cst_49 : f32 to vector<4x128xf32>
    %155 = arith.addf %154, %153 : vector<4x128xf32>
    %156 = arith.divf %154, %155 : vector<4x128xf32>
    %157 = vector.extract_strided_slice %150 {offsets = [0, 128], sizes = [4, 128], strides = [1, 1]} : vector<4x512xf32> to vector<4x128xf32>
    %158 = arith.negf %157 : vector<4x128xf32>
    %159 = math.exp %158 : vector<4x128xf32>
    %cst_50 = arith.constant 1.000000e+00 : f32
    %160 = vector.broadcast %cst_50 : f32 to vector<4x128xf32>
    %161 = arith.addf %160, %159 : vector<4x128xf32>
    %162 = arith.divf %160, %161 : vector<4x128xf32>
    %163 = vector.extract_strided_slice %150 {offsets = [0, 256], sizes = [4, 128], strides = [1, 1]} : vector<4x512xf32> to vector<4x128xf32>
    %164 = math.tanh %163 : vector<4x128xf32>
    %165 = vector.extract_strided_slice %150 {offsets = [0, 384], sizes = [4, 128], strides = [1, 1]} : vector<4x512xf32> to vector<4x128xf32>
    %166 = arith.negf %165 : vector<4x128xf32>
    %167 = math.exp %166 : vector<4x128xf32>
    %cst_51 = arith.constant 1.000000e+00 : f32
    %168 = vector.broadcast %cst_51 : f32 to vector<4x128xf32>
    %169 = arith.addf %168, %167 : vector<4x128xf32>
    %170 = arith.divf %168, %169 : vector<4x128xf32>
    %171 = arith.mulf %162, %105 : vector<4x128xf32>
    %172 = arith.mulf %156, %164 : vector<4x128xf32>
    %173 = arith.addf %171, %172 : vector<4x128xf32>
    %174 = math.tanh %173 : vector<4x128xf32>
    %175 = arith.mulf %170, %174 : vector<4x128xf32>
    %176 = vector.extract_strided_slice %175 {offsets = [0, 0], sizes = [2, 128], strides = [1, 1]} : vector<4x128xf32> to vector<2x128xf32>
    %177 = vector.extract_strided_slice %175 {offsets = [2, 0], sizes = [2, 128], strides = [1, 1]} : vector<4x128xf32> to vector<2x128xf32>
    %c0_52 = arith.constant 0 : index
    %c0_53 = arith.constant 0 : index
    %178 = vector.load %arg4[%c0_52, %c0_53] : memref<128x512xf32, #tpu.memory_space<vmem>>, vector<128x512xf32>
    %cst_54 = arith.constant dense<0.000000e+00> : vector<2x512xf32>
    %179 = tpu.matmul %176, %178, %cst_54 {dimension_numbers = #tpu.dot_dimension_numbers<[1], [0], [0], [1], [0, 0, 1, 1], [], []>} : vector<2x128xf32>, vector<128x512xf32>, vector<2x512xf32> -> vector<2x512xf32>
    %c0_55 = arith.constant 0 : index
    %c0_56 = arith.constant 0 : index
    %180 = vector.load %arg5[%c0_55, %c0_56] : memref<128x512xf32, #tpu.memory_space<vmem>>, vector<128x512xf32>
    %cst_57 = arith.constant dense<0.000000e+00> : vector<2x512xf32>
    %181 = tpu.matmul %177, %180, %cst_57 {dimension_numbers = #tpu.dot_dimension_numbers<[1], [0], [0], [1], [0, 0, 1, 1], [], []>} : vector<2x128xf32>, vector<128x512xf32>, vector<2x512xf32> -> vector<2x512xf32>
    %182 = arith.addf %179, %181 : vector<2x512xf32>
    %c0_58 = arith.constant 0 : index
    %c0_59 = arith.constant 0 : index
    %183 = vector.load %arg6[%c0_58, %c0_59] : memref<128x512xf32, #tpu.memory_space<vmem>>, vector<128x512xf32>
    %cst_60 = arith.constant dense<0.000000e+00> : vector<2x512xf32>
    %184 = tpu.matmul %143, %183, %cst_60 {dimension_numbers = #tpu.dot_dimension_numbers<[1], [0], [0], [1], [0, 0, 1, 1], [], []>} : vector<2x128xf32>, vector<128x512xf32>, vector<2x512xf32> -> vector<2x512xf32>
    %185 = arith.addf %182, %184 : vector<2x512xf32>
    %186 = arith.addf %185, %5 : vector<2x512xf32>
    %187 = vector.extract_strided_slice %186 {offsets = [0, 0], sizes = [2, 128], strides = [1, 1]} : vector<2x512xf32> to vector<2x128xf32>
    %188 = arith.negf %187 : vector<2x128xf32>
    %189 = math.exp %188 : vector<2x128xf32>
    %cst_61 = arith.constant 1.000000e+00 : f32
    %190 = vector.broadcast %cst_61 : f32 to vector<2x128xf32>
    %191 = arith.addf %190, %189 : vector<2x128xf32>
    %192 = arith.divf %190, %191 : vector<2x128xf32>
    %193 = vector.extract_strided_slice %186 {offsets = [0, 128], sizes = [2, 128], strides = [1, 1]} : vector<2x512xf32> to vector<2x128xf32>
    %194 = arith.negf %193 : vector<2x128xf32>
    %195 = math.exp %194 : vector<2x128xf32>
    %cst_62 = arith.constant 1.000000e+00 : f32
    %196 = vector.broadcast %cst_62 : f32 to vector<2x128xf32>
    %197 = arith.addf %196, %195 : vector<2x128xf32>
    %198 = arith.divf %196, %197 : vector<2x128xf32>
    %199 = vector.extract_strided_slice %186 {offsets = [0, 256], sizes = [2, 128], strides = [1, 1]} : vector<2x512xf32> to vector<2x128xf32>
    %200 = math.tanh %199 : vector<2x128xf32>
    %201 = vector.extract_strided_slice %186 {offsets = [0, 384], sizes = [2, 128], strides = [1, 1]} : vector<2x512xf32> to vector<2x128xf32>
    %202 = arith.negf %201 : vector<2x128xf32>
    %203 = math.exp %202 : vector<2x128xf32>
    %cst_63 = arith.constant 1.000000e+00 : f32
    %204 = vector.broadcast %cst_63 : f32 to vector<2x128xf32>
    %205 = arith.addf %204, %203 : vector<2x128xf32>
    %206 = arith.divf %204, %205 : vector<2x128xf32>
    %207 = arith.mulf %198, %141 : vector<2x128xf32>
    %208 = arith.mulf %192, %200 : vector<2x128xf32>
    %209 = arith.addf %207, %208 : vector<2x128xf32>
    %210 = math.tanh %209 : vector<2x128xf32>
    %211 = arith.mulf %206, %210 : vector<2x128xf32>
    %c3_i32 = arith.constant 3 : i32
    %212 = arith.index_cast %c3_i32 : i32 to index
    %c0_64 = arith.constant 0 : index
    %c0_65 = arith.constant 0 : index
    %213 = vector.load %arg1[%212, %c0_64, %c0_65] : memref<8x4x128xf32, #tpu.memory_space<vmem>>, vector<1x4x128xf32>
    %214 = vector.shape_cast %213 : vector<1x4x128xf32> to vector<4x128xf32>
    %215 = tpu.concatenate %214, %175 in 1 : vector<4x128xf32>, vector<4x128xf32> -> vector<4x256xf32>
    %c0_66 = arith.constant 0 : index
    %c0_67 = arith.constant 0 : index
    %216 = vector.load %arg2[%c0_66, %c0_67] : memref<256x512xf32, #tpu.memory_space<vmem>>, vector<256x512xf32>
    %cst_68 = arith.constant dense<0.000000e+00> : vector<4x512xf32>
    %217 = tpu.matmul %215, %216, %cst_68 {dimension_numbers = #tpu.dot_dimension_numbers<[1], [0], [0], [1], [0, 0, 1, 1], [], []>} : vector<4x256xf32>, vector<256x512xf32>, vector<4x512xf32> -> vector<4x512xf32>
    %218 = arith.addf %217, %2 : vector<4x512xf32>
    %219 = vector.extract_strided_slice %218 {offsets = [0, 0], sizes = [4, 128], strides = [1, 1]} : vector<4x512xf32> to vector<4x128xf32>
    %220 = arith.negf %219 : vector<4x128xf32>
    %221 = math.exp %220 : vector<4x128xf32>
    %cst_69 = arith.constant 1.000000e+00 : f32
    %222 = vector.broadcast %cst_69 : f32 to vector<4x128xf32>
    %223 = arith.addf %222, %221 : vector<4x128xf32>
    %224 = arith.divf %222, %223 : vector<4x128xf32>
    %225 = vector.extract_strided_slice %218 {offsets = [0, 128], sizes = [4, 128], strides = [1, 1]} : vector<4x512xf32> to vector<4x128xf32>
    %226 = arith.negf %225 : vector<4x128xf32>
    %227 = math.exp %226 : vector<4x128xf32>
    %cst_70 = arith.constant 1.000000e+00 : f32
    %228 = vector.broadcast %cst_70 : f32 to vector<4x128xf32>
    %229 = arith.addf %228, %227 : vector<4x128xf32>
    %230 = arith.divf %228, %229 : vector<4x128xf32>
    %231 = vector.extract_strided_slice %218 {offsets = [0, 256], sizes = [4, 128], strides = [1, 1]} : vector<4x512xf32> to vector<4x128xf32>
    %232 = math.tanh %231 : vector<4x128xf32>
    %233 = vector.extract_strided_slice %218 {offsets = [0, 384], sizes = [4, 128], strides = [1, 1]} : vector<4x512xf32> to vector<4x128xf32>
    %234 = arith.negf %233 : vector<4x128xf32>
    %235 = math.exp %234 : vector<4x128xf32>
    %cst_71 = arith.constant 1.000000e+00 : f32
    %236 = vector.broadcast %cst_71 : f32 to vector<4x128xf32>
    %237 = arith.addf %236, %235 : vector<4x128xf32>
    %238 = arith.divf %236, %237 : vector<4x128xf32>
    %239 = arith.mulf %230, %173 : vector<4x128xf32>
    %240 = arith.mulf %224, %232 : vector<4x128xf32>
    %241 = arith.addf %239, %240 : vector<4x128xf32>
    %242 = math.tanh %241 : vector<4x128xf32>
    %243 = arith.mulf %238, %242 : vector<4x128xf32>
    %244 = vector.extract_strided_slice %243 {offsets = [0, 0], sizes = [2, 128], strides = [1, 1]} : vector<4x128xf32> to vector<2x128xf32>
    %245 = vector.extract_strided_slice %243 {offsets = [2, 0], sizes = [2, 128], strides = [1, 1]} : vector<4x128xf32> to vector<2x128xf32>
    %c0_72 = arith.constant 0 : index
    %c0_73 = arith.constant 0 : index
    %246 = vector.load %arg4[%c0_72, %c0_73] : memref<128x512xf32, #tpu.memory_space<vmem>>, vector<128x512xf32>
    %cst_74 = arith.constant dense<0.000000e+00> : vector<2x512xf32>
    %247 = tpu.matmul %244, %246, %cst_74 {dimension_numbers = #tpu.dot_dimension_numbers<[1], [0], [0], [1], [0, 0, 1, 1], [], []>} : vector<2x128xf32>, vector<128x512xf32>, vector<2x512xf32> -> vector<2x512xf32>
    %c0_75 = arith.constant 0 : index
    %c0_76 = arith.constant 0 : index
    %248 = vector.load %arg5[%c0_75, %c0_76] : memref<128x512xf32, #tpu.memory_space<vmem>>, vector<128x512xf32>
    %cst_77 = arith.constant dense<0.000000e+00> : vector<2x512xf32>
    %249 = tpu.matmul %245, %248, %cst_77 {dimension_numbers = #tpu.dot_dimension_numbers<[1], [0], [0], [1], [0, 0, 1, 1], [], []>} : vector<2x128xf32>, vector<128x512xf32>, vector<2x512xf32> -> vector<2x512xf32>
    %250 = arith.addf %247, %249 : vector<2x512xf32>
    %c0_78 = arith.constant 0 : index
    %c0_79 = arith.constant 0 : index
    %251 = vector.load %arg6[%c0_78, %c0_79] : memref<128x512xf32, #tpu.memory_space<vmem>>, vector<128x512xf32>
    %cst_80 = arith.constant dense<0.000000e+00> : vector<2x512xf32>
    %252 = tpu.matmul %211, %251, %cst_80 {dimension_numbers = #tpu.dot_dimension_numbers<[1], [0], [0], [1], [0, 0, 1, 1], [], []>} : vector<2x128xf32>, vector<128x512xf32>, vector<2x512xf32> -> vector<2x512xf32>
    %253 = arith.addf %250, %252 : vector<2x512xf32>
    %254 = arith.addf %253, %5 : vector<2x512xf32>
    %255 = vector.extract_strided_slice %254 {offsets = [0, 0], sizes = [2, 128], strides = [1, 1]} : vector<2x512xf32> to vector<2x128xf32>
    %256 = arith.negf %255 : vector<2x128xf32>
    %257 = math.exp %256 : vector<2x128xf32>
    %cst_81 = arith.constant 1.000000e+00 : f32
    %258 = vector.broadcast %cst_81 : f32 to vector<2x128xf32>
    %259 = arith.addf %258, %257 : vector<2x128xf32>
    %260 = arith.divf %258, %259 : vector<2x128xf32>
    %261 = vector.extract_strided_slice %254 {offsets = [0, 128], sizes = [2, 128], strides = [1, 1]} : vector<2x512xf32> to vector<2x128xf32>
    %262 = arith.negf %261 : vector<2x128xf32>
    %263 = math.exp %262 : vector<2x128xf32>
    %cst_82 = arith.constant 1.000000e+00 : f32
    %264 = vector.broadcast %cst_82 : f32 to vector<2x128xf32>
    %265 = arith.addf %264, %263 : vector<2x128xf32>
    %266 = arith.divf %264, %265 : vector<2x128xf32>
    %267 = vector.extract_strided_slice %254 {offsets = [0, 256], sizes = [2, 128], strides = [1, 1]} : vector<2x512xf32> to vector<2x128xf32>
    %268 = math.tanh %267 : vector<2x128xf32>
    %269 = vector.extract_strided_slice %254 {offsets = [0, 384], sizes = [2, 128], strides = [1, 1]} : vector<2x512xf32> to vector<2x128xf32>
    %270 = arith.negf %269 : vector<2x128xf32>
    %271 = math.exp %270 : vector<2x128xf32>
    %cst_83 = arith.constant 1.000000e+00 : f32
    %272 = vector.broadcast %cst_83 : f32 to vector<2x128xf32>
    %273 = arith.addf %272, %271 : vector<2x128xf32>
    %274 = arith.divf %272, %273 : vector<2x128xf32>
    %275 = arith.mulf %266, %209 : vector<2x128xf32>
    %276 = arith.mulf %260, %268 : vector<2x128xf32>
    %277 = arith.addf %275, %276 : vector<2x128xf32>
    %278 = math.tanh %277 : vector<2x128xf32>
    %279 = arith.mulf %274, %278 : vector<2x128xf32>
    %c4_i32 = arith.constant 4 : i32
    %280 = arith.index_cast %c4_i32 : i32 to index
    %c0_84 = arith.constant 0 : index
    %c0_85 = arith.constant 0 : index
    %281 = vector.load %arg1[%280, %c0_84, %c0_85] : memref<8x4x128xf32, #tpu.memory_space<vmem>>, vector<1x4x128xf32>
    %282 = vector.shape_cast %281 : vector<1x4x128xf32> to vector<4x128xf32>
    %283 = tpu.concatenate %282, %243 in 1 : vector<4x128xf32>, vector<4x128xf32> -> vector<4x256xf32>
    %c0_86 = arith.constant 0 : index
    %c0_87 = arith.constant 0 : index
    %284 = vector.load %arg2[%c0_86, %c0_87] : memref<256x512xf32, #tpu.memory_space<vmem>>, vector<256x512xf32>
    %cst_88 = arith.constant dense<0.000000e+00> : vector<4x512xf32>
    %285 = tpu.matmul %283, %284, %cst_88 {dimension_numbers = #tpu.dot_dimension_numbers<[1], [0], [0], [1], [0, 0, 1, 1], [], []>} : vector<4x256xf32>, vector<256x512xf32>, vector<4x512xf32> -> vector<4x512xf32>
    %286 = arith.addf %285, %2 : vector<4x512xf32>
    %287 = vector.extract_strided_slice %286 {offsets = [0, 0], sizes = [4, 128], strides = [1, 1]} : vector<4x512xf32> to vector<4x128xf32>
    %288 = arith.negf %287 : vector<4x128xf32>
    %289 = math.exp %288 : vector<4x128xf32>
    %cst_89 = arith.constant 1.000000e+00 : f32
    %290 = vector.broadcast %cst_89 : f32 to vector<4x128xf32>
    %291 = arith.addf %290, %289 : vector<4x128xf32>
    %292 = arith.divf %290, %291 : vector<4x128xf32>
    %293 = vector.extract_strided_slice %286 {offsets = [0, 128], sizes = [4, 128], strides = [1, 1]} : vector<4x512xf32> to vector<4x128xf32>
    %294 = arith.negf %293 : vector<4x128xf32>
    %295 = math.exp %294 : vector<4x128xf32>
    %cst_90 = arith.constant 1.000000e+00 : f32
    %296 = vector.broadcast %cst_90 : f32 to vector<4x128xf32>
    %297 = arith.addf %296, %295 : vector<4x128xf32>
    %298 = arith.divf %296, %297 : vector<4x128xf32>
    %299 = vector.extract_strided_slice %286 {offsets = [0, 256], sizes = [4, 128], strides = [1, 1]} : vector<4x512xf32> to vector<4x128xf32>
    %300 = math.tanh %299 : vector<4x128xf32>
    %301 = vector.extract_strided_slice %286 {offsets = [0, 384], sizes = [4, 128], strides = [1, 1]} : vector<4x512xf32> to vector<4x128xf32>
    %302 = arith.negf %301 : vector<4x128xf32>
    %303 = math.exp %302 : vector<4x128xf32>
    %cst_91 = arith.constant 1.000000e+00 : f32
    %304 = vector.broadcast %cst_91 : f32 to vector<4x128xf32>
    %305 = arith.addf %304, %303 : vector<4x128xf32>
    %306 = arith.divf %304, %305 : vector<4x128xf32>
    %307 = arith.mulf %298, %241 : vector<4x128xf32>
    %308 = arith.mulf %292, %300 : vector<4x128xf32>
    %309 = arith.addf %307, %308 : vector<4x128xf32>
    %310 = math.tanh %309 : vector<4x128xf32>
    %311 = arith.mulf %306, %310 : vector<4x128xf32>
    %312 = vector.extract_strided_slice %311 {offsets = [0, 0], sizes = [2, 128], strides = [1, 1]} : vector<4x128xf32> to vector<2x128xf32>
    %313 = vector.extract_strided_slice %311 {offsets = [2, 0], sizes = [2, 128], strides = [1, 1]} : vector<4x128xf32> to vector<2x128xf32>
    %c0_92 = arith.constant 0 : index
    %c0_93 = arith.constant 0 : index
    %314 = vector.load %arg4[%c0_92, %c0_93] : memref<128x512xf32, #tpu.memory_space<vmem>>, vector<128x512xf32>
    %cst_94 = arith.constant dense<0.000000e+00> : vector<2x512xf32>
    %315 = tpu.matmul %312, %314, %cst_94 {dimension_numbers = #tpu.dot_dimension_numbers<[1], [0], [0], [1], [0, 0, 1, 1], [], []>} : vector<2x128xf32>, vector<128x512xf32>, vector<2x512xf32> -> vector<2x512xf32>
    %c0_95 = arith.constant 0 : index
    %c0_96 = arith.constant 0 : index
    %316 = vector.load %arg5[%c0_95, %c0_96] : memref<128x512xf32, #tpu.memory_space<vmem>>, vector<128x512xf32>
    %cst_97 = arith.constant dense<0.000000e+00> : vector<2x512xf32>
    %317 = tpu.matmul %313, %316, %cst_97 {dimension_numbers = #tpu.dot_dimension_numbers<[1], [0], [0], [1], [0, 0, 1, 1], [], []>} : vector<2x128xf32>, vector<128x512xf32>, vector<2x512xf32> -> vector<2x512xf32>
    %318 = arith.addf %315, %317 : vector<2x512xf32>
    %c0_98 = arith.constant 0 : index
    %c0_99 = arith.constant 0 : index
    %319 = vector.load %arg6[%c0_98, %c0_99] : memref<128x512xf32, #tpu.memory_space<vmem>>, vector<128x512xf32>
    %cst_100 = arith.constant dense<0.000000e+00> : vector<2x512xf32>
    %320 = tpu.matmul %279, %319, %cst_100 {dimension_numbers = #tpu.dot_dimension_numbers<[1], [0], [0], [1], [0, 0, 1, 1], [], []>} : vector<2x128xf32>, vector<128x512xf32>, vector<2x512xf32> -> vector<2x512xf32>
    %321 = arith.addf %318, %320 : vector<2x512xf32>
    %322 = arith.addf %321, %5 : vector<2x512xf32>
    %323 = vector.extract_strided_slice %322 {offsets = [0, 0], sizes = [2, 128], strides = [1, 1]} : vector<2x512xf32> to vector<2x128xf32>
    %324 = arith.negf %323 : vector<2x128xf32>
    %325 = math.exp %324 : vector<2x128xf32>
    %cst_101 = arith.constant 1.000000e+00 : f32
    %326 = vector.broadcast %cst_101 : f32 to vector<2x128xf32>
    %327 = arith.addf %326, %325 : vector<2x128xf32>
    %328 = arith.divf %326, %327 : vector<2x128xf32>
    %329 = vector.extract_strided_slice %322 {offsets = [0, 128], sizes = [2, 128], strides = [1, 1]} : vector<2x512xf32> to vector<2x128xf32>
    %330 = arith.negf %329 : vector<2x128xf32>
    %331 = math.exp %330 : vector<2x128xf32>
    %cst_102 = arith.constant 1.000000e+00 : f32
    %332 = vector.broadcast %cst_102 : f32 to vector<2x128xf32>
    %333 = arith.addf %332, %331 : vector<2x128xf32>
    %334 = arith.divf %332, %333 : vector<2x128xf32>
    %335 = vector.extract_strided_slice %322 {offsets = [0, 256], sizes = [2, 128], strides = [1, 1]} : vector<2x512xf32> to vector<2x128xf32>
    %336 = math.tanh %335 : vector<2x128xf32>
    %337 = vector.extract_strided_slice %322 {offsets = [0, 384], sizes = [2, 128], strides = [1, 1]} : vector<2x512xf32> to vector<2x128xf32>
    %338 = arith.negf %337 : vector<2x128xf32>
    %339 = math.exp %338 : vector<2x128xf32>
    %cst_103 = arith.constant 1.000000e+00 : f32
    %340 = vector.broadcast %cst_103 : f32 to vector<2x128xf32>
    %341 = arith.addf %340, %339 : vector<2x128xf32>
    %342 = arith.divf %340, %341 : vector<2x128xf32>
    %343 = arith.mulf %334, %277 : vector<2x128xf32>
    %344 = arith.mulf %328, %336 : vector<2x128xf32>
    %345 = arith.addf %343, %344 : vector<2x128xf32>
    %346 = math.tanh %345 : vector<2x128xf32>
    %347 = arith.mulf %342, %346 : vector<2x128xf32>
    %c5_i32 = arith.constant 5 : i32
    %348 = arith.index_cast %c5_i32 : i32 to index
    %c0_104 = arith.constant 0 : index
    %c0_105 = arith.constant 0 : index
    %349 = vector.load %arg1[%348, %c0_104, %c0_105] : memref<8x4x128xf32, #tpu.memory_space<vmem>>, vector<1x4x128xf32>
    %350 = vector.shape_cast %349 : vector<1x4x128xf32> to vector<4x128xf32>
    %351 = tpu.concatenate %350, %311 in 1 : vector<4x128xf32>, vector<4x128xf32> -> vector<4x256xf32>
    %c0_106 = arith.constant 0 : index
    %c0_107 = arith.constant 0 : index
    %352 = vector.load %arg2[%c0_106, %c0_107] : memref<256x512xf32, #tpu.memory_space<vmem>>, vector<256x512xf32>
    %cst_108 = arith.constant dense<0.000000e+00> : vector<4x512xf32>
    %353 = tpu.matmul %351, %352, %cst_108 {dimension_numbers = #tpu.dot_dimension_numbers<[1], [0], [0], [1], [0, 0, 1, 1], [], []>} : vector<4x256xf32>, vector<256x512xf32>, vector<4x512xf32> -> vector<4x512xf32>
    %354 = arith.addf %353, %2 : vector<4x512xf32>
    %355 = vector.extract_strided_slice %354 {offsets = [0, 0], sizes = [4, 128], strides = [1, 1]} : vector<4x512xf32> to vector<4x128xf32>
    %356 = arith.negf %355 : vector<4x128xf32>
    %357 = math.exp %356 : vector<4x128xf32>
    %cst_109 = arith.constant 1.000000e+00 : f32
    %358 = vector.broadcast %cst_109 : f32 to vector<4x128xf32>
    %359 = arith.addf %358, %357 : vector<4x128xf32>
    %360 = arith.divf %358, %359 : vector<4x128xf32>
    %361 = vector.extract_strided_slice %354 {offsets = [0, 128], sizes = [4, 128], strides = [1, 1]} : vector<4x512xf32> to vector<4x128xf32>
    %362 = arith.negf %361 : vector<4x128xf32>
    %363 = math.exp %362 : vector<4x128xf32>
    %cst_110 = arith.constant 1.000000e+00 : f32
    %364 = vector.broadcast %cst_110 : f32 to vector<4x128xf32>
    %365 = arith.addf %364, %363 : vector<4x128xf32>
    %366 = arith.divf %364, %365 : vector<4x128xf32>
    %367 = vector.extract_strided_slice %354 {offsets = [0, 256], sizes = [4, 128], strides = [1, 1]} : vector<4x512xf32> to vector<4x128xf32>
    %368 = math.tanh %367 : vector<4x128xf32>
    %369 = vector.extract_strided_slice %354 {offsets = [0, 384], sizes = [4, 128], strides = [1, 1]} : vector<4x512xf32> to vector<4x128xf32>
    %370 = arith.negf %369 : vector<4x128xf32>
    %371 = math.exp %370 : vector<4x128xf32>
    %cst_111 = arith.constant 1.000000e+00 : f32
    %372 = vector.broadcast %cst_111 : f32 to vector<4x128xf32>
    %373 = arith.addf %372, %371 : vector<4x128xf32>
    %374 = arith.divf %372, %373 : vector<4x128xf32>
    %375 = arith.mulf %366, %309 : vector<4x128xf32>
    %376 = arith.mulf %360, %368 : vector<4x128xf32>
    %377 = arith.addf %375, %376 : vector<4x128xf32>
    %378 = math.tanh %377 : vector<4x128xf32>
    %379 = arith.mulf %374, %378 : vector<4x128xf32>
    %380 = vector.extract_strided_slice %379 {offsets = [0, 0], sizes = [2, 128], strides = [1, 1]} : vector<4x128xf32> to vector<2x128xf32>
    %381 = vector.extract_strided_slice %379 {offsets = [2, 0], sizes = [2, 128], strides = [1, 1]} : vector<4x128xf32> to vector<2x128xf32>
    %c0_112 = arith.constant 0 : index
    %c0_113 = arith.constant 0 : index
    %382 = vector.load %arg4[%c0_112, %c0_113] : memref<128x512xf32, #tpu.memory_space<vmem>>, vector<128x512xf32>
    %cst_114 = arith.constant dense<0.000000e+00> : vector<2x512xf32>
    %383 = tpu.matmul %380, %382, %cst_114 {dimension_numbers = #tpu.dot_dimension_numbers<[1], [0], [0], [1], [0, 0, 1, 1], [], []>} : vector<2x128xf32>, vector<128x512xf32>, vector<2x512xf32> -> vector<2x512xf32>
    %c0_115 = arith.constant 0 : index
    %c0_116 = arith.constant 0 : index
    %384 = vector.load %arg5[%c0_115, %c0_116] : memref<128x512xf32, #tpu.memory_space<vmem>>, vector<128x512xf32>
    %cst_117 = arith.constant dense<0.000000e+00> : vector<2x512xf32>
    %385 = tpu.matmul %381, %384, %cst_117 {dimension_numbers = #tpu.dot_dimension_numbers<[1], [0], [0], [1], [0, 0, 1, 1], [], []>} : vector<2x128xf32>, vector<128x512xf32>, vector<2x512xf32> -> vector<2x512xf32>
    %386 = arith.addf %383, %385 : vector<2x512xf32>
    %c0_118 = arith.constant 0 : index
    %c0_119 = arith.constant 0 : index
    %387 = vector.load %arg6[%c0_118, %c0_119] : memref<128x512xf32, #tpu.memory_space<vmem>>, vector<128x512xf32>
    %cst_120 = arith.constant dense<0.000000e+00> : vector<2x512xf32>
    %388 = tpu.matmul %347, %387, %cst_120 {dimension_numbers = #tpu.dot_dimension_numbers<[1], [0], [0], [1], [0, 0, 1, 1], [], []>} : vector<2x128xf32>, vector<128x512xf32>, vector<2x512xf32> -> vector<2x512xf32>
    %389 = arith.addf %386, %388 : vector<2x512xf32>
    %390 = arith.addf %389, %5 : vector<2x512xf32>
    %391 = vector.extract_strided_slice %390 {offsets = [0, 0], sizes = [2, 128], strides = [1, 1]} : vector<2x512xf32> to vector<2x128xf32>
    %392 = arith.negf %391 : vector<2x128xf32>
    %393 = math.exp %392 : vector<2x128xf32>
    %cst_121 = arith.constant 1.000000e+00 : f32
    %394 = vector.broadcast %cst_121 : f32 to vector<2x128xf32>
    %395 = arith.addf %394, %393 : vector<2x128xf32>
    %396 = arith.divf %394, %395 : vector<2x128xf32>
    %397 = vector.extract_strided_slice %390 {offsets = [0, 128], sizes = [2, 128], strides = [1, 1]} : vector<2x512xf32> to vector<2x128xf32>
    %398 = arith.negf %397 : vector<2x128xf32>
    %399 = math.exp %398 : vector<2x128xf32>
    %cst_122 = arith.constant 1.000000e+00 : f32
    %400 = vector.broadcast %cst_122 : f32 to vector<2x128xf32>
    %401 = arith.addf %400, %399 : vector<2x128xf32>
    %402 = arith.divf %400, %401 : vector<2x128xf32>
    %403 = vector.extract_strided_slice %390 {offsets = [0, 256], sizes = [2, 128], strides = [1, 1]} : vector<2x512xf32> to vector<2x128xf32>
    %404 = math.tanh %403 : vector<2x128xf32>
    %405 = vector.extract_strided_slice %390 {offsets = [0, 384], sizes = [2, 128], strides = [1, 1]} : vector<2x512xf32> to vector<2x128xf32>
    %406 = arith.negf %405 : vector<2x128xf32>
    %407 = math.exp %406 : vector<2x128xf32>
    %cst_123 = arith.constant 1.000000e+00 : f32
    %408 = vector.broadcast %cst_123 : f32 to vector<2x128xf32>
    %409 = arith.addf %408, %407 : vector<2x128xf32>
    %410 = arith.divf %408, %409 : vector<2x128xf32>
    %411 = arith.mulf %402, %345 : vector<2x128xf32>
    %412 = arith.mulf %396, %404 : vector<2x128xf32>
    %413 = arith.addf %411, %412 : vector<2x128xf32>
    %414 = math.tanh %413 : vector<2x128xf32>
    %415 = arith.mulf %410, %414 : vector<2x128xf32>
    %c6_i32 = arith.constant 6 : i32
    %416 = arith.index_cast %c6_i32 : i32 to index
    %c0_124 = arith.constant 0 : index
    %c0_125 = arith.constant 0 : index
    %417 = vector.load %arg1[%416, %c0_124, %c0_125] : memref<8x4x128xf32, #tpu.memory_space<vmem>>, vector<1x4x128xf32>
    %418 = vector.shape_cast %417 : vector<1x4x128xf32> to vector<4x128xf32>
    %419 = tpu.concatenate %418, %379 in 1 : vector<4x128xf32>, vector<4x128xf32> -> vector<4x256xf32>
    %c0_126 = arith.constant 0 : index
    %c0_127 = arith.constant 0 : index
    %420 = vector.load %arg2[%c0_126, %c0_127] : memref<256x512xf32, #tpu.memory_space<vmem>>, vector<256x512xf32>
    %cst_128 = arith.constant dense<0.000000e+00> : vector<4x512xf32>
    %421 = tpu.matmul %419, %420, %cst_128 {dimension_numbers = #tpu.dot_dimension_numbers<[1], [0], [0], [1], [0, 0, 1, 1], [], []>} : vector<4x256xf32>, vector<256x512xf32>, vector<4x512xf32> -> vector<4x512xf32>
    %422 = arith.addf %421, %2 : vector<4x512xf32>
    %423 = vector.extract_strided_slice %422 {offsets = [0, 0], sizes = [4, 128], strides = [1, 1]} : vector<4x512xf32> to vector<4x128xf32>
    %424 = arith.negf %423 : vector<4x128xf32>
    %425 = math.exp %424 : vector<4x128xf32>
    %cst_129 = arith.constant 1.000000e+00 : f32
    %426 = vector.broadcast %cst_129 : f32 to vector<4x128xf32>
    %427 = arith.addf %426, %425 : vector<4x128xf32>
    %428 = arith.divf %426, %427 : vector<4x128xf32>
    %429 = vector.extract_strided_slice %422 {offsets = [0, 128], sizes = [4, 128], strides = [1, 1]} : vector<4x512xf32> to vector<4x128xf32>
    %430 = arith.negf %429 : vector<4x128xf32>
    %431 = math.exp %430 : vector<4x128xf32>
    %cst_130 = arith.constant 1.000000e+00 : f32
    %432 = vector.broadcast %cst_130 : f32 to vector<4x128xf32>
    %433 = arith.addf %432, %431 : vector<4x128xf32>
    %434 = arith.divf %432, %433 : vector<4x128xf32>
    %435 = vector.extract_strided_slice %422 {offsets = [0, 256], sizes = [4, 128], strides = [1, 1]} : vector<4x512xf32> to vector<4x128xf32>
    %436 = math.tanh %435 : vector<4x128xf32>
    %437 = vector.extract_strided_slice %422 {offsets = [0, 384], sizes = [4, 128], strides = [1, 1]} : vector<4x512xf32> to vector<4x128xf32>
    %438 = arith.negf %437 : vector<4x128xf32>
    %439 = math.exp %438 : vector<4x128xf32>
    %cst_131 = arith.constant 1.000000e+00 : f32
    %440 = vector.broadcast %cst_131 : f32 to vector<4x128xf32>
    %441 = arith.addf %440, %439 : vector<4x128xf32>
    %442 = arith.divf %440, %441 : vector<4x128xf32>
    %443 = arith.mulf %434, %377 : vector<4x128xf32>
    %444 = arith.mulf %428, %436 : vector<4x128xf32>
    %445 = arith.addf %443, %444 : vector<4x128xf32>
    %446 = math.tanh %445 : vector<4x128xf32>
    %447 = arith.mulf %442, %446 : vector<4x128xf32>
    %448 = vector.extract_strided_slice %447 {offsets = [0, 0], sizes = [2, 128], strides = [1, 1]} : vector<4x128xf32> to vector<2x128xf32>
    %449 = vector.extract_strided_slice %447 {offsets = [2, 0], sizes = [2, 128], strides = [1, 1]} : vector<4x128xf32> to vector<2x128xf32>
    %c0_132 = arith.constant 0 : index
    %c0_133 = arith.constant 0 : index
    %450 = vector.load %arg4[%c0_132, %c0_133] : memref<128x512xf32, #tpu.memory_space<vmem>>, vector<128x512xf32>
    %cst_134 = arith.constant dense<0.000000e+00> : vector<2x512xf32>
    %451 = tpu.matmul %448, %450, %cst_134 {dimension_numbers = #tpu.dot_dimension_numbers<[1], [0], [0], [1], [0, 0, 1, 1], [], []>} : vector<2x128xf32>, vector<128x512xf32>, vector<2x512xf32> -> vector<2x512xf32>
    %c0_135 = arith.constant 0 : index
    %c0_136 = arith.constant 0 : index
    %452 = vector.load %arg5[%c0_135, %c0_136] : memref<128x512xf32, #tpu.memory_space<vmem>>, vector<128x512xf32>
    %cst_137 = arith.constant dense<0.000000e+00> : vector<2x512xf32>
    %453 = tpu.matmul %449, %452, %cst_137 {dimension_numbers = #tpu.dot_dimension_numbers<[1], [0], [0], [1], [0, 0, 1, 1], [], []>} : vector<2x128xf32>, vector<128x512xf32>, vector<2x512xf32> -> vector<2x512xf32>
    %454 = arith.addf %451, %453 : vector<2x512xf32>
    %c0_138 = arith.constant 0 : index
    %c0_139 = arith.constant 0 : index
    %455 = vector.load %arg6[%c0_138, %c0_139] : memref<128x512xf32, #tpu.memory_space<vmem>>, vector<128x512xf32>
    %cst_140 = arith.constant dense<0.000000e+00> : vector<2x512xf32>
    %456 = tpu.matmul %415, %455, %cst_140 {dimension_numbers = #tpu.dot_dimension_numbers<[1], [0], [0], [1], [0, 0, 1, 1], [], []>} : vector<2x128xf32>, vector<128x512xf32>, vector<2x512xf32> -> vector<2x512xf32>
    %457 = arith.addf %454, %456 : vector<2x512xf32>
    %458 = arith.addf %457, %5 : vector<2x512xf32>
    %459 = vector.extract_strided_slice %458 {offsets = [0, 0], sizes = [2, 128], strides = [1, 1]} : vector<2x512xf32> to vector<2x128xf32>
    %460 = arith.negf %459 : vector<2x128xf32>
    %461 = math.exp %460 : vector<2x128xf32>
    %cst_141 = arith.constant 1.000000e+00 : f32
    %462 = vector.broadcast %cst_141 : f32 to vector<2x128xf32>
    %463 = arith.addf %462, %461 : vector<2x128xf32>
    %464 = arith.divf %462, %463 : vector<2x128xf32>
    %465 = vector.extract_strided_slice %458 {offsets = [0, 128], sizes = [2, 128], strides = [1, 1]} : vector<2x512xf32> to vector<2x128xf32>
    %466 = arith.negf %465 : vector<2x128xf32>
    %467 = math.exp %466 : vector<2x128xf32>
    %cst_142 = arith.constant 1.000000e+00 : f32
    %468 = vector.broadcast %cst_142 : f32 to vector<2x128xf32>
    %469 = arith.addf %468, %467 : vector<2x128xf32>
    %470 = arith.divf %468, %469 : vector<2x128xf32>
    %471 = vector.extract_strided_slice %458 {offsets = [0, 256], sizes = [2, 128], strides = [1, 1]} : vector<2x512xf32> to vector<2x128xf32>
    %472 = math.tanh %471 : vector<2x128xf32>
    %473 = vector.extract_strided_slice %458 {offsets = [0, 384], sizes = [2, 128], strides = [1, 1]} : vector<2x512xf32> to vector<2x128xf32>
    %474 = arith.negf %473 : vector<2x128xf32>
    %475 = math.exp %474 : vector<2x128xf32>
    %cst_143 = arith.constant 1.000000e+00 : f32
    %476 = vector.broadcast %cst_143 : f32 to vector<2x128xf32>
    %477 = arith.addf %476, %475 : vector<2x128xf32>
    %478 = arith.divf %476, %477 : vector<2x128xf32>
    %479 = arith.mulf %470, %413 : vector<2x128xf32>
    %480 = arith.mulf %464, %472 : vector<2x128xf32>
    %481 = arith.addf %479, %480 : vector<2x128xf32>
    %482 = math.tanh %481 : vector<2x128xf32>
    %483 = arith.mulf %478, %482 : vector<2x128xf32>
    %c7_i32 = arith.constant 7 : i32
    %484 = arith.index_cast %c7_i32 : i32 to index
    %c0_144 = arith.constant 0 : index
    %c0_145 = arith.constant 0 : index
    %485 = vector.load %arg1[%484, %c0_144, %c0_145] : memref<8x4x128xf32, #tpu.memory_space<vmem>>, vector<1x4x128xf32>
    %486 = vector.shape_cast %485 : vector<1x4x128xf32> to vector<4x128xf32>
    %487 = tpu.concatenate %486, %447 in 1 : vector<4x128xf32>, vector<4x128xf32> -> vector<4x256xf32>
    %c0_146 = arith.constant 0 : index
    %c0_147 = arith.constant 0 : index
    %488 = vector.load %arg2[%c0_146, %c0_147] : memref<256x512xf32, #tpu.memory_space<vmem>>, vector<256x512xf32>
    %cst_148 = arith.constant dense<0.000000e+00> : vector<4x512xf32>
    %489 = tpu.matmul %487, %488, %cst_148 {dimension_numbers = #tpu.dot_dimension_numbers<[1], [0], [0], [1], [0, 0, 1, 1], [], []>} : vector<4x256xf32>, vector<256x512xf32>, vector<4x512xf32> -> vector<4x512xf32>
    %490 = arith.addf %489, %2 : vector<4x512xf32>
    %491 = vector.extract_strided_slice %490 {offsets = [0, 0], sizes = [4, 128], strides = [1, 1]} : vector<4x512xf32> to vector<4x128xf32>
    %492 = arith.negf %491 : vector<4x128xf32>
    %493 = math.exp %492 : vector<4x128xf32>
    %cst_149 = arith.constant 1.000000e+00 : f32
    %494 = vector.broadcast %cst_149 : f32 to vector<4x128xf32>
    %495 = arith.addf %494, %493 : vector<4x128xf32>
    %496 = arith.divf %494, %495 : vector<4x128xf32>
    %497 = vector.extract_strided_slice %490 {offsets = [0, 128], sizes = [4, 128], strides = [1, 1]} : vector<4x512xf32> to vector<4x128xf32>
    %498 = arith.negf %497 : vector<4x128xf32>
    %499 = math.exp %498 : vector<4x128xf32>
    %cst_150 = arith.constant 1.000000e+00 : f32
    %500 = vector.broadcast %cst_150 : f32 to vector<4x128xf32>
    %501 = arith.addf %500, %499 : vector<4x128xf32>
    %502 = arith.divf %500, %501 : vector<4x128xf32>
    %503 = vector.extract_strided_slice %490 {offsets = [0, 256], sizes = [4, 128], strides = [1, 1]} : vector<4x512xf32> to vector<4x128xf32>
    %504 = math.tanh %503 : vector<4x128xf32>
    %505 = vector.extract_strided_slice %490 {offsets = [0, 384], sizes = [4, 128], strides = [1, 1]} : vector<4x512xf32> to vector<4x128xf32>
    %506 = arith.negf %505 : vector<4x128xf32>
    %507 = math.exp %506 : vector<4x128xf32>
    %cst_151 = arith.constant 1.000000e+00 : f32
    %508 = vector.broadcast %cst_151 : f32 to vector<4x128xf32>
    %509 = arith.addf %508, %507 : vector<4x128xf32>
    %510 = arith.divf %508, %509 : vector<4x128xf32>
    %511 = arith.mulf %502, %445 : vector<4x128xf32>
    %512 = arith.mulf %496, %504 : vector<4x128xf32>
    %513 = arith.addf %511, %512 : vector<4x128xf32>
    %514 = math.tanh %513 : vector<4x128xf32>
    %515 = arith.mulf %510, %514 : vector<4x128xf32>
    %516 = vector.extract_strided_slice %515 {offsets = [0, 0], sizes = [2, 128], strides = [1, 1]} : vector<4x128xf32> to vector<2x128xf32>
    %517 = vector.extract_strided_slice %515 {offsets = [2, 0], sizes = [2, 128], strides = [1, 1]} : vector<4x128xf32> to vector<2x128xf32>
    %c0_152 = arith.constant 0 : index
    %c0_153 = arith.constant 0 : index
    %518 = vector.load %arg4[%c0_152, %c0_153] : memref<128x512xf32, #tpu.memory_space<vmem>>, vector<128x512xf32>
    %cst_154 = arith.constant dense<0.000000e+00> : vector<2x512xf32>
    %519 = tpu.matmul %516, %518, %cst_154 {dimension_numbers = #tpu.dot_dimension_numbers<[1], [0], [0], [1], [0, 0, 1, 1], [], []>} : vector<2x128xf32>, vector<128x512xf32>, vector<2x512xf32> -> vector<2x512xf32>
    %c0_155 = arith.constant 0 : index
    %c0_156 = arith.constant 0 : index
    %520 = vector.load %arg5[%c0_155, %c0_156] : memref<128x512xf32, #tpu.memory_space<vmem>>, vector<128x512xf32>
    %cst_157 = arith.constant dense<0.000000e+00> : vector<2x512xf32>
    %521 = tpu.matmul %517, %520, %cst_157 {dimension_numbers = #tpu.dot_dimension_numbers<[1], [0], [0], [1], [0, 0, 1, 1], [], []>} : vector<2x128xf32>, vector<128x512xf32>, vector<2x512xf32> -> vector<2x512xf32>
    %522 = arith.addf %519, %521 : vector<2x512xf32>
    %c0_158 = arith.constant 0 : index
    %c0_159 = arith.constant 0 : index
    %523 = vector.load %arg6[%c0_158, %c0_159] : memref<128x512xf32, #tpu.memory_space<vmem>>, vector<128x512xf32>
    %cst_160 = arith.constant dense<0.000000e+00> : vector<2x512xf32>
    %524 = tpu.matmul %483, %523, %cst_160 {dimension_numbers = #tpu.dot_dimension_numbers<[1], [0], [0], [1], [0, 0, 1, 1], [], []>} : vector<2x128xf32>, vector<128x512xf32>, vector<2x512xf32> -> vector<2x512xf32>
    %525 = arith.addf %522, %524 : vector<2x512xf32>
    %526 = arith.addf %525, %5 : vector<2x512xf32>
    %527 = vector.extract_strided_slice %526 {offsets = [0, 0], sizes = [2, 128], strides = [1, 1]} : vector<2x512xf32> to vector<2x128xf32>
    %528 = arith.negf %527 : vector<2x128xf32>
    %529 = math.exp %528 : vector<2x128xf32>
    %cst_161 = arith.constant 1.000000e+00 : f32
    %530 = vector.broadcast %cst_161 : f32 to vector<2x128xf32>
    %531 = arith.addf %530, %529 : vector<2x128xf32>
    %532 = arith.divf %530, %531 : vector<2x128xf32>
    %533 = vector.extract_strided_slice %526 {offsets = [0, 128], sizes = [2, 128], strides = [1, 1]} : vector<2x512xf32> to vector<2x128xf32>
    %534 = arith.negf %533 : vector<2x128xf32>
    %535 = math.exp %534 : vector<2x128xf32>
    %cst_162 = arith.constant 1.000000e+00 : f32
    %536 = vector.broadcast %cst_162 : f32 to vector<2x128xf32>
    %537 = arith.addf %536, %535 : vector<2x128xf32>
    %538 = arith.divf %536, %537 : vector<2x128xf32>
    %539 = vector.extract_strided_slice %526 {offsets = [0, 256], sizes = [2, 128], strides = [1, 1]} : vector<2x512xf32> to vector<2x128xf32>
    %540 = math.tanh %539 : vector<2x128xf32>
    %541 = vector.extract_strided_slice %526 {offsets = [0, 384], sizes = [2, 128], strides = [1, 1]} : vector<2x512xf32> to vector<2x128xf32>
    %542 = arith.negf %541 : vector<2x128xf32>
    %543 = math.exp %542 : vector<2x128xf32>
    %cst_163 = arith.constant 1.000000e+00 : f32
    %544 = vector.broadcast %cst_163 : f32 to vector<2x128xf32>
    %545 = arith.addf %544, %543 : vector<2x128xf32>
    %546 = arith.divf %544, %545 : vector<2x128xf32>
    %547 = arith.mulf %538, %481 : vector<2x128xf32>
    %548 = arith.mulf %532, %540 : vector<2x128xf32>
    %549 = arith.addf %547, %548 : vector<2x128xf32>
    %550 = math.tanh %549 : vector<2x128xf32>
    %551 = arith.mulf %546, %550 : vector<2x128xf32>
    %c8_i32 = arith.constant 8 : i32
    %c0_164 = arith.constant 0 : index
    %c0_165 = arith.constant 0 : index
    %552 = vector.load %arg8[%c0_164, %c0_165] : memref<128x3xf32, #tpu.memory_space<vmem>>, vector<128x3xf32>
    %cst_166 = arith.constant dense<0.000000e+00> : vector<2x3xf32>
    %553 = tpu.matmul %551, %552, %cst_166 {dimension_numbers = #tpu.dot_dimension_numbers<[1], [0], [0], [1], [0, 0, 1, 1], [], []>} : vector<2x128xf32>, vector<128x3xf32>, vector<2x3xf32> -> vector<2x3xf32>
    %c0_167 = arith.constant 0 : index
    %c0_168 = arith.constant 0 : index
    %554 = vector.load %arg9[%c0_167, %c0_168] : memref<1x3xf32, #tpu.memory_space<vmem>>, vector<1x3xf32>
    %555 = vector.broadcast %554 : vector<1x3xf32> to vector<2x3xf32>
    %556 = arith.addf %553, %555 : vector<2x3xf32>
    %cst_169 = arith.constant dense<0xFF800000> : vector<2xf32>
    %557 = vector.multi_reduction <maximumf>, %556, %cst_169 [1] : vector<2x3xf32> to vector<2xf32>
    %558 = vector.shape_cast %557 : vector<2xf32> to vector<2x1xf32>
    %559 = vector.broadcast %558 : vector<2x1xf32> to vector<2x3xf32>
    %560 = arith.subf %556, %559 : vector<2x3xf32>
    %561 = math.exp %560 : vector<2x3xf32>
    %cst_170 = arith.constant dense<0.000000e+00> : vector<2xf32>
    %562 = vector.multi_reduction <add>, %561, %cst_170 [1] : vector<2x3xf32> to vector<2xf32>
    %563 = vector.shape_cast %562 : vector<2xf32> to vector<2x1xf32>
    %564 = math.log %563 : vector<2x1xf32>
    %565 = arith.addf %558, %564 : vector<2x1xf32>
    %566 = vector.broadcast %565 : vector<2x1xf32> to vector<2x3xf32>
    %567 = arith.subf %556, %566 : vector<2x3xf32>
    %c0_171 = arith.constant 0 : index
    %c0_172 = arith.constant 0 : index
    %568 = vector.load %arg10[%c0_171, %c0_172] : memref<2x3xf32, #tpu.memory_space<vmem>>, vector<2x3xf32>
    tpu.vector_store %arg10[%c0_171, %c0_172], %567 {strides = array<i32>} : memref<2x3xf32, #tpu.memory_space<vmem>>, vector<2x3xf32>,
    return
  }
  func.func @transform_0(%arg0: i32) -> (i32, i32, i32) {
    %c0_i32 = arith.constant 0 : i32
    %c0_i32_0 = arith.constant 0 : i32
    %c0_i32_1 = arith.constant 0 : i32
    %c0_i32_2 = arith.constant 0 : i32
    return %c0_i32, %c0_i32_0, %c0_i32_1 : i32, i32, i32
  }
  func.func @transform_1(%arg0: i32) -> (i32, i32) {
    %c0_i32 = arith.constant 0 : i32
    %c0_i32_0 = arith.constant 0 : i32
    %c0_i32_1 = arith.constant 0 : i32
    return %c0_i32, %c0_i32_0 : i32, i32
  }
  func.func @transform_2(%arg0: i32) -> (i32, i32) {
    %c0_i32 = arith.constant 0 : i32
    %c0_i32_0 = arith.constant 0 : i32
    %c0_i32_1 = arith.constant 0 : i32
    return %c0_i32, %c0_i32_0 : i32, i32
  }
  func.func @transform_3(%arg0: i32) -> (i32, i32) {
    %c0_i32 = arith.constant 0 : i32
    %c0_i32_0 = arith.constant 0 : i32
    %c0_i32_1 = arith.constant 0 : i32
    return %c0_i32, %c0_i32_0 : i32, i32
  }
  func.func @transform_4(%arg0: i32) -> (i32, i32) {
    %c0_i32 = arith.constant 0 : i32
    %c0_i32_0 = arith.constant 0 : i32
    %c0_i32_1 = arith.constant 0 : i32
    return %c0_i32, %c0_i32_0 : i32, i32
  }
  func.func @transform_5(%arg0: i32) -> (i32, i32) {
    %c0_i32 = arith.constant 0 : i32
    %c0_i32_0 = arith.constant 0 : i32
    %c0_i32_1 = arith.constant 0 : i32
    return %c0_i32, %c0_i32_0 : i32, i32
  }
  func.func @transform_6(%arg0: i32) -> (i32, i32) {
    %c0_i32 = arith.constant 0 : i32
    %c0_i32_0 = arith.constant 0 : i32
    %c0_i32_1 = arith.constant 0 : i32
    return %c0_i32, %c0_i32_0 : i32, i32
  }
  func.func @transform_7(%arg0: i32) -> (i32, i32) {
    %c0_i32 = arith.constant 0 : i32
    %c0_i32_0 = arith.constant 0 : i32
    %c0_i32_1 = arith.constant 0 : i32
    return %c0_i32, %c0_i32_0 : i32, i32
  }
  func.func @transform_8(%arg0: i32) -> (i32, i32) {
    %c0_i32 = arith.constant 0 : i32
    %c0_i32_0 = arith.constant 0 : i32
    %c0_i32_1 = arith.constant 0 : i32
    return %c0_i32, %c0_i32_0 : i32, i32
  }
  func.func @transform_9(%arg0: i32) -> (i32, i32) {
    %c0_i32 = arith.constant 0 : i32
    %c0_i32_0 = arith.constant 0 : i32
    %c0_i32_1 = arith.constant 0 : i32
    return %c0_i32, %c0_i32_0 : i32, i32
  }
}

</mosaic_0001>

<bundles_post_ra>
// kernel: fencing_forward.1
= control target key start
LH: loop header
LB: loop body
LE: loop exit
PB: predicated region body
PF: predicated region fallthrough
CT: control target
= control target key end

     0   :  { %14 = vsyncpa [#allocation3], 0  ;;  %s11964_s0 = inlined_call_operand.vmem [shape: f32[8,4,128], index: 0, kind: input, shape index: {}]   ;;  %s11965_s1 = inlined_call_operand.hbm [shape: f32[256,512], index: 1, kind: input, shape index: {}]   ;;  %s11966_s2 = inlined_call_operand.vmem [shape: f32[1,512], index: 2, kind: input, shape index: {}]   ;;  %s11967_s3 = inlined_call_operand.hbm [shape: f32[128,512], index: 3, kind: input, shape index: {}]   ;;  %s11968_s4 = inlined_call_operand.hbm [shape: f32[128,512], index: 4, kind: input, shape index: {}]   ;;  %s11969_s5 = inlined_call_operand.hbm [shape: f32[128,512], index: 5, kind: input, shape index: {}]   ;;  %s11970_s6 = inlined_call_operand.vmem [shape: f32[1,512], index: 6, kind: input, shape index: {}]   ;;  %s11971_s7 = inlined_call_operand.vmem [shape: f32[128,3], index: 7, kind: input, shape index: {}]   ;;  %s11972_s8 = inlined_call_operand.vmem [shape: f32[1,3], index: 8, kind: input, shape index: {}]   ;;  %s11973_s9 = inlined_call_operand.hbm [shape: f32[2,3], index: 9, kind: output, shape index: {}]  }
   0x1   :  { %15 = vsyncpa [#allocation6], 0 }
   0x2   :  { %16 = vsyncpa [#allocation9], 0 }
   0x3   :  { %17 = vsyncpa [#allocation4], 0  ;;  %s7282_s30 = smov [#allocation5]   ;;  %s7283_s11 = smov [#allocation2]  }
   0x4   :  { %s39_s10 = sshll.u32 %s7282_s30, 4  ;;  %s25_s12 = sshll.u32 %s7283_s11, 4  ;;  %s40_s10 = int_to_ptr.vmem [resolvable:$true] %s39_s10  ;;  %s26_s12 = int_to_ptr.vmem [resolvable:$true] %s25_s12 }
   0x5   :  { %s7182_s13 = scalar_lea.vmem %s40_s10, 8192  ;;  %p7187_p1 = scmp.lt.s32.totalorder %s40_s10, %s40_s10 }
   0x6   :  { %p7183_p0 = scmp.ne.s32.totalorder %s40_s10, %s7182_s13  ;;  %p7188_p2 = scmp.lt.s32.totalorder %s7182_s13, %s7182_s13 }
   0x8   :  { %p7189_p3 = por %p7188_p2, %p7187_p1 }
   0xa   :  { %p7190_p4 = pnand %p7189_p3, %p7183_p0 }
   0xc   :  { %7193 = shalt.err (!%p7190_p4)
}
   0xd   :  { %s7284_s14 = smov 512   ;;  %s7285_s15 = smov 32  }
   0xe   :  { %45 = dma.hbm_to_vmem [thread:$0]  %s11967_s3, 8192, %s40_s10, [#allocation6], %s7284_s14, %s7284_s14, %s7285_s15  }
   0xf   :  { %s7202_s18 = scalar_lea.vmem %s26_s12, 16384  ;;  %p7207_p6 = scmp.lt.s32.totalorder %s26_s12, %s26_s12 }
  0x10   :  { %p7203_p5 = scmp.ne.s32.totalorder %s26_s12, %s7202_s18  ;;  %p7208_p7 = scmp.lt.s32.totalorder %s7202_s18, %s7202_s18 }
  0x12   :  { %p7209_p8 = por %p7208_p7, %p7207_p6 }
  0x14   :  { %p7210_p9 = pnand %p7209_p8, %p7203_p5 }
  0x16   :  { %7213 = shalt.err (!%p7210_p9)
}
  0x17   :  { %31 = dma.hbm_to_vmem [thread:$0]  %s11965_s1, 16384, %s26_s12, [#allocation3], %s7284_s14, %s7284_s14, %s7285_s15  }
  0x18   :  { %s7286_s21 = smov [#allocation7]   ;;  %s7287_s23 = smov [#allocation8]  }
  0x19   :  { %s51_s22 = sshll.u32 %s7286_s21, 4  ;;  %s63_s24 = sshll.u32 %s7287_s23, 4  ;;  %s52_s22 = int_to_ptr.vmem [resolvable:$true] %s51_s22  ;;  %s64_s24 = int_to_ptr.vmem [resolvable:$true] %s63_s24 }
  0x1a   :  { %s7222_s3 = scalar_lea.vmem %s52_s22, 8192  ;;  %p7227_p11 = scmp.lt.s32.totalorder %s52_s22, %s52_s22 }
  0x1b   :  { %p7223_p10 = scmp.ne.s32.totalorder %s52_s22, %s7222_s3  ;;  %p7228_p12 = scmp.lt.s32.totalorder %s7222_s3, %s7222_s3 }
  0x1d   :  { %p7229_p13 = por %p7228_p12, %p7227_p11 }
  0x1f   :  { %p7230_p0 = pnand %p7229_p13, %p7223_p10 }
  0x21   :  { %7233 = shalt.err (!%p7230_p0)
}
  0x22   :  { %57 = dma.hbm_to_vmem [thread:$0]  %s11968_s4, 8192, %s52_s22, [#allocation6], %s7284_s14, %s7284_s14, %s7285_s15  }
  0x23   :  { %s7242_s1 = scalar_lea.vmem %s64_s24, 8192  ;;  %p7247_p2 = scmp.lt.s32.totalorder %s64_s24, %s64_s24 }
  0x24   :  { %p7243_p1 = scmp.ne.s32.totalorder %s64_s24, %s7242_s1  ;;  %p7248_p3 = scmp.lt.s32.totalorder %s7242_s1, %s7242_s1 }
  0x26   :  { %p7249_p4 = por %p7248_p3, %p7247_p2 }
  0x28   :  { %p7250_p5 = pnand %p7249_p4, %p7243_p1 }
  0x2a   :  { %7253 = shalt.err (!%p7250_p5)
}
  0x2b   :  { %69 = dma.hbm_to_vmem [thread:$0]  %s11969_s5, 8192, %s64_s24, [#allocation9], %s7284_s14, %s7284_s14, %s7285_s15  }
  0x2c   :  { %7274 = dma.done.wait [#allocation3], 16384  }
  0x2d   :  { %7275 = vsyncadd [#allocation3], 4294950912 }
  0x2e   :  { %7276 = dma.done.wait [#allocation6], 16384  }
  0x2f   :  { %7277 = vsyncadd [#allocation6], 4294950912 }
  0x30   :  { %7278 = dma.done.wait [#allocation9], 8192  }
  0x31   :  { %7279 = vsyncadd [#allocation9], 4294959104  ;;  %v11978_v0 = vmov 0.0   ;;  %v194_v1 = vld [vmem:[#allocation2 + $0x1e8] sm:$0xff]  ;;  %v193_v2 = vld [vmem:[#allocation2 + $0x1e0] sm:$0xff]  ;;  %vm7289_vm0 = vmmov 0  }
  0x32   :  { %325 = vmatprep.mubr.f32.mxu0 %v11978_v0  ;;  %396 = vmatprep.mubr.f32.mxu1 %v11978_v0  ;;  %v190_v3 = vld [vmem:[#allocation2 + $0x1c8] sm:$0xff]  ;;  %v189_v4 = vld [vmem:[#allocation2 + $0x1c0] sm:$0xff]  ;;  %v196_v9 = vld [vmem:[#allocation2 + $0x1f8] sm:$0xff]  ;;  %vm5576_vm1 = vcmask 17408  }
  0x33   :  { %261 = vmatprep.subr.mxu0 %v194_v1  ;;  %v186_v5 = vld [vmem:[#allocation2 + $0x1a8] sm:$0xff]  ;;  %v185_v6 = vld [vmem:[#allocation2 + $0x1a0] sm:$0xff]  ;;  %332 = vmatprep.subr.mxu1 %v196_v9  ;;  %v195_v11 = vld [vmem:[#allocation2 + $0x1f0] sm:$0xff] }
  0x34   :  { %262 = vmatpush1.msra.mxu0 %v193_v2  ;;  %v182_v7 = vld [vmem:[#allocation2 + $0x188] sm:$0xff]  ;;  %v181_v8 = vld [vmem:[#allocation2 + $0x180] sm:$0xff]  ;;  %333 = vmatpush1.msra.mxu1 %v195_v11  ;;  %v192_v13 = vld [vmem:[#allocation2 + $0x1d8] sm:$0xff] }
  0x35   :  { %263 = vmatprep.subr.mxu0 %v190_v3  ;;  %v178_v10 = vld [vmem:[#allocation2 + $0x168] sm:$0xff]  ;;  %v177_v12 = vld [vmem:[#allocation2 + $0x160] sm:$0xff]  ;;  %v191_v14 = vld [vmem:[#allocation2 + $0x1d0] sm:$0xff]  ;;  %334 = vmatprep.subr.mxu1 %v192_v13 }
  0x36   :  { %264 = vmatpush1.msra.mxu0 %v189_v4  ;;  %v174_v15 = vld [vmem:[#allocation2 + $0x148] sm:$0xff]  ;;  %v188_v16 = vld [vmem:[#allocation2 + $0x1b8] sm:$0xff]  ;;  %v173_v17 = vld [vmem:[#allocation2 + $0x140] sm:$0xff]  ;;  %335 = vmatpush1.msra.mxu1 %v191_v14 }
  0x37   :  { %265 = vmatprep.subr.mxu0 %v186_v5  ;;  %v187_v18 = vld [vmem:[#allocation2 + $0x1b0] sm:$0xff]  ;;  %v184_v19 = vld [vmem:[#allocation2 + $0x198] sm:$0xff]  ;;  %v170_v20 = vld [vmem:[#allocation2 + $0x128] sm:$0xff]  ;;  %336 = vmatprep.subr.mxu1 %v188_v16 }
  0x38   :  { %266 = vmatpush1.msra.mxu0 %v185_v6  ;;  %v183_v21 = vld [vmem:[#allocation2 + $0x190] sm:$0xff]  ;;  %v169_v22 = vld [vmem:[#allocation2 + $0x120] sm:$0xff]  ;;  %337 = vmatpush1.msra.mxu1 %v187_v18  ;;  %v180_v23 = vld [vmem:[#allocation2 + $0x178] sm:$0xff] }
  0x39   :  { %267 = vmatprep.subr.mxu0 %v182_v7  ;;  %v166_v24 = vld [vmem:[#allocation2 + $0x108] sm:$0xff]  ;;  %338 = vmatprep.subr.mxu1 %v184_v19  ;;  %v179_v25 = vld [vmem:[#allocation2 + $0x170] sm:$0xff]  ;;  %v165_v26 = vld [vmem:[#allocation2 + $0x100] sm:$0xff] }
  0x3a   :  { %268 = vmatpush1.msra.mxu0 %v181_v8  ;;  %339 = vmatpush1.msra.mxu1 %v183_v21  ;;  %v176_v27 = vld [vmem:[#allocation2 + $0x158] sm:$0xff]  ;;  %v162_v28 = vld [vmem:[#allocation2 + $0xe8] sm:$0xff]  ;;  %v175_v29 = vld [vmem:[#allocation2 + $0x150] sm:$0xff] }
  0x3b   :  { %269 = vmatprep.subr.mxu0 %v178_v10  ;;  %340 = vmatprep.subr.mxu1 %v180_v23  ;;  %v161_v30 = vld [vmem:[#allocation2 + $0xe0] sm:$0xff]  ;;  %v172_v31 = vld [vmem:[#allocation2 + $0x138] sm:$0xff]  ;;  %v158_v32 = vld [vmem:[#allocation2 + $0xc8] sm:$0xff] }
  0x3c   :  { %270 = vmatpush1.msra.mxu0 %v177_v12  ;;  %341 = vmatpush1.msra.mxu1 %v179_v25  ;;  %v171_v33 = vld [vmem:[#allocation2 + $0x130] sm:$0xff]  ;;  %v157_v34 = vld [vmem:[#allocation2 + $0xc0] sm:$0xff]  ;;  %v168_v35 = vld [vmem:[#allocation2 + $0x118] sm:$0xff] }
  0x3d   :  { %271 = vmatprep.subr.mxu0 %v174_v15  ;;  %342 = vmatprep.subr.mxu1 %v176_v27  ;;  %v154_v36 = vld [vmem:[#allocation2 + $0xa8] sm:$0xff]  ;;  %v167_v37 = vld [vmem:[#allocation2 + $0x110] sm:$0xff]  ;;  %v153_v38 = vld [vmem:[#allocation2 + $0xa0] sm:$0xff] }
  0x3e   :  { %272 = vmatpush1.msra.mxu0 %v173_v17  ;;  %343 = vmatpush1.msra.mxu1 %v175_v29  ;;  %v164_v39 = vld [vmem:[#allocation2 + $0xf8] sm:$0xff]  ;;  %v150_v40 = vld [vmem:[#allocation2 + $0x88] sm:$0xff]  ;;  %v163_v41 = vld [vmem:[#allocation2 + $0xf0] sm:$0xff] }
  0x3f   :  { %273 = vmatprep.subr.mxu0 %v170_v20  ;;  %344 = vmatprep.subr.mxu1 %v172_v31  ;;  %v149_v42 = vld [vmem:[#allocation2 + $0x80] sm:$0xff]  ;;  %v160_v43 = vld [vmem:[#allocation2 + $0xd8] sm:$0xff]  ;;  %v146_v44 = vld [vmem:[#allocation2 + $0x68] sm:$0xff] }
  0x40   :  { %274 = vmatpush1.msra.mxu0 %v169_v22  ;;  %345 = vmatpush1.msra.mxu1 %v171_v33  ;;  %v159_v45 = vld [vmem:[#allocation2 + $0xd0] sm:$0xff]  ;;  %v145_v46 = vld [vmem:[#allocation2 + $0x60] sm:$0xff]  ;;  %v156_v47 = vld [vmem:[#allocation2 + $0xb8] sm:$0xff] }
  0x41   :  { %275 = vmatprep.subr.mxu0 %v166_v24  ;;  %346 = vmatprep.subr.mxu1 %v168_v35  ;;  %v142_v48 = vld [vmem:[#allocation2 + $0x48] sm:$0xff]  ;;  %v155_v49 = vld [vmem:[#allocation2 + $0xb0] sm:$0xff]  ;;  %v141_v50 = vld [vmem:[#allocation2 + $0x40] sm:$0xff] }
  0x42   :  { %276 = vmatpush1.msra.mxu0 %v165_v26  ;;  %347 = vmatpush1.msra.mxu1 %v167_v37  ;;  %v152_v51 = vld [vmem:[#allocation2 + $0x98] sm:$0xff]  ;;  %v138_v52 = vld [vmem:[#allocation2 + $0x28] sm:$0xff]  ;;  %v151_v53 = vld [vmem:[#allocation2 + $0x90] sm:$0xff] }
  0x43   :  { %277 = vmatprep.subr.mxu0 %v162_v28  ;;  %348 = vmatprep.subr.mxu1 %v164_v39  ;;  %v137_v54 = vld [vmem:[#allocation2 + $0x20] sm:$0xff]  ;;  %v148_v55 = vld [vmem:[#allocation2 + $0x78] sm:$0xff]  ;;  %v134_v56 = vld [vmem:[#allocation2 + $0x8] sm:$0xff] }
  0x44   :  { %278 = vmatpush1.msra.mxu0 %v161_v30  ;;  %349 = vmatpush1.msra.mxu1 %v163_v41  ;;  %v147_v57 = vld [vmem:[#allocation2 + $0x70] sm:$0xff]  ;;  %v133_v58 = vld [vmem:[#allocation2] sm:$0xff]  ;;  %v144_v59 = vld [vmem:[#allocation2 + $0x58] sm:$0xff] }
  0x45   :  { %279 = vmatprep.subr.mxu0 %v158_v32  ;;  %350 = vmatprep.subr.mxu1 %v160_v43  ;;  %v258_v60 = vld [vmem:[#allocation2 + $0x3e8] sm:$0xff]  ;;  %v143_v61 = vld [vmem:[#allocation2 + $0x50] sm:$0xff]  ;;  %v257_v62 = vld [vmem:[#allocation2 + $0x3e0] sm:$0xff] }
  0x46   :  { %280 = vmatpush1.msra.mxu0 %v157_v34  ;;  %351 = vmatpush1.msra.mxu1 %v159_v45  ;;  %v140_v63 = vld [vmem:[#allocation2 + $0x38] sm:$0xff]  ;;  %v254_v1 = vld [vmem:[#allocation2 + $0x3c8] sm:$0xff]  ;;  %v139_v2 = vld [vmem:[#allocation2 + $0x30] sm:$0xff] }
  0x47   :  { %281 = vmatprep.subr.mxu0 %v154_v36  ;;  %352 = vmatprep.subr.mxu1 %v156_v47  ;;  %v253_v3 = vld [vmem:[#allocation2 + $0x3c0] sm:$0xff]  ;;  %v136_v4 = vld [vmem:[#allocation2 + $0x18] sm:$0xff]  ;;  %v250_v5 = vld [vmem:[#allocation2 + $0x3a8] sm:$0xff] }
  0x48   :  { %282 = vmatpush1.msra.mxu0 %v153_v38  ;;  %353 = vmatpush1.msra.mxu1 %v155_v49  ;;  %v135_v6 = vld [vmem:[#allocation2 + $0x10] sm:$0xff]  ;;  %v249_v7 = vld [vmem:[#allocation2 + $0x3a0] sm:$0xff]  ;;  %v260_v8 = vld [vmem:[#allocation2 + $0x3f8] sm:$0xff] }
  0x49   :  { %283 = vmatprep.subr.mxu0 %v150_v40  ;;  %354 = vmatprep.subr.mxu1 %v152_v51  ;;  %v246_v9 = vld [vmem:[#allocation2 + $0x388] sm:$0xff]  ;;  %v259_v10 = vld [vmem:[#allocation2 + $0x3f0] sm:$0xff]  ;;  %v245_v11 = vld [vmem:[#allocation2 + $0x380] sm:$0xff] }
  0x4a   :  { %284 = vmatpush1.msra.mxu0 %v149_v42  ;;  %355 = vmatpush1.msra.mxu1 %v151_v53  ;;  %v256_v12 = vld [vmem:[#allocation2 + $0x3d8] sm:$0xff]  ;;  %v242_v13 = vld [vmem:[#allocation2 + $0x368] sm:$0xff]  ;;  %v255_v14 = vld [vmem:[#allocation2 + $0x3d0] sm:$0xff] }
  0x4b   :  { %285 = vmatprep.subr.mxu0 %v146_v44  ;;  %356 = vmatprep.subr.mxu1 %v148_v55  ;;  %v241_v15 = vld [vmem:[#allocation2 + $0x360] sm:$0xff]  ;;  %v252_v16 = vld [vmem:[#allocation2 + $0x3b8] sm:$0xff]  ;;  %v238_v17 = vld [vmem:[#allocation2 + $0x348] sm:$0xff] }
  0x4c   :  { %286 = vmatpush1.msra.mxu0 %v145_v46  ;;  %357 = vmatpush1.msra.mxu1 %v147_v57  ;;  %v251_v18 = vld [vmem:[#allocation2 + $0x3b0] sm:$0xff]  ;;  %v237_v19 = vld [vmem:[#allocation2 + $0x340] sm:$0xff]  ;;  %v248_v20 = vld [vmem:[#allocation2 + $0x398] sm:$0xff] }
  0x4d   :  { %287 = vmatprep.subr.mxu0 %v142_v48  ;;  %358 = vmatprep.subr.mxu1 %v144_v59  ;;  %v234_v21 = vld [vmem:[#allocation2 + $0x328] sm:$0xff]  ;;  %v247_v22 = vld [vmem:[#allocation2 + $0x390] sm:$0xff]  ;;  %v233_v23 = vld [vmem:[#allocation2 + $0x320] sm:$0xff] }
  0x4e   :  { %288 = vmatpush1.msra.mxu0 %v141_v50  ;;  %359 = vmatpush1.msra.mxu1 %v143_v61  ;;  %v244_v24 = vld [vmem:[#allocation2 + $0x378] sm:$0xff]  ;;  %v230_v25 = vld [vmem:[#allocation2 + $0x308] sm:$0xff]  ;;  %v243_v26 = vld [vmem:[#allocation2 + $0x370] sm:$0xff] }
  0x4f   :  { %289 = vmatprep.subr.mxu0 %v138_v52  ;;  %360 = vmatprep.subr.mxu1 %v140_v63  ;;  %v229_v27 = vld [vmem:[#allocation2 + $0x300] sm:$0xff]  ;;  %v240_v28 = vld [vmem:[#allocation2 + $0x358] sm:$0xff]  ;;  %v226_v29 = vld [vmem:[#allocation2 + $0x2e8] sm:$0xff] }
  0x50   :  { %290 = vmatpush1.msra.mxu0 %v137_v54  ;;  %361 = vmatpush1.msra.mxu1 %v139_v2  ;;  %v239_v30 = vld [vmem:[#allocation2 + $0x350] sm:$0xff]  ;;  %v225_v31 = vld [vmem:[#allocation2 + $0x2e0] sm:$0xff]  ;;  %v236_v32 = vld [vmem:[#allocation2 + $0x338] sm:$0xff] }
  0x51   :  { %291 = vmatprep.subr.mxu0 %v134_v56  ;;  %362 = vmatprep.subr.mxu1 %v136_v4  ;;  %v222_v33 = vld [vmem:[#allocation2 + $0x2c8] sm:$0xff]  ;;  %v235_v34 = vld [vmem:[#allocation2 + $0x330] sm:$0xff]  ;;  %v221_v35 = vld [vmem:[#allocation2 + $0x2c0] sm:$0xff] }
  0x52   :  { %292 = vmatpush1.msra.mxu0 %v133_v58  ;;  %363 = vmatpush1.msra.mxu1 %v135_v6  ;;  %v232_v36 = vld [vmem:[#allocation2 + $0x318] sm:$0xff]  ;;  %v218_v37 = vld [vmem:[#allocation2 + $0x2a8] sm:$0xff]  ;;  %v231_v38 = vld [vmem:[#allocation2 + $0x310] sm:$0xff] }
  0x53   :  { %293 = vmatprep.subr.mxu0 %v258_v60  ;;  %364 = vmatprep.subr.mxu1 %v260_v8  ;;  %v217_v39 = vld [vmem:[#allocation2 + $0x2a0] sm:$0xff]  ;;  %v228_v40 = vld [vmem:[#allocation2 + $0x2f8] sm:$0xff]  ;;  %v214_v41 = vld [vmem:[#allocation2 + $0x288] sm:$0xff] }
  0x54   :  { %294 = vmatpush2.msra.mxu0 %v257_v62  ;;  %365 = vmatpush2.msra.mxu1 %v259_v10  ;;  %v227_v42 = vld [vmem:[#allocation2 + $0x2f0] sm:$0xff]  ;;  %v213_v43 = vld [vmem:[#allocation2 + $0x280] sm:$0xff]  ;;  %v224_v44 = vld [vmem:[#allocation2 + $0x2d8] sm:$0xff] }
  0x55   :  { %295 = vmatprep.subr.mxu0 %v254_v1  ;;  %366 = vmatprep.subr.mxu1 %v256_v12  ;;  %v210_v45 = vld [vmem:[#allocation2 + $0x268] sm:$0xff]  ;;  %v223_v46 = vld [vmem:[#allocation2 + $0x2d0] sm:$0xff]  ;;  %v209_v47 = vld [vmem:[#allocation2 + $0x260] sm:$0xff] }
  0x56   :  { %296 = vmatpush2.msra.mxu0 %v253_v3  ;;  %367 = vmatpush2.msra.mxu1 %v255_v14  ;;  %v220_v48 = vld [vmem:[#allocation2 + $0x2b8] sm:$0xff]  ;;  %v206_v49 = vld [vmem:[#allocation2 + $0x248] sm:$0xff]  ;;  %v219_v50 = vld [vmem:[#allocation2 + $0x2b0] sm:$0xff] }
  0x57   :  { %297 = vmatprep.subr.mxu0 %v250_v5  ;;  %368 = vmatprep.subr.mxu1 %v252_v16  ;;  %v205_v51 = vld [vmem:[#allocation2 + $0x240] sm:$0xff]  ;;  %v216_v52 = vld [vmem:[#allocation2 + $0x298] sm:$0xff]  ;;  %v202_v53 = vld [vmem:[#allocation2 + $0x228] sm:$0xff] }
  0x58   :  { %298 = vmatpush2.msra.mxu0 %v249_v7  ;;  %369 = vmatpush2.msra.mxu1 %v251_v18  ;;  %v215_v54 = vld [vmem:[#allocation2 + $0x290] sm:$0xff]  ;;  %v201_v55 = vld [vmem:[#allocation2 + $0x220] sm:$0xff]  ;;  %v212_v56 = vld [vmem:[#allocation2 + $0x278] sm:$0xff] }
  0x59   :  { %299 = vmatprep.subr.mxu0 %v246_v9  ;;  %370 = vmatprep.subr.mxu1 %v248_v20  ;;  %v198_v57 = vld [vmem:[#allocation2 + $0x208] sm:$0xff]  ;;  %v211_v58 = vld [vmem:[#allocation2 + $0x270] sm:$0xff]  ;;  %v197_v59 = vld [vmem:[#allocation2 + $0x200] sm:$0xff] }
  0x5a   :  { %300 = vmatpush2.msra.mxu0 %v245_v11  ;;  %371 = vmatpush2.msra.mxu1 %v247_v22  ;;  %v208_v60 = vld [vmem:[#allocation2 + $0x258] sm:$0xff]  ;;  %v132_v61 = vld [vmem:[%s11964_s0] sm:$0xf]  ;;  %v207_v62 = vld [vmem:[#allocation2 + $0x250] sm:$0xff] }
  0x5b   :  { %301 = vmatprep.subr.mxu0 %v242_v13  ;;  %372 = vmatprep.subr.mxu1 %v244_v24  ;;  %v204_v63 = vld [vmem:[#allocation2 + $0x238] sm:$0xff]  ;;  %v203_v1 = vld [vmem:[#allocation2 + $0x230] sm:$0xff]  ;;  %v552_v4 = vld [vmem:[#allocation7 + $0x1e8] sm:$0xff] }
  0x5c   :  { %302 = vmatpush2.msra.mxu0 %v241_v15  ;;  %373 = vmatpush2.msra.mxu1 %v243_v26  ;;  %v200_v2 = vld [vmem:[#allocation2 + $0x218] sm:$0xff]  ;;  %v199_v3 = vld [vmem:[#allocation2 + $0x210] sm:$0xff]  ;;  %v551_v6 = vld [vmem:[#allocation7 + $0x1e0] sm:$0xff] }
  0x5d   :  { %303 = vmatprep.subr.mxu0 %v238_v17  ;;  %374 = vmatprep.subr.mxu1 %v240_v28  ;;  %v554_v5 = vld [vmem:[#allocation7 + $0x1f8] sm:$0xff]  ;;  %v553_v7 = vld [vmem:[#allocation7 + $0x1f0] sm:$0xff]  ;;  %v548_v8 = vld [vmem:[#allocation7 + $0x1c8] sm:$0xff] }
  0x5e   :  { %304 = vmatpush2.msra.mxu0 %v237_v19  ;;  %375 = vmatpush2.msra.mxu1 %v239_v30  ;;  %v550_v9 = vld [vmem:[#allocation7 + $0x1d8] sm:$0xff]  ;;  %v547_v10 = vld [vmem:[#allocation7 + $0x1c0] sm:$0xff]  ;;  %v549_v11 = vld [vmem:[#allocation7 + $0x1d0] sm:$0xff] }
  0x5f   :  { %305 = vmatprep.subr.mxu0 %v234_v21  ;;  %376 = vmatprep.subr.mxu1 %v236_v32  ;;  %v544_v12 = vld [vmem:[#allocation7 + $0x1a8] sm:$0xff]  ;;  %v546_v13 = vld [vmem:[#allocation7 + $0x1b8] sm:$0xff]  ;;  %v543_v14 = vld [vmem:[#allocation7 + $0x1a0] sm:$0xff] }
  0x60   :  { %306 = vmatpush2.msra.mxu0 %v233_v23  ;;  %377 = vmatpush2.msra.mxu1 %v235_v34  ;;  %v545_v15 = vld [vmem:[#allocation7 + $0x1b0] sm:$0xff]  ;;  %v540_v16 = vld [vmem:[#allocation7 + $0x188] sm:$0xff]  ;;  %v542_v17 = vld [vmem:[#allocation7 + $0x198] sm:$0xff] }
  0x61   :  { %307 = vmatprep.subr.mxu0 %v230_v25  ;;  %378 = vmatprep.subr.mxu1 %v232_v36  ;;  %v539_v18 = vld [vmem:[#allocation7 + $0x180] sm:$0xff]  ;;  %v541_v19 = vld [vmem:[#allocation7 + $0x190] sm:$0xff]  ;;  %v536_v20 = vld [vmem:[#allocation7 + $0x168] sm:$0xff] }
  0x62   :  { %308 = vmatpush2.msra.mxu0 %v229_v27  ;;  %379 = vmatpush2.msra.mxu1 %v231_v38  ;;  %v538_v21 = vld [vmem:[#allocation7 + $0x178] sm:$0xff]  ;;  %v535_v22 = vld [vmem:[#allocation7 + $0x160] sm:$0xff]  ;;  %v537_v23 = vld [vmem:[#allocation7 + $0x170] sm:$0xff] }
  0x63   :  { %309 = vmatprep.subr.mxu0 %v226_v29  ;;  %380 = vmatprep.subr.mxu1 %v228_v40  ;;  %v532_v24 = vld [vmem:[#allocation7 + $0x148] sm:$0xff]  ;;  %v534_v25 = vld [vmem:[#allocation7 + $0x158] sm:$0xff]  ;;  %v531_v26 = vld [vmem:[#allocation7 + $0x140] sm:$0xff] }
  0x64   :  { %310 = vmatpush2.msra.mxu0 %v225_v31  ;;  %381 = vmatpush2.msra.mxu1 %v227_v42  ;;  %v533_v27 = vld [vmem:[#allocation7 + $0x150] sm:$0xff]  ;;  %v528_v28 = vld [vmem:[#allocation7 + $0x128] sm:$0xff]  ;;  %v530_v29 = vld [vmem:[#allocation7 + $0x138] sm:$0xff] }
  0x65   :  { %311 = vmatprep.subr.mxu0 %v222_v33  ;;  %382 = vmatprep.subr.mxu1 %v224_v44  ;;  %v527_v30 = vld [vmem:[#allocation7 + $0x120] sm:$0xff]  ;;  %v529_v31 = vld [vmem:[#allocation7 + $0x130] sm:$0xff]  ;;  %v524_v32 = vld [vmem:[#allocation7 + $0x108] sm:$0xff] }
  0x66   :  { %312 = vmatpush2.msra.mxu0 %v221_v35  ;;  %383 = vmatpush2.msra.mxu1 %v223_v46  ;;  %v526_v33 = vld [vmem:[#allocation7 + $0x118] sm:$0xff]  ;;  %v523_v34 = vld [vmem:[#allocation7 + $0x100] sm:$0xff]  ;;  %v525_v35 = vld [vmem:[#allocation7 + $0x110] sm:$0xff] }
  0x67   :  { %313 = vmatprep.subr.mxu0 %v218_v37  ;;  %384 = vmatprep.subr.mxu1 %v220_v48  ;;  %v520_v36 = vld [vmem:[#allocation7 + $0xe8] sm:$0xff]  ;;  %v522_v37 = vld [vmem:[#allocation7 + $0xf8] sm:$0xff]  ;;  %v519_v38 = vld [vmem:[#allocation7 + $0xe0] sm:$0xff] }
  0x68   :  { %314 = vmatpush2.msra.mxu0 %v217_v39  ;;  %385 = vmatpush2.msra.mxu1 %v219_v50  ;;  %v521_v39 = vld [vmem:[#allocation7 + $0xf0] sm:$0xff]  ;;  %v516_v40 = vld [vmem:[#allocation7 + $0xc8] sm:$0xff]  ;;  %v515_v42 = vld [vmem:[#allocation7 + $0xc0] sm:$0xff] }
  0x69   :  { %315 = vmatprep.subr.mxu0 %v214_v41  ;;  %386 = vmatprep.subr.mxu1 %v216_v52  ;;  %v518_v41 = vld [vmem:[#allocation7 + $0xd8] sm:$0xff]  ;;  %v512_v44 = vld [vmem:[#allocation7 + $0xa8] sm:$0xff]  ;;  %v511_v46 = vld [vmem:[#allocation7 + $0xa0] sm:$0xff] }
  0x6a   :  { %316 = vmatpush2.msra.mxu0 %v213_v43  ;;  %387 = vmatpush2.msra.mxu1 %v215_v54  ;;  %v517_v43 = vld [vmem:[#allocation7 + $0xd0] sm:$0xff]  ;;  %v508_v48 = vld [vmem:[#allocation7 + $0x88] sm:$0xff]  ;;  %v507_v50 = vld [vmem:[#allocation7 + $0x80] sm:$0xff] }
  0x6b   :  { %317 = vmatprep.subr.mxu0 %v210_v45  ;;  %388 = vmatprep.subr.mxu1 %v212_v56  ;;  %v514_v45 = vld [vmem:[#allocation7 + $0xb8] sm:$0xff]  ;;  %v504_v52 = vld [vmem:[#allocation7 + $0x68] sm:$0xff]  ;;  %v503_v54 = vld [vmem:[#allocation7 + $0x60] sm:$0xff] }
  0x6c   :  { %318 = vmatpush2.msra.mxu0 %v209_v47  ;;  %389 = vmatpush2.msra.mxu1 %v211_v58  ;;  %v513_v47 = vld [vmem:[#allocation7 + $0xb0] sm:$0xff]  ;;  %v500_v56 = vld [vmem:[#allocation7 + $0x48] sm:$0xff]  ;;  %v499_v58 = vld [vmem:[#allocation7 + $0x40] sm:$0xff] }
  0x6d   :  { %319 = vmatprep.subr.mxu0 %v206_v49  ;;  %390 = vmatprep.subr.mxu1 %v208_v60  ;;  %v510_v49 = vld [vmem:[#allocation7 + $0x98] sm:$0xff]  ;;  %v496_v60 = vld [vmem:[#allocation7 + $0x28] sm:$0xff] }
  0x6e   :  { %320 = vmatpush2.msra.mxu0 %v205_v51  ;;  %391 = vmatpush2.msra.mxu1 %v207_v62  ;;  %v509_v51 = vld [vmem:[#allocation7 + $0x90] sm:$0xff]  ;;  %v495_v62 = vld [vmem:[#allocation7 + $0x20] sm:$0xff] }
  0x6f   :  { %321 = vmatprep.subr.mxu0 %v202_v53  ;;  %392 = vmatprep.subr.mxu1 %v204_v63  ;;  %v506_v53 = vld [vmem:[#allocation7 + $0x78] sm:$0xff]  ;;  %v497_v63 = vld [vmem:[#allocation7 + $0x30] sm:$0xff] }
  0x70   :  { %322 = vmatpush2.msra.mxu0 %v201_v55  ;;  %393 = vmatpush2.msra.mxu1 %v203_v1  ;;  %v505_v55 = vld [vmem:[#allocation7 + $0x70] sm:$0xff]  ;;  %v492_v1 = vld [vmem:[#allocation7 + $0x8] sm:$0xff] }
  0x71   :  { %323 = vmatprep.subr.mxu0 %v198_v57  ;;  %394 = vmatprep.subr.mxu1 %v200_v2  ;;  %v502_v57 = vld [vmem:[#allocation7 + $0x58] sm:$0xff] }
  0x72   :  { %324 = vmatpush2.msra.mxu0 %v197_v59  ;;  %395 = vmatpush2.msra.mxu1 %v199_v3  ;;  %v501_v59 = vld [vmem:[#allocation7 + $0x50] sm:$0xff]  ;;  %v494_v2 = vld [vmem:[#allocation7 + $0x18] sm:$0xff]  ;;  %v491_v3 = vld [vmem:[#allocation7] sm:$0xff] }
  0x73   :  { %326 = vmatmul.mubr.f32.vlgmr.msra.gmra.mxu0 %v132_v61  ;;  %397 = vmatmul.mubr.f32.vlgmr.msra.gmra.mxu1 %v132_v61  ;;  %v498_v61 = vld [vmem:[#allocation7 + $0x38] sm:$0xff] }
  0x74   :  { %622 = vmatprep.mubr.f32.mxu0 %v11978_v0  ;;  %693 = vmatprep.mubr.f32.mxu1 %v11978_v0 }
  0x75   :  { %558 = vmatprep.subr.mxu0 %v552_v4  ;;  %629 = vmatprep.subr.mxu1 %v554_v5  ;;  %v7372_v4 = vld [vmem:[#allocation7 + $0x10] sm:$0xff]  ;;  %v488_v5 = vld [vmem:[#allocation5 + $0x1e8] sm:$0xff] }
  0x76   :  { %559 = vmatpush1.msra.mxu0 %v551_v6  ;;  %630 = vmatpush1.msra.mxu1 %v553_v7  ;;  %v490_v6 = vld [vmem:[#allocation5 + $0x1f8] sm:$0xff]  ;;  %v90_v7 = vlaneseq }
  0x77   :  { %560 = vmatprep.subr.mxu0 %v548_v8  ;;  %631 = vmatprep.subr.mxu1 %v550_v9 }
  0x78   :  { %561 = vmatpush1.msra.mxu0 %v547_v10  ;;  %632 = vmatpush1.msra.mxu1 %v549_v11  ;;  %v7375_v8 = vshrl.u32 %v90_v7, 7  ;;  %v88_v10 = vld [vmem:[%s11966_s2] sm:$0xf] }
  0x79   :  { %562 = vmatprep.subr.mxu0 %v544_v12  ;;  %633 = vmatprep.subr.mxu1 %v546_v13  ;;  %v463_v7 = vld [vmem:[#allocation5 + $0x120] sm:$0xff] }
  0x7a   :  { %563 = vmatpush1.msra.mxu0 %v543_v14  ;;  %634 = vmatpush1.msra.mxu1 %v545_v15  ;;  %v11977_v9 = vsub.s32 0, %v7375_v8  ;;  %v11976_v11 = vsub.s32 1, %v7375_v8 }
  0x7b   :  { %564 = vmatprep.subr.mxu0 %v540_v16  ;;  %635 = vmatprep.subr.mxu1 %v542_v17 }
  0x7c   :  { %565 = vmatpush1.msra.mxu0 %v539_v18  ;;  %636 = vmatpush1.msra.mxu1 %v541_v19  ;;  %v7384_v12 = vrot.slane %v88_v10, %v11977_v9  ;;  %v7388_v13 = vrot.slane %v88_v10, %v11976_v11  ;;  %v11974_v19 = vsub.s32 3, %v7375_v8  ;;  %v7568_v11 = vld [vmem:[#allocation8 + $0x130] sm:$0xff]  ;;  %v7572_v9 = vld [vmem:[#allocation8 + $0x108] sm:$0xff] }
  0x7d   :  { %566 = vmatprep.subr.mxu0 %v536_v20  ;;  %637 = vmatprep.subr.mxu1 %v538_v21  ;;  %12868 = vst [vmem:[#allocation33_spill] sm:$0xff] %v7568_v11  ;;  %12869 = vst [vmem:[#allocation34_spill] sm:$0xff] %v7572_v9 }
  0x7e   :  { %567 = vmatpush1.msra.mxu0 %v535_v22  ;;  %638 = vmatpush1.msra.mxu1 %v537_v23  ;;  %12850 = vst [vmem:[#allocation15_spill] sm:$0xff] %v7388_v13  ;;  %v11975_v22 = vsub.s32 2, %v7375_v8  ;;  %v7396_v23 = vrot.slane %v88_v10, %v11974_v19  ;;  %v7562_v19 = vld [vmem:[#allocation8 + $0x138] sm:$0xff] }
  0x7f   :  { %568 = vmatprep.subr.mxu0 %v532_v24  ;;  %639 = vmatprep.subr.mxu1 %v534_v25  ;;  %12866 = vst [vmem:[#allocation31_spill] sm:$0xff] %v7562_v19 }
  0x80   :  { %569 = vmatpush1.msra.mxu0 %v531_v26  ;;  %640 = vmatpush1.msra.mxu1 %v533_v27  ;;  %v7400_v25 = vrot.slane %v88_v10, %v11975_v22  ;;  %v465_v10 = vld [vmem:[#allocation5 + $0x130] sm:$0xff]  ;;  %v7566_v22 = vld [vmem:[#allocation8 + $0x120] sm:$0xff] }
  0x81   :  { %570 = vmatprep.subr.mxu0 %v528_v28  ;;  %641 = vmatprep.subr.mxu1 %v530_v29  ;;  %12867 = vst [vmem:[#allocation32_spill] sm:$0xff] %v7566_v22 }
  0x82   :  { %571 = vmatpush1.msra.mxu0 %v527_v30  ;;  %642 = vmatpush1.msra.mxu1 %v529_v31 }
  0x83   :  { %572 = vmatprep.subr.mxu0 %v524_v32  ;;  %643 = vmatprep.subr.mxu1 %v526_v33 }
  0x84   :  { %573 = vmatpush1.msra.mxu0 %v523_v34  ;;  %644 = vmatpush1.msra.mxu1 %v525_v35 }
  0x85   :  { %574 = vmatprep.subr.mxu0 %v520_v36  ;;  %645 = vmatprep.subr.mxu1 %v522_v37 }
  0x86   :  { %575 = vmatpush1.msra.mxu0 %v519_v38  ;;  %646 = vmatpush1.msra.mxu1 %v521_v39 }
  0x87   :  { %576 = vmatprep.subr.mxu0 %v516_v40  ;;  %647 = vmatprep.subr.mxu1 %v518_v41 }
  0x88   :  { %577 = vmatpush1.msra.mxu0 %v515_v42  ;;  %648 = vmatpush1.msra.mxu1 %v517_v43 }
  0x89   :  { %578 = vmatprep.subr.mxu0 %v512_v44  ;;  %649 = vmatprep.subr.mxu1 %v514_v45  ;;  %v487_v45 = vld [vmem:[#allocation5 + $0x1e0] sm:$0xff] }
  0x8a   :  { %579 = vmatpush1.msra.mxu0 %v511_v46  ;;  %650 = vmatpush1.msra.mxu1 %v513_v47  ;;  %v489_v46 = vld [vmem:[#allocation5 + $0x1f0] sm:$0xff]  ;;  %v484_v47 = vld [vmem:[#allocation5 + $0x1c8] sm:$0xff] }
  0x8b   :  { %580 = vmatprep.subr.mxu0 %v508_v48  ;;  %651 = vmatprep.subr.mxu1 %v510_v49  ;;  %v486_v48 = vld [vmem:[#allocation5 + $0x1d8] sm:$0xff]  ;;  %v483_v49 = vld [vmem:[#allocation5 + $0x1c0] sm:$0xff] }
  0x8c   :  { %581 = vmatpush1.msra.mxu0 %v507_v50  ;;  %652 = vmatpush1.msra.mxu1 %v509_v51  ;;  %v485_v50 = vld [vmem:[#allocation5 + $0x1d0] sm:$0xff]  ;;  %v480_v51 = vld [vmem:[#allocation5 + $0x1a8] sm:$0xff] }
  0x8d   :  { %582 = vmatprep.subr.mxu0 %v504_v52  ;;  %653 = vmatprep.subr.mxu1 %v506_v53  ;;  %v482_v52 = vld [vmem:[#allocation5 + $0x1b8] sm:$0xff]  ;;  %v479_v53 = vld [vmem:[#allocation5 + $0x1a0] sm:$0xff] }
  0x8e   :  { %583 = vmatpush1.msra.mxu0 %v503_v54  ;;  %654 = vmatpush1.msra.mxu1 %v505_v55  ;;  %v481_v54 = vld [vmem:[#allocation5 + $0x1b0] sm:$0xff]  ;;  %v476_v55 = vld [vmem:[#allocation5 + $0x188] sm:$0xff] }
  0x8f   :  { %584 = vmatprep.subr.mxu0 %v500_v56  ;;  %655 = vmatprep.subr.mxu1 %v502_v57  ;;  %v478_v56 = vld [vmem:[#allocation5 + $0x198] sm:$0xff]  ;;  %v475_v57 = vld [vmem:[#allocation5 + $0x180] sm:$0xff] }
  0x90   :  { %585 = vmatpush1.msra.mxu0 %v499_v58  ;;  %656 = vmatpush1.msra.mxu1 %v501_v59  ;;  %v477_v58 = vld [vmem:[#allocation5 + $0x190] sm:$0xff]  ;;  %v472_v59 = vld [vmem:[#allocation5 + $0x168] sm:$0xff] }
  0x91   :  { %586 = vmatprep.subr.mxu0 %v496_v60  ;;  %657 = vmatprep.subr.mxu1 %v498_v61  ;;  %v474_v60 = vld [vmem:[#allocation5 + $0x178] sm:$0xff]  ;;  %v471_v61 = vld [vmem:[#allocation5 + $0x160] sm:$0xff] }
  0x92   :  { %587 = vmatpush1.msra.mxu0 %v495_v62  ;;  %658 = vmatpush1.msra.mxu1 %v497_v63  ;;  %v473_v62 = vld [vmem:[#allocation5 + $0x170] sm:$0xff]  ;;  %v468_v63 = vld [vmem:[#allocation5 + $0x148] sm:$0xff] }
  0x93   :  { %588 = vmatprep.subr.mxu0 %v492_v1  ;;  %659 = vmatprep.subr.mxu1 %v494_v2  ;;  %v470_v1 = vld [vmem:[#allocation5 + $0x158] sm:$0xff]  ;;  %v467_v2 = vld [vmem:[#allocation5 + $0x140] sm:$0xff] }
  0x94   :  { %589 = vmatpush1.msra.mxu0 %v491_v3  ;;  %660 = vmatpush1.msra.mxu1 %v7372_v4  ;;  %v469_v3 = vld [vmem:[#allocation5 + $0x150] sm:$0xff] }
  0x95   :  { %700 = vmatprep.subr.mxu0 %v488_v5  ;;  %771 = vmatprep.subr.mxu1 %v490_v6  ;;  %v464_v5 = vld [vmem:[#allocation5 + $0x128] sm:$0xff]  ;;  %v466_v6 = vld [vmem:[#allocation5 + $0x138] sm:$0xff] }
 0x133   :  { %v327_v14 = vpop.f32.mrf.mxu0  ;;  %v398_v21 = vpop.f32.mrf.mxu1 }
 0x134   :  { %v328_v15 = vadd.f32 %v327_v14, %v7384_v12  ;;  %v399_v27 = vadd.f32 %v398_v21, %v7400_v25  ;;  %v460_v14 = vld [vmem:[#allocation5 + $0x108] sm:$0xff]  ;;  %v455_v21 = vld [vmem:[#allocation5 + $0xe0] sm:$0xff] }
 0x135   :  { %v329_v16 = vpop.f32.mrf.mxu0  ;;  %v400_v24 = vpop.f32.mrf.mxu1 }
 0x136   :  { %v5608_v17 = vmul.f32 -1.442695, %v328_v15  ;;  %v330_v18 = vadd.f32 %v329_v16, %v7388_v13  ;;  %v401_v26 = vadd.f32 %v400_v24, %v7396_v23  ;;  %v462_v15 = vld [vmem:[#allocation5 + $0x118] sm:$0xff]  ;;  %v459_v16 = vld [vmem:[#allocation5 + $0x100] sm:$0xff]  ;;  %v457_v24 = vld [vmem:[#allocation5 + $0xf0] sm:$0xff] }
 0x138   :  { %5725 = vpow2.f32 %v5608_v17  ;;  %v5609_v20 = vmul.f32 -1.442695, %v330_v18  ;;  %v5610_v28 = vmul.f32 -1.442695, %v401_v26  ;;  %v461_v17 = vld [vmem:[#allocation5 + $0x110] sm:$0xff]  ;;  %v456_v18 = vld [vmem:[#allocation5 + $0xe8] sm:$0xff] }
 0x139   :  { %v452_v26 = vld [vmem:[#allocation5 + $0xc8] sm:$0xff] }
 0x13a   :  { %5727 = vpow2.f32 %v5609_v20  ;;  %v458_v20 = vld [vmem:[#allocation5 + $0xf8] sm:$0xff] }
 0x13b   :  { %5729 = vtanh.f32 %v399_v27  ;;  %v454_v27 = vld [vmem:[#allocation5 + $0xd8] sm:$0xff] }
 0x13c   :  { %5731 = vpow2.f32 %v5610_v28  ;;  %v7410_v28 = vld [vmem:[#allocation5 + $0xc0] sm:$0xff] }
 0x145   :  { %v5726_v29 = vpop.eup %5725 }
 0x146   :  { %v406_v30 = vadd.f32 1.0, %v5726_v29  ;;  %v7412_v29 = vld [vmem:[#allocation5 + $0xd0] sm:$0xff] }
 0x147   :  { %v5728_v31 = vpop.eup %5727 }
 0x148   :  { %5733 = vrcp.f32 %v406_v30  ;;  %v412_v32 = vadd.f32 1.0, %v5728_v31  ;;  %v5730_v33 = vpop.eup %5729  ;;  %v7414_v30 = vld [vmem:[#allocation5 + $0xa8] sm:$0xff]  ;;  %v7416_v31 = vld [vmem:[#allocation5 + $0xb8] sm:$0xff] }
 0x149   :  { %v5732_v34 = vpop.eup %5731 }
 0x14a   :  { %5735 = vrcp.f32 %v412_v32  ;;  %v419_v37 = vadd.f32 1.0, %v5732_v34  ;;  %v7418_v32 = vld [vmem:[#allocation5 + $0xa0] sm:$0xff]  ;;  %v7424_v34 = vld [vmem:[#allocation5 + $0x88] sm:$0xff] }
 0x14c   :  { %5737 = vrcp.f32 %v419_v37  ;;  %v7432_v37 = vld [vmem:[#allocation5 + $0x90] sm:$0xff] }
 0x155   :  { %v5734_v35 = vpop.eup %5733 }
 0x156   :  { %v423_v39 = vmul.f32 %v5734_v35, %v5730_v33  ;;  %v7420_v33 = vld [vmem:[#allocation5 + $0xb0] sm:$0xff]  ;;  %v7426_v35 = vld [vmem:[#allocation5 + $0x98] sm:$0xff] }
 0x157   :  { %v5736_v36 = vpop.eup %5735 }
 0x158   :  { %v422_v38 = vmul.f32 0.0, %v5736_v36  ;;  %v7430_v36 = vld [vmem:[#allocation5 + $0x80] sm:$0xff] }
 0x159   :  { %v5738_v41 = vpop.eup %5737 }
 0x15a   :  { %v7404_v40 = vadd.f32 %v423_v39, %v422_v38  ;;  %v7436_v38 = vld [vmem:[#allocation5 + $0x68] sm:$0xff]  ;;  %v7438_v39 = vld [vmem:[#allocation5 + $0x78] sm:$0xff] }
 0x15c   :  { %5739 = vtanh.f32 %v7404_v40 }
 0x169   :  { %v5740_v42 = vpop.eup %5739 }
 0x16a   :  { %v7407_v43 = vmul.f32 %v5740_v42, %v5738_v41  ;;  %v7442_v41 = vld [vmem:[#allocation5 + $0x60] sm:$0xff]  ;;  %v7444_v42 = vld [vmem:[#allocation5 + $0x70] sm:$0xff] }
 0x16c   :  { %v556_v44 = vrot.slane %v7407_v43, 2 }
 0x16e   :  { %623 = vmatmul.mubr.f32.vlgmr.msra.gmra.mxu0 %v556_v44  ;;  %694 = vmatmul.mubr.f32.vlgmr.msra.gmra.mxu1 %v556_v44  ;;  %v7448_v44 = vld [vmem:[#allocation5 + $0x48] sm:$0xff] }
 0x16f   :  { %701 = vmatpush1.msra.mxu0 %v487_v45  ;;  %772 = vmatpush1.msra.mxu1 %v489_v46  ;;  %v7450_v45 = vld [vmem:[#allocation5 + $0x58] sm:$0xff]  ;;  %v7454_v46 = vld [vmem:[#allocation5 + $0x40] sm:$0xff] }
 0x170   :  { %702 = vmatprep.subr.mxu0 %v484_v47  ;;  %773 = vmatprep.subr.mxu1 %v486_v48  ;;  %v7456_v47 = vld [vmem:[#allocation5 + $0x50] sm:$0xff]  ;;  %v7460_v48 = vld [vmem:[#allocation5 + $0x28] sm:$0xff] }
 0x171   :  { %703 = vmatpush1.msra.mxu0 %v483_v49  ;;  %774 = vmatpush1.msra.mxu1 %v485_v50  ;;  %v7462_v49 = vld [vmem:[#allocation5 + $0x38] sm:$0xff]  ;;  %v7466_v50 = vld [vmem:[#allocation5 + $0x20] sm:$0xff] }
 0x172   :  { %704 = vmatprep.subr.mxu0 %v480_v51  ;;  %775 = vmatprep.subr.mxu1 %v482_v52  ;;  %v7468_v51 = vld [vmem:[#allocation5 + $0x30] sm:$0xff]  ;;  %v7472_v52 = vld [vmem:[#allocation5 + $0x8] sm:$0xff] }
 0x173   :  { %705 = vmatpush1.msra.mxu0 %v479_v53  ;;  %776 = vmatpush1.msra.mxu1 %v481_v54  ;;  %v7474_v53 = vld [vmem:[#allocation5 + $0x18] sm:$0xff]  ;;  %v7478_v54 = vld [vmem:[#allocation5] sm:$0xff] }
 0x174   :  { %706 = vmatprep.subr.mxu0 %v476_v55  ;;  %777 = vmatprep.subr.mxu1 %v478_v56  ;;  %v7482_v55 = vld [vmem:[#allocation5 + $0x10] sm:$0xff]  ;;  %v7488_v56 = vld [vmem:[#allocation8 + $0x1e8] sm:$0xff] }
 0x175   :  { %707 = vmatpush1.msra.mxu0 %v475_v57  ;;  %778 = vmatpush1.msra.mxu1 %v477_v58  ;;  %v7490_v57 = vld [vmem:[#allocation8 + $0x1f8] sm:$0xff]  ;;  %v7494_v58 = vld [vmem:[#allocation8 + $0x1e0] sm:$0xff] }
 0x176   :  { %708 = vmatprep.subr.mxu0 %v472_v59  ;;  %779 = vmatprep.subr.mxu1 %v474_v60  ;;  %v7496_v59 = vld [vmem:[#allocation8 + $0x1f0] sm:$0xff]  ;;  %v7500_v60 = vld [vmem:[#allocation8 + $0x1c8] sm:$0xff] }
 0x177   :  { %709 = vmatpush1.msra.mxu0 %v471_v61  ;;  %780 = vmatpush1.msra.mxu1 %v473_v62  ;;  %v7502_v61 = vld [vmem:[#allocation8 + $0x1d8] sm:$0xff]  ;;  %v7506_v62 = vld [vmem:[#allocation8 + $0x1c0] sm:$0xff] }
 0x178   :  { %710 = vmatprep.subr.mxu0 %v468_v63  ;;  %781 = vmatprep.subr.mxu1 %v470_v1  ;;  %v7508_v63 = vld [vmem:[#allocation8 + $0x1d0] sm:$0xff]  ;;  %v7512_v1 = vld [vmem:[#allocation8 + $0x1a8] sm:$0xff] }
 0x179   :  { %711 = vmatpush1.msra.mxu0 %v467_v2  ;;  %782 = vmatpush1.msra.mxu1 %v469_v3  ;;  %v7514_v2 = vld [vmem:[#allocation8 + $0x1b8] sm:$0xff]  ;;  %v7518_v3 = vld [vmem:[#allocation8 + $0x1a0] sm:$0xff] }
 0x17a   :  { %712 = vmatprep.subr.mxu0 %v464_v5  ;;  %783 = vmatprep.subr.mxu1 %v466_v6  ;;  %12851 = vst [vmem:[#allocation16_spill] sm:$0xff] %v7518_v3  ;;  %v7520_v5 = vld [vmem:[#allocation8 + $0x1b0] sm:$0xff]  ;;  %v7524_v6 = vld [vmem:[#allocation8 + $0x188] sm:$0xff] }
 0x17b   :  { %713 = vmatpush1.msra.mxu0 %v463_v7  ;;  %784 = vmatpush1.msra.mxu1 %v465_v10  ;;  %12852 = vst [vmem:[#allocation17_spill] sm:$0xff] %v7520_v5  ;;  %12853 = vst [vmem:[#allocation18_spill] sm:$0xff] %v7524_v6  ;;  %v7526_v7 = vld [vmem:[#allocation8 + $0x198] sm:$0xff]  ;;  %v7530_v10 = vld [vmem:[#allocation8 + $0x180] sm:$0xff] }
 0x17c   :  { %714 = vmatprep.subr.mxu0 %v460_v14  ;;  %785 = vmatprep.subr.mxu1 %v462_v15  ;;  %12854 = vst [vmem:[#allocation19_spill] sm:$0xff] %v7526_v7  ;;  %12855 = vst [vmem:[#allocation20_spill] sm:$0xff] %v7530_v10  ;;  %v7532_v14 = vld [vmem:[#allocation8 + $0x190] sm:$0xff]  ;;  %v7536_v15 = vld [vmem:[#allocation8 + $0x168] sm:$0xff] }
 0x17d   :  { %715 = vmatpush1.msra.mxu0 %v459_v16  ;;  %786 = vmatpush1.msra.mxu1 %v461_v17  ;;  %12856 = vst [vmem:[#allocation21_spill] sm:$0xff] %v7532_v14  ;;  %12857 = vst [vmem:[#allocation22_spill] sm:$0xff] %v7536_v15  ;;  %v7538_v16 = vld [vmem:[#allocation8 + $0x178] sm:$0xff]  ;;  %v7542_v17 = vld [vmem:[#allocation8 + $0x160] sm:$0xff] }
 0x17e   :  { %716 = vmatprep.subr.mxu0 %v456_v18  ;;  %787 = vmatprep.subr.mxu1 %v458_v20  ;;  %12858 = vst [vmem:[#allocation23_spill] sm:$0xff] %v7538_v16  ;;  %12859 = vst [vmem:[#allocation24_spill] sm:$0xff] %v7542_v17  ;;  %v7544_v18 = vld [vmem:[#allocation8 + $0x170] sm:$0xff]  ;;  %v7548_v20 = vld [vmem:[#allocation8 + $0x148] sm:$0xff] }
 0x17f   :  { %717 = vmatpush1.msra.mxu0 %v455_v21  ;;  %788 = vmatpush1.msra.mxu1 %v457_v24  ;;  %12860 = vst [vmem:[#allocation25_spill] sm:$0xff] %v7544_v18  ;;  %12861 = vst [vmem:[#allocation26_spill] sm:$0xff] %v7548_v20  ;;  %v7550_v21 = vld [vmem:[#allocation8 + $0x158] sm:$0xff]  ;;  %v7554_v24 = vld [vmem:[#allocation8 + $0x140] sm:$0xff] }
 0x180   :  { %718 = vmatprep.subr.mxu0 %v452_v26  ;;  %789 = vmatprep.subr.mxu1 %v454_v27  ;;  %12862 = vst [vmem:[#allocation27_spill] sm:$0xff] %v7550_v21  ;;  %12863 = vst [vmem:[#allocation28_spill] sm:$0xff] %v7554_v24  ;;  %v7556_v26 = vld [vmem:[#allocation8 + $0x150] sm:$0xff]  ;;  %v7560_v27 = vld [vmem:[#allocation8 + $0x128] sm:$0xff] }
 0x181   :  { %719 = vmatpush1.msra.mxu0 %v7410_v28  ;;  %790 = vmatpush1.msra.mxu1 %v7412_v29  ;;  %12864 = vst [vmem:[#allocation29_spill] sm:$0xff] %v7556_v26  ;;  %12865 = vst [vmem:[#allocation30_spill] sm:$0xff] %v7560_v27 }
 0x182   :  { %720 = vmatprep.subr.mxu0 %v7414_v30  ;;  %791 = vmatprep.subr.mxu1 %v7416_v31 }
 0x183   :  { %721 = vmatpush1.msra.mxu0 %v7418_v32  ;;  %792 = vmatpush1.msra.mxu1 %v7420_v33 }
 0x184   :  { %722 = vmatprep.subr.mxu0 %v7424_v34  ;;  %793 = vmatprep.subr.mxu1 %v7426_v35 }
 0x185   :  { %723 = vmatpush1.msra.mxu0 %v7430_v36  ;;  %794 = vmatpush1.msra.mxu1 %v7432_v37 }
 0x186   :  { %724 = vmatprep.subr.mxu0 %v7436_v38  ;;  %795 = vmatprep.subr.mxu1 %v7438_v39 }
 0x187   :  { %725 = vmatpush1.msra.mxu0 %v7442_v41  ;;  %796 = vmatpush1.msra.mxu1 %v7444_v42 }
 0x188   :  { %726 = vmatprep.subr.mxu0 %v7448_v44  ;;  %797 = vmatprep.subr.mxu1 %v7450_v45 }
 0x189   :  { %727 = vmatpush1.msra.mxu0 %v7454_v46  ;;  %798 = vmatpush1.msra.mxu1 %v7456_v47 }
 0x18a   :  { %728 = vmatprep.subr.mxu0 %v7460_v48  ;;  %799 = vmatprep.subr.mxu1 %v7462_v49 }
 0x18b   :  { %729 = vmatpush1.msra.mxu0 %v7466_v50  ;;  %800 = vmatpush1.msra.mxu1 %v7468_v51 }
 0x18c   :  { %730 = vmatprep.subr.mxu0 %v7472_v52  ;;  %801 = vmatprep.subr.mxu1 %v7474_v53 }
 0x18d   :  { %731 = vmatpush1.msra.mxu0 %v7478_v54  ;;  %764 = vmatprep.mubr.f32.mxu0 %v11978_v0 }
 0x18e   :  { %802 = vmatpush1.msra.mxu1 %v7482_v55  ;;  %835 = vmatprep.mubr.f32.mxu1 %v11978_v0  ;;  %v7574_v0 = vld [vmem:[#allocation8 + $0x118] sm:$0xff] }
 0x18f   :  { %765 = vmatmul.mubr.f32.vlgmr.msra.gmra.mxu0 %v7407_v43  ;;  %836 = vmatmul.mubr.f32.vlgmr.msra.gmra.mxu1 %v7407_v43  ;;  %12870 = vst [vmem:[#allocation35_spill] sm:$0xff] %v7574_v0 }
 0x190   :  { %906 = vmatprep.subr.mxu0 %v7488_v56  ;;  %977 = vmatprep.subr.mxu1 %v7490_v57 }
 0x191   :  { %907 = vmatpush1.msra.mxu0 %v7494_v58  ;;  %978 = vmatpush1.msra.mxu1 %v7496_v59 }
 0x192   :  { %908 = vmatprep.subr.mxu0 %v7500_v60  ;;  %979 = vmatprep.subr.mxu1 %v7502_v61 }
 0x193   :  { %909 = vmatpush1.msra.mxu0 %v7506_v62  ;;  %980 = vmatpush1.msra.mxu1 %v7508_v63 }
 0x194   :  { %910 = vmatprep.subr.mxu0 %v7512_v1  ;;  %981 = vmatprep.subr.mxu1 %v7514_v2 }
 0x195   :  { %911 = vmatpush1.msra.mxu0 %v7518_v3  ;;  %982 = vmatpush1.msra.mxu1 %v7520_v5 }
 0x196   :  { %912 = vmatprep.subr.mxu0 %v7524_v6  ;;  %983 = vmatprep.subr.mxu1 %v7526_v7 }
 0x197   :  { %913 = vmatpush1.msra.mxu0 %v7530_v10  ;;  %984 = vmatpush1.msra.mxu1 %v7532_v14 }
 0x198   :  { %914 = vmatprep.subr.mxu0 %v7536_v15  ;;  %985 = vmatprep.subr.mxu1 %v7538_v16  ;;  %v13099_v15 = vsub.s32 0, %v7375_v8 }
 0x199   :  { %915 = vmatpush1.msra.mxu0 %v7542_v17  ;;  %986 = vmatpush1.msra.mxu1 %v7544_v18  ;;  %v7578_v18 = vld [vmem:[#allocation8 + $0x100] sm:$0xff] }
 0x19a   :  { %916 = vmatprep.subr.mxu0 %v7548_v20  ;;  %987 = vmatprep.subr.mxu1 %v7550_v21  ;;  %12871 = vst [vmem:[#allocation36_spill] sm:$0xff] %v7578_v18  ;;  %v7580_v20 = vld [vmem:[#allocation8 + $0x110] sm:$0xff]  ;;  %v7584_v21 = vld [vmem:[#allocation8 + $0xe8] sm:$0xff] }
 0x19b   :  { %917 = vmatpush1.msra.mxu0 %v7554_v24  ;;  %988 = vmatpush1.msra.mxu1 %v7556_v26  ;;  %12872 = vst [vmem:[#allocation37_spill] sm:$0xff] %v7580_v20  ;;  %12873 = vst [vmem:[#allocation38_spill] sm:$0xff] %v7584_v21  ;;  %v7586_v24 = vld [vmem:[#allocation8 + $0xf8] sm:$0xff]  ;;  %v7590_v26 = vld [vmem:[#allocation8 + $0xe0] sm:$0xff] }
 0x19c   :  { %918 = vmatprep.subr.mxu0 %v7560_v27  ;;  %989 = vmatprep.subr.mxu1 %v7562_v19  ;;  %12874 = vst [vmem:[#allocation39_spill] sm:$0xff] %v7586_v24  ;;  %12875 = vst [vmem:[#allocation40_spill] sm:$0xff] %v7590_v26  ;;  %v7592_v27 = vld [vmem:[#allocation8 + $0xf0] sm:$0xff]  ;;  %v7596_v19 = vld [vmem:[#allocation8 + $0xc8] sm:$0xff] }
 0x19d   :  { %919 = vmatpush1.msra.mxu0 %v7566_v22  ;;  %990 = vmatpush1.msra.mxu1 %v7568_v11  ;;  %12876 = vst [vmem:[#allocation41_spill] sm:$0xff] %v7592_v27  ;;  %12877 = vst [vmem:[#allocation42_spill] sm:$0xff] %v7596_v19  ;;  %v7598_v22 = vld [vmem:[#allocation8 + $0xd8] sm:$0xff]  ;;  %v7602_v11 = vld [vmem:[#allocation8 + $0xc0] sm:$0xff] }
 0x19e   :  { %920 = vmatprep.subr.mxu0 %v7572_v9  ;;  %991 = vmatprep.subr.mxu1 %v7574_v0  ;;  %12878 = vst [vmem:[#allocation43_spill] sm:$0xff] %v7598_v22  ;;  %12879 = vst [vmem:[#allocation44_spill] sm:$0xff] %v7602_v11  ;;  %v7604_v9 = vld [vmem:[#allocation8 + $0xd0] sm:$0xff]  ;;  %v7608_v0 = vld [vmem:[#allocation8 + $0xa8] sm:$0xff] }
 0x19f   :  { %921 = vmatpush1.msra.mxu0 %v7578_v18  ;;  %992 = vmatpush1.msra.mxu1 %v7580_v20  ;;  %12880 = vst [vmem:[#allocation45_spill] sm:$0xff] %v7604_v9  ;;  %12881 = vst [vmem:[#allocation46_spill] sm:$0xff] %v7608_v0  ;;  %v7610_v18 = vld [vmem:[#allocation8 + $0xb8] sm:$0xff]  ;;  %v7614_v20 = vld [vmem:[#allocation8 + $0xa0] sm:$0xff] }
 0x1a0   :  { %922 = vmatprep.subr.mxu0 %v7584_v21  ;;  %993 = vmatprep.subr.mxu1 %v7586_v24  ;;  %12882 = vst [vmem:[#allocation47_spill] sm:$0xff] %v7610_v18  ;;  %12883 = vst [vmem:[#allocation48_spill] sm:$0xff] %v7614_v20  ;;  %v7616_v21 = vld [vmem:[#allocation8 + $0xb0] sm:$0xff]  ;;  %v7620_v24 = vld [vmem:[#allocation8 + $0x88] sm:$0xff] }
 0x1a1   :  { %923 = vmatpush1.msra.mxu0 %v7590_v26  ;;  %994 = vmatpush1.msra.mxu1 %v7592_v27  ;;  %12884 = vst [vmem:[#allocation49_spill] sm:$0xff] %v7616_v21  ;;  %12885 = vst [vmem:[#allocation50_spill] sm:$0xff] %v7620_v24  ;;  %v7622_v26 = vld [vmem:[#allocation8 + $0x98] sm:$0xff]  ;;  %v7626_v27 = vld [vmem:[#allocation8 + $0x80] sm:$0xff] }
 0x1a2   :  { %924 = vmatprep.subr.mxu0 %v7596_v19  ;;  %995 = vmatprep.subr.mxu1 %v7598_v22  ;;  %12886 = vst [vmem:[#allocation51_spill] sm:$0xff] %v7622_v26  ;;  %12887 = vst [vmem:[#allocation52_spill] sm:$0xff] %v7626_v27  ;;  %v7628_v19 = vld [vmem:[#allocation8 + $0x90] sm:$0xff]  ;;  %v7632_v22 = vld [vmem:[#allocation8 + $0x68] sm:$0xff] }
 0x1a3   :  { %925 = vmatpush1.msra.mxu0 %v7602_v11  ;;  %996 = vmatpush1.msra.mxu1 %v7604_v9  ;;  %12888 = vst [vmem:[#allocation53_spill] sm:$0xff] %v7628_v19  ;;  %12889 = vst [vmem:[#allocation54_spill] sm:$0xff] %v7632_v22  ;;  %v7634_v11 = vld [vmem:[#allocation8 + $0x78] sm:$0xff]  ;;  %v7638_v9 = vld [vmem:[#allocation8 + $0x60] sm:$0xff] }
 0x1a4   :  { %926 = vmatprep.subr.mxu0 %v7608_v0  ;;  %997 = vmatprep.subr.mxu1 %v7610_v18  ;;  %12890 = vst [vmem:[#allocation55_spill] sm:$0xff] %v7634_v11  ;;  %12891 = vst [vmem:[#allocation56_spill] sm:$0xff] %v7638_v9  ;;  %v7640_v0 = vld [vmem:[#allocation8 + $0x70] sm:$0xff]  ;;  %v7644_v18 = vld [vmem:[#allocation8 + $0x48] sm:$0xff] }
 0x1a5   :  { %927 = vmatpush1.msra.mxu0 %v7614_v20  ;;  %998 = vmatpush1.msra.mxu1 %v7616_v21  ;;  %12892 = vst [vmem:[#allocation57_spill] sm:$0xff] %v7640_v0  ;;  %12893 = vst [vmem:[#allocation58_spill] sm:$0xff] %v7644_v18  ;;  %v7646_v20 = vld [vmem:[#allocation8 + $0x58] sm:$0xff]  ;;  %v7650_v21 = vld [vmem:[#allocation8 + $0x40] sm:$0xff] }
 0x1a6   :  { %928 = vmatprep.subr.mxu0 %v7620_v24  ;;  %999 = vmatprep.subr.mxu1 %v7622_v26  ;;  %12894 = vst [vmem:[#allocation59_spill] sm:$0xff] %v7646_v20  ;;  %12895 = vst [vmem:[#allocation60_spill] sm:$0xff] %v7650_v21  ;;  %v7652_v24 = vld [vmem:[#allocation8 + $0x50] sm:$0xff]  ;;  %v7656_v26 = vld [vmem:[#allocation8 + $0x28] sm:$0xff] }
 0x1a7   :  { %929 = vmatpush1.msra.mxu0 %v7626_v27  ;;  %1000 = vmatpush1.msra.mxu1 %v7628_v19  ;;  %12896 = vst [vmem:[#allocation61_spill] sm:$0xff] %v7652_v24  ;;  %12897 = vst [vmem:[#allocation62_spill] sm:$0xff] %v7656_v26  ;;  %v7658_v27 = vld [vmem:[#allocation8 + $0x38] sm:$0xff]  ;;  %v7662_v19 = vld [vmem:[#allocation8 + $0x20] sm:$0xff] }
 0x1a8   :  { %930 = vmatprep.subr.mxu0 %v7632_v22  ;;  %1001 = vmatprep.subr.mxu1 %v7634_v11  ;;  %12898 = vst [vmem:[#allocation63_spill] sm:$0xff] %v7658_v27  ;;  %12899 = vst [vmem:[#allocation64_spill] sm:$0xff] %v7662_v19  ;;  %v7664_v22 = vld [vmem:[#allocation8 + $0x30] sm:$0xff]  ;;  %v7668_v11 = vld [vmem:[#allocation8 + $0x8] sm:$0xff] }
 0x1a9   :  { %931 = vmatpush1.msra.mxu0 %v7638_v9  ;;  %1002 = vmatpush1.msra.mxu1 %v7640_v0  ;;  %12900 = vst [vmem:[#allocation65_spill] sm:$0xff] %v7664_v22  ;;  %12901 = vst [vmem:[#allocation66_spill] sm:$0xff] %v7668_v11  ;;  %v7670_v9 = vld [vmem:[#allocation8 + $0x18] sm:$0xff]  ;;  %v7674_v0 = vld [vmem:[#allocation8] sm:$0xff] }
 0x1aa   :  { %932 = vmatprep.subr.mxu0 %v7644_v18  ;;  %1003 = vmatprep.subr.mxu1 %v7646_v20  ;;  %12902 = vst [vmem:[#allocation67_spill] sm:$0xff] %v7670_v9  ;;  %12903 = vst [vmem:[#allocation68_spill] sm:$0xff] %v7674_v0  ;;  %v7678_v20 = vld [vmem:[#allocation8 + $0x10] sm:$0xff] }
 0x1ab   :  { %933 = vmatpush1.msra.mxu0 %v7650_v21  ;;  %1004 = vmatpush1.msra.mxu1 %v7652_v24  ;;  %12904 = vst [vmem:[#allocation69_spill] sm:$0xff] %v7678_v20  ;;  %v12905_v24 = vmov 0.0  }
 0x1ac   :  { %934 = vmatprep.subr.mxu0 %v7656_v26  ;;  %1005 = vmatprep.subr.mxu1 %v7658_v27 }
 0x1ad   :  { %935 = vmatpush1.msra.mxu0 %v7662_v19  ;;  %1006 = vmatpush1.msra.mxu1 %v7664_v22  ;;  %v7688_v19 = vld [vmem:[#allocation2 + $0x1e8] sm:$0xff] }
 0x1ae   :  { %936 = vmatprep.subr.mxu0 %v7668_v11  ;;  %1007 = vmatprep.subr.mxu1 %v7670_v9  ;;  %12906 = vst [vmem:[#allocation70_spill] sm:$0xff] %v7688_v19  ;;  %v7692_v11 = vld [vmem:[#allocation2 + $0x1e0] sm:$0xff]  ;;  %v7708_v22 = vld [vmem:[#allocation2 + $0x1a8] sm:$0xff] }
 0x1af   :  { %937 = vmatpush1.msra.mxu0 %v7674_v0  ;;  %970 = vmatprep.mubr.f32.mxu0 %v12905_v24  ;;  %12907 = vst [vmem:[#allocation71_spill] sm:$0xff] %v7692_v11  ;;  %v7696_v0 = vld [vmem:[#allocation2 + $0x1c8] sm:$0xff]  ;;  %v7702_v9 = vld [vmem:[#allocation2 + $0x1c0] sm:$0xff]  ;;  %12912 = vst [vmem:[#allocation76_spill] sm:$0xff] %v7708_v22 }
 0x1b0   :  { %1008 = vmatpush1.msra.mxu1 %v7678_v20  ;;  %1041 = vmatprep.mubr.f32.mxu1 %v12905_v24  ;;  %12908 = vst [vmem:[#allocation72_spill] sm:$0xff] %v7696_v0  ;;  %v7699_v20 = vld [vmem:[#allocation2 + $0x1f8] sm:$0xff]  ;;  %12910 = vst [vmem:[#allocation74_spill] sm:$0xff] %v7702_v9 }
 0x1b1   :  { %971 = vmatmul.mubr.f32.vlgmr.msra.gmra.mxu0 %v12905_v24  ;;  %1042 = vmatmul.mubr.f32.vlgmr.msra.gmra.mxu1 %v12905_v24  ;;  %12909 = vst [vmem:[#allocation73_spill] sm:$0xff] %v7699_v20 }
 0x1b2   :  { %1082 = vmatprep.subr.mxu0 %v7688_v19  ;;  %1146 = vmatprep.mubr.f32.mxu0 %v7407_v43  ;;  %v7705_v19 = vld [vmem:[#allocation2 + $0x1f0] sm:$0xff] }
 0x1b3   :  { %1083 = vmatpush1.msra.mxu0 %v7692_v11  ;;  %1217 = vmatprep.mubr.f32.mxu1 %v7407_v43  ;;  %12911 = vst [vmem:[#allocation75_spill] sm:$0xff] %v7705_v19  ;;  %v7711_v43 = vld [vmem:[#allocation2 + $0x1d8] sm:$0xff] }
 0x1b4   :  { %1084 = vmatprep.subr.mxu0 %v7696_v0  ;;  %1153 = vmatprep.subr.mxu1 %v7699_v20  ;;  %12913 = vst [vmem:[#allocation77_spill] sm:$0xff] %v7711_v43  ;;  %v7714_v0 = vld [vmem:[#allocation2 + $0x1a0] sm:$0xff]  ;;  %v7717_v20 = vld [vmem:[#allocation2 + $0x1d0] sm:$0xff]  ;;  %v8071_v11 = vld [vmem:[#allocation2 + $0x218] sm:$0xff] }
 0x1b5   :  { %1085 = vmatpush1.msra.mxu0 %v7702_v9  ;;  %1154 = vmatpush1.msra.mxu1 %v7705_v19  ;;  %12914 = vst [vmem:[#allocation78_spill] sm:$0xff] %v7714_v0  ;;  %12915 = vst [vmem:[#allocation79_spill] sm:$0xff] %v7717_v20  ;;  %v7720_v9 = vld [vmem:[#allocation2 + $0x188] sm:$0xff]  ;;  %v7723_v19 = vld [vmem:[#allocation2 + $0x1b8] sm:$0xff] }
 0x1b6   :  { %1086 = vmatprep.subr.mxu0 %v7708_v22  ;;  %1155 = vmatprep.subr.mxu1 %v7711_v43  ;;  %12916 = vst [vmem:[#allocation80_spill] sm:$0xff] %v7720_v9  ;;  %12917 = vst [vmem:[#allocation81_spill] sm:$0xff] %v7723_v19  ;;  %v7726_v22 = vld [vmem:[#allocation2 + $0x180] sm:$0xff]  ;;  %v7729_v43 = vld [vmem:[#allocation2 + $0x1b0] sm:$0xff] }
 0x1b7   :  { %1087 = vmatpush1.msra.mxu0 %v7714_v0  ;;  %1156 = vmatpush1.msra.mxu1 %v7717_v20  ;;  %12918 = vst [vmem:[#allocation82_spill] sm:$0xff] %v7726_v22  ;;  %12919 = vst [vmem:[#allocation83_spill] sm:$0xff] %v7729_v43  ;;  %v7732_v0 = vld [vmem:[#allocation2 + $0x168] sm:$0xff]  ;;  %v7735_v20 = vld [vmem:[#allocation2 + $0x198] sm:$0xff] }
 0x1b8   :  { %1088 = vmatprep.subr.mxu0 %v7720_v9  ;;  %1157 = vmatprep.subr.mxu1 %v7723_v19  ;;  %12920 = vst [vmem:[#allocation84_spill] sm:$0xff] %v7732_v0  ;;  %12921 = vst [vmem:[#allocation85_spill] sm:$0xff] %v7735_v20  ;;  %v7738_v9 = vld [vmem:[#allocation2 + $0x160] sm:$0xff]  ;;  %v7741_v19 = vld [vmem:[#allocation2 + $0x190] sm:$0xff] }
 0x1b9   :  { %1089 = vmatpush1.msra.mxu0 %v7726_v22  ;;  %1158 = vmatpush1.msra.mxu1 %v7729_v43  ;;  %12922 = vst [vmem:[#allocation86_spill] sm:$0xff] %v7738_v9  ;;  %12923 = vst [vmem:[#allocation87_spill] sm:$0xff] %v7741_v19  ;;  %v7744_v22 = vld [vmem:[#allocation2 + $0x148] sm:$0xff]  ;;  %v7747_v43 = vld [vmem:[#allocation2 + $0x178] sm:$0xff] }
 0x1ba   :  { %1090 = vmatprep.subr.mxu0 %v7732_v0  ;;  %1159 = vmatprep.subr.mxu1 %v7735_v20  ;;  %12924 = vst [vmem:[#allocation88_spill] sm:$0xff] %v7744_v22  ;;  %12925 = vst [vmem:[#allocation89_spill] sm:$0xff] %v7747_v43  ;;  %v7750_v0 = vld [vmem:[#allocation2 + $0x140] sm:$0xff]  ;;  %v7753_v20 = vld [vmem:[#allocation2 + $0x170] sm:$0xff] }
 0x1bb   :  { %1091 = vmatpush1.msra.mxu0 %v7738_v9  ;;  %1160 = vmatpush1.msra.mxu1 %v7741_v19  ;;  %12926 = vst [vmem:[#allocation90_spill] sm:$0xff] %v7750_v0  ;;  %12927 = vst [vmem:[#allocation91_spill] sm:$0xff] %v7753_v20  ;;  %v7756_v9 = vld [vmem:[#allocation2 + $0x128] sm:$0xff]  ;;  %v7759_v19 = vld [vmem:[#allocation2 + $0x158] sm:$0xff] }
 0x1bc   :  { %1092 = vmatprep.subr.mxu0 %v7744_v22  ;;  %1161 = vmatprep.subr.mxu1 %v7747_v43  ;;  %12928 = vst [vmem:[#allocation92_spill] sm:$0xff] %v7756_v9  ;;  %12929 = vst [vmem:[#allocation93_spill] sm:$0xff] %v7759_v19  ;;  %v7762_v22 = vld [vmem:[#allocation2 + $0x120] sm:$0xff]  ;;  %v7765_v43 = vld [vmem:[#allocation2 + $0x150] sm:$0xff] }
 0x1bd   :  { %1093 = vmatpush1.msra.mxu0 %v7750_v0  ;;  %1162 = vmatpush1.msra.mxu1 %v7753_v20  ;;  %12930 = vst [vmem:[#allocation94_spill] sm:$0xff] %v7762_v22  ;;  %12931 = vst [vmem:[#allocation95_spill] sm:$0xff] %v7765_v43  ;;  %v7768_v0 = vld [vmem:[#allocation2 + $0x108] sm:$0xff]  ;;  %v7771_v20 = vld [vmem:[#allocation2 + $0x138] sm:$0xff] }
 0x1be   :  { %1094 = vmatprep.subr.mxu0 %v7756_v9  ;;  %1163 = vmatprep.subr.mxu1 %v7759_v19  ;;  %12932 = vst [vmem:[#allocation96_spill] sm:$0xff] %v7768_v0  ;;  %12933 = vst [vmem:[#allocation97_spill] sm:$0xff] %v7771_v20  ;;  %v7774_v9 = vld [vmem:[#allocation2 + $0x100] sm:$0xff]  ;;  %v7777_v19 = vld [vmem:[#allocation2 + $0x130] sm:$0xff] }
 0x1bf   :  { %1095 = vmatpush1.msra.mxu0 %v7762_v22  ;;  %1164 = vmatpush1.msra.mxu1 %v7765_v43  ;;  %12934 = vst [vmem:[#allocation98_spill] sm:$0xff] %v7774_v9  ;;  %12935 = vst [vmem:[#allocation99_spill] sm:$0xff] %v7777_v19  ;;  %v7780_v22 = vld [vmem:[#allocation2 + $0xe8] sm:$0xff]  ;;  %v7783_v43 = vld [vmem:[#allocation2 + $0x118] sm:$0xff] }
 0x1c0   :  { %1096 = vmatprep.subr.mxu0 %v7768_v0  ;;  %1165 = vmatprep.subr.mxu1 %v7771_v20  ;;  %12936 = vst [vmem:[#allocation100_spill] sm:$0xff] %v7780_v22  ;;  %12937 = vst [vmem:[#allocation101_spill] sm:$0xff] %v7783_v43  ;;  %v7786_v0 = vld [vmem:[#allocation2 + $0xe0] sm:$0xff]  ;;  %v7789_v20 = vld [vmem:[#allocation2 + $0x110] sm:$0xff] }
 0x1c1   :  { %1097 = vmatpush1.msra.mxu0 %v7774_v9  ;;  %1166 = vmatpush1.msra.mxu1 %v7777_v19  ;;  %12938 = vst [vmem:[#allocation102_spill] sm:$0xff] %v7786_v0  ;;  %12939 = vst [vmem:[#allocation103_spill] sm:$0xff] %v7789_v20  ;;  %v7792_v9 = vld [vmem:[#allocation2 + $0xc8] sm:$0xff]  ;;  %v7795_v19 = vld [vmem:[#allocation2 + $0xf8] sm:$0xff] }
 0x1c2   :  { %1098 = vmatprep.subr.mxu0 %v7780_v22  ;;  %1167 = vmatprep.subr.mxu1 %v7783_v43  ;;  %12940 = vst [vmem:[#allocation104_spill] sm:$0xff] %v7792_v9  ;;  %12941 = vst [vmem:[#allocation105_spill] sm:$0xff] %v7795_v19  ;;  %v7798_v22 = vld [vmem:[#allocation2 + $0xc0] sm:$0xff]  ;;  %v7801_v43 = vld [vmem:[#allocation2 + $0xf0] sm:$0xff] }
 0x1c3   :  { %1099 = vmatpush1.msra.mxu0 %v7786_v0  ;;  %1168 = vmatpush1.msra.mxu1 %v7789_v20  ;;  %12942 = vst [vmem:[#allocation106_spill] sm:$0xff] %v7798_v22  ;;  %12943 = vst [vmem:[#allocation107_spill] sm:$0xff] %v7801_v43  ;;  %v7804_v0 = vld [vmem:[#allocation2 + $0xa8] sm:$0xff]  ;;  %v7807_v20 = vld [vmem:[#allocation2 + $0xd8] sm:$0xff] }
 0x1c4   :  { %1100 = vmatprep.subr.mxu0 %v7792_v9  ;;  %1169 = vmatprep.subr.mxu1 %v7795_v19  ;;  %12944 = vst [vmem:[#allocation108_spill] sm:$0xff] %v7804_v0  ;;  %12945 = vst [vmem:[#allocation109_spill] sm:$0xff] %v7807_v20  ;;  %v7810_v9 = vld [vmem:[#allocation2 + $0xa0] sm:$0xff]  ;;  %v7813_v19 = vld [vmem:[#allocation2 + $0xd0] sm:$0xff] }
 0x1c5   :  { %1101 = vmatpush1.msra.mxu0 %v7798_v22  ;;  %1170 = vmatpush1.msra.mxu1 %v7801_v43  ;;  %12946 = vst [vmem:[#allocation110_spill] sm:$0xff] %v7810_v9  ;;  %12947 = vst [vmem:[#allocation111_spill] sm:$0xff] %v7813_v19  ;;  %v7816_v22 = vld [vmem:[#allocation2 + $0x88] sm:$0xff]  ;;  %v7819_v43 = vld [vmem:[#allocation2 + $0xb8] sm:$0xff] }
 0x1c6   :  { %1102 = vmatprep.subr.mxu0 %v7804_v0  ;;  %1171 = vmatprep.subr.mxu1 %v7807_v20  ;;  %12948 = vst [vmem:[#allocation112_spill] sm:$0xff] %v7816_v22  ;;  %12949 = vst [vmem:[#allocation113_spill] sm:$0xff] %v7819_v43  ;;  %v7822_v0 = vld [vmem:[#allocation2 + $0x80] sm:$0xff]  ;;  %v7825_v20 = vld [vmem:[#allocation2 + $0xb0] sm:$0xff] }
 0x1c7   :  { %1103 = vmatpush1.msra.mxu0 %v7810_v9  ;;  %1172 = vmatpush1.msra.mxu1 %v7813_v19  ;;  %12950 = vst [vmem:[#allocation114_spill] sm:$0xff] %v7822_v0  ;;  %12951 = vst [vmem:[#allocation115_spill] sm:$0xff] %v7825_v20  ;;  %v7828_v9 = vld [vmem:[#allocation2 + $0x68] sm:$0xff]  ;;  %v7831_v19 = vld [vmem:[#allocation2 + $0x98] sm:$0xff] }
 0x1c8   :  { %1104 = vmatprep.subr.mxu0 %v7816_v22  ;;  %1173 = vmatprep.subr.mxu1 %v7819_v43  ;;  %12952 = vst [vmem:[#allocation116_spill] sm:$0xff] %v7828_v9  ;;  %12953 = vst [vmem:[#allocation117_spill] sm:$0xff] %v7831_v19  ;;  %v7834_v22 = vld [vmem:[#allocation2 + $0x60] sm:$0xff]  ;;  %v7837_v43 = vld [vmem:[#allocation2 + $0x90] sm:$0xff] }
 0x1c9   :  { %1105 = vmatpush1.msra.mxu0 %v7822_v0  ;;  %1174 = vmatpush1.msra.mxu1 %v7825_v20  ;;  %12954 = vst [vmem:[#allocation118_spill] sm:$0xff] %v7834_v22  ;;  %12955 = vst [vmem:[#allocation119_spill] sm:$0xff] %v7837_v43  ;;  %v7840_v0 = vld [vmem:[#allocation2 + $0x48] sm:$0xff]  ;;  %v7843_v20 = vld [vmem:[#allocation2 + $0x78] sm:$0xff] }
 0x1ca   :  { %1106 = vmatprep.subr.mxu0 %v7828_v9  ;;  %1175 = vmatprep.subr.mxu1 %v7831_v19  ;;  %12956 = vst [vmem:[#allocation120_spill] sm:$0xff] %v7840_v0  ;;  %12957 = vst [vmem:[#allocation121_spill] sm:$0xff] %v7843_v20  ;;  %v7846_v9 = vld [vmem:[#allocation2 + $0x40] sm:$0xff]  ;;  %v7849_v19 = vld [vmem:[#allocation2 + $0x70] sm:$0xff] }
 0x1cb   :  { %1107 = vmatpush1.msra.mxu0 %v7834_v22  ;;  %1176 = vmatpush1.msra.mxu1 %v7837_v43  ;;  %12958 = vst [vmem:[#allocation122_spill] sm:$0xff] %v7846_v9  ;;  %12959 = vst [vmem:[#allocation123_spill] sm:$0xff] %v7849_v19  ;;  %v7852_v22 = vld [vmem:[#allocation2 + $0x28] sm:$0xff]  ;;  %v7855_v43 = vld [vmem:[#allocation2 + $0x58] sm:$0xff] }
 0x1cc   :  { %1108 = vmatprep.subr.mxu0 %v7840_v0  ;;  %1177 = vmatprep.subr.mxu1 %v7843_v20  ;;  %12960 = vst [vmem:[#allocation124_spill] sm:$0xff] %v7852_v22  ;;  %12961 = vst [vmem:[#allocation125_spill] sm:$0xff] %v7855_v43  ;;  %v7858_v0 = vld [vmem:[#allocation2 + $0x20] sm:$0xff]  ;;  %v7861_v20 = vld [vmem:[#allocation2 + $0x50] sm:$0xff] }
 0x1cd   :  { %1109 = vmatpush1.msra.mxu0 %v7846_v9  ;;  %1178 = vmatpush1.msra.mxu1 %v7849_v19  ;;  %12962 = vst [vmem:[#allocation126_spill] sm:$0xff] %v7858_v0  ;;  %12963 = vst [vmem:[#allocation127_spill] sm:$0xff] %v7861_v20  ;;  %v7864_v9 = vld [vmem:[#allocation2 + $0x8] sm:$0xff]  ;;  %v7867_v19 = vld [vmem:[#allocation2 + $0x38] sm:$0xff] }
 0x1ce   :  { %1110 = vmatprep.subr.mxu0 %v7852_v22  ;;  %1179 = vmatprep.subr.mxu1 %v7855_v43  ;;  %12964 = vst [vmem:[#allocation128_spill] sm:$0xff] %v7864_v9  ;;  %12965 = vst [vmem:[#allocation129_spill] sm:$0xff] %v7867_v19  ;;  %v7870_v22 = vld [vmem:[#allocation2] sm:$0xff]  ;;  %v7873_v43 = vld [vmem:[#allocation2 + $0x30] sm:$0xff] }
 0x1cf   :  { %1111 = vmatpush1.msra.mxu0 %v7858_v0  ;;  %1180 = vmatpush1.msra.mxu1 %v7861_v20  ;;  %12966 = vst [vmem:[#allocation130_spill] sm:$0xff] %v7870_v22  ;;  %12967 = vst [vmem:[#allocation131_spill] sm:$0xff] %v7873_v43  ;;  %v7876_v0 = vld [vmem:[#allocation2 + $0x3e8] sm:$0xff]  ;;  %v7879_v20 = vld [vmem:[#allocation2 + $0x18] sm:$0xff] }
 0x1d0   :  { %1112 = vmatprep.subr.mxu0 %v7864_v9  ;;  %1181 = vmatprep.subr.mxu1 %v7867_v19  ;;  %12968 = vst [vmem:[#allocation132_spill] sm:$0xff] %v7876_v0  ;;  %12969 = vst [vmem:[#allocation133_spill] sm:$0xff] %v7879_v20  ;;  %v7882_v9 = vld [vmem:[#allocation2 + $0x3e0] sm:$0xff]  ;;  %v7885_v19 = vld [vmem:[#allocation2 + $0x10] sm:$0xff] }
 0x1d1   :  { %1113 = vmatpush1.msra.mxu0 %v7870_v22  ;;  %1182 = vmatpush1.msra.mxu1 %v7873_v43  ;;  %12970 = vst [vmem:[#allocation134_spill] sm:$0xff] %v7882_v9  ;;  %12971 = vst [vmem:[#allocation135_spill] sm:$0xff] %v7885_v19  ;;  %v7888_v22 = vld [vmem:[#allocation2 + $0x3c8] sm:$0xff]  ;;  %v7891_v43 = vld [vmem:[#allocation2 + $0x3f8] sm:$0xff] }
 0x1d2   :  { %1114 = vmatprep.subr.mxu0 %v7876_v0  ;;  %1183 = vmatprep.subr.mxu1 %v7879_v20  ;;  %12972 = vst [vmem:[#allocation136_spill] sm:$0xff] %v7888_v22  ;;  %12973 = vst [vmem:[#allocation137_spill] sm:$0xff] %v7891_v43  ;;  %v7894_v0 = vld [vmem:[#allocation2 + $0x3c0] sm:$0xff]  ;;  %v7897_v20 = vld [vmem:[#allocation2 + $0x3f0] sm:$0xff] }
 0x1d3   :  { %1115 = vmatpush2.msra.mxu0 %v7882_v9  ;;  %1184 = vmatpush1.msra.mxu1 %v7885_v19  ;;  %12974 = vst [vmem:[#allocation138_spill] sm:$0xff] %v7894_v0  ;;  %12975 = vst [vmem:[#allocation139_spill] sm:$0xff] %v7897_v20  ;;  %v7900_v9 = vld [vmem:[#allocation2 + $0x3a8] sm:$0xff]  ;;  %v7903_v19 = vld [vmem:[#allocation2 + $0x3d8] sm:$0xff] }
 0x1d4   :  { %1116 = vmatprep.subr.mxu0 %v7888_v22  ;;  %1185 = vmatprep.subr.mxu1 %v7891_v43  ;;  %12976 = vst [vmem:[#allocation140_spill] sm:$0xff] %v7900_v9  ;;  %12977 = vst [vmem:[#allocation141_spill] sm:$0xff] %v7903_v19  ;;  %v7906_v22 = vld [vmem:[#allocation2 + $0x3a0] sm:$0xff]  ;;  %v7909_v43 = vld [vmem:[#allocation2 + $0x3d0] sm:$0xff] }
 0x1d5   :  { %1117 = vmatpush2.msra.mxu0 %v7894_v0  ;;  %1186 = vmatpush2.msra.mxu1 %v7897_v20  ;;  %12978 = vst [vmem:[#allocation142_spill] sm:$0xff] %v7906_v22  ;;  %12979 = vst [vmem:[#allocation143_spill] sm:$0xff] %v7909_v43  ;;  %v7912_v0 = vld [vmem:[#allocation2 + $0x388] sm:$0xff]  ;;  %v7915_v20 = vld [vmem:[#allocation2 + $0x3b8] sm:$0xff] }
 0x1d6   :  { %1118 = vmatprep.subr.mxu0 %v7900_v9  ;;  %1187 = vmatprep.subr.mxu1 %v7903_v19  ;;  %12980 = vst [vmem:[#allocation144_spill] sm:$0xff] %v7912_v0  ;;  %12981 = vst [vmem:[#allocation145_spill] sm:$0xff] %v7915_v20  ;;  %v7918_v9 = vld [vmem:[#allocation2 + $0x380] sm:$0xff]  ;;  %v7921_v19 = vld [vmem:[#allocation2 + $0x3b0] sm:$0xff] }
 0x1d7   :  { %1119 = vmatpush2.msra.mxu0 %v7906_v22  ;;  %1188 = vmatpush2.msra.mxu1 %v7909_v43  ;;  %12982 = vst [vmem:[#allocation146_spill] sm:$0xff] %v7918_v9  ;;  %12983 = vst [vmem:[#allocation147_spill] sm:$0xff] %v7921_v19  ;;  %v7924_v22 = vld [vmem:[#allocation2 + $0x368] sm:$0xff]  ;;  %v7927_v43 = vld [vmem:[#allocation2 + $0x398] sm:$0xff] }
 0x1d8   :  { %1120 = vmatprep.subr.mxu0 %v7912_v0  ;;  %1189 = vmatprep.subr.mxu1 %v7915_v20  ;;  %12984 = vst [vmem:[#allocation148_spill] sm:$0xff] %v7924_v22  ;;  %12985 = vst [vmem:[#allocation149_spill] sm:$0xff] %v7927_v43  ;;  %v7930_v0 = vld [vmem:[#allocation2 + $0x360] sm:$0xff]  ;;  %v7933_v20 = vld [vmem:[#allocation2 + $0x390] sm:$0xff] }
 0x1d9   :  { %1121 = vmatpush2.msra.mxu0 %v7918_v9  ;;  %1190 = vmatpush2.msra.mxu1 %v7921_v19  ;;  %12986 = vst [vmem:[#allocation150_spill] sm:$0xff] %v7930_v0  ;;  %12987 = vst [vmem:[#allocation151_spill] sm:$0xff] %v7933_v20  ;;  %v7936_v9 = vld [vmem:[#allocation2 + $0x348] sm:$0xff]  ;;  %v7939_v19 = vld [vmem:[#allocation2 + $0x378] sm:$0xff] }
 0x1da   :  { %1122 = vmatprep.subr.mxu0 %v7924_v22  ;;  %1191 = vmatprep.subr.mxu1 %v7927_v43  ;;  %12988 = vst [vmem:[#allocation152_spill] sm:$0xff] %v7936_v9  ;;  %12989 = vst [vmem:[#allocation153_spill] sm:$0xff] %v7939_v19  ;;  %v7942_v22 = vld [vmem:[#allocation2 + $0x340] sm:$0xff]  ;;  %v7945_v43 = vld [vmem:[#allocation2 + $0x370] sm:$0xff] }
 0x1db   :  { %1123 = vmatpush2.msra.mxu0 %v7930_v0  ;;  %1192 = vmatpush2.msra.mxu1 %v7933_v20  ;;  %12990 = vst [vmem:[#allocation154_spill] sm:$0xff] %v7942_v22  ;;  %12991 = vst [vmem:[#allocation155_spill] sm:$0xff] %v7945_v43  ;;  %v7948_v0 = vld [vmem:[#allocation2 + $0x328] sm:$0xff]  ;;  %v7951_v20 = vld [vmem:[#allocation2 + $0x358] sm:$0xff] }
 0x1dc   :  { %1124 = vmatprep.subr.mxu0 %v7936_v9  ;;  %1193 = vmatprep.subr.mxu1 %v7939_v19  ;;  %12992 = vst [vmem:[#allocation156_spill] sm:$0xff] %v7948_v0  ;;  %12993 = vst [vmem:[#allocation157_spill] sm:$0xff] %v7951_v20  ;;  %v7954_v9 = vld [vmem:[#allocation2 + $0x320] sm:$0xff]  ;;  %v7957_v19 = vld [vmem:[#allocation2 + $0x350] sm:$0xff] }
 0x1dd   :  { %1125 = vmatpush2.msra.mxu0 %v7942_v22  ;;  %1194 = vmatpush2.msra.mxu1 %v7945_v43  ;;  %12994 = vst [vmem:[#allocation158_spill] sm:$0xff] %v7954_v9  ;;  %12995 = vst [vmem:[#allocation159_spill] sm:$0xff] %v7957_v19  ;;  %v7960_v22 = vld [vmem:[#allocation2 + $0x308] sm:$0xff]  ;;  %v7963_v43 = vld [vmem:[#allocation2 + $0x338] sm:$0xff] }
 0x1de   :  { %1126 = vmatprep.subr.mxu0 %v7948_v0  ;;  %1195 = vmatprep.subr.mxu1 %v7951_v20  ;;  %12996 = vst [vmem:[#allocation160_spill] sm:$0xff] %v7960_v22  ;;  %12997 = vst [vmem:[#allocation161_spill] sm:$0xff] %v7963_v43  ;;  %v7966_v0 = vld [vmem:[#allocation2 + $0x300] sm:$0xff]  ;;  %v7969_v20 = vld [vmem:[#allocation2 + $0x330] sm:$0xff] }
 0x1df   :  { %1127 = vmatpush2.msra.mxu0 %v7954_v9  ;;  %1196 = vmatpush2.msra.mxu1 %v7957_v19  ;;  %12998 = vst [vmem:[#allocation162_spill] sm:$0xff] %v7966_v0  ;;  %12999 = vst [vmem:[#allocation163_spill] sm:$0xff] %v7969_v20  ;;  %v7972_v9 = vld [vmem:[#allocation2 + $0x2e8] sm:$0xff]  ;;  %v7975_v19 = vld [vmem:[#allocation2 + $0x318] sm:$0xff] }
 0x1e0   :  { %1128 = vmatprep.subr.mxu0 %v7960_v22  ;;  %1197 = vmatprep.subr.mxu1 %v7963_v43  ;;  %13000 = vst [vmem:[#allocation164_spill] sm:$0xff] %v7972_v9  ;;  %13001 = vst [vmem:[#allocation165_spill] sm:$0xff] %v7975_v19  ;;  %v7978_v22 = vld [vmem:[#allocation2 + $0x2e0] sm:$0xff]  ;;  %v7981_v43 = vld [vmem:[#allocation2 + $0x310] sm:$0xff] }
 0x1e1   :  { %1129 = vmatpush2.msra.mxu0 %v7966_v0  ;;  %1198 = vmatpush2.msra.mxu1 %v7969_v20  ;;  %13002 = vst [vmem:[#allocation166_spill] sm:$0xff] %v7978_v22  ;;  %13003 = vst [vmem:[#allocation167_spill] sm:$0xff] %v7981_v43  ;;  %v7984_v0 = vld [vmem:[#allocation2 + $0x2c8] sm:$0xff]  ;;  %v7987_v20 = vld [vmem:[#allocation2 + $0x2f8] sm:$0xff] }
 0x1e2   :  { %1130 = vmatprep.subr.mxu0 %v7972_v9  ;;  %1199 = vmatprep.subr.mxu1 %v7975_v19  ;;  %13004 = vst [vmem:[#allocation168_spill] sm:$0xff] %v7984_v0  ;;  %13005 = vst [vmem:[#allocation169_spill] sm:$0xff] %v7987_v20  ;;  %v7990_v9 = vld [vmem:[#allocation2 + $0x2c0] sm:$0xff]  ;;  %v7993_v19 = vld [vmem:[#allocation2 + $0x2f0] sm:$0xff] }
 0x1e3   :  { %1131 = vmatpush2.msra.mxu0 %v7978_v22  ;;  %1200 = vmatpush2.msra.mxu1 %v7981_v43  ;;  %13006 = vst [vmem:[#allocation170_spill] sm:$0xff] %v7990_v9  ;;  %13007 = vst [vmem:[#allocation171_spill] sm:$0xff] %v7993_v19  ;;  %v7996_v22 = vld [vmem:[#allocation2 + $0x2a8] sm:$0xff]  ;;  %v7999_v43 = vld [vmem:[#allocation2 + $0x2d8] sm:$0xff] }
 0x1e4   :  { %1132 = vmatprep.subr.mxu0 %v7984_v0  ;;  %1201 = vmatprep.subr.mxu1 %v7987_v20  ;;  %13008 = vst [vmem:[#allocation172_spill] sm:$0xff] %v7996_v22  ;;  %13009 = vst [vmem:[#allocation173_spill] sm:$0xff] %v7999_v43  ;;  %v8002_v0 = vld [vmem:[#allocation2 + $0x2a0] sm:$0xff]  ;;  %v8005_v20 = vld [vmem:[#allocation2 + $0x2d0] sm:$0xff] }
 0x1e5   :  { %1133 = vmatpush2.msra.mxu0 %v7990_v9  ;;  %1202 = vmatpush2.msra.mxu1 %v7993_v19  ;;  %13010 = vst [vmem:[#allocation174_spill] sm:$0xff] %v8002_v0  ;;  %13011 = vst [vmem:[#allocation175_spill] sm:$0xff] %v8005_v20  ;;  %v8008_v9 = vld [vmem:[#allocation2 + $0x288] sm:$0xff]  ;;  %v8011_v19 = vld [vmem:[#allocation2 + $0x2b8] sm:$0xff] }
 0x1e6   :  { %1134 = vmatprep.subr.mxu0 %v7996_v22  ;;  %1203 = vmatprep.subr.mxu1 %v7999_v43  ;;  %13012 = vst [vmem:[#allocation176_spill] sm:$0xff] %v8008_v9  ;;  %13013 = vst [vmem:[#allocation177_spill] sm:$0xff] %v8011_v19  ;;  %v8014_v22 = vld [vmem:[#allocation2 + $0x280] sm:$0xff]  ;;  %v8017_v43 = vld [vmem:[#allocation2 + $0x2b0] sm:$0xff] }
 0x1e7   :  { %1135 = vmatpush2.msra.mxu0 %v8002_v0  ;;  %1204 = vmatpush2.msra.mxu1 %v8005_v20  ;;  %13014 = vst [vmem:[#allocation178_spill] sm:$0xff] %v8014_v22  ;;  %13015 = vst [vmem:[#allocation179_spill] sm:$0xff] %v8017_v43  ;;  %v8020_v0 = vld [vmem:[#allocation2 + $0x268] sm:$0xff]  ;;  %v8023_v20 = vld [vmem:[#allocation2 + $0x298] sm:$0xff] }
 0x1e8   :  { %1136 = vmatprep.subr.mxu0 %v8008_v9  ;;  %1205 = vmatprep.subr.mxu1 %v8011_v19  ;;  %13016 = vst [vmem:[#allocation180_spill] sm:$0xff] %v8020_v0  ;;  %13017 = vst [vmem:[#allocation181_spill] sm:$0xff] %v8023_v20  ;;  %v8026_v9 = vld [vmem:[#allocation2 + $0x260] sm:$0xff]  ;;  %v8029_v19 = vld [vmem:[#allocation2 + $0x290] sm:$0xff] }
 0x1e9   :  { %1137 = vmatpush2.msra.mxu0 %v8014_v22  ;;  %1206 = vmatpush2.msra.mxu1 %v8017_v43  ;;  %13018 = vst [vmem:[#allocation182_spill] sm:$0xff] %v8026_v9  ;;  %13019 = vst [vmem:[#allocation183_spill] sm:$0xff] %v8029_v19  ;;  %v8032_v22 = vld [vmem:[#allocation2 + $0x248] sm:$0xff]  ;;  %v8035_v43 = vld [vmem:[#allocation2 + $0x278] sm:$0xff] }
 0x1ea   :  { %1138 = vmatprep.subr.mxu0 %v8020_v0  ;;  %1207 = vmatprep.subr.mxu1 %v8023_v20  ;;  %13020 = vst [vmem:[#allocation184_spill] sm:$0xff] %v8032_v22  ;;  %13021 = vst [vmem:[#allocation185_spill] sm:$0xff] %v8035_v43  ;;  %v8038_v0 = vld [vmem:[#allocation2 + $0x240] sm:$0xff]  ;;  %v8041_v20 = vld [vmem:[#allocation2 + $0x270] sm:$0xff] }
 0x1eb   :  { %1139 = vmatpush2.msra.mxu0 %v8026_v9  ;;  %1208 = vmatpush2.msra.mxu1 %v8029_v19  ;;  %13022 = vst [vmem:[#allocation186_spill] sm:$0xff] %v8038_v0  ;;  %13023 = vst [vmem:[#allocation187_spill] sm:$0xff] %v8041_v20  ;;  %v8044_v9 = vld [vmem:[#allocation2 + $0x228] sm:$0xff]  ;;  %v8047_v19 = vld [vmem:[#allocation2 + $0x258] sm:$0xff] }
 0x1ec   :  { %1140 = vmatprep.subr.mxu0 %v8032_v22  ;;  %1209 = vmatprep.subr.mxu1 %v8035_v43  ;;  %13024 = vst [vmem:[#allocation188_spill] sm:$0xff] %v8044_v9  ;;  %13025 = vst [vmem:[#allocation189_spill] sm:$0xff] %v8047_v19  ;;  %v8050_v22 = vld [vmem:[#allocation2 + $0x220] sm:$0xff]  ;;  %v8056_v43 = vld [vmem:[#allocation2 + $0x250] sm:$0xff] }
 0x1ed   :  { %1141 = vmatpush2.msra.mxu0 %v8038_v0  ;;  %1210 = vmatpush2.msra.mxu1 %v8041_v20  ;;  %13026 = vst [vmem:[#allocation190_spill] sm:$0xff] %v8050_v22  ;;  %v5614_v0 = vld [vmem:[%s11964_s0 + $0x4] sm:$0xf]  ;;  %13027 = vst [vmem:[#allocation191_spill] sm:$0xff] %v8056_v43  ;;  %v8059_v20 = vld [vmem:[#allocation2 + $0x208] sm:$0xff] }
 0x1ee   :  { %1142 = vmatprep.subr.mxu0 %v8044_v9  ;;  %1211 = vmatprep.subr.mxu1 %v8047_v19  ;;  %13028 = vst [vmem:[#allocation192_spill] sm:$0xff] %v8059_v20  ;;  %v8062_v9 = vld [vmem:[#allocation2 + $0x238] sm:$0xff]  ;;  %v8065_v19 = vld [vmem:[#allocation2 + $0x200] sm:$0xff]  ;;  %13032 = vst [vmem:[#allocation196_spill] sm:$0xff] %v8071_v11 }
 0x1ef   :  { %1143 = vmatpush2.msra.mxu0 %v8050_v22  ;;  %1212 = vmatpush2.msra.mxu1 %v8056_v43  ;;  %13029 = vst [vmem:[#allocation193_spill] sm:$0xff] %v8062_v9  ;;  %13030 = vst [vmem:[#allocation194_spill] sm:$0xff] %v8065_v19  ;;  %v8068_v22 = vld [vmem:[#allocation2 + $0x230] sm:$0xff] }
 0x1f0   :  { %1144 = vmatprep.subr.mxu0 %v8059_v20  ;;  %1213 = vmatprep.subr.mxu1 %v8062_v9  ;;  %13031 = vst [vmem:[#allocation195_spill] sm:$0xff] %v8068_v22  ;;  %v8074_v43 = vld [vmem:[#allocation2 + $0x210] sm:$0xff]  ;;  %v8077_v20 = vld [vmem:[#allocation7 + $0x1e8] sm:$0xff]  ;;  %v8080_v9 = vld [vmem:[#allocation7 + $0x1f8] sm:$0xff] }
 0x1f1   :  { %1145 = vmatpush2.msra.mxu0 %v8065_v19  ;;  %1214 = vmatpush2.msra.mxu1 %v8068_v22  ;;  %13033 = vst [vmem:[#allocation197_spill] sm:$0xff] %v8074_v43  ;;  %13034 = vst [vmem:[#allocation198_spill] sm:$0xff] %v8077_v20  ;;  %v8083_v19 = vld [vmem:[#allocation7 + $0x1e0] sm:$0xff]  ;;  %v8086_v22 = vld [vmem:[#allocation7 + $0x1f0] sm:$0xff] }
 0x1f2   :  { %1147 = vmatmul.mubr.f32.vlgmr.msra.gmra.mxu0 %v5614_v0  ;;  %1215 = vmatprep.subr.mxu1 %v8071_v11  ;;  %13035 = vst [vmem:[#allocation199_spill] sm:$0xff] %v8080_v9  ;;  %13036 = vst [vmem:[#allocation200_spill] sm:$0xff] %v8083_v19  ;;  %v8089_v11 = vld [vmem:[#allocation7 + $0x1c8] sm:$0xff] }
 0x1f3   :  { %1216 = vmatpush2.msra.mxu1 %v8074_v43  ;;  %1251 = vmatprep.subr.mxu0 %v8077_v20  ;;  %13037 = vst [vmem:[#allocation201_spill] sm:$0xff] %v8086_v22  ;;  %13038 = vst [vmem:[#allocation202_spill] sm:$0xff] %v8089_v11  ;;  %v8092_v43 = vld [vmem:[#allocation7 + $0x1d8] sm:$0xff] }
 0x1f4   :  { %1218 = vmatmul.mubr.f32.vlgmr.msra.gmra.mxu1 %v5614_v0  ;;  %1322 = vmatprep.subr.mxu1 %v8080_v9  ;;  %13039 = vst [vmem:[#allocation203_spill] sm:$0xff] %v8092_v43  ;;  %v8095_v0 = vld [vmem:[#allocation7 + $0x1c0] sm:$0xff]  ;;  %v8098_v9 = vld [vmem:[#allocation7 + $0x1d0] sm:$0xff] }
 0x1f5   :  { %1252 = vmatpush1.msra.mxu0 %v8083_v19  ;;  %1323 = vmatpush1.msra.mxu1 %v8086_v22  ;;  %13040 = vst [vmem:[#allocation204_spill] sm:$0xff] %v8095_v0  ;;  %13041 = vst [vmem:[#allocation205_spill] sm:$0xff] %v8098_v9  ;;  %v8101_v19 = vld [vmem:[#allocation7 + $0x1a8] sm:$0xff]  ;;  %v8104_v22 = vld [vmem:[#allocation7 + $0x1b8] sm:$0xff] }
 0x1f6   :  { %1253 = vmatprep.subr.mxu0 %v8089_v11  ;;  %1324 = vmatprep.subr.mxu1 %v8092_v43  ;;  %13042 = vst [vmem:[#allocation206_spill] sm:$0xff] %v8101_v19  ;;  %13043 = vst [vmem:[#allocation207_spill] sm:$0xff] %v8104_v22  ;;  %v8107_v11 = vld [vmem:[#allocation7 + $0x1a0] sm:$0xff]  ;;  %v8110_v43 = vld [vmem:[#allocation7 + $0x1b0] sm:$0xff] }
 0x1f7   :  { %1254 = vmatpush1.msra.mxu0 %v8095_v0  ;;  %1325 = vmatpush1.msra.mxu1 %v8098_v9  ;;  %13044 = vst [vmem:[#allocation208_spill] sm:$0xff] %v8107_v11  ;;  %13045 = vst [vmem:[#allocation209_spill] sm:$0xff] %v8110_v43  ;;  %v8113_v0 = vld [vmem:[#allocation7 + $0x188] sm:$0xff]  ;;  %v8116_v9 = vld [vmem:[#allocation7 + $0x198] sm:$0xff] }
 0x1f8   :  { %1255 = vmatprep.subr.mxu0 %v8101_v19  ;;  %1326 = vmatprep.subr.mxu1 %v8104_v22  ;;  %13046 = vst [vmem:[#allocation210_spill] sm:$0xff] %v8113_v0  ;;  %13047 = vst [vmem:[#allocation211_spill] sm:$0xff] %v8116_v9  ;;  %v8119_v19 = vld [vmem:[#allocation7 + $0x180] sm:$0xff]  ;;  %v8122_v22 = vld [vmem:[#allocation7 + $0x190] sm:$0xff] }
 0x1f9   :  { %1256 = vmatpush1.msra.mxu0 %v8107_v11  ;;  %1327 = vmatpush1.msra.mxu1 %v8110_v43  ;;  %13048 = vst [vmem:[#allocation212_spill] sm:$0xff] %v8119_v19  ;;  %13049 = vst [vmem:[#allocation213_spill] sm:$0xff] %v8122_v22  ;;  %v8125_v11 = vld [vmem:[#allocation7 + $0x168] sm:$0xff]  ;;  %v8128_v43 = vld [vmem:[#allocation7 + $0x178] sm:$0xff] }
 0x1fa   :  { %1257 = vmatprep.subr.mxu0 %v8113_v0  ;;  %1328 = vmatprep.subr.mxu1 %v8116_v9  ;;  %13050 = vst [vmem:[#allocation214_spill] sm:$0xff] %v8125_v11  ;;  %13051 = vst [vmem:[#allocation215_spill] sm:$0xff] %v8128_v43  ;;  %v8131_v0 = vld [vmem:[#allocation7 + $0x160] sm:$0xff]  ;;  %v8134_v9 = vld [vmem:[#allocation7 + $0x170] sm:$0xff] }
 0x1fb   :  { %1258 = vmatpush1.msra.mxu0 %v8119_v19  ;;  %1329 = vmatpush1.msra.mxu1 %v8122_v22  ;;  %13052 = vst [vmem:[#allocation216_spill] sm:$0xff] %v8131_v0  ;;  %13053 = vst [vmem:[#allocation217_spill] sm:$0xff] %v8134_v9  ;;  %v8137_v19 = vld [vmem:[#allocation7 + $0x148] sm:$0xff]  ;;  %v8140_v22 = vld [vmem:[#allocation7 + $0x158] sm:$0xff] }
 0x1fc   :  { %1259 = vmatprep.subr.mxu0 %v8125_v11  ;;  %1330 = vmatprep.subr.mxu1 %v8128_v43  ;;  %13054 = vst [vmem:[#allocation218_spill] sm:$0xff] %v8137_v19  ;;  %13055 = vst [vmem:[#allocation219_spill] sm:$0xff] %v8140_v22  ;;  %v8143_v11 = vld [vmem:[#allocation7 + $0x140] sm:$0xff]  ;;  %v8146_v43 = vld [vmem:[#allocation7 + $0x150] sm:$0xff] }
 0x1fd   :  { %1260 = vmatpush1.msra.mxu0 %v8131_v0  ;;  %1331 = vmatpush1.msra.mxu1 %v8134_v9  ;;  %13056 = vst [vmem:[#allocation220_spill] sm:$0xff] %v8143_v11  ;;  %13057 = vst [vmem:[#allocation221_spill] sm:$0xff] %v8146_v43  ;;  %v8149_v0 = vld [vmem:[#allocation7 + $0x128] sm:$0xff]  ;;  %v8152_v9 = vld [vmem:[#allocation7 + $0x138] sm:$0xff] }
 0x1fe   :  { %1261 = vmatprep.subr.mxu0 %v8137_v19  ;;  %1332 = vmatprep.subr.mxu1 %v8140_v22  ;;  %13058 = vst [vmem:[#allocation222_spill] sm:$0xff] %v8149_v0  ;;  %13059 = vst [vmem:[#allocation223_spill] sm:$0xff] %v8152_v9  ;;  %v8155_v19 = vld [vmem:[#allocation7 + $0x120] sm:$0xff]  ;;  %v8158_v22 = vld [vmem:[#allocation7 + $0x130] sm:$0xff] }
 0x1ff   :  { %1262 = vmatpush1.msra.mxu0 %v8143_v11  ;;  %1333 = vmatpush1.msra.mxu1 %v8146_v43  ;;  %13060 = vst [vmem:[#allocation224_spill] sm:$0xff] %v8155_v19  ;;  %13061 = vst [vmem:[#allocation225_spill] sm:$0xff] %v8158_v22  ;;  %v8161_v11 = vld [vmem:[#allocation7 + $0x108] sm:$0xff]  ;;  %v8164_v43 = vld [vmem:[#allocation7 + $0x118] sm:$0xff] }
 0x200   :  { %1263 = vmatprep.subr.mxu0 %v8149_v0  ;;  %1334 = vmatprep.subr.mxu1 %v8152_v9  ;;  %13062 = vst [vmem:[#allocation226_spill] sm:$0xff] %v8161_v11  ;;  %13063 = vst [vmem:[#allocation227_spill] sm:$0xff] %v8164_v43  ;;  %v8167_v0 = vld [vmem:[#allocation7 + $0x100] sm:$0xff]  ;;  %v8170_v9 = vld [vmem:[#allocation7 + $0x110] sm:$0xff] }
 0x201   :  { %1264 = vmatpush1.msra.mxu0 %v8155_v19  ;;  %1335 = vmatpush1.msra.mxu1 %v8158_v22  ;;  %13064 = vst [vmem:[#allocation228_spill] sm:$0xff] %v8167_v0  ;;  %13065 = vst [vmem:[#allocation229_spill] sm:$0xff] %v8170_v9  ;;  %v8173_v19 = vld [vmem:[#allocation7 + $0xe8] sm:$0xff]  ;;  %v8176_v22 = vld [vmem:[#allocation7 + $0xf8] sm:$0xff] }
 0x202   :  { %1265 = vmatprep.subr.mxu0 %v8161_v11  ;;  %1336 = vmatprep.subr.mxu1 %v8164_v43  ;;  %13066 = vst [vmem:[#allocation230_spill] sm:$0xff] %v8173_v19  ;;  %13067 = vst [vmem:[#allocation231_spill] sm:$0xff] %v8176_v22  ;;  %v8179_v11 = vld [vmem:[#allocation7 + $0xe0] sm:$0xff]  ;;  %v8182_v43 = vld [vmem:[#allocation7 + $0xf0] sm:$0xff] }
 0x203   :  { %1266 = vmatpush1.msra.mxu0 %v8167_v0  ;;  %1337 = vmatpush1.msra.mxu1 %v8170_v9  ;;  %13068 = vst [vmem:[#allocation232_spill] sm:$0xff] %v8179_v11  ;;  %13069 = vst [vmem:[#allocation233_spill] sm:$0xff] %v8182_v43  ;;  %v8185_v0 = vld [vmem:[#allocation7 + $0xc8] sm:$0xff]  ;;  %v8188_v9 = vld [vmem:[#allocation7 + $0xd8] sm:$0xff] }
 0x204   :  { %1267 = vmatprep.subr.mxu0 %v8173_v19  ;;  %1338 = vmatprep.subr.mxu1 %v8176_v22  ;;  %13070 = vst [vmem:[#allocation234_spill] sm:$0xff] %v8185_v0  ;;  %13071 = vst [vmem:[#allocation235_spill] sm:$0xff] %v8188_v9  ;;  %v8191_v19 = vld [vmem:[#allocation7 + $0xc0] sm:$0xff]  ;;  %v8194_v22 = vld [vmem:[#allocation7 + $0xd0] sm:$0xff] }
 0x205   :  { %1268 = vmatpush1.msra.mxu0 %v8179_v11  ;;  %1339 = vmatpush1.msra.mxu1 %v8182_v43  ;;  %13072 = vst [vmem:[#allocation236_spill] sm:$0xff] %v8191_v19  ;;  %13073 = vst [vmem:[#allocation237_spill] sm:$0xff] %v8194_v22  ;;  %v8197_v11 = vld [vmem:[#allocation7 + $0xa8] sm:$0xff]  ;;  %v8200_v43 = vld [vmem:[#allocation7 + $0xb8] sm:$0xff] }
 0x206   :  { %1269 = vmatprep.subr.mxu0 %v8185_v0  ;;  %1340 = vmatprep.subr.mxu1 %v8188_v9  ;;  %13074 = vst [vmem:[#allocation238_spill] sm:$0xff] %v8197_v11  ;;  %13075 = vst [vmem:[#allocation239_spill] sm:$0xff] %v8200_v43  ;;  %v8203_v0 = vld [vmem:[#allocation7 + $0xa0] sm:$0xff]  ;;  %v8206_v9 = vld [vmem:[#allocation7 + $0xb0] sm:$0xff] }
 0x207   :  { %1270 = vmatpush1.msra.mxu0 %v8191_v19  ;;  %1341 = vmatpush1.msra.mxu1 %v8194_v22  ;;  %13076 = vst [vmem:[#allocation240_spill] sm:$0xff] %v8203_v0  ;;  %13077 = vst [vmem:[#allocation241_spill] sm:$0xff] %v8206_v9  ;;  %v8209_v19 = vld [vmem:[#allocation7 + $0x88] sm:$0xff]  ;;  %v8212_v22 = vld [vmem:[#allocation7 + $0x98] sm:$0xff] }
 0x208   :  { %1271 = vmatprep.subr.mxu0 %v8197_v11  ;;  %1342 = vmatprep.subr.mxu1 %v8200_v43  ;;  %13078 = vst [vmem:[#allocation242_spill] sm:$0xff] %v8209_v19  ;;  %13079 = vst [vmem:[#allocation243_spill] sm:$0xff] %v8212_v22  ;;  %v8215_v11 = vld [vmem:[#allocation7 + $0x80] sm:$0xff]  ;;  %v8218_v43 = vld [vmem:[#allocation7 + $0x90] sm:$0xff] }
 0x209   :  { %1272 = vmatpush1.msra.mxu0 %v8203_v0  ;;  %1343 = vmatpush1.msra.mxu1 %v8206_v9  ;;  %13080 = vst [vmem:[#allocation244_spill] sm:$0xff] %v8215_v11  ;;  %13081 = vst [vmem:[#allocation245_spill] sm:$0xff] %v8218_v43  ;;  %v8221_v0 = vld [vmem:[#allocation7 + $0x68] sm:$0xff]  ;;  %v8224_v9 = vld [vmem:[#allocation7 + $0x78] sm:$0xff] }
 0x20a   :  { %1273 = vmatprep.subr.mxu0 %v8209_v19  ;;  %1344 = vmatprep.subr.mxu1 %v8212_v22  ;;  %13082 = vst [vmem:[#allocation246_spill] sm:$0xff] %v8221_v0  ;;  %13083 = vst [vmem:[#allocation247_spill] sm:$0xff] %v8224_v9  ;;  %v8227_v19 = vld [vmem:[#allocation7 + $0x60] sm:$0xff]  ;;  %v8230_v22 = vld [vmem:[#allocation7 + $0x70] sm:$0xff] }
 0x20b   :  { %1274 = vmatpush1.msra.mxu0 %v8215_v11  ;;  %1345 = vmatpush1.msra.mxu1 %v8218_v43  ;;  %13084 = vst [vmem:[#allocation248_spill] sm:$0xff] %v8227_v19  ;;  %13085 = vst [vmem:[#allocation249_spill] sm:$0xff] %v8230_v22  ;;  %v8233_v11 = vld [vmem:[#allocation7 + $0x48] sm:$0xff]  ;;  %v8236_v43 = vld [vmem:[#allocation7 + $0x58] sm:$0xff] }
 0x20c   :  { %1275 = vmatprep.subr.mxu0 %v8221_v0  ;;  %1346 = vmatprep.subr.mxu1 %v8224_v9  ;;  %13086 = vst [vmem:[#allocation250_spill] sm:$0xff] %v8233_v11  ;;  %13087 = vst [vmem:[#allocation251_spill] sm:$0xff] %v8236_v43  ;;  %v8239_v0 = vld [vmem:[#allocation7 + $0x40] sm:$0xff]  ;;  %v8242_v9 = vld [vmem:[#allocation7 + $0x50] sm:$0xff] }
 0x20d   :  { %1276 = vmatpush1.msra.mxu0 %v8227_v19  ;;  %1347 = vmatpush1.msra.mxu1 %v8230_v22  ;;  %13088 = vst [vmem:[#allocation252_spill] sm:$0xff] %v8239_v0  ;;  %13089 = vst [vmem:[#allocation253_spill] sm:$0xff] %v8242_v9  ;;  %v8245_v19 = vld [vmem:[#allocation7 + $0x28] sm:$0xff]  ;;  %v8248_v22 = vld [vmem:[#allocation7 + $0x38] sm:$0xff] }
 0x20e   :  { %1277 = vmatprep.subr.mxu0 %v8233_v11  ;;  %1348 = vmatprep.subr.mxu1 %v8236_v43  ;;  %13090 = vst [vmem:[#allocation254_spill] sm:$0xff] %v8245_v19  ;;  %13091 = vst [vmem:[#allocation255_spill] sm:$0xff] %v8248_v22  ;;  %v8251_v11 = vld [vmem:[#allocation7 + $0x20] sm:$0xff]  ;;  %v8254_v43 = vld [vmem:[#allocation7 + $0x30] sm:$0xff] }
 0x20f   :  { %1278 = vmatpush1.msra.mxu0 %v8239_v0  ;;  %1349 = vmatpush1.msra.mxu1 %v8242_v9  ;;  %13092 = vst [vmem:[#allocation256_spill] sm:$0xff] %v8251_v11  ;;  %13093 = vst [vmem:[#allocation257_spill] sm:$0xff] %v8254_v43  ;;  %v8257_v0 = vld [vmem:[#allocation7 + $0x8] sm:$0xff]  ;;  %v8260_v9 = vld [vmem:[#allocation7 + $0x18] sm:$0xff] }
 0x210   :  { %1279 = vmatprep.subr.mxu0 %v8245_v19  ;;  %1350 = vmatprep.subr.mxu1 %v8248_v22  ;;  %13094 = vst [vmem:[#allocation258_spill] sm:$0xff] %v8257_v0  ;;  %13095 = vst [vmem:[#allocation259_spill] sm:$0xff] %v8260_v9  ;;  %v8263_v19 = vld [vmem:[#allocation7] sm:$0xff] }
 0x211   :  { %1280 = vmatpush1.msra.mxu0 %v8251_v11  ;;  %1351 = vmatpush1.msra.mxu1 %v8254_v43  ;;  %13096 = vst [vmem:[#allocation260_spill] sm:$0xff] %v8263_v19  ;;  %v8269_v11 = vld [vmem:[#allocation5 + $0x1e8] sm:$0xff]  ;;  %v8272_v43 = vld [vmem:[#allocation5 + $0x1f8] sm:$0xff] }
 0x212   :  { %1281 = vmatprep.subr.mxu0 %v8257_v0  ;;  %1352 = vmatprep.subr.mxu1 %v8260_v9  ;;  %13097 = vst [vmem:[#allocation261_spill] sm:$0xff] %v8269_v11  ;;  %13098 = vst [vmem:[#allocation262_spill] sm:$0xff] %v8272_v43 }
 0x213   :  { %1282 = vmatpush1.msra.mxu0 %v8263_v19  ;;  %1353 = vmatpush1.msra.mxu1 %v7372_v4 }
 0x214   :  { %1315 = vmatprep.mubr.f32.mxu0 %v12905_v24  ;;  %1386 = vmatprep.mubr.f32.mxu1 %v12905_v24 }
 0x215   :  { %1393 = vmatprep.subr.mxu0 %v8269_v11  ;;  %1464 = vmatprep.subr.mxu1 %v8272_v43  ;;  %v8278_v11 = vld [vmem:[%s11970_s6] sm:$0xf] }
 0x216   :  { %v8283_v43 = vrot.slane %v8278_v11, %v13099_v15 }
 0x22e   :  { %v624_v0 = vpop.f32.mrf.mxu0  ;;  %v695_v9 = vpop.f32.mrf.mxu1 }
 0x230   :  { %v626_v22 = vpop.f32.mrf.mxu0  ;;  %v697_v20 = vpop.f32.mrf.mxu1 }
 0x24f   :  { %v766_v27 = vpop.f32.mrf.mxu0  ;;  %v837_v19 = vpop.f32.mrf.mxu1 }
 0x250   :  { %v767_v26 = vadd.f32 %v766_v27, %v624_v0  ;;  %v838_v4 = vadd.f32 %v837_v19, %v695_v9  ;;  %v13100_v9 = vsub.s32 1, %v7375_v8 }
 0x251   :  { %v768_v21 = vpop.f32.mrf.mxu0  ;;  %v839_v18 = vpop.f32.mrf.mxu1 }
 0x252   :  { %v769_v17 = vadd.f32 %v768_v21, %v626_v22  ;;  %v840_v16 = vadd.f32 %v839_v18, %v697_v20  ;;  %v8288_v19 = vrot.slane %v8278_v11, %v13100_v9 }
 0x271   :  { %v972_v14 = vpop.f32.mrf.mxu0  ;;  %v1043_v10 = vpop.f32.mrf.mxu1 }
 0x272   :  { %v1048_v7 = vadd.f32 %v972_v14, %v767_v26  ;;  %v1050_v6 = vadd.f32 %v1043_v10, %v838_v4  ;;  %v13101_v10 = vsub.s32 2, %v7375_v8 }
 0x273   :  { %v974_v22 = vpop.f32.mrf.mxu0  ;;  %v1045_v18 = vpop.f32.mrf.mxu1 }
 0x274   :  { %v1052_v20 = vadd.f32 %v1048_v7, %v8283_v43  ;;  %v1049_v21 = vadd.f32 %v974_v22, %v769_v17  ;;  %v8291_v27 = vadd.f32 %v1045_v18, %v840_v16  ;;  %v8297_v14 = vrot.slane %v8278_v11, %v13101_v10 }
 0x276   :  { %v5611_v0 = vmul.f32 -1.442695, %v1052_v20  ;;  %v1053_v15 = vadd.f32 %v1049_v21, %v8288_v19  ;;  %v1054_v26 = vadd.f32 %v1050_v6, %v8297_v14 }
 0x278   :  { %5741 = vpow2.f32 %v5611_v0  ;;  %v5612_v5 = vmul.f32 -1.442695, %v1053_v15 }
 0x27a   :  { %5743 = vpow2.f32 %v5612_v5 }
 0x27b   :  { %5745 = vtanh.f32 %v1054_v26 }
 0x285   :  { %v5742_v4 = vpop.eup %5741 }
 0x286   :  { %v1059_v9 = vadd.f32 1.0, %v5742_v4 }
 0x287   :  { %v5744_v3 = vpop.eup %5743 }
 0x288   :  { %5747 = vrcp.f32 %v1059_v9  ;;  %v1065_v7 = vadd.f32 1.0, %v5744_v3  ;;  %v5746_v16 = vpop.eup %5745 }
 0x28a   :  { %5749 = vrcp.f32 %v1065_v7 }
 0x295   :  { %v5748_v17 = vpop.eup %5747 }
 0x296   :  { %v1076_v22 = vmul.f32 %v5748_v17, %v5746_v16 }
 0x297   :  { %v5750_v18 = vpop.eup %5749 }
 0x298   :  { %v1075_v20 = vmul.f32 0.0, %v5750_v18 }
 0x29a   :  { %v8300_v5 = vadd.f32 %v1076_v22, %v1075_v20 }
 0x2b2   :  { %v1148_v21 = vpop.f32.mrf.mxu0 }
 0x2b3   :  { %v1149_v0 = vadd.f32 %v1148_v21, %v7384_v12 }
 0x2b4   :  { %v1150_v15 = vpop.f32.mrf.mxu0  ;;  %v1219_v26 = vpop.f32.mrf.mxu1 }
 0x2b5   :  { %v5615_v10 = vmul.f32 -1.442695, %v1149_v0  ;;  %v1151_v6 = vadd.f32 %v1150_v15, %v7388_v13  ;;  %v1220_v7 = vadd.f32 %v1219_v26, %v7400_v25 }
 0x2b6   :  { %v1221_v3 = vpop.f32.mrf.mxu1 }
 0x2b7   :  { %5751 = vpow2.f32 %v5615_v10  ;;  %v5616_v4 = vmul.f32 -1.442695, %v1151_v6  ;;  %v1222_v9 = vadd.f32 %v1221_v3, %v7396_v23 }
 0x2b9   :  { %5753 = vpow2.f32 %v5616_v4  ;;  %v5617_v16 = vmul.f32 -1.442695, %v1222_v9 }
 0x2ba   :  { %5755 = vtanh.f32 %v1220_v7 }
 0x2bb   :  { %5757 = vpow2.f32 %v5617_v16 }
 0x2c4   :  { %v5752_v17 = vpop.eup %5751 }
 0x2c5   :  { %v1227_v22 = vadd.f32 1.0, %v5752_v17  ;;  %v8313_v17 = vld [vmem:[#allocation5 + $0x1e0] sm:$0xff] }
 0x2c6   :  { %v5754_v18 = vpop.eup %5753 }
 0x2c7   :  { %5759 = vrcp.f32 %v1227_v22  ;;  %v1233_v20 = vadd.f32 1.0, %v5754_v18  ;;  %v5756_v21 = vpop.eup %5755  ;;  %v8316_v22 = vld [vmem:[#allocation5 + $0x1f0] sm:$0xff]  ;;  %v8325_v18 = vld [vmem:[#allocation5 + $0x1c0] sm:$0xff] }
 0x2c8   :  { %v5758_v0 = vpop.eup %5757 }
 0x2c9   :  { %5761 = vrcp.f32 %v1233_v20  ;;  %v1240_v6 = vadd.f32 1.0, %v5758_v0  ;;  %v8328_v20 = vld [vmem:[#allocation5 + $0x1d0] sm:$0xff]  ;;  %v8334_v0 = vld [vmem:[#allocation5 + $0x1b8] sm:$0xff] }
 0x2cb   :  { %5763 = vrcp.f32 %v1240_v6  ;;  %v8343_v6 = vld [vmem:[#allocation5 + $0x188] sm:$0xff] }
 0x2cc   :  { %13103 = vst [vmem:[#allocation264_spill] sm:$0xff] %v8343_v6 }
 0x2d4   :  { %v5760_v15 = vpop.eup %5759 }
 0x2d5   :  { %v1244_v13 = vmul.f32 %v5760_v15, %v5756_v21  ;;  %v8331_v21 = vld [vmem:[#allocation5 + $0x1a8] sm:$0xff]  ;;  %v8337_v15 = vld [vmem:[#allocation5 + $0x1a0] sm:$0xff] }
 0x2d6   :  { %v5762_v10 = vpop.eup %5761 }
 0x2d7   :  { %v1243_v4 = vmul.f32 %v5762_v10, %v7404_v40  ;;  %v8322_v40 = vld [vmem:[#allocation5 + $0x1d8] sm:$0xff]  ;;  %v8340_v10 = vld [vmem:[#allocation5 + $0x1b0] sm:$0xff] }
 0x2d8   :  { %v5764_v26 = vpop.eup %5763  ;;  %13102 = vst [vmem:[#allocation263_spill] sm:$0xff] %v8340_v10 }
 0x2d9   :  { %v8307_v3 = vadd.f32 %v1244_v13, %v1243_v4  ;;  %v8319_v13 = vld [vmem:[#allocation5 + $0x1c8] sm:$0xff]  ;;  %v8346_v4 = vld [vmem:[#allocation5 + $0x198] sm:$0xff] }
 0x2da   :  { %13104 = vst [vmem:[#allocation265_spill] sm:$0xff] %v8346_v4 }
 0x2db   :  { %5765 = vtanh.f32 %v8307_v3 }
 0x2e8   :  { %v5766_v9 = vpop.eup %5765 }
 0x2e9   :  { %v8310_v7 = vmul.f32 %v5766_v9, %v5764_v26  ;;  %v8349_v26 = vld [vmem:[#allocation5 + $0x180] sm:$0xff]  ;;  %v8352_v9 = vld [vmem:[#allocation5 + $0x190] sm:$0xff] }
 0x2ea   :  { %13105 = vst [vmem:[#allocation266_spill] sm:$0xff] %v8349_v26  ;;  %13106 = vst [vmem:[#allocation267_spill] sm:$0xff] %v8352_v9 }
 0x2eb   :  { %v1249_v16 = vrot.slane %v8310_v7, 2 }
 0x2ed   :  { %1316 = vmatmul.mubr.f32.vlgmr.msra.gmra.mxu0 %v1249_v16  ;;  %1387 = vmatmul.mubr.f32.vlgmr.msra.gmra.mxu1 %v1249_v16  ;;  %v8355_v16 = vld [vmem:[#allocation5 + $0x168] sm:$0xff] }
 0x2ee   :  { %1394 = vmatpush1.msra.mxu0 %v8313_v17  ;;  %1465 = vmatpush1.msra.mxu1 %v8316_v22  ;;  %13107 = vst [vmem:[#allocation268_spill] sm:$0xff] %v8355_v16 }
 0x2ef   :  { %1395 = vmatprep.subr.mxu0 %v8319_v13  ;;  %1466 = vmatprep.subr.mxu1 %v8322_v40 }
 0x2f0   :  { %1396 = vmatpush1.msra.mxu0 %v8325_v18  ;;  %1467 = vmatpush1.msra.mxu1 %v8328_v20 }
 0x2f1   :  { %1397 = vmatprep.subr.mxu0 %v8331_v21  ;;  %1468 = vmatprep.subr.mxu1 %v8334_v0 }
 0x2f2   :  { %1398 = vmatpush1.msra.mxu0 %v8337_v15  ;;  %1469 = vmatpush1.msra.mxu1 %v8340_v10  ;;  %v8358_v10 = vld [vmem:[#allocation5 + $0x178] sm:$0xff] }
 0x2f3   :  { %1399 = vmatprep.subr.mxu0 %v8343_v6  ;;  %1470 = vmatprep.subr.mxu1 %v8346_v4  ;;  %13108 = vst [vmem:[#allocation269_spill] sm:$0xff] %v8358_v10  ;;  %v8361_v6 = vld [vmem:[#allocation5 + $0x160] sm:$0xff]  ;;  %v8364_v4 = vld [vmem:[#allocation5 + $0x170] sm:$0xff] }
 0x2f4   :  { %1400 = vmatpush1.msra.mxu0 %v8349_v26  ;;  %1471 = vmatpush1.msra.mxu1 %v8352_v9  ;;  %13109 = vst [vmem:[#allocation270_spill] sm:$0xff] %v8361_v6  ;;  %13110 = vst [vmem:[#allocation271_spill] sm:$0xff] %v8364_v4  ;;  %v8367_v26 = vld [vmem:[#allocation5 + $0x148] sm:$0xff]  ;;  %v8370_v9 = vld [vmem:[#allocation5 + $0x158] sm:$0xff] }
 0x2f5   :  { %1401 = vmatprep.subr.mxu0 %v8355_v16  ;;  %1472 = vmatprep.subr.mxu1 %v8358_v10  ;;  %13111 = vst [vmem:[#allocation272_spill] sm:$0xff] %v8367_v26  ;;  %13112 = vst [vmem:[#allocation273_spill] sm:$0xff] %v8370_v9  ;;  %v8373_v16 = vld [vmem:[#allocation5 + $0x140] sm:$0xff]  ;;  %v8376_v10 = vld [vmem:[#allocation5 + $0x150] sm:$0xff] }
 0x2f6   :  { %1402 = vmatpush1.msra.mxu0 %v8361_v6  ;;  %1473 = vmatpush1.msra.mxu1 %v8364_v4  ;;  %13113 = vst [vmem:[#allocation274_spill] sm:$0xff] %v8373_v16  ;;  %13114 = vst [vmem:[#allocation275_spill] sm:$0xff] %v8376_v10  ;;  %v8379_v6 = vld [vmem:[#allocation5 + $0x128] sm:$0xff]  ;;  %v8382_v4 = vld [vmem:[#allocation5 + $0x138] sm:$0xff] }
 0x2f7   :  { %1403 = vmatprep.subr.mxu0 %v8367_v26  ;;  %1474 = vmatprep.subr.mxu1 %v8370_v9  ;;  %13115 = vst [vmem:[#allocation276_spill] sm:$0xff] %v8379_v6  ;;  %13116 = vst [vmem:[#allocation277_spill] sm:$0xff] %v8382_v4  ;;  %v8385_v26 = vld [vmem:[#allocation5 + $0x120] sm:$0xff]  ;;  %v8388_v9 = vld [vmem:[#allocation5 + $0x130] sm:$0xff] }
 0x2f8   :  { %1404 = vmatpush1.msra.mxu0 %v8373_v16  ;;  %1475 = vmatpush1.msra.mxu1 %v8376_v10  ;;  %13117 = vst [vmem:[#allocation278_spill] sm:$0xff] %v8385_v26  ;;  %13118 = vst [vmem:[#allocation279_spill] sm:$0xff] %v8388_v9  ;;  %v8391_v16 = vld [vmem:[#allocation5 + $0x108] sm:$0xff]  ;;  %v8394_v10 = vld [vmem:[#allocation5 + $0x118] sm:$0xff] }
 0x2f9   :  { %1405 = vmatprep.subr.mxu0 %v8379_v6  ;;  %1476 = vmatprep.subr.mxu1 %v8382_v4  ;;  %13119 = vst [vmem:[#allocation280_spill] sm:$0xff] %v8391_v16  ;;  %13120 = vst [vmem:[#allocation281_spill] sm:$0xff] %v8394_v10  ;;  %v8397_v6 = vld [vmem:[#allocation5 + $0x100] sm:$0xff]  ;;  %v8400_v4 = vld [vmem:[#allocation5 + $0x110] sm:$0xff] }
 0x2fa   :  { %1406 = vmatpush1.msra.mxu0 %v8385_v26  ;;  %1477 = vmatpush1.msra.mxu1 %v8388_v9  ;;  %13121 = vst [vmem:[#allocation282_spill] sm:$0xff] %v8397_v6  ;;  %13122 = vst [vmem:[#allocation283_spill] sm:$0xff] %v8400_v4  ;;  %v8403_v26 = vld [vmem:[#allocation5 + $0xe8] sm:$0xff]  ;;  %v8406_v9 = vld [vmem:[#allocation5 + $0xf8] sm:$0xff] }
 0x2fb   :  { %1407 = vmatprep.subr.mxu0 %v8391_v16  ;;  %1478 = vmatprep.subr.mxu1 %v8394_v10  ;;  %13123 = vst [vmem:[#allocation284_spill] sm:$0xff] %v8403_v26  ;;  %13124 = vst [vmem:[#allocation285_spill] sm:$0xff] %v8406_v9  ;;  %v8409_v16 = vld [vmem:[#allocation5 + $0xe0] sm:$0xff]  ;;  %v8412_v10 = vld [vmem:[#allocation5 + $0xf0] sm:$0xff] }
 0x2fc   :  { %1408 = vmatpush1.msra.mxu0 %v8397_v6  ;;  %1479 = vmatpush1.msra.mxu1 %v8400_v4  ;;  %v8415_v6 = vld [vmem:[#allocation5 + $0xc8] sm:$0xff]  ;;  %v8418_v4 = vld [vmem:[#allocation5 + $0xd8] sm:$0xff] }
 0x2fd   :  { %1409 = vmatprep.subr.mxu0 %v8403_v26  ;;  %1480 = vmatprep.subr.mxu1 %v8406_v9  ;;  %v13125_v26 = vsub.s32 3, %v7375_v8 }
 0x2fe   :  { %1410 = vmatpush1.msra.mxu0 %v8409_v16  ;;  %1481 = vmatpush1.msra.mxu1 %v8412_v10 }
 0x2ff   :  { %1411 = vmatprep.subr.mxu0 %v8415_v6  ;;  %1482 = vmatprep.subr.mxu1 %v8418_v4  ;;  %v8424_v9 = vrot.slane %v8278_v11, %v13125_v26  ;;  %v13161_v26 = vld [vmem:[#allocation51_spill] sm:$0xff] }
 0x300   :  { %1412 = vmatpush1.msra.mxu0 %v7410_v28  ;;  %1483 = vmatpush1.msra.mxu1 %v7412_v29  ;;  %v13126_v28 = vld [vmem:[#allocation16_spill] sm:$0xff]  ;;  %v13127_v29 = vld [vmem:[#allocation17_spill] sm:$0xff] }
 0x301   :  { %1413 = vmatprep.subr.mxu0 %v7414_v30  ;;  %1484 = vmatprep.subr.mxu1 %v7416_v31  ;;  %v1055_v8 = vadd.f32 %v8291_v27, %v8424_v9  ;;  %v13128_v30 = vld [vmem:[#allocation18_spill] sm:$0xff]  ;;  %v13129_v31 = vld [vmem:[#allocation19_spill] sm:$0xff] }
 0x302   :  { %1414 = vmatpush1.msra.mxu0 %v7418_v32  ;;  %1485 = vmatpush1.msra.mxu1 %v7420_v33  ;;  %v13130_v32 = vld [vmem:[#allocation20_spill] sm:$0xff]  ;;  %v13131_v33 = vld [vmem:[#allocation21_spill] sm:$0xff]  ;;  %v13160_v27 = vld [vmem:[#allocation50_spill] sm:$0xff] }
 0x303   :  { %1415 = vmatprep.subr.mxu0 %v7424_v34  ;;  %1486 = vmatprep.subr.mxu1 %v7426_v35  ;;  %v5613_v11 = vmul.f32 -1.442695, %v1055_v8  ;;  %v13132_v34 = vld [vmem:[#allocation22_spill] sm:$0xff]  ;;  %v13133_v35 = vld [vmem:[#allocation23_spill] sm:$0xff]  ;;  %v13162_v8 = vld [vmem:[#allocation52_spill] sm:$0xff] }
 0x304   :  { %1416 = vmatpush1.msra.mxu0 %v7430_v36  ;;  %1487 = vmatpush1.msra.mxu1 %v7432_v37  ;;  %v13134_v36 = vld [vmem:[#allocation24_spill] sm:$0xff]  ;;  %v13135_v37 = vld [vmem:[#allocation25_spill] sm:$0xff] }
 0x305   :  { %1417 = vmatprep.subr.mxu0 %v7436_v38  ;;  %1488 = vmatprep.subr.mxu1 %v7438_v39  ;;  %5767 = vpow2.f32 %v5613_v11  ;;  %v13136_v39 = vld [vmem:[#allocation26_spill] sm:$0xff]  ;;  %v13163_v11 = vld [vmem:[#allocation53_spill] sm:$0xff] }
 0x306   :  { %1418 = vmatpush1.msra.mxu0 %v7442_v41  ;;  %1489 = vmatpush1.msra.mxu1 %v7444_v42  ;;  %v13137_v41 = vld [vmem:[#allocation27_spill] sm:$0xff]  ;;  %v13138_v42 = vld [vmem:[#allocation28_spill] sm:$0xff]  ;;  %5769 = vtanh.f32 %v8300_v5 }
 0x307   :  { %1419 = vmatprep.subr.mxu0 %v7448_v44  ;;  %1490 = vmatprep.subr.mxu1 %v7450_v45  ;;  %v13139_v44 = vld [vmem:[#allocation29_spill] sm:$0xff]  ;;  %v13140_v45 = vld [vmem:[#allocation30_spill] sm:$0xff] }
 0x308   :  { %1420 = vmatpush1.msra.mxu0 %v7454_v46  ;;  %1491 = vmatpush1.msra.mxu1 %v7456_v47  ;;  %v13141_v46 = vld [vmem:[#allocation31_spill] sm:$0xff] }
 0x309   :  { %1421 = vmatprep.subr.mxu0 %v7460_v48  ;;  %1492 = vmatprep.subr.mxu1 %v7462_v49  ;;  %v13142_v48 = vld [vmem:[#allocation32_spill] sm:$0xff]  ;;  %v13143_v49 = vld [vmem:[#allocation33_spill] sm:$0xff] }
 0x30a   :  { %1422 = vmatpush1.msra.mxu0 %v7466_v50  ;;  %1493 = vmatpush1.msra.mxu1 %v7468_v51  ;;  %v13144_v50 = vld [vmem:[#allocation34_spill] sm:$0xff]  ;;  %v13145_v51 = vld [vmem:[#allocation35_spill] sm:$0xff] }
 0x30b   :  { %1423 = vmatprep.subr.mxu0 %v7472_v52  ;;  %1494 = vmatprep.subr.mxu1 %v7474_v53  ;;  %v13146_v52 = vld [vmem:[#allocation36_spill] sm:$0xff]  ;;  %v13147_v53 = vld [vmem:[#allocation37_spill] sm:$0xff] }
 0x30c   :  { %1424 = vmatpush1.msra.mxu0 %v7478_v54  ;;  %1457 = vmatprep.mubr.f32.mxu0 %v12905_v24  ;;  %v13148_v54 = vld [vmem:[#allocation38_spill] sm:$0xff] }
 0x30d   :  { %1495 = vmatpush1.msra.mxu1 %v7482_v55  ;;  %1528 = vmatprep.mubr.f32.mxu1 %v12905_v24  ;;  %v13149_v55 = vld [vmem:[#allocation39_spill] sm:$0xff] }
 0x30e   :  { %1458 = vmatmul.mubr.f32.vlgmr.msra.gmra.mxu0 %v8310_v7  ;;  %1529 = vmatmul.mubr.f32.vlgmr.msra.gmra.mxu1 %v8310_v7 }
 0x30f   :  { %1535 = vmatprep.subr.mxu0 %v7488_v56  ;;  %1606 = vmatprep.subr.mxu1 %v7490_v57  ;;  %v13150_v56 = vld [vmem:[#allocation40_spill] sm:$0xff]  ;;  %v13151_v57 = vld [vmem:[#allocation41_spill] sm:$0xff] }
 0x310   :  { %1536 = vmatpush1.msra.mxu0 %v7494_v58  ;;  %1607 = vmatpush1.msra.mxu1 %v7496_v59  ;;  %v13152_v58 = vld [vmem:[#allocation42_spill] sm:$0xff]  ;;  %v13153_v59 = vld [vmem:[#allocation43_spill] sm:$0xff] }
 0x311   :  { %1537 = vmatprep.subr.mxu0 %v7500_v60  ;;  %1608 = vmatprep.subr.mxu1 %v7502_v61  ;;  %v13154_v60 = vld [vmem:[#allocation44_spill] sm:$0xff]  ;;  %v13155_v61 = vld [vmem:[#allocation45_spill] sm:$0xff] }
 0x312   :  { %1538 = vmatpush1.msra.mxu0 %v7506_v62  ;;  %1609 = vmatpush1.msra.mxu1 %v7508_v63  ;;  %v5768_v38 = vpop.eup %5767  ;;  %v13156_v62 = vld [vmem:[#allocation46_spill] sm:$0xff]  ;;  %v13157_v63 = vld [vmem:[#allocation47_spill] sm:$0xff] }
 0x313   :  { %1539 = vmatprep.subr.mxu0 %v7512_v1  ;;  %1610 = vmatprep.subr.mxu1 %v7514_v2  ;;  %v1072_v47 = vadd.f32 1.0, %v5768_v38  ;;  %v13158_v1 = vld [vmem:[#allocation48_spill] sm:$0xff]  ;;  %v13159_v2 = vld [vmem:[#allocation49_spill] sm:$0xff]  ;;  %v13173_v38 = vld [vmem:[#allocation63_spill] sm:$0xff] }
 0x314   :  { %1540 = vmatpush1.msra.mxu0 %v13126_v28  ;;  %1611 = vmatpush1.msra.mxu1 %v13127_v29  ;;  %v13164_v28 = vld [vmem:[#allocation54_spill] sm:$0xff]  ;;  %v13165_v29 = vld [vmem:[#allocation55_spill] sm:$0xff] }
 0x315   :  { %1541 = vmatprep.subr.mxu0 %v13128_v30  ;;  %1612 = vmatprep.subr.mxu1 %v13129_v31  ;;  %5771 = vrcp.f32 %v1072_v47  ;;  %v13166_v30 = vld [vmem:[#allocation56_spill] sm:$0xff]  ;;  %v13167_v31 = vld [vmem:[#allocation57_spill] sm:$0xff] }
 0x316   :  { %1542 = vmatpush1.msra.mxu0 %v13130_v32  ;;  %1613 = vmatpush1.msra.mxu1 %v13131_v33  ;;  %v13168_v32 = vld [vmem:[#allocation58_spill] sm:$0xff]  ;;  %v13169_v33 = vld [vmem:[#allocation59_spill] sm:$0xff] }
 0x317   :  { %1543 = vmatprep.subr.mxu0 %v13132_v34  ;;  %1614 = vmatprep.subr.mxu1 %v13133_v35  ;;  %v13170_v34 = vld [vmem:[#allocation60_spill] sm:$0xff]  ;;  %v13171_v35 = vld [vmem:[#allocation61_spill] sm:$0xff] }
 0x318   :  { %1544 = vmatpush1.msra.mxu0 %v13134_v36  ;;  %1615 = vmatpush1.msra.mxu1 %v13135_v37  ;;  %v5770_v36 = vpop.eup %5769  ;;  %v13172_v37 = vld [vmem:[#allocation62_spill] sm:$0xff] }
 0x319   :  { %1545 = vmatprep.subr.mxu0 %v13136_v39  ;;  %1616 = vmatprep.subr.mxu1 %v13137_v41  ;;  %v13174_v39 = vld [vmem:[#allocation64_spill] sm:$0xff]  ;;  %v13175_v41 = vld [vmem:[#allocation65_spill] sm:$0xff] }
 0x31a   :  { %1546 = vmatpush1.msra.mxu0 %v13138_v42  ;;  %1617 = vmatpush1.msra.mxu1 %v13139_v44  ;;  %v13176_v44 = vld [vmem:[#allocation66_spill] sm:$0xff] }
 0x31b   :  { %1547 = vmatprep.subr.mxu0 %v13140_v45  ;;  %1618 = vmatprep.subr.mxu1 %v13141_v46  ;;  %v13177_v45 = vld [vmem:[#allocation67_spill] sm:$0xff]  ;;  %v13178_v46 = vld [vmem:[#allocation68_spill] sm:$0xff] }
 0x31c   :  { %1548 = vmatpush1.msra.mxu0 %v13142_v48  ;;  %1619 = vmatpush1.msra.mxu1 %v13143_v49  ;;  %v13179_v48 = vld [vmem:[#allocation69_spill] sm:$0xff]  ;;  %v13180_v49 = vld [vmem:[#allocation70_spill] sm:$0xff] }
 0x31d   :  { %1549 = vmatprep.subr.mxu0 %v13144_v50  ;;  %1620 = vmatprep.subr.mxu1 %v13145_v51  ;;  %v13181_v50 = vld [vmem:[#allocation71_spill] sm:$0xff]  ;;  %v13182_v51 = vld [vmem:[#allocation72_spill] sm:$0xff] }
 0x31e   :  { %1550 = vmatpush1.msra.mxu0 %v13146_v52  ;;  %1621 = vmatpush1.msra.mxu1 %v13147_v53  ;;  %v13183_v52 = vld [vmem:[#allocation73_spill] sm:$0xff]  ;;  %v13184_v53 = vld [vmem:[#allocation74_spill] sm:$0xff] }
 0x31f   :  { %1551 = vmatprep.subr.mxu0 %v13148_v54  ;;  %1622 = vmatprep.subr.mxu1 %v13149_v55  ;;  %v13185_v54 = vld [vmem:[#allocation75_spill] sm:$0xff]  ;;  %v13186_v55 = vld [vmem:[#allocation76_spill] sm:$0xff] }
 0x320   :  { %1552 = vmatpush1.msra.mxu0 %v13150_v56  ;;  %1623 = vmatpush1.msra.mxu1 %v13151_v57  ;;  %v13187_v56 = vld [vmem:[#allocation77_spill] sm:$0xff]  ;;  %v13188_v57 = vld [vmem:[#allocation78_spill] sm:$0xff] }
 0x321   :  { %1553 = vmatprep.subr.mxu0 %v13152_v58  ;;  %1624 = vmatprep.subr.mxu1 %v13153_v59  ;;  %v13189_v58 = vld [vmem:[#allocation79_spill] sm:$0xff]  ;;  %v13190_v59 = vld [vmem:[#allocation80_spill] sm:$0xff] }
 0x322   :  { %1554 = vmatpush1.msra.mxu0 %v13154_v60  ;;  %1625 = vmatpush1.msra.mxu1 %v13155_v61  ;;  %v5772_v42 = vpop.eup %5771  ;;  %v13191_v60 = vld [vmem:[#allocation81_spill] sm:$0xff]  ;;  %v13193_v61 = vld [vmem:[#allocation83_spill] sm:$0xff] }
 0x323   :  { %1555 = vmatprep.subr.mxu0 %v13156_v62  ;;  %1626 = vmatprep.subr.mxu1 %v13157_v63  ;;  %v1079_v47 = vmul.f32 %v5772_v42, %v5770_v36  ;;  %v13194_v62 = vld [vmem:[#allocation84_spill] sm:$0xff]  ;;  %v13195_v63 = vld [vmem:[#allocation85_spill] sm:$0xff] }
 0x324   :  { %1556 = vmatpush1.msra.mxu0 %v13158_v1  ;;  %1627 = vmatpush1.msra.mxu1 %v13159_v2  ;;  %v13196_v1 = vld [vmem:[#allocation86_spill] sm:$0xff]  ;;  %v13197_v2 = vld [vmem:[#allocation87_spill] sm:$0xff]  ;;  %v13210_v36 = vld [vmem:[#allocation100_spill] sm:$0xff] }
 0x325   :  { %1557 = vmatprep.subr.mxu0 %v13160_v27  ;;  %1628 = vmatprep.subr.mxu1 %v13161_v26  ;;  %v13198_v27 = vld [vmem:[#allocation88_spill] sm:$0xff]  ;;  %v13199_v26 = vld [vmem:[#allocation89_spill] sm:$0xff] }
 0x326   :  { %1558 = vmatpush1.msra.mxu0 %v13162_v8  ;;  %1629 = vmatpush1.msra.mxu1 %v13163_v11  ;;  %v13200_v8 = vld [vmem:[#allocation90_spill] sm:$0xff]  ;;  %v13201_v11 = vld [vmem:[#allocation91_spill] sm:$0xff]  ;;  %v13215_v42 = vld [vmem:[#allocation105_spill] sm:$0xff] }
 0x327   :  { %1559 = vmatprep.subr.mxu0 %v13164_v28  ;;  %1630 = vmatprep.subr.mxu1 %v13165_v29  ;;  %v13202_v28 = vld [vmem:[#allocation92_spill] sm:$0xff]  ;;  %v13203_v29 = vld [vmem:[#allocation93_spill] sm:$0xff] }
 0x328   :  { %1560 = vmatpush1.msra.mxu0 %v13166_v30  ;;  %1631 = vmatpush1.msra.mxu1 %v13167_v31  ;;  %v13204_v30 = vld [vmem:[#allocation94_spill] sm:$0xff]  ;;  %v13205_v31 = vld [vmem:[#allocation95_spill] sm:$0xff] }
 0x329   :  { %1561 = vmatprep.subr.mxu0 %v13168_v32  ;;  %1632 = vmatprep.subr.mxu1 %v13169_v33  ;;  %v13206_v32 = vld [vmem:[#allocation96_spill] sm:$0xff]  ;;  %v13207_v33 = vld [vmem:[#allocation97_spill] sm:$0xff] }
 0x32a   :  { %1562 = vmatpush1.msra.mxu0 %v13170_v34  ;;  %1633 = vmatpush1.msra.mxu1 %v13171_v35  ;;  %v13208_v34 = vld [vmem:[#allocation98_spill] sm:$0xff]  ;;  %v13209_v35 = vld [vmem:[#allocation99_spill] sm:$0xff] }
 0x32b   :  { %1563 = vmatprep.subr.mxu0 %v13172_v37  ;;  %1634 = vmatprep.subr.mxu1 %v13173_v38  ;;  %v13211_v37 = vld [vmem:[#allocation101_spill] sm:$0xff]  ;;  %v13212_v38 = vld [vmem:[#allocation102_spill] sm:$0xff] }
 0x32c   :  { %1564 = vmatpush1.msra.mxu0 %v13174_v39  ;;  %1635 = vmatpush1.msra.mxu1 %v13175_v41  ;;  %v13213_v39 = vld [vmem:[#allocation103_spill] sm:$0xff]  ;;  %v13214_v41 = vld [vmem:[#allocation104_spill] sm:$0xff] }
 0x32d   :  { %1565 = vmatprep.subr.mxu0 %v13176_v44  ;;  %1636 = vmatprep.subr.mxu1 %v13177_v45  ;;  %v13216_v44 = vld [vmem:[#allocation106_spill] sm:$0xff]  ;;  %v13217_v45 = vld [vmem:[#allocation107_spill] sm:$0xff] }
 0x32e   :  { %1566 = vmatpush1.msra.mxu0 %v13178_v46  ;;  %1599 = vmatprep.mubr.f32.mxu0 %v12905_v24  ;;  %v13218_v46 = vld [vmem:[#allocation108_spill] sm:$0xff] }
 0x32f   :  { %1637 = vmatpush1.msra.mxu1 %v13179_v48  ;;  %1670 = vmatprep.mubr.f32.mxu1 %v12905_v24  ;;  %v13220_v48 = vld [vmem:[#allocation110_spill] sm:$0xff] }
 0x330   :  { %1600 = vmatmul.mubr.f32.vlgmr.msra.gmra.mxu0 %v1079_v47  ;;  %1671 = vmatmul.mubr.f32.vlgmr.msra.gmra.mxu1 %v1079_v47  ;;  %v13219_v47 = vld [vmem:[#allocation109_spill] sm:$0xff] }
 0x331   :  { %1711 = vmatprep.subr.mxu0 %v13180_v49  ;;  %1775 = vmatprep.mubr.f32.mxu0 %v8310_v7  ;;  %v13221_v49 = vld [vmem:[#allocation111_spill] sm:$0xff] }
 0x332   :  { %1712 = vmatpush1.msra.mxu0 %v13181_v50  ;;  %1846 = vmatprep.mubr.f32.mxu1 %v8310_v7  ;;  %v13192_v7 = vld [vmem:[#allocation82_spill] sm:$0xff]  ;;  %v13222_v50 = vld [vmem:[#allocation112_spill] sm:$0xff] }
 0x333   :  { %1713 = vmatprep.subr.mxu0 %v13182_v51  ;;  %1782 = vmatprep.subr.mxu1 %v13183_v52  ;;  %v13223_v51 = vld [vmem:[#allocation113_spill] sm:$0xff]  ;;  %v13224_v52 = vld [vmem:[#allocation114_spill] sm:$0xff] }
 0x334   :  { %1714 = vmatpush1.msra.mxu0 %v13184_v53  ;;  %1783 = vmatpush1.msra.mxu1 %v13185_v54  ;;  %v13225_v53 = vld [vmem:[#allocation115_spill] sm:$0xff]  ;;  %v13226_v54 = vld [vmem:[#allocation116_spill] sm:$0xff] }
 0x335   :  { %1715 = vmatprep.subr.mxu0 %v13186_v55  ;;  %1784 = vmatprep.subr.mxu1 %v13187_v56  ;;  %v13227_v55 = vld [vmem:[#allocation117_spill] sm:$0xff]  ;;  %v13228_v56 = vld [vmem:[#allocation118_spill] sm:$0xff] }
 0x336   :  { %1716 = vmatpush1.msra.mxu0 %v13188_v57  ;;  %1785 = vmatpush1.msra.mxu1 %v13189_v58  ;;  %v13229_v57 = vld [vmem:[#allocation119_spill] sm:$0xff]  ;;  %v13230_v58 = vld [vmem:[#allocation120_spill] sm:$0xff] }
 0x337   :  { %1717 = vmatprep.subr.mxu0 %v13190_v59  ;;  %1786 = vmatprep.subr.mxu1 %v13191_v60  ;;  %v13231_v59 = vld [vmem:[#allocation121_spill] sm:$0xff]  ;;  %v13232_v60 = vld [vmem:[#allocation122_spill] sm:$0xff] }
 0x338   :  { %1718 = vmatpush1.msra.mxu0 %v13192_v7  ;;  %1787 = vmatpush1.msra.mxu1 %v13193_v61  ;;  %v13233_v7 = vld [vmem:[#allocation123_spill] sm:$0xff]  ;;  %v13234_v61 = vld [vmem:[#allocation124_spill] sm:$0xff] }
 0x339   :  { %1719 = vmatprep.subr.mxu0 %v13194_v62  ;;  %1788 = vmatprep.subr.mxu1 %v13195_v63  ;;  %v13235_v62 = vld [vmem:[#allocation125_spill] sm:$0xff]  ;;  %v13236_v63 = vld [vmem:[#allocation126_spill] sm:$0xff] }
 0x33a   :  { %1720 = vmatpush1.msra.mxu0 %v13196_v1  ;;  %1789 = vmatpush1.msra.mxu1 %v13197_v2  ;;  %v13237_v1 = vld [vmem:[#allocation127_spill] sm:$0xff]  ;;  %v13238_v2 = vld [vmem:[#allocation128_spill] sm:$0xff] }
 0x33b   :  { %1721 = vmatprep.subr.mxu0 %v13198_v27  ;;  %1790 = vmatprep.subr.mxu1 %v13199_v26  ;;  %v13239_v27 = vld [vmem:[#allocation129_spill] sm:$0xff]  ;;  %v13240_v26 = vld [vmem:[#allocation130_spill] sm:$0xff] }
 0x33c   :  { %1722 = vmatpush1.msra.mxu0 %v13200_v8  ;;  %1791 = vmatpush1.msra.mxu1 %v13201_v11  ;;  %v13241_v8 = vld [vmem:[#allocation131_spill] sm:$0xff]  ;;  %v13242_v11 = vld [vmem:[#allocation132_spill] sm:$0xff] }
 0x33d   :  { %1723 = vmatprep.subr.mxu0 %v13202_v28  ;;  %1792 = vmatprep.subr.mxu1 %v13203_v29  ;;  %v13243_v28 = vld [vmem:[#allocation133_spill] sm:$0xff]  ;;  %v13244_v29 = vld [vmem:[#allocation134_spill] sm:$0xff] }
 0x33e   :  { %1724 = vmatpush1.msra.mxu0 %v13204_v30  ;;  %1793 = vmatpush1.msra.mxu1 %v13205_v31  ;;  %v13245_v30 = vld [vmem:[#allocation135_spill] sm:$0xff]  ;;  %v13246_v31 = vld [vmem:[#allocation136_spill] sm:$0xff] }
 0x33f   :  { %1725 = vmatprep.subr.mxu0 %v13206_v32  ;;  %1794 = vmatprep.subr.mxu1 %v13207_v33  ;;  %v13247_v32 = vld [vmem:[#allocation137_spill] sm:$0xff]  ;;  %v13248_v33 = vld [vmem:[#allocation138_spill] sm:$0xff] }
 0x340   :  { %1726 = vmatpush1.msra.mxu0 %v13208_v34  ;;  %1795 = vmatpush1.msra.mxu1 %v13209_v35  ;;  %v13249_v34 = vld [vmem:[#allocation139_spill] sm:$0xff]  ;;  %v13250_v35 = vld [vmem:[#allocation140_spill] sm:$0xff] }
 0x341   :  { %1727 = vmatprep.subr.mxu0 %v13210_v36  ;;  %1796 = vmatprep.subr.mxu1 %v13211_v37  ;;  %v13251_v36 = vld [vmem:[#allocation141_spill] sm:$0xff]  ;;  %v13252_v37 = vld [vmem:[#allocation142_spill] sm:$0xff] }
 0x342   :  { %1728 = vmatpush1.msra.mxu0 %v13212_v38  ;;  %1797 = vmatpush1.msra.mxu1 %v13213_v39  ;;  %v13253_v38 = vld [vmem:[#allocation143_spill] sm:$0xff]  ;;  %v13254_v39 = vld [vmem:[#allocation144_spill] sm:$0xff] }
 0x343   :  { %1729 = vmatprep.subr.mxu0 %v13214_v41  ;;  %1798 = vmatprep.subr.mxu1 %v13215_v42  ;;  %v13255_v41 = vld [vmem:[#allocation145_spill] sm:$0xff]  ;;  %v13256_v42 = vld [vmem:[#allocation146_spill] sm:$0xff] }
 0x344   :  { %1730 = vmatpush1.msra.mxu0 %v13216_v44  ;;  %1799 = vmatpush1.msra.mxu1 %v13217_v45  ;;  %v13257_v44 = vld [vmem:[#allocation147_spill] sm:$0xff]  ;;  %v13258_v45 = vld [vmem:[#allocation148_spill] sm:$0xff] }
 0x345   :  { %1731 = vmatprep.subr.mxu0 %v13218_v46  ;;  %1800 = vmatprep.subr.mxu1 %v13219_v47  ;;  %v13259_v46 = vld [vmem:[#allocation149_spill] sm:$0xff]  ;;  %v13260_v47 = vld [vmem:[#allocation150_spill] sm:$0xff] }
 0x346   :  { %1732 = vmatpush1.msra.mxu0 %v13220_v48  ;;  %1801 = vmatpush1.msra.mxu1 %v13221_v49  ;;  %v13261_v48 = vld [vmem:[#allocation151_spill] sm:$0xff]  ;;  %v13262_v49 = vld [vmem:[#allocation152_spill] sm:$0xff] }
 0x347   :  { %1733 = vmatprep.subr.mxu0 %v13222_v50  ;;  %1802 = vmatprep.subr.mxu1 %v13223_v51  ;;  %v13263_v50 = vld [vmem:[#allocation153_spill] sm:$0xff]  ;;  %v13264_v51 = vld [vmem:[#allocation154_spill] sm:$0xff] }
 0x348   :  { %1734 = vmatpush1.msra.mxu0 %v13224_v52  ;;  %1803 = vmatpush1.msra.mxu1 %v13225_v53  ;;  %v13265_v52 = vld [vmem:[#allocation155_spill] sm:$0xff]  ;;  %v13266_v53 = vld [vmem:[#allocation156_spill] sm:$0xff] }
 0x349   :  { %1735 = vmatprep.subr.mxu0 %v13226_v54  ;;  %1804 = vmatprep.subr.mxu1 %v13227_v55  ;;  %v13267_v54 = vld [vmem:[#allocation157_spill] sm:$0xff]  ;;  %v13268_v55 = vld [vmem:[#allocation158_spill] sm:$0xff] }
 0x34a   :  { %1736 = vmatpush1.msra.mxu0 %v13228_v56  ;;  %1805 = vmatpush1.msra.mxu1 %v13229_v57  ;;  %v13269_v56 = vld [vmem:[#allocation159_spill] sm:$0xff]  ;;  %v13270_v57 = vld [vmem:[#allocation160_spill] sm:$0xff] }
 0x34b   :  { %1737 = vmatprep.subr.mxu0 %v13230_v58  ;;  %1806 = vmatprep.subr.mxu1 %v13231_v59  ;;  %v13271_v58 = vld [vmem:[#allocation161_spill] sm:$0xff]  ;;  %v13272_v59 = vld [vmem:[#allocation162_spill] sm:$0xff] }
 0x34c   :  { %1738 = vmatpush1.msra.mxu0 %v13232_v60  ;;  %1807 = vmatpush1.msra.mxu1 %v13233_v7  ;;  %v13273_v60 = vld [vmem:[#allocation163_spill] sm:$0xff]  ;;  %v13274_v7 = vld [vmem:[#allocation164_spill] sm:$0xff] }
 0x34d   :  { %1739 = vmatprep.subr.mxu0 %v13234_v61  ;;  %1808 = vmatprep.subr.mxu1 %v13235_v62  ;;  %v13275_v61 = vld [vmem:[#allocation165_spill] sm:$0xff]  ;;  %v13276_v62 = vld [vmem:[#allocation166_spill] sm:$0xff] }
 0x34e   :  { %1740 = vmatpush1.msra.mxu0 %v13236_v63  ;;  %1809 = vmatpush1.msra.mxu1 %v13237_v1  ;;  %v13277_v63 = vld [vmem:[#allocation167_spill] sm:$0xff]  ;;  %v13278_v1 = vld [vmem:[#allocation168_spill] sm:$0xff] }
 0x34f   :  { %1741 = vmatprep.subr.mxu0 %v13238_v2  ;;  %1810 = vmatprep.subr.mxu1 %v13239_v27  ;;  %v13279_v2 = vld [vmem:[#allocation169_spill] sm:$0xff]  ;;  %v13280_v27 = vld [vmem:[#allocation170_spill] sm:$0xff] }
 0x350   :  { %1742 = vmatpush1.msra.mxu0 %v13240_v26  ;;  %1811 = vmatpush1.msra.mxu1 %v13241_v8  ;;  %v13281_v26 = vld [vmem:[#allocation171_spill] sm:$0xff]  ;;  %v13282_v8 = vld [vmem:[#allocation172_spill] sm:$0xff] }
 0x351   :  { %1743 = vmatprep.subr.mxu0 %v13242_v11  ;;  %1812 = vmatprep.subr.mxu1 %v13243_v28  ;;  %v13283_v11 = vld [vmem:[#allocation173_spill] sm:$0xff]  ;;  %v13284_v28 = vld [vmem:[#allocation174_spill] sm:$0xff] }
 0x352   :  { %1744 = vmatpush2.msra.mxu0 %v13244_v29  ;;  %1813 = vmatpush1.msra.mxu1 %v13245_v30  ;;  %v13285_v29 = vld [vmem:[#allocation175_spill] sm:$0xff]  ;;  %v13286_v30 = vld [vmem:[#allocation176_spill] sm:$0xff] }
 0x353   :  { %1745 = vmatprep.subr.mxu0 %v13246_v31  ;;  %1814 = vmatprep.subr.mxu1 %v13247_v32  ;;  %v13287_v31 = vld [vmem:[#allocation177_spill] sm:$0xff]  ;;  %v13288_v32 = vld [vmem:[#allocation178_spill] sm:$0xff] }
 0x354   :  { %1746 = vmatpush2.msra.mxu0 %v13248_v33  ;;  %1815 = vmatpush2.msra.mxu1 %v13249_v34  ;;  %v13289_v33 = vld [vmem:[#allocation179_spill] sm:$0xff]  ;;  %v13290_v34 = vld [vmem:[#allocation180_spill] sm:$0xff] }
 0x355   :  { %1747 = vmatprep.subr.mxu0 %v13250_v35  ;;  %1816 = vmatprep.subr.mxu1 %v13251_v36  ;;  %v13291_v35 = vld [vmem:[#allocation181_spill] sm:$0xff]  ;;  %v13292_v36 = vld [vmem:[#allocation182_spill] sm:$0xff] }
 0x356   :  { %1748 = vmatpush2.msra.mxu0 %v13252_v37  ;;  %1817 = vmatpush2.msra.mxu1 %v13253_v38  ;;  %v13293_v37 = vld [vmem:[#allocation183_spill] sm:$0xff]  ;;  %v13294_v38 = vld [vmem:[#allocation184_spill] sm:$0xff] }
 0x357   :  { %1749 = vmatprep.subr.mxu0 %v13254_v39  ;;  %1818 = vmatprep.subr.mxu1 %v13255_v41  ;;  %v13295_v39 = vld [vmem:[#allocation185_spill] sm:$0xff]  ;;  %v13296_v41 = vld [vmem:[#allocation186_spill] sm:$0xff] }
 0x358   :  { %1750 = vmatpush2.msra.mxu0 %v13256_v42  ;;  %1819 = vmatpush2.msra.mxu1 %v13257_v44  ;;  %v13297_v42 = vld [vmem:[#allocation187_spill] sm:$0xff]  ;;  %v13298_v44 = vld [vmem:[#allocation188_spill] sm:$0xff] }
 0x359   :  { %1751 = vmatprep.subr.mxu0 %v13258_v45  ;;  %1820 = vmatprep.subr.mxu1 %v13259_v46  ;;  %v13299_v45 = vld [vmem:[#allocation189_spill] sm:$0xff]  ;;  %v13300_v46 = vld [vmem:[#allocation190_spill] sm:$0xff] }
 0x35a   :  { %1752 = vmatpush2.msra.mxu0 %v13260_v47  ;;  %1821 = vmatpush2.msra.mxu1 %v13261_v48  ;;  %v5621_v47 = vld [vmem:[%s11964_s0 + $0x8] sm:$0xf] }
 0x35b   :  { %1753 = vmatprep.subr.mxu0 %v13262_v49  ;;  %1822 = vmatprep.subr.mxu1 %v13263_v50  ;;  %v13301_v48 = vld [vmem:[#allocation191_spill] sm:$0xff]  ;;  %v13302_v49 = vld [vmem:[#allocation192_spill] sm:$0xff]  ;;  %v13303_v50 = vld [vmem:[#allocation193_spill] sm:$0xff] }
 0x35c   :  { %1754 = vmatpush2.msra.mxu0 %v13264_v51  ;;  %1823 = vmatpush2.msra.mxu1 %v13265_v52  ;;  %v13304_v51 = vld [vmem:[#allocation194_spill] sm:$0xff]  ;;  %v13305_v52 = vld [vmem:[#allocation195_spill] sm:$0xff] }
 0x35d   :  { %1755 = vmatprep.subr.mxu0 %v13266_v53  ;;  %1824 = vmatprep.subr.mxu1 %v13267_v54  ;;  %v13306_v53 = vld [vmem:[#allocation196_spill] sm:$0xff]  ;;  %v13307_v54 = vld [vmem:[#allocation197_spill] sm:$0xff] }
 0x35e   :  { %1756 = vmatpush2.msra.mxu0 %v13268_v55  ;;  %1825 = vmatpush2.msra.mxu1 %v13269_v56  ;;  %v13308_v55 = vld [vmem:[#allocation198_spill] sm:$0xff]  ;;  %v13309_v56 = vld [vmem:[#allocation199_spill] sm:$0xff] }
 0x35f   :  { %1757 = vmatprep.subr.mxu0 %v13270_v57  ;;  %1826 = vmatprep.subr.mxu1 %v13271_v58  ;;  %v13310_v57 = vld [vmem:[#allocation200_spill] sm:$0xff]  ;;  %v13311_v58 = vld [vmem:[#allocation201_spill] sm:$0xff] }
 0x360   :  { %1758 = vmatpush2.msra.mxu0 %v13272_v59  ;;  %1827 = vmatpush2.msra.mxu1 %v13273_v60  ;;  %v13312_v59 = vld [vmem:[#allocation202_spill] sm:$0xff]  ;;  %v13313_v60 = vld [vmem:[#allocation203_spill] sm:$0xff] }
 0x361   :  { %1759 = vmatprep.subr.mxu0 %v13274_v7  ;;  %1828 = vmatprep.subr.mxu1 %v13275_v61  ;;  %v13314_v7 = vld [vmem:[#allocation204_spill] sm:$0xff]  ;;  %v13315_v61 = vld [vmem:[#allocation205_spill] sm:$0xff] }
 0x362   :  { %1760 = vmatpush2.msra.mxu0 %v13276_v62  ;;  %1829 = vmatpush2.msra.mxu1 %v13277_v63  ;;  %v13316_v62 = vld [vmem:[#allocation206_spill] sm:$0xff]  ;;  %v13317_v63 = vld [vmem:[#allocation207_spill] sm:$0xff] }
 0x363   :  { %1761 = vmatprep.subr.mxu0 %v13278_v1  ;;  %1830 = vmatprep.subr.mxu1 %v13279_v2  ;;  %v13318_v1 = vld [vmem:[#allocation208_spill] sm:$0xff]  ;;  %v13319_v2 = vld [vmem:[#allocation209_spill] sm:$0xff] }
 0x364   :  { %1762 = vmatpush2.msra.mxu0 %v13280_v27  ;;  %1831 = vmatpush2.msra.mxu1 %v13281_v26  ;;  %v13320_v27 = vld [vmem:[#allocation210_spill] sm:$0xff]  ;;  %v13321_v26 = vld [vmem:[#allocation211_spill] sm:$0xff] }
 0x365   :  { %1763 = vmatprep.subr.mxu0 %v13282_v8  ;;  %1832 = vmatprep.subr.mxu1 %v13283_v11  ;;  %v13322_v8 = vld [vmem:[#allocation212_spill] sm:$0xff]  ;;  %v13323_v11 = vld [vmem:[#allocation213_spill] sm:$0xff] }
 0x366   :  { %1764 = vmatpush2.msra.mxu0 %v13284_v28  ;;  %1833 = vmatpush2.msra.mxu1 %v13285_v29  ;;  %v13324_v28 = vld [vmem:[#allocation214_spill] sm:$0xff]  ;;  %v13325_v29 = vld [vmem:[#allocation215_spill] sm:$0xff] }
 0x367   :  { %1765 = vmatprep.subr.mxu0 %v13286_v30  ;;  %1834 = vmatprep.subr.mxu1 %v13287_v31  ;;  %v13326_v30 = vld [vmem:[#allocation216_spill] sm:$0xff]  ;;  %v13327_v31 = vld [vmem:[#allocation217_spill] sm:$0xff] }
 0x368   :  { %1766 = vmatpush2.msra.mxu0 %v13288_v32  ;;  %1835 = vmatpush2.msra.mxu1 %v13289_v33  ;;  %v13328_v32 = vld [vmem:[#allocation218_spill] sm:$0xff]  ;;  %v13329_v33 = vld [vmem:[#allocation219_spill] sm:$0xff] }
 0x369   :  { %1767 = vmatprep.subr.mxu0 %v13290_v34  ;;  %1836 = vmatprep.subr.mxu1 %v13291_v35  ;;  %v13330_v34 = vld [vmem:[#allocation220_spill] sm:$0xff]  ;;  %v13331_v35 = vld [vmem:[#allocation221_spill] sm:$0xff] }
 0x36a   :  { %1768 = vmatpush2.msra.mxu0 %v13292_v36  ;;  %1837 = vmatpush2.msra.mxu1 %v13293_v37  ;;  %v13332_v36 = vld [vmem:[#allocation222_spill] sm:$0xff]  ;;  %v13333_v37 = vld [vmem:[#allocation223_spill] sm:$0xff] }
 0x36b   :  { %1769 = vmatprep.subr.mxu0 %v13294_v38  ;;  %1838 = vmatprep.subr.mxu1 %v13295_v39  ;;  %v13334_v38 = vld [vmem:[#allocation224_spill] sm:$0xff]  ;;  %v13335_v39 = vld [vmem:[#allocation225_spill] sm:$0xff] }
 0x36c   :  { %1770 = vmatpush2.msra.mxu0 %v13296_v41  ;;  %1839 = vmatpush2.msra.mxu1 %v13297_v42  ;;  %v13336_v41 = vld [vmem:[#allocation226_spill] sm:$0xff]  ;;  %v13337_v42 = vld [vmem:[#allocation227_spill] sm:$0xff] }
 0x36d   :  { %1771 = vmatprep.subr.mxu0 %v13298_v44  ;;  %1840 = vmatprep.subr.mxu1 %v13299_v45  ;;  %v13338_v44 = vld [vmem:[#allocation228_spill] sm:$0xff]  ;;  %v13339_v45 = vld [vmem:[#allocation229_spill] sm:$0xff] }
 0x36e   :  { %1772 = vmatpush2.msra.mxu0 %v13300_v46  ;;  %1841 = vmatpush2.msra.mxu1 %v13301_v48  ;;  %v13340_v46 = vld [vmem:[#allocation230_spill] sm:$0xff]  ;;  %v13342_v48 = vld [vmem:[#allocation232_spill] sm:$0xff] }
 0x36f   :  { %1773 = vmatprep.subr.mxu0 %v13302_v49  ;;  %1842 = vmatprep.subr.mxu1 %v13303_v50  ;;  %v13343_v49 = vld [vmem:[#allocation233_spill] sm:$0xff]  ;;  %v13344_v50 = vld [vmem:[#allocation234_spill] sm:$0xff] }
 0x370   :  { %1774 = vmatpush2.msra.mxu0 %v13304_v51  ;;  %1843 = vmatpush2.msra.mxu1 %v13305_v52  ;;  %v13345_v51 = vld [vmem:[#allocation235_spill] sm:$0xff]  ;;  %v13346_v52 = vld [vmem:[#allocation236_spill] sm:$0xff] }
 0x371   :  { %1776 = vmatmul.mubr.f32.vlgmr.msra.gmra.mxu0 %v5621_v47  ;;  %1844 = vmatprep.subr.mxu1 %v13306_v53  ;;  %v13347_v53 = vld [vmem:[#allocation237_spill] sm:$0xff] }
 0x372   :  { %1845 = vmatpush2.msra.mxu1 %v13307_v54  ;;  %1880 = vmatprep.subr.mxu0 %v13308_v55  ;;  %v13348_v54 = vld [vmem:[#allocation238_spill] sm:$0xff]  ;;  %v13349_v55 = vld [vmem:[#allocation239_spill] sm:$0xff] }
 0x373   :  { %1847 = vmatmul.mubr.f32.vlgmr.msra.gmra.mxu1 %v5621_v47  ;;  %1951 = vmatprep.subr.mxu1 %v13309_v56  ;;  %v13341_v47 = vld [vmem:[#allocation231_spill] sm:$0xff]  ;;  %v13350_v56 = vld [vmem:[#allocation240_spill] sm:$0xff] }
 0x374   :  { %1881 = vmatpush1.msra.mxu0 %v13310_v57  ;;  %1952 = vmatpush1.msra.mxu1 %v13311_v58  ;;  %v13351_v57 = vld [vmem:[#allocation241_spill] sm:$0xff]  ;;  %v13352_v58 = vld [vmem:[#allocation242_spill] sm:$0xff] }
 0x375   :  { %1882 = vmatprep.subr.mxu0 %v13312_v59  ;;  %1953 = vmatprep.subr.mxu1 %v13313_v60  ;;  %v13353_v59 = vld [vmem:[#allocation243_spill] sm:$0xff]  ;;  %v13354_v60 = vld [vmem:[#allocation244_spill] sm:$0xff] }
 0x376   :  { %1883 = vmatpush1.msra.mxu0 %v13314_v7  ;;  %1954 = vmatpush1.msra.mxu1 %v13315_v61  ;;  %v13355_v7 = vld [vmem:[#allocation245_spill] sm:$0xff]  ;;  %v13356_v61 = vld [vmem:[#allocation246_spill] sm:$0xff] }
 0x377   :  { %1884 = vmatprep.subr.mxu0 %v13316_v62  ;;  %1955 = vmatprep.subr.mxu1 %v13317_v63  ;;  %v13357_v62 = vld [vmem:[#allocation247_spill] sm:$0xff]  ;;  %v13358_v63 = vld [vmem:[#allocation248_spill] sm:$0xff] }
 0x378   :  { %1885 = vmatpush1.msra.mxu0 %v13318_v1  ;;  %1956 = vmatpush1.msra.mxu1 %v13319_v2  ;;  %v13359_v1 = vld [vmem:[#allocation249_spill] sm:$0xff]  ;;  %v13360_v2 = vld [vmem:[#allocation250_spill] sm:$0xff] }
 0x379   :  { %1886 = vmatprep.subr.mxu0 %v13320_v27  ;;  %1957 = vmatprep.subr.mxu1 %v13321_v26  ;;  %v13361_v27 = vld [vmem:[#allocation251_spill] sm:$0xff]  ;;  %v13362_v26 = vld [vmem:[#allocation252_spill] sm:$0xff] }
 0x37a   :  { %1887 = vmatpush1.msra.mxu0 %v13322_v8  ;;  %1958 = vmatpush1.msra.mxu1 %v13323_v11  ;;  %v13363_v8 = vld [vmem:[#allocation253_spill] sm:$0xff]  ;;  %v13364_v11 = vld [vmem:[#allocation254_spill] sm:$0xff] }
 0x37b   :  { %1888 = vmatprep.subr.mxu0 %v13324_v28  ;;  %1959 = vmatprep.subr.mxu1 %v13325_v29  ;;  %v13365_v28 = vld [vmem:[#allocation255_spill] sm:$0xff]  ;;  %v13366_v29 = vld [vmem:[#allocation256_spill] sm:$0xff] }
 0x37c   :  { %1889 = vmatpush1.msra.mxu0 %v13326_v30  ;;  %1960 = vmatpush1.msra.mxu1 %v13327_v31  ;;  %v13367_v30 = vld [vmem:[#allocation257_spill] sm:$0xff]  ;;  %v13368_v31 = vld [vmem:[#allocation258_spill] sm:$0xff] }
 0x37d   :  { %1890 = vmatprep.subr.mxu0 %v13328_v32  ;;  %1961 = vmatprep.subr.mxu1 %v13329_v33  ;;  %v13369_v32 = vld [vmem:[#allocation259_spill] sm:$0xff]  ;;  %v13370_v33 = vld [vmem:[#allocation260_spill] sm:$0xff] }
 0x37e   :  { %1891 = vmatpush1.msra.mxu0 %v13330_v34  ;;  %1962 = vmatpush1.msra.mxu1 %v13331_v35  ;;  %v8721_v34 = vld [vmem:[#allocation7 + $0x10] sm:$0xff] }
 0x37f   :  { %1892 = vmatprep.subr.mxu0 %v13332_v36  ;;  %1963 = vmatprep.subr.mxu1 %v13333_v37  ;;  %v13371_v35 = vld [vmem:[#allocation261_spill] sm:$0xff]  ;;  %v13372_v36 = vld [vmem:[#allocation262_spill] sm:$0xff] }
 0x380   :  { %1893 = vmatpush1.msra.mxu0 %v13334_v38  ;;  %1964 = vmatpush1.msra.mxu1 %v13335_v39 }
 0x381   :  { %1894 = vmatprep.subr.mxu0 %v13336_v41  ;;  %1965 = vmatprep.subr.mxu1 %v13337_v42 }
 0x382   :  { %1895 = vmatpush1.msra.mxu0 %v13338_v44  ;;  %1966 = vmatpush1.msra.mxu1 %v13339_v45 }
 0x383   :  { %1896 = vmatprep.subr.mxu0 %v13340_v46  ;;  %1967 = vmatprep.subr.mxu1 %v13341_v47 }
 0x384   :  { %1897 = vmatpush1.msra.mxu0 %v13342_v48  ;;  %1968 = vmatpush1.msra.mxu1 %v13343_v49 }
 0x385   :  { %1898 = vmatprep.subr.mxu0 %v13344_v50  ;;  %1969 = vmatprep.subr.mxu1 %v13345_v51 }
 0x386   :  { %1899 = vmatpush1.msra.mxu0 %v13346_v52  ;;  %1970 = vmatpush1.msra.mxu1 %v13347_v53 }
 0x387   :  { %1900 = vmatprep.subr.mxu0 %v13348_v54  ;;  %1971 = vmatprep.subr.mxu1 %v13349_v55 }
 0x388   :  { %1901 = vmatpush1.msra.mxu0 %v13350_v56  ;;  %1972 = vmatpush1.msra.mxu1 %v13351_v57 }
 0x389   :  { %1902 = vmatprep.subr.mxu0 %v13352_v58  ;;  %1973 = vmatprep.subr.mxu1 %v13353_v59 }
 0x38a   :  { %1903 = vmatpush1.msra.mxu0 %v13354_v60  ;;  %1974 = vmatpush1.msra.mxu1 %v13355_v7 }
 0x38b   :  { %1904 = vmatprep.subr.mxu0 %v13356_v61  ;;  %1975 = vmatprep.subr.mxu1 %v13357_v62 }
 0x38c   :  { %1905 = vmatpush1.msra.mxu0 %v13358_v63  ;;  %1976 = vmatpush1.msra.mxu1 %v13359_v1 }
 0x38d   :  { %1906 = vmatprep.subr.mxu0 %v13360_v2  ;;  %1977 = vmatprep.subr.mxu1 %v13361_v27 }
 0x38e   :  { %1907 = vmatpush1.msra.mxu0 %v13362_v26  ;;  %1978 = vmatpush1.msra.mxu1 %v13363_v8 }
 0x38f   :  { %1908 = vmatprep.subr.mxu0 %v13364_v11  ;;  %1979 = vmatprep.subr.mxu1 %v13365_v28 }
 0x390   :  { %1909 = vmatpush1.msra.mxu0 %v13366_v29  ;;  %1980 = vmatpush1.msra.mxu1 %v13367_v30 }
 0x391   :  { %1910 = vmatprep.subr.mxu0 %v13368_v31  ;;  %1981 = vmatprep.subr.mxu1 %v13369_v32 }
 0x392   :  { %1911 = vmatpush1.msra.mxu0 %v13370_v33  ;;  %1982 = vmatpush1.msra.mxu1 %v8721_v34 }
 0x393   :  { %1944 = vmatprep.mubr.f32.mxu0 %v12905_v24  ;;  %2015 = vmatprep.mubr.f32.mxu1 %v12905_v24 }
 0x394   :  { %2022 = vmatprep.subr.mxu0 %v13371_v35  ;;  %2093 = vmatprep.subr.mxu1 %v13372_v36  ;;  %v13373_v36 = vld [vmem:[#allocation15_spill] sm:$0xff] }
 0x3ad   :  { %v1317_v37 = vpop.f32.mrf.mxu0  ;;  %v1388_v38 = vpop.f32.mrf.mxu1 }
 0x3af   :  { %v1319_v39 = vpop.f32.mrf.mxu0  ;;  %v1390_v41 = vpop.f32.mrf.mxu1 }
 0x3ce   :  { %v1459_v42 = vpop.f32.mrf.mxu0  ;;  %v1530_v44 = vpop.f32.mrf.mxu1 }
 0x3cf   :  { %v1460_v45 = vadd.f32 %v1459_v42, %v1317_v37  ;;  %v1531_v46 = vadd.f32 %v1530_v44, %v1388_v38 }
 0x3d0   :  { %v1461_v47 = vpop.f32.mrf.mxu0  ;;  %v1532_v48 = vpop.f32.mrf.mxu1 }
 0x3d1   :  { %v1462_v49 = vadd.f32 %v1461_v47, %v1319_v39  ;;  %v1533_v50 = vadd.f32 %v1532_v48, %v1390_v41 }
 0x3f0   :  { %v1601_v51 = vpop.f32.mrf.mxu0  ;;  %v1672_v52 = vpop.f32.mrf.mxu1 }
 0x3f1   :  { %v1677_v53 = vadd.f32 %v1601_v51, %v1460_v45  ;;  %v1679_v54 = vadd.f32 %v1672_v52, %v1531_v46 }
 0x3f2   :  { %v1603_v55 = vpop.f32.mrf.mxu0  ;;  %v1674_v56 = vpop.f32.mrf.mxu1 }
 0x3f3   :  { %v1681_v57 = vadd.f32 %v1677_v53, %v8283_v43  ;;  %v1678_v58 = vadd.f32 %v1603_v55, %v1462_v49  ;;  %v8729_v59 = vadd.f32 %v1674_v56, %v1533_v50  ;;  %v1683_v62 = vadd.f32 %v1679_v54, %v8297_v14 }
 0x3f5   :  { %v5618_v60 = vmul.f32 -1.442695, %v1681_v57  ;;  %v1682_v7 = vadd.f32 %v1678_v58, %v8288_v19 }
 0x3f7   :  { %5773 = vpow2.f32 %v5618_v60  ;;  %v5619_v61 = vmul.f32 -1.442695, %v1682_v7 }
 0x3f9   :  { %5775 = vpow2.f32 %v5619_v61  ;;  %v13375_v61 = vld [vmem:[#allocation264_spill] sm:$0xff] }
 0x3fa   :  { %5777 = vtanh.f32 %v1683_v62  ;;  %v13385_v62 = vld [vmem:[#allocation274_spill] sm:$0xff] }
 0x404   :  { %v5774_v63 = vpop.eup %5773 }
 0x405   :  { %v1688_v1 = vadd.f32 1.0, %v5774_v63  ;;  %v13386_v63 = vld [vmem:[#allocation275_spill] sm:$0xff] }
 0x406   :  { %v5776_v2 = vpop.eup %5775 }
 0x407   :  { %5779 = vrcp.f32 %v1688_v1  ;;  %v1694_v27 = vadd.f32 1.0, %v5776_v2  ;;  %v5778_v26 = vpop.eup %5777  ;;  %v13387_v1 = vld [vmem:[#allocation276_spill] sm:$0xff]  ;;  %v13388_v2 = vld [vmem:[#allocation277_spill] sm:$0xff] }
 0x409   :  { %5781 = vrcp.f32 %v1694_v27  ;;  %v13389_v27 = vld [vmem:[#allocation278_spill] sm:$0xff] }
 0x414   :  { %v5780_v8 = vpop.eup %5779 }
 0x415   :  { %v1705_v11 = vmul.f32 %v5780_v8, %v5778_v26  ;;  %v13390_v26 = vld [vmem:[#allocation279_spill] sm:$0xff]  ;;  %v13391_v8 = vld [vmem:[#allocation280_spill] sm:$0xff] }
 0x416   :  { %v5782_v28 = vpop.eup %5781 }
 0x417   :  { %v1704_v29 = vmul.f32 %v5782_v28, %v8300_v5  ;;  %v13393_v28 = vld [vmem:[#allocation282_spill] sm:$0xff] }
 0x419   :  { %v8734_v30 = vadd.f32 %v1705_v11, %v1704_v29  ;;  %v13392_v11 = vld [vmem:[#allocation281_spill] sm:$0xff]  ;;  %v13394_v29 = vld [vmem:[#allocation283_spill] sm:$0xff] }
 0x431   :  { %v1777_v31 = vpop.f32.mrf.mxu0 }
 0x432   :  { %v1778_v32 = vadd.f32 %v1777_v31, %v7384_v12  ;;  %v13395_v31 = vld [vmem:[#allocation284_spill] sm:$0xff] }
 0x433   :  { %v1779_v33 = vpop.f32.mrf.mxu0  ;;  %v1848_v39 = vpop.f32.mrf.mxu1 }
 0x434   :  { %v5622_v35 = vmul.f32 -1.442695, %v1778_v32  ;;  %v1780_v37 = vadd.f32 %v1779_v33, %v13373_v36  ;;  %v1849_v44 = vadd.f32 %v1848_v39, %v7400_v25  ;;  %v13396_v32 = vld [vmem:[#allocation285_spill] sm:$0xff]  ;;  %v8783_v33 = vld [vmem:[#allocation5 + $0xc0] sm:$0xff]  ;;  %v1684_v39 = vadd.f32 %v8729_v59, %v8424_v9 }
 0x435   :  { %v1850_v41 = vpop.f32.mrf.mxu1  ;;  %v8824_v59 = vld [vmem:[#allocation5 + $0x70] sm:$0xff] }
 0x436   :  { %5783 = vpow2.f32 %v5622_v35  ;;  %v5623_v38 = vmul.f32 -1.442695, %v1780_v37  ;;  %v1851_v42 = vadd.f32 %v1850_v41, %v7396_v23  ;;  %v8786_v35 = vld [vmem:[#allocation5 + $0xd0] sm:$0xff]  ;;  %v8789_v37 = vld [vmem:[#allocation5 + $0xa8] sm:$0xff]  ;;  %v8809_v41 = vld [vmem:[#allocation5 + $0x80] sm:$0xff] }
 0x438   :  { %5785 = vpow2.f32 %v5623_v38  ;;  %v5624_v45 = vmul.f32 -1.442695, %v1851_v42  ;;  %v8792_v38 = vld [vmem:[#allocation5 + $0xb8] sm:$0xff]  ;;  %v8812_v42 = vld [vmem:[#allocation5 + $0x90] sm:$0xff] }
 0x439   :  { %5787 = vtanh.f32 %v1849_v44  ;;  %v8815_v44 = vld [vmem:[#allocation5 + $0x68] sm:$0xff] }
 0x43a   :  { %5789 = vpow2.f32 %v5624_v45  ;;  %v8818_v45 = vld [vmem:[#allocation5 + $0x78] sm:$0xff] }
 0x443   :  { %v5784_v5 = vpop.eup %5783 }
 0x444   :  { %v1856_v46 = vadd.f32 1.0, %v5784_v5  ;;  %v8821_v5 = vld [vmem:[#allocation5 + $0x60] sm:$0xff] }
 0x445   :  { %v5786_v47 = vpop.eup %5785 }
 0x446   :  { %5791 = vrcp.f32 %v1856_v46  ;;  %v1862_v48 = vadd.f32 1.0, %v5786_v47  ;;  %v5788_v49 = vpop.eup %5787  ;;  %v8827_v46 = vld [vmem:[#allocation5 + $0x48] sm:$0xff]  ;;  %v8830_v47 = vld [vmem:[#allocation5 + $0x58] sm:$0xff] }
 0x447   :  { %v5790_v50 = vpop.eup %5789 }
 0x448   :  { %5793 = vrcp.f32 %v1862_v48  ;;  %v1869_v53 = vadd.f32 1.0, %v5790_v50  ;;  %v5620_v48 = vmul.f32 -1.442695, %v1684_v39  ;;  %v8836_v50 = vld [vmem:[#allocation5 + $0x50] sm:$0xff]  ;;  %v8933_v39 = vld [vmem:[#allocation8 + $0x140] sm:$0xff] }
 0x449   :  { %13415 = vst [vmem:[#allocation34_spill] sm:$0xff] %v8933_v39 }
 0x44a   :  { %5795 = vrcp.f32 %v1869_v53  ;;  %v8845_v53 = vld [vmem:[#allocation5 + $0x20] sm:$0xff] }
 0x453   :  { %v5792_v51 = vpop.eup %5791 }
 0x454   :  { %v1873_v55 = vmul.f32 %v5792_v51, %v5788_v49  ;;  %v8833_v49 = vld [vmem:[#allocation5 + $0x40] sm:$0xff]  ;;  %v8839_v51 = vld [vmem:[#allocation5 + $0x28] sm:$0xff] }
 0x455   :  { %v5794_v52 = vpop.eup %5793 }
 0x456   :  { %v1872_v54 = vmul.f32 %v5794_v52, %v8307_v3  ;;  %v13374_v3 = vld [vmem:[#allocation263_spill] sm:$0xff]  ;;  %v8842_v52 = vld [vmem:[#allocation5 + $0x38] sm:$0xff] }
 0x457   :  { %v5796_v57 = vpop.eup %5795 }
 0x458   :  { %v8741_v56 = vadd.f32 %v1873_v55, %v1872_v54  ;;  %v8848_v54 = vld [vmem:[#allocation5 + $0x30] sm:$0xff]  ;;  %v8851_v55 = vld [vmem:[#allocation5 + $0x8] sm:$0xff] }
 0x45a   :  { %5797 = vtanh.f32 %v8741_v56 }
 0x45b   :  { %5799 = vpow2.f32 %v5620_v48  ;;  %v8936_v48 = vld [vmem:[#allocation8 + $0x150] sm:$0xff] }
 0x45c   :  { %13416 = vst [vmem:[#allocation35_spill] sm:$0xff] %v8936_v48  ;;  %5801 = vtanh.f32 %v8734_v30 }
 0x467   :  { %v5798_v58 = vpop.eup %5797 }
 0x468   :  { %v8744_v60 = vmul.f32 %v5798_v58, %v5796_v57  ;;  %v8854_v57 = vld [vmem:[#allocation5 + $0x18] sm:$0xff]  ;;  %v8857_v58 = vld [vmem:[#allocation5] sm:$0xff] }
 0x46a   :  { %v1878_v7 = vrot.slane %v8744_v60, 2 }
 0x46c   :  { %1945 = vmatmul.mubr.f32.vlgmr.msra.gmra.mxu0 %v1878_v7  ;;  %2016 = vmatmul.mubr.f32.vlgmr.msra.gmra.mxu1 %v1878_v7  ;;  %v8861_v7 = vld [vmem:[#allocation5 + $0x10] sm:$0xff] }
 0x46d   :  { %2023 = vmatpush1.msra.mxu0 %v8313_v17  ;;  %2094 = vmatpush1.msra.mxu1 %v8316_v22  ;;  %v13376_v17 = vld [vmem:[#allocation265_spill] sm:$0xff]  ;;  %v13377_v22 = vld [vmem:[#allocation266_spill] sm:$0xff] }
 0x46e   :  { %2024 = vmatprep.subr.mxu0 %v8319_v13  ;;  %2095 = vmatprep.subr.mxu1 %v8322_v40  ;;  %v13378_v13 = vld [vmem:[#allocation267_spill] sm:$0xff]  ;;  %v13379_v40 = vld [vmem:[#allocation268_spill] sm:$0xff] }
 0x46f   :  { %2025 = vmatpush1.msra.mxu0 %v8325_v18  ;;  %2096 = vmatpush1.msra.mxu1 %v8328_v20  ;;  %v13380_v18 = vld [vmem:[#allocation269_spill] sm:$0xff]  ;;  %v13381_v20 = vld [vmem:[#allocation270_spill] sm:$0xff] }
 0x470   :  { %2026 = vmatprep.subr.mxu0 %v8331_v21  ;;  %2097 = vmatprep.subr.mxu1 %v8334_v0  ;;  %v13382_v21 = vld [vmem:[#allocation271_spill] sm:$0xff]  ;;  %v13383_v0 = vld [vmem:[#allocation272_spill] sm:$0xff] }
 0x471   :  { %2027 = vmatpush1.msra.mxu0 %v8337_v15  ;;  %2098 = vmatpush1.msra.mxu1 %v13374_v3  ;;  %v13384_v15 = vld [vmem:[#allocation273_spill] sm:$0xff]  ;;  %v8867_v3 = vld [vmem:[#allocation8 + $0x1e8] sm:$0xff] }
 0x472   :  { %2028 = vmatprep.subr.mxu0 %v13375_v61  ;;  %2099 = vmatprep.subr.mxu1 %v13376_v17  ;;  %v8870_v61 = vld [vmem:[#allocation8 + $0x1f8] sm:$0xff]  ;;  %v8873_v17 = vld [vmem:[#allocation8 + $0x1e0] sm:$0xff] }
 0x473   :  { %2029 = vmatpush1.msra.mxu0 %v13377_v22  ;;  %2100 = vmatpush1.msra.mxu1 %v13378_v13  ;;  %v8876_v22 = vld [vmem:[#allocation8 + $0x1f0] sm:$0xff]  ;;  %v8879_v13 = vld [vmem:[#allocation8 + $0x1c8] sm:$0xff] }
 0x474   :  { %2030 = vmatprep.subr.mxu0 %v13379_v40  ;;  %2101 = vmatprep.subr.mxu1 %v13380_v18  ;;  %13397 = vst [vmem:[#allocation16_spill] sm:$0xff] %v8879_v13  ;;  %v8882_v40 = vld [vmem:[#allocation8 + $0x1d8] sm:$0xff]  ;;  %v8885_v18 = vld [vmem:[#allocation8 + $0x1c0] sm:$0xff] }
 0x475   :  { %2031 = vmatpush1.msra.mxu0 %v13381_v20  ;;  %2102 = vmatpush1.msra.mxu1 %v13382_v21  ;;  %13398 = vst [vmem:[#allocation17_spill] sm:$0xff] %v8882_v40  ;;  %13399 = vst [vmem:[#allocation18_spill] sm:$0xff] %v8885_v18  ;;  %v8888_v20 = vld [vmem:[#allocation8 + $0x1d0] sm:$0xff]  ;;  %v8891_v21 = vld [vmem:[#allocation8 + $0x1a8] sm:$0xff] }
 0x476   :  { %2032 = vmatprep.subr.mxu0 %v13383_v0  ;;  %2103 = vmatprep.subr.mxu1 %v13384_v15  ;;  %13400 = vst [vmem:[#allocation19_spill] sm:$0xff] %v8888_v20  ;;  %13401 = vst [vmem:[#allocation20_spill] sm:$0xff] %v8891_v21  ;;  %v8894_v0 = vld [vmem:[#allocation8 + $0x1b8] sm:$0xff]  ;;  %v8897_v15 = vld [vmem:[#allocation8 + $0x1a0] sm:$0xff] }
 0x477   :  { %2033 = vmatpush1.msra.mxu0 %v13385_v62  ;;  %2104 = vmatpush1.msra.mxu1 %v13386_v63  ;;  %13402 = vst [vmem:[#allocation21_spill] sm:$0xff] %v8894_v0  ;;  %13403 = vst [vmem:[#allocation22_spill] sm:$0xff] %v8897_v15  ;;  %v8900_v62 = vld [vmem:[#allocation8 + $0x1b0] sm:$0xff]  ;;  %v8903_v63 = vld [vmem:[#allocation8 + $0x188] sm:$0xff] }
 0x478   :  { %2034 = vmatprep.subr.mxu0 %v13387_v1  ;;  %2105 = vmatprep.subr.mxu1 %v13388_v2  ;;  %13404 = vst [vmem:[#allocation23_spill] sm:$0xff] %v8900_v62  ;;  %13405 = vst [vmem:[#allocation24_spill] sm:$0xff] %v8903_v63  ;;  %v8906_v1 = vld [vmem:[#allocation8 + $0x198] sm:$0xff]  ;;  %v8909_v2 = vld [vmem:[#allocation8 + $0x180] sm:$0xff] }
 0x479   :  { %2035 = vmatpush1.msra.mxu0 %v13389_v27  ;;  %2106 = vmatpush1.msra.mxu1 %v13390_v26  ;;  %13406 = vst [vmem:[#allocation25_spill] sm:$0xff] %v8906_v1  ;;  %13407 = vst [vmem:[#allocation26_spill] sm:$0xff] %v8909_v2  ;;  %v8912_v27 = vld [vmem:[#allocation8 + $0x190] sm:$0xff]  ;;  %v8915_v26 = vld [vmem:[#allocation8 + $0x168] sm:$0xff] }
 0x47a   :  { %2036 = vmatprep.subr.mxu0 %v13391_v8  ;;  %2107 = vmatprep.subr.mxu1 %v13392_v11  ;;  %13408 = vst [vmem:[#allocation27_spill] sm:$0xff] %v8912_v27  ;;  %13409 = vst [vmem:[#allocation28_spill] sm:$0xff] %v8915_v26  ;;  %v8918_v8 = vld [vmem:[#allocation8 + $0x178] sm:$0xff]  ;;  %v8921_v11 = vld [vmem:[#allocation8 + $0x160] sm:$0xff] }
 0x47b   :  { %2037 = vmatpush1.msra.mxu0 %v13393_v28  ;;  %2108 = vmatpush1.msra.mxu1 %v13394_v29  ;;  %13410 = vst [vmem:[#allocation29_spill] sm:$0xff] %v8918_v8  ;;  %13411 = vst [vmem:[#allocation30_spill] sm:$0xff] %v8921_v11  ;;  %v8924_v28 = vld [vmem:[#allocation8 + $0x170] sm:$0xff]  ;;  %v5800_v29 = vpop.eup %5799 }
 0x47c   :  { %2038 = vmatprep.subr.mxu0 %v13395_v31  ;;  %2109 = vmatprep.subr.mxu1 %v13396_v32  ;;  %13412 = vst [vmem:[#allocation31_spill] sm:$0xff] %v8924_v28  ;;  %v8927_v31 = vld [vmem:[#allocation8 + $0x148] sm:$0xff]  ;;  %v8930_v32 = vld [vmem:[#allocation8 + $0x158] sm:$0xff] }
 0x47d   :  { %2039 = vmatpush1.msra.mxu0 %v8409_v16  ;;  %2110 = vmatpush1.msra.mxu1 %v8412_v10  ;;  %v8795_v10 = vld [vmem:[#allocation5 + $0xa0] sm:$0xff]  ;;  %v8804_v16 = vld [vmem:[#allocation5 + $0x98] sm:$0xff]  ;;  %13413 = vst [vmem:[#allocation32_spill] sm:$0xff] %v8927_v31  ;;  %13414 = vst [vmem:[#allocation33_spill] sm:$0xff] %v8930_v32 }
 0x47e   :  { %2040 = vmatprep.subr.mxu0 %v8415_v6  ;;  %2111 = vmatprep.subr.mxu1 %v8418_v4  ;;  %v8798_v6 = vld [vmem:[#allocation5 + $0xb0] sm:$0xff]  ;;  %v8801_v4 = vld [vmem:[#allocation5 + $0x88] sm:$0xff] }
 0x47f   :  { %2041 = vmatpush1.msra.mxu0 %v8783_v33  ;;  %2112 = vmatpush1.msra.mxu1 %v8786_v35 }
 0x480   :  { %2042 = vmatprep.subr.mxu0 %v8789_v37  ;;  %2113 = vmatprep.subr.mxu1 %v8792_v38 }
 0x481   :  { %2043 = vmatpush1.msra.mxu0 %v8795_v10  ;;  %2114 = vmatpush1.msra.mxu1 %v8798_v6 }
 0x482   :  { %2044 = vmatprep.subr.mxu0 %v8801_v4  ;;  %2115 = vmatprep.subr.mxu1 %v8804_v16 }
 0x483   :  { %2045 = vmatpush1.msra.mxu0 %v8809_v41  ;;  %2116 = vmatpush1.msra.mxu1 %v8812_v42 }
 0x484   :  { %2046 = vmatprep.subr.mxu0 %v8815_v44  ;;  %2117 = vmatprep.subr.mxu1 %v8818_v45 }
 0x485   :  { %2047 = vmatpush1.msra.mxu0 %v8821_v5  ;;  %2118 = vmatpush1.msra.mxu1 %v8824_v59 }
 0x486   :  { %2048 = vmatprep.subr.mxu0 %v8827_v46  ;;  %2119 = vmatprep.subr.mxu1 %v8830_v47 }
 0x487   :  { %2049 = vmatpush1.msra.mxu0 %v8833_v49  ;;  %2120 = vmatpush1.msra.mxu1 %v8836_v50 }
 0x488   :  { %2050 = vmatprep.subr.mxu0 %v8839_v51  ;;  %2121 = vmatprep.subr.mxu1 %v8842_v52 }
 0x489   :  { %2051 = vmatpush1.msra.mxu0 %v8845_v53  ;;  %2122 = vmatpush1.msra.mxu1 %v8848_v54 }
 0x48a   :  { %2052 = vmatprep.subr.mxu0 %v8851_v55  ;;  %2123 = vmatprep.subr.mxu1 %v8854_v57 }
 0x48b   :  { %2053 = vmatpush1.msra.mxu0 %v8857_v58  ;;  %2086 = vmatprep.mubr.f32.mxu0 %v12905_v24 }
 0x48c   :  { %2124 = vmatpush1.msra.mxu1 %v8861_v7  ;;  %2157 = vmatprep.mubr.f32.mxu1 %v12905_v24 }
 0x48d   :  { %2087 = vmatmul.mubr.f32.vlgmr.msra.gmra.mxu0 %v8744_v60  ;;  %2158 = vmatmul.mubr.f32.vlgmr.msra.gmra.mxu1 %v8744_v60 }
 0x48e   :  { %2164 = vmatprep.subr.mxu0 %v8867_v3  ;;  %2235 = vmatprep.subr.mxu1 %v8870_v61 }
 0x48f   :  { %2165 = vmatpush1.msra.mxu0 %v8873_v17  ;;  %2236 = vmatpush1.msra.mxu1 %v8876_v22 }
 0x490   :  { %2166 = vmatprep.subr.mxu0 %v8879_v13  ;;  %2237 = vmatprep.subr.mxu1 %v8882_v40 }
 0x491   :  { %2167 = vmatpush1.msra.mxu0 %v8885_v18  ;;  %2238 = vmatpush1.msra.mxu1 %v8888_v20 }
 0x492   :  { %2168 = vmatprep.subr.mxu0 %v8891_v21  ;;  %2239 = vmatprep.subr.mxu1 %v8894_v0 }
 0x493   :  { %2169 = vmatpush1.msra.mxu0 %v8897_v15  ;;  %2240 = vmatpush1.msra.mxu1 %v8900_v62 }
 0x494   :  { %2170 = vmatprep.subr.mxu0 %v8903_v63  ;;  %2241 = vmatprep.subr.mxu1 %v8906_v1 }
 0x495   :  { %2171 = vmatpush1.msra.mxu0 %v8909_v2  ;;  %2242 = vmatpush1.msra.mxu1 %v8912_v27 }
 0x496   :  { %2172 = vmatprep.subr.mxu0 %v8915_v26  ;;  %2243 = vmatprep.subr.mxu1 %v8918_v8  ;;  %v8945_v8 = vld [vmem:[#allocation8 + $0x120] sm:$0xff] }
 0x497   :  { %2173 = vmatpush1.msra.mxu0 %v8921_v11  ;;  %2244 = vmatpush1.msra.mxu1 %v8924_v28  ;;  %v8939_v11 = vld [vmem:[#allocation8 + $0x128] sm:$0xff]  ;;  %v8942_v28 = vld [vmem:[#allocation8 + $0x138] sm:$0xff]  ;;  %13419 = vst [vmem:[#allocation38_spill] sm:$0xff] %v8945_v8 }
 0x498   :  { %2174 = vmatprep.subr.mxu0 %v8927_v31  ;;  %2245 = vmatprep.subr.mxu1 %v8930_v32  ;;  %13417 = vst [vmem:[#allocation36_spill] sm:$0xff] %v8939_v11  ;;  %13418 = vst [vmem:[#allocation37_spill] sm:$0xff] %v8942_v28  ;;  %v1701_v31 = vadd.f32 1.0, %v5800_v29  ;;  %v8948_v32 = vld [vmem:[#allocation8 + $0x130] sm:$0xff] }
 0x499   :  { %2175 = vmatpush1.msra.mxu0 %v8933_v39  ;;  %2246 = vmatpush1.msra.mxu1 %v8936_v48  ;;  %13420 = vst [vmem:[#allocation39_spill] sm:$0xff] %v8948_v32  ;;  %v8951_v39 = vld [vmem:[#allocation8 + $0x108] sm:$0xff]  ;;  %v8954_v48 = vld [vmem:[#allocation8 + $0x118] sm:$0xff]  ;;  %v8960_v29 = vld [vmem:[#allocation8 + $0x110] sm:$0xff] }
 0x49a   :  { %2176 = vmatprep.subr.mxu0 %v8939_v11  ;;  %2247 = vmatprep.subr.mxu1 %v8942_v28  ;;  %13421 = vst [vmem:[#allocation40_spill] sm:$0xff] %v8951_v39  ;;  %13422 = vst [vmem:[#allocation41_spill] sm:$0xff] %v8954_v48  ;;  %v8957_v11 = vld [vmem:[#allocation8 + $0x100] sm:$0xff]  ;;  %5803 = vrcp.f32 %v1701_v31  ;;  %v8985_v31 = vld [vmem:[#allocation8 + $0xd0] sm:$0xff] }
 0x49b   :  { %2177 = vmatpush1.msra.mxu0 %v8945_v8  ;;  %2248 = vmatpush1.msra.mxu1 %v8948_v32  ;;  %13423 = vst [vmem:[#allocation42_spill] sm:$0xff] %v8957_v11  ;;  %13424 = vst [vmem:[#allocation43_spill] sm:$0xff] %v8960_v29  ;;  %v8964_v8 = vld [vmem:[#allocation8 + $0xe8] sm:$0xff]  ;;  %v8967_v32 = vld [vmem:[#allocation8 + $0xf8] sm:$0xff] }
 0x49c   :  { %2178 = vmatprep.subr.mxu0 %v8951_v39  ;;  %2249 = vmatprep.subr.mxu1 %v8954_v48  ;;  %13425 = vst [vmem:[#allocation44_spill] sm:$0xff] %v8964_v8  ;;  %13426 = vst [vmem:[#allocation45_spill] sm:$0xff] %v8967_v32  ;;  %v8970_v48 = vld [vmem:[#allocation8 + $0xe0] sm:$0xff]  ;;  %v8979_v39 = vld [vmem:[#allocation8 + $0xd8] sm:$0xff] }
 0x49d   :  { %2179 = vmatpush1.msra.mxu0 %v8957_v11  ;;  %2250 = vmatpush1.msra.mxu1 %v8960_v29  ;;  %13427 = vst [vmem:[#allocation46_spill] sm:$0xff] %v8970_v48  ;;  %v8973_v11 = vld [vmem:[#allocation8 + $0xf0] sm:$0xff]  ;;  %v8976_v29 = vld [vmem:[#allocation8 + $0xc8] sm:$0xff]  ;;  %13430 = vst [vmem:[#allocation49_spill] sm:$0xff] %v8979_v39 }
 0x49e   :  { %2180 = vmatprep.subr.mxu0 %v8964_v8  ;;  %2251 = vmatprep.subr.mxu1 %v8967_v32  ;;  %13428 = vst [vmem:[#allocation47_spill] sm:$0xff] %v8973_v11  ;;  %13429 = vst [vmem:[#allocation48_spill] sm:$0xff] %v8976_v29  ;;  %v8982_v8 = vld [vmem:[#allocation8 + $0xc0] sm:$0xff]  ;;  %v9036_v32 = vld [vmem:[#allocation8 + $0x28] sm:$0xff] }
 0x49f   :  { %2181 = vmatpush1.msra.mxu0 %v8970_v48  ;;  %2252 = vmatpush1.msra.mxu1 %v8973_v11  ;;  %13431 = vst [vmem:[#allocation50_spill] sm:$0xff] %v8982_v8  ;;  %13432 = vst [vmem:[#allocation51_spill] sm:$0xff] %v8985_v31  ;;  %v8988_v48 = vld [vmem:[#allocation8 + $0xa8] sm:$0xff]  ;;  %v8991_v11 = vld [vmem:[#allocation8 + $0xb8] sm:$0xff] }
 0x4a0   :  { %2182 = vmatprep.subr.mxu0 %v8976_v29  ;;  %2253 = vmatprep.subr.mxu1 %v8979_v39  ;;  %13433 = vst [vmem:[#allocation52_spill] sm:$0xff] %v8988_v48  ;;  %13434 = vst [vmem:[#allocation53_spill] sm:$0xff] %v8991_v11  ;;  %v8994_v29 = vld [vmem:[#allocation8 + $0xa0] sm:$0xff]  ;;  %v8997_v39 = vld [vmem:[#allocation8 + $0xb0] sm:$0xff] }
 0x4a1   :  { %2183 = vmatpush1.msra.mxu0 %v8982_v8  ;;  %2254 = vmatpush1.msra.mxu1 %v8985_v31  ;;  %13435 = vst [vmem:[#allocation54_spill] sm:$0xff] %v8994_v29  ;;  %13436 = vst [vmem:[#allocation55_spill] sm:$0xff] %v8997_v39  ;;  %v9000_v8 = vld [vmem:[#allocation8 + $0x88] sm:$0xff]  ;;  %v9003_v31 = vld [vmem:[#allocation8 + $0x98] sm:$0xff] }
 0x4a2   :  { %2184 = vmatprep.subr.mxu0 %v8988_v48  ;;  %2255 = vmatprep.subr.mxu1 %v8991_v11  ;;  %13437 = vst [vmem:[#allocation56_spill] sm:$0xff] %v9000_v8  ;;  %13438 = vst [vmem:[#allocation57_spill] sm:$0xff] %v9003_v31  ;;  %v9006_v48 = vld [vmem:[#allocation8 + $0x80] sm:$0xff]  ;;  %v9009_v11 = vld [vmem:[#allocation8 + $0x90] sm:$0xff] }
 0x4a3   :  { %2185 = vmatpush1.msra.mxu0 %v8994_v29  ;;  %2256 = vmatpush1.msra.mxu1 %v8997_v39  ;;  %13439 = vst [vmem:[#allocation58_spill] sm:$0xff] %v9006_v48  ;;  %13440 = vst [vmem:[#allocation59_spill] sm:$0xff] %v9009_v11  ;;  %v9012_v29 = vld [vmem:[#allocation8 + $0x68] sm:$0xff]  ;;  %v9015_v39 = vld [vmem:[#allocation8 + $0x78] sm:$0xff] }
 0x4a4   :  { %2186 = vmatprep.subr.mxu0 %v9000_v8  ;;  %2257 = vmatprep.subr.mxu1 %v9003_v31  ;;  %13441 = vst [vmem:[#allocation60_spill] sm:$0xff] %v9012_v29  ;;  %13442 = vst [vmem:[#allocation61_spill] sm:$0xff] %v9015_v39  ;;  %v9018_v8 = vld [vmem:[#allocation8 + $0x60] sm:$0xff]  ;;  %v9021_v31 = vld [vmem:[#allocation8 + $0x70] sm:$0xff] }
 0x4a5   :  { %2187 = vmatpush1.msra.mxu0 %v9006_v48  ;;  %2258 = vmatpush1.msra.mxu1 %v9009_v11  ;;  %13443 = vst [vmem:[#allocation62_spill] sm:$0xff] %v9018_v8  ;;  %13444 = vst [vmem:[#allocation63_spill] sm:$0xff] %v9021_v31  ;;  %v9024_v48 = vld [vmem:[#allocation8 + $0x48] sm:$0xff]  ;;  %v9027_v11 = vld [vmem:[#allocation8 + $0x58] sm:$0xff] }
 0x4a6   :  { %2188 = vmatprep.subr.mxu0 %v9012_v29  ;;  %2259 = vmatprep.subr.mxu1 %v9015_v39  ;;  %13445 = vst [vmem:[#allocation64_spill] sm:$0xff] %v9024_v48  ;;  %13446 = vst [vmem:[#allocation65_spill] sm:$0xff] %v9027_v11  ;;  %v9030_v29 = vld [vmem:[#allocation8 + $0x40] sm:$0xff]  ;;  %v9033_v39 = vld [vmem:[#allocation8 + $0x50] sm:$0xff] }
 0x4a7   :  { %2189 = vmatpush1.msra.mxu0 %v9018_v8  ;;  %2260 = vmatpush1.msra.mxu1 %v9021_v31  ;;  %13447 = vst [vmem:[#allocation66_spill] sm:$0xff] %v9030_v29  ;;  %13448 = vst [vmem:[#allocation67_spill] sm:$0xff] %v9033_v39  ;;  %v5802_v8 = vpop.eup %5801  ;;  %v9039_v31 = vld [vmem:[#allocation8 + $0x38] sm:$0xff]  ;;  %v9048_v28 = vld [vmem:[#allocation8 + $0x8] sm:$0xff] }
 0x4a8   :  { %2190 = vmatprep.subr.mxu0 %v9024_v48  ;;  %2261 = vmatprep.subr.mxu1 %v9027_v11  ;;  %13449 = vst [vmem:[#allocation68_spill] sm:$0xff] %v9036_v32  ;;  %13450 = vst [vmem:[#allocation69_spill] sm:$0xff] %v9039_v31  ;;  %v9042_v48 = vld [vmem:[#allocation8 + $0x20] sm:$0xff]  ;;  %v9045_v11 = vld [vmem:[#allocation8 + $0x30] sm:$0xff] }
 0x4a9   :  { %2191 = vmatpush1.msra.mxu0 %v9030_v29  ;;  %2262 = vmatpush1.msra.mxu1 %v9033_v39  ;;  %13451 = vst [vmem:[#allocation70_spill] sm:$0xff] %v9042_v48  ;;  %13452 = vst [vmem:[#allocation71_spill] sm:$0xff] %v9045_v11  ;;  %v5804_v29 = vpop.eup %5803  ;;  %v9051_v39 = vld [vmem:[#allocation8 + $0x18] sm:$0xff] }
 0x4aa   :  { %2192 = vmatprep.subr.mxu0 %v9036_v32  ;;  %2263 = vmatprep.subr.mxu1 %v9039_v31  ;;  %13453 = vst [vmem:[#allocation72_spill] sm:$0xff] %v9048_v28  ;;  %13454 = vst [vmem:[#allocation73_spill] sm:$0xff] %v9051_v39  ;;  %v9054_v32 = vld [vmem:[#allocation8] sm:$0xff]  ;;  %v9058_v31 = vld [vmem:[#allocation8 + $0x10] sm:$0xff] }
 0x4ab   :  { %2193 = vmatpush1.msra.mxu0 %v9042_v48  ;;  %2264 = vmatpush1.msra.mxu1 %v9045_v11  ;;  %13455 = vst [vmem:[#allocation74_spill] sm:$0xff] %v9054_v32  ;;  %v1708_v48 = vmul.f32 %v5804_v29, %v5802_v8  ;;  %13456 = vst [vmem:[#allocation75_spill] sm:$0xff] %v9058_v31  ;;  %v9070_v8 = vld [vmem:[#allocation2 + $0x1c8] sm:$0xff]  ;;  %v9073_v29 = vld [vmem:[#allocation2 + $0x1f8] sm:$0xff] }
 0x4ac   :  { %2194 = vmatprep.subr.mxu0 %v9048_v28  ;;  %2265 = vmatprep.subr.mxu1 %v9051_v39  ;;  %v9062_v28 = vld [vmem:[#allocation2 + $0x1e8] sm:$0xff]  ;;  %v9066_v39 = vld [vmem:[#allocation2 + $0x1e0] sm:$0xff]  ;;  %13459 = vst [vmem:[#allocation78_spill] sm:$0xff] %v9070_v8  ;;  %13460 = vst [vmem:[#allocation79_spill] sm:$0xff] %v9073_v29 }
 0x4ad   :  { %2195 = vmatpush1.msra.mxu0 %v9054_v32  ;;  %2228 = vmatprep.mubr.f32.mxu0 %v12905_v24  ;;  %13457 = vst [vmem:[#allocation76_spill] sm:$0xff] %v9062_v28  ;;  %13458 = vst [vmem:[#allocation77_spill] sm:$0xff] %v9066_v39 }
 0x4ae   :  { %2266 = vmatpush1.msra.mxu1 %v9058_v31  ;;  %2299 = vmatprep.mubr.f32.mxu1 %v12905_v24  ;;  %v9082_v31 = vld [vmem:[#allocation2 + $0x1a8] sm:$0xff] }
 0x4af   :  { %2229 = vmatmul.mubr.f32.vlgmr.msra.gmra.mxu0 %v1708_v48  ;;  %2300 = vmatmul.mubr.f32.vlgmr.msra.gmra.mxu1 %v1708_v48  ;;  %v9076_v48 = vld [vmem:[#allocation2 + $0x1c0] sm:$0xff]  ;;  %13463 = vst [vmem:[#allocation82_spill] sm:$0xff] %v9082_v31 }
 0x4b0   :  { %2340 = vmatprep.subr.mxu0 %v9062_v28  ;;  %2404 = vmatprep.mubr.f32.mxu0 %v8744_v60  ;;  %13461 = vst [vmem:[#allocation80_spill] sm:$0xff] %v9076_v48  ;;  %v9079_v28 = vld [vmem:[#allocation2 + $0x1f0] sm:$0xff] }
 0x4b1   :  { %2341 = vmatpush1.msra.mxu0 %v9066_v39  ;;  %2475 = vmatprep.mubr.f32.mxu1 %v8744_v60  ;;  %13462 = vst [vmem:[#allocation81_spill] sm:$0xff] %v9079_v28  ;;  %v9085_v60 = vld [vmem:[#allocation2 + $0x1d8] sm:$0xff] }
 0x4b2   :  { %2342 = vmatprep.subr.mxu0 %v9070_v8  ;;  %2411 = vmatprep.subr.mxu1 %v9073_v29  ;;  %13464 = vst [vmem:[#allocation83_spill] sm:$0xff] %v9085_v60  ;;  %v9088_v8 = vld [vmem:[#allocation2 + $0x1a0] sm:$0xff]  ;;  %v9091_v29 = vld [vmem:[#allocation2 + $0x1d0] sm:$0xff]  ;;  %v9445_v39 = vld [vmem:[#allocation2 + $0x218] sm:$0xff] }
 0x4b3   :  { %2343 = vmatpush1.msra.mxu0 %v9076_v48  ;;  %2412 = vmatpush1.msra.mxu1 %v9079_v28  ;;  %13465 = vst [vmem:[#allocation84_spill] sm:$0xff] %v9088_v8  ;;  %13466 = vst [vmem:[#allocation85_spill] sm:$0xff] %v9091_v29  ;;  %v9094_v48 = vld [vmem:[#allocation2 + $0x188] sm:$0xff]  ;;  %v9097_v28 = vld [vmem:[#allocation2 + $0x1b8] sm:$0xff] }
 0x4b4   :  { %2344 = vmatprep.subr.mxu0 %v9082_v31  ;;  %2413 = vmatprep.subr.mxu1 %v9085_v60  ;;  %13467 = vst [vmem:[#allocation86_spill] sm:$0xff] %v9094_v48  ;;  %13468 = vst [vmem:[#allocation87_spill] sm:$0xff] %v9097_v28  ;;  %v9100_v31 = vld [vmem:[#allocation2 + $0x180] sm:$0xff]  ;;  %v9103_v60 = vld [vmem:[#allocation2 + $0x1b0] sm:$0xff] }
 0x4b5   :  { %2345 = vmatpush1.msra.mxu0 %v9088_v8  ;;  %2414 = vmatpush1.msra.mxu1 %v9091_v29  ;;  %13469 = vst [vmem:[#allocation88_spill] sm:$0xff] %v9100_v31  ;;  %13470 = vst [vmem:[#allocation89_spill] sm:$0xff] %v9103_v60  ;;  %v9106_v8 = vld [vmem:[#allocation2 + $0x168] sm:$0xff]  ;;  %v9109_v29 = vld [vmem:[#allocation2 + $0x198] sm:$0xff] }
 0x4b6   :  { %2346 = vmatprep.subr.mxu0 %v9094_v48  ;;  %2415 = vmatprep.subr.mxu1 %v9097_v28  ;;  %13471 = vst [vmem:[#allocation90_spill] sm:$0xff] %v9106_v8  ;;  %13472 = vst [vmem:[#allocation91_spill] sm:$0xff] %v9109_v29  ;;  %v9112_v48 = vld [vmem:[#allocation2 + $0x160] sm:$0xff]  ;;  %v9115_v28 = vld [vmem:[#allocation2 + $0x190] sm:$0xff] }
 0x4b7   :  { %2347 = vmatpush1.msra.mxu0 %v9100_v31  ;;  %2416 = vmatpush1.msra.mxu1 %v9103_v60  ;;  %13473 = vst [vmem:[#allocation92_spill] sm:$0xff] %v9112_v48  ;;  %13474 = vst [vmem:[#allocation93_spill] sm:$0xff] %v9115_v28  ;;  %v9118_v31 = vld [vmem:[#allocation2 + $0x148] sm:$0xff]  ;;  %v9121_v60 = vld [vmem:[#allocation2 + $0x178] sm:$0xff] }
 0x4b8   :  { %2348 = vmatprep.subr.mxu0 %v9106_v8  ;;  %2417 = vmatprep.subr.mxu1 %v9109_v29  ;;  %13475 = vst [vmem:[#allocation94_spill] sm:$0xff] %v9118_v31  ;;  %13476 = vst [vmem:[#allocation95_spill] sm:$0xff] %v9121_v60  ;;  %v9124_v8 = vld [vmem:[#allocation2 + $0x140] sm:$0xff]  ;;  %v9127_v29 = vld [vmem:[#allocation2 + $0x170] sm:$0xff] }
 0x4b9   :  { %2349 = vmatpush1.msra.mxu0 %v9112_v48  ;;  %2418 = vmatpush1.msra.mxu1 %v9115_v28  ;;  %13477 = vst [vmem:[#allocation96_spill] sm:$0xff] %v9124_v8  ;;  %13478 = vst [vmem:[#allocation97_spill] sm:$0xff] %v9127_v29  ;;  %v9130_v48 = vld [vmem:[#allocation2 + $0x128] sm:$0xff]  ;;  %v9133_v28 = vld [vmem:[#allocation2 + $0x158] sm:$0xff] }
 0x4ba   :  { %2350 = vmatprep.subr.mxu0 %v9118_v31  ;;  %2419 = vmatprep.subr.mxu1 %v9121_v60  ;;  %13479 = vst [vmem:[#allocation98_spill] sm:$0xff] %v9130_v48  ;;  %13480 = vst [vmem:[#allocation99_spill] sm:$0xff] %v9133_v28  ;;  %v9136_v31 = vld [vmem:[#allocation2 + $0x120] sm:$0xff]  ;;  %v9139_v60 = vld [vmem:[#allocation2 + $0x150] sm:$0xff] }
 0x4bb   :  { %2351 = vmatpush1.msra.mxu0 %v9124_v8  ;;  %2420 = vmatpush1.msra.mxu1 %v9127_v29  ;;  %13481 = vst [vmem:[#allocation100_spill] sm:$0xff] %v9136_v31  ;;  %13482 = vst [vmem:[#allocation101_spill] sm:$0xff] %v9139_v60  ;;  %v9142_v8 = vld [vmem:[#allocation2 + $0x108] sm:$0xff]  ;;  %v9145_v29 = vld [vmem:[#allocation2 + $0x138] sm:$0xff] }
 0x4bc   :  { %2352 = vmatprep.subr.mxu0 %v9130_v48  ;;  %2421 = vmatprep.subr.mxu1 %v9133_v28  ;;  %13483 = vst [vmem:[#allocation102_spill] sm:$0xff] %v9142_v8  ;;  %13484 = vst [vmem:[#allocation103_spill] sm:$0xff] %v9145_v29  ;;  %v9148_v48 = vld [vmem:[#allocation2 + $0x100] sm:$0xff]  ;;  %v9151_v28 = vld [vmem:[#allocation2 + $0x130] sm:$0xff] }
 0x4bd   :  { %2353 = vmatpush1.msra.mxu0 %v9136_v31  ;;  %2422 = vmatpush1.msra.mxu1 %v9139_v60  ;;  %13485 = vst [vmem:[#allocation104_spill] sm:$0xff] %v9148_v48  ;;  %13486 = vst [vmem:[#allocation105_spill] sm:$0xff] %v9151_v28  ;;  %v9154_v31 = vld [vmem:[#allocation2 + $0xe8] sm:$0xff]  ;;  %v9157_v60 = vld [vmem:[#allocation2 + $0x118] sm:$0xff] }
 0x4be   :  { %2354 = vmatprep.subr.mxu0 %v9142_v8  ;;  %2423 = vmatprep.subr.mxu1 %v9145_v29  ;;  %13487 = vst [vmem:[#allocation106_spill] sm:$0xff] %v9154_v31  ;;  %13488 = vst [vmem:[#allocation107_spill] sm:$0xff] %v9157_v60  ;;  %v9160_v8 = vld [vmem:[#allocation2 + $0xe0] sm:$0xff]  ;;  %v9163_v29 = vld [vmem:[#allocation2 + $0x110] sm:$0xff] }
 0x4bf   :  { %2355 = vmatpush1.msra.mxu0 %v9148_v48  ;;  %2424 = vmatpush1.msra.mxu1 %v9151_v28  ;;  %13489 = vst [vmem:[#allocation108_spill] sm:$0xff] %v9160_v8  ;;  %13490 = vst [vmem:[#allocation109_spill] sm:$0xff] %v9163_v29  ;;  %v9166_v48 = vld [vmem:[#allocation2 + $0xc8] sm:$0xff]  ;;  %v9169_v28 = vld [vmem:[#allocation2 + $0xf8] sm:$0xff] }
 0x4c0   :  { %2356 = vmatprep.subr.mxu0 %v9154_v31  ;;  %2425 = vmatprep.subr.mxu1 %v9157_v60  ;;  %13491 = vst [vmem:[#allocation110_spill] sm:$0xff] %v9166_v48  ;;  %13492 = vst [vmem:[#allocation111_spill] sm:$0xff] %v9169_v28  ;;  %v9172_v31 = vld [vmem:[#allocation2 + $0xc0] sm:$0xff]  ;;  %v9175_v60 = vld [vmem:[#allocation2 + $0xf0] sm:$0xff] }
 0x4c1   :  { %2357 = vmatpush1.msra.mxu0 %v9160_v8  ;;  %2426 = vmatpush1.msra.mxu1 %v9163_v29  ;;  %13493 = vst [vmem:[#allocation112_spill] sm:$0xff] %v9172_v31  ;;  %13494 = vst [vmem:[#allocation113_spill] sm:$0xff] %v9175_v60  ;;  %v9178_v8 = vld [vmem:[#allocation2 + $0xa8] sm:$0xff]  ;;  %v9181_v29 = vld [vmem:[#allocation2 + $0xd8] sm:$0xff] }
 0x4c2   :  { %2358 = vmatprep.subr.mxu0 %v9166_v48  ;;  %2427 = vmatprep.subr.mxu1 %v9169_v28  ;;  %13495 = vst [vmem:[#allocation114_spill] sm:$0xff] %v9178_v8  ;;  %13496 = vst [vmem:[#allocation115_spill] sm:$0xff] %v9181_v29  ;;  %v9184_v48 = vld [vmem:[#allocation2 + $0xa0] sm:$0xff]  ;;  %v9187_v28 = vld [vmem:[#allocation2 + $0xd0] sm:$0xff] }
 0x4c3   :  { %2359 = vmatpush1.msra.mxu0 %v9172_v31  ;;  %2428 = vmatpush1.msra.mxu1 %v9175_v60  ;;  %13497 = vst [vmem:[#allocation116_spill] sm:$0xff] %v9184_v48  ;;  %13498 = vst [vmem:[#allocation117_spill] sm:$0xff] %v9187_v28  ;;  %v9190_v31 = vld [vmem:[#allocation2 + $0x88] sm:$0xff]  ;;  %v9193_v60 = vld [vmem:[#allocation2 + $0xb8] sm:$0xff] }
 0x4c4   :  { %2360 = vmatprep.subr.mxu0 %v9178_v8  ;;  %2429 = vmatprep.subr.mxu1 %v9181_v29  ;;  %13499 = vst [vmem:[#allocation118_spill] sm:$0xff] %v9190_v31  ;;  %13500 = vst [vmem:[#allocation119_spill] sm:$0xff] %v9193_v60  ;;  %v9196_v8 = vld [vmem:[#allocation2 + $0x80] sm:$0xff]  ;;  %v9199_v29 = vld [vmem:[#allocation2 + $0xb0] sm:$0xff] }
 0x4c5   :  { %2361 = vmatpush1.msra.mxu0 %v9184_v48  ;;  %2430 = vmatpush1.msra.mxu1 %v9187_v28  ;;  %13501 = vst [vmem:[#allocation120_spill] sm:$0xff] %v9196_v8  ;;  %13502 = vst [vmem:[#allocation121_spill] sm:$0xff] %v9199_v29  ;;  %v9202_v48 = vld [vmem:[#allocation2 + $0x68] sm:$0xff]  ;;  %v9205_v28 = vld [vmem:[#allocation2 + $0x98] sm:$0xff] }
 0x4c6   :  { %2362 = vmatprep.subr.mxu0 %v9190_v31  ;;  %2431 = vmatprep.subr.mxu1 %v9193_v60  ;;  %13503 = vst [vmem:[#allocation122_spill] sm:$0xff] %v9202_v48  ;;  %13504 = vst [vmem:[#allocation123_spill] sm:$0xff] %v9205_v28  ;;  %v9208_v31 = vld [vmem:[#allocation2 + $0x60] sm:$0xff]  ;;  %v9211_v60 = vld [vmem:[#allocation2 + $0x90] sm:$0xff] }
 0x4c7   :  { %2363 = vmatpush1.msra.mxu0 %v9196_v8  ;;  %2432 = vmatpush1.msra.mxu1 %v9199_v29  ;;  %13505 = vst [vmem:[#allocation124_spill] sm:$0xff] %v9208_v31  ;;  %13506 = vst [vmem:[#allocation125_spill] sm:$0xff] %v9211_v60  ;;  %v9214_v8 = vld [vmem:[#allocation2 + $0x48] sm:$0xff]  ;;  %v9217_v29 = vld [vmem:[#allocation2 + $0x78] sm:$0xff] }
 0x4c8   :  { %2364 = vmatprep.subr.mxu0 %v9202_v48  ;;  %2433 = vmatprep.subr.mxu1 %v9205_v28  ;;  %13507 = vst [vmem:[#allocation126_spill] sm:$0xff] %v9214_v8  ;;  %13508 = vst [vmem:[#allocation127_spill] sm:$0xff] %v9217_v29  ;;  %v9220_v48 = vld [vmem:[#allocation2 + $0x40] sm:$0xff]  ;;  %v9223_v28 = vld [vmem:[#allocation2 + $0x70] sm:$0xff] }
 0x4c9   :  { %2365 = vmatpush1.msra.mxu0 %v9208_v31  ;;  %2434 = vmatpush1.msra.mxu1 %v9211_v60  ;;  %13509 = vst [vmem:[#allocation128_spill] sm:$0xff] %v9220_v48  ;;  %13510 = vst [vmem:[#allocation129_spill] sm:$0xff] %v9223_v28  ;;  %v9226_v31 = vld [vmem:[#allocation2 + $0x28] sm:$0xff]  ;;  %v9229_v60 = vld [vmem:[#allocation2 + $0x58] sm:$0xff] }
 0x4ca   :  { %2366 = vmatprep.subr.mxu0 %v9214_v8  ;;  %2435 = vmatprep.subr.mxu1 %v9217_v29  ;;  %13511 = vst [vmem:[#allocation130_spill] sm:$0xff] %v9226_v31  ;;  %13512 = vst [vmem:[#allocation131_spill] sm:$0xff] %v9229_v60  ;;  %v9232_v8 = vld [vmem:[#allocation2 + $0x20] sm:$0xff]  ;;  %v9235_v29 = vld [vmem:[#allocation2 + $0x50] sm:$0xff] }
 0x4cb   :  { %2367 = vmatpush1.msra.mxu0 %v9220_v48  ;;  %2436 = vmatpush1.msra.mxu1 %v9223_v28  ;;  %13513 = vst [vmem:[#allocation132_spill] sm:$0xff] %v9232_v8  ;;  %13514 = vst [vmem:[#allocation133_spill] sm:$0xff] %v9235_v29  ;;  %v9238_v48 = vld [vmem:[#allocation2 + $0x8] sm:$0xff]  ;;  %v9241_v28 = vld [vmem:[#allocation2 + $0x38] sm:$0xff] }
 0x4cc   :  { %2368 = vmatprep.subr.mxu0 %v9226_v31  ;;  %2437 = vmatprep.subr.mxu1 %v9229_v60  ;;  %13515 = vst [vmem:[#allocation134_spill] sm:$0xff] %v9238_v48  ;;  %13516 = vst [vmem:[#allocation135_spill] sm:$0xff] %v9241_v28  ;;  %v9244_v31 = vld [vmem:[#allocation2] sm:$0xff]  ;;  %v9247_v60 = vld [vmem:[#allocation2 + $0x30] sm:$0xff] }
 0x4cd   :  { %2369 = vmatpush1.msra.mxu0 %v9232_v8  ;;  %2438 = vmatpush1.msra.mxu1 %v9235_v29  ;;  %13517 = vst [vmem:[#allocation136_spill] sm:$0xff] %v9244_v31  ;;  %13518 = vst [vmem:[#allocation137_spill] sm:$0xff] %v9247_v60  ;;  %v9250_v8 = vld [vmem:[#allocation2 + $0x3e8] sm:$0xff]  ;;  %v9253_v29 = vld [vmem:[#allocation2 + $0x18] sm:$0xff] }
 0x4ce   :  { %2370 = vmatprep.subr.mxu0 %v9238_v48  ;;  %2439 = vmatprep.subr.mxu1 %v9241_v28  ;;  %13519 = vst [vmem:[#allocation138_spill] sm:$0xff] %v9250_v8  ;;  %13520 = vst [vmem:[#allocation139_spill] sm:$0xff] %v9253_v29  ;;  %v9256_v48 = vld [vmem:[#allocation2 + $0x3e0] sm:$0xff]  ;;  %v9259_v28 = vld [vmem:[#allocation2 + $0x10] sm:$0xff] }
 0x4cf   :  { %2371 = vmatpush1.msra.mxu0 %v9244_v31  ;;  %2440 = vmatpush1.msra.mxu1 %v9247_v60  ;;  %13521 = vst [vmem:[#allocation140_spill] sm:$0xff] %v9256_v48  ;;  %13522 = vst [vmem:[#allocation141_spill] sm:$0xff] %v9259_v28  ;;  %v9262_v31 = vld [vmem:[#allocation2 + $0x3c8] sm:$0xff]  ;;  %v9265_v60 = vld [vmem:[#allocation2 + $0x3f8] sm:$0xff] }
 0x4d0   :  { %2372 = vmatprep.subr.mxu0 %v9250_v8  ;;  %2441 = vmatprep.subr.mxu1 %v9253_v29  ;;  %13523 = vst [vmem:[#allocation142_spill] sm:$0xff] %v9262_v31  ;;  %13524 = vst [vmem:[#allocation143_spill] sm:$0xff] %v9265_v60  ;;  %v9268_v8 = vld [vmem:[#allocation2 + $0x3c0] sm:$0xff]  ;;  %v9271_v29 = vld [vmem:[#allocation2 + $0x3f0] sm:$0xff] }
 0x4d1   :  { %2373 = vmatpush2.msra.mxu0 %v9256_v48  ;;  %2442 = vmatpush1.msra.mxu1 %v9259_v28  ;;  %13525 = vst [vmem:[#allocation144_spill] sm:$0xff] %v9268_v8  ;;  %13526 = vst [vmem:[#allocation145_spill] sm:$0xff] %v9271_v29  ;;  %v9274_v48 = vld [vmem:[#allocation2 + $0x3a8] sm:$0xff]  ;;  %v9277_v28 = vld [vmem:[#allocation2 + $0x3d8] sm:$0xff] }
 0x4d2   :  { %2374 = vmatprep.subr.mxu0 %v9262_v31  ;;  %2443 = vmatprep.subr.mxu1 %v9265_v60  ;;  %13527 = vst [vmem:[#allocation146_spill] sm:$0xff] %v9274_v48  ;;  %13528 = vst [vmem:[#allocation147_spill] sm:$0xff] %v9277_v28  ;;  %v9280_v31 = vld [vmem:[#allocation2 + $0x3a0] sm:$0xff]  ;;  %v9283_v60 = vld [vmem:[#allocation2 + $0x3d0] sm:$0xff] }
 0x4d3   :  { %2375 = vmatpush2.msra.mxu0 %v9268_v8  ;;  %2444 = vmatpush2.msra.mxu1 %v9271_v29  ;;  %13529 = vst [vmem:[#allocation148_spill] sm:$0xff] %v9280_v31  ;;  %13530 = vst [vmem:[#allocation149_spill] sm:$0xff] %v9283_v60  ;;  %v9286_v8 = vld [vmem:[#allocation2 + $0x388] sm:$0xff]  ;;  %v9289_v29 = vld [vmem:[#allocation2 + $0x3b8] sm:$0xff] }
 0x4d4   :  { %2376 = vmatprep.subr.mxu0 %v9274_v48  ;;  %2445 = vmatprep.subr.mxu1 %v9277_v28  ;;  %13531 = vst [vmem:[#allocation150_spill] sm:$0xff] %v9286_v8  ;;  %13532 = vst [vmem:[#allocation151_spill] sm:$0xff] %v9289_v29  ;;  %v9292_v48 = vld [vmem:[#allocation2 + $0x380] sm:$0xff]  ;;  %v9295_v28 = vld [vmem:[#allocation2 + $0x3b0] sm:$0xff] }
 0x4d5   :  { %2377 = vmatpush2.msra.mxu0 %v9280_v31  ;;  %2446 = vmatpush2.msra.mxu1 %v9283_v60  ;;  %13533 = vst [vmem:[#allocation152_spill] sm:$0xff] %v9292_v48  ;;  %13534 = vst [vmem:[#allocation153_spill] sm:$0xff] %v9295_v28  ;;  %v9298_v31 = vld [vmem:[#allocation2 + $0x368] sm:$0xff]  ;;  %v9301_v60 = vld [vmem:[#allocation2 + $0x398] sm:$0xff] }
 0x4d6   :  { %2378 = vmatprep.subr.mxu0 %v9286_v8  ;;  %2447 = vmatprep.subr.mxu1 %v9289_v29  ;;  %13535 = vst [vmem:[#allocation154_spill] sm:$0xff] %v9298_v31  ;;  %13536 = vst [vmem:[#allocation155_spill] sm:$0xff] %v9301_v60  ;;  %v9304_v8 = vld [vmem:[#allocation2 + $0x360] sm:$0xff]  ;;  %v9307_v29 = vld [vmem:[#allocation2 + $0x390] sm:$0xff] }
 0x4d7   :  { %2379 = vmatpush2.msra.mxu0 %v9292_v48  ;;  %2448 = vmatpush2.msra.mxu1 %v9295_v28  ;;  %13537 = vst [vmem:[#allocation156_spill] sm:$0xff] %v9304_v8  ;;  %13538 = vst [vmem:[#allocation157_spill] sm:$0xff] %v9307_v29  ;;  %v9310_v48 = vld [vmem:[#allocation2 + $0x348] sm:$0xff]  ;;  %v9313_v28 = vld [vmem:[#allocation2 + $0x378] sm:$0xff] }
 0x4d8   :  { %2380 = vmatprep.subr.mxu0 %v9298_v31  ;;  %2449 = vmatprep.subr.mxu1 %v9301_v60  ;;  %13539 = vst [vmem:[#allocation158_spill] sm:$0xff] %v9310_v48  ;;  %13540 = vst [vmem:[#allocation159_spill] sm:$0xff] %v9313_v28  ;;  %v9316_v31 = vld [vmem:[#allocation2 + $0x340] sm:$0xff]  ;;  %v9319_v60 = vld [vmem:[#allocation2 + $0x370] sm:$0xff] }
 0x4d9   :  { %2381 = vmatpush2.msra.mxu0 %v9304_v8  ;;  %2450 = vmatpush2.msra.mxu1 %v9307_v29  ;;  %13541 = vst [vmem:[#allocation160_spill] sm:$0xff] %v9316_v31  ;;  %13542 = vst [vmem:[#allocation161_spill] sm:$0xff] %v9319_v60  ;;  %v9322_v8 = vld [vmem:[#allocation2 + $0x328] sm:$0xff]  ;;  %v9325_v29 = vld [vmem:[#allocation2 + $0x358] sm:$0xff] }
 0x4da   :  { %2382 = vmatprep.subr.mxu0 %v9310_v48  ;;  %2451 = vmatprep.subr.mxu1 %v9313_v28  ;;  %13543 = vst [vmem:[#allocation162_spill] sm:$0xff] %v9322_v8  ;;  %13544 = vst [vmem:[#allocation163_spill] sm:$0xff] %v9325_v29  ;;  %v9328_v48 = vld [vmem:[#allocation2 + $0x320] sm:$0xff]  ;;  %v9331_v28 = vld [vmem:[#allocation2 + $0x350] sm:$0xff] }
 0x4db   :  { %2383 = vmatpush2.msra.mxu0 %v9316_v31  ;;  %2452 = vmatpush2.msra.mxu1 %v9319_v60  ;;  %13545 = vst [vmem:[#allocation164_spill] sm:$0xff] %v9328_v48  ;;  %13546 = vst [vmem:[#allocation165_spill] sm:$0xff] %v9331_v28  ;;  %v9334_v31 = vld [vmem:[#allocation2 + $0x308] sm:$0xff]  ;;  %v9337_v60 = vld [vmem:[#allocation2 + $0x338] sm:$0xff] }
 0x4dc   :  { %2384 = vmatprep.subr.mxu0 %v9322_v8  ;;  %2453 = vmatprep.subr.mxu1 %v9325_v29  ;;  %13547 = vst [vmem:[#allocation166_spill] sm:$0xff] %v9334_v31  ;;  %13548 = vst [vmem:[#allocation167_spill] sm:$0xff] %v9337_v60  ;;  %v9340_v8 = vld [vmem:[#allocation2 + $0x300] sm:$0xff]  ;;  %v9343_v29 = vld [vmem:[#allocation2 + $0x330] sm:$0xff] }
 0x4dd   :  { %2385 = vmatpush2.msra.mxu0 %v9328_v48  ;;  %2454 = vmatpush2.msra.mxu1 %v9331_v28  ;;  %13549 = vst [vmem:[#allocation168_spill] sm:$0xff] %v9340_v8  ;;  %13550 = vst [vmem:[#allocation169_spill] sm:$0xff] %v9343_v29  ;;  %v9346_v48 = vld [vmem:[#allocation2 + $0x2e8] sm:$0xff]  ;;  %v9349_v28 = vld [vmem:[#allocation2 + $0x318] sm:$0xff] }
 0x4de   :  { %2386 = vmatprep.subr.mxu0 %v9334_v31  ;;  %2455 = vmatprep.subr.mxu1 %v9337_v60  ;;  %13551 = vst [vmem:[#allocation170_spill] sm:$0xff] %v9346_v48  ;;  %13552 = vst [vmem:[#allocation171_spill] sm:$0xff] %v9349_v28  ;;  %v9352_v31 = vld [vmem:[#allocation2 + $0x2e0] sm:$0xff]  ;;  %v9355_v60 = vld [vmem:[#allocation2 + $0x310] sm:$0xff] }
 0x4df   :  { %2387 = vmatpush2.msra.mxu0 %v9340_v8  ;;  %2456 = vmatpush2.msra.mxu1 %v9343_v29  ;;  %13553 = vst [vmem:[#allocation172_spill] sm:$0xff] %v9352_v31  ;;  %13554 = vst [vmem:[#allocation173_spill] sm:$0xff] %v9355_v60  ;;  %v9358_v8 = vld [vmem:[#allocation2 + $0x2c8] sm:$0xff]  ;;  %v9361_v29 = vld [vmem:[#allocation2 + $0x2f8] sm:$0xff] }
 0x4e0   :  { %2388 = vmatprep.subr.mxu0 %v9346_v48  ;;  %2457 = vmatprep.subr.mxu1 %v9349_v28  ;;  %13555 = vst [vmem:[#allocation174_spill] sm:$0xff] %v9358_v8  ;;  %13556 = vst [vmem:[#allocation175_spill] sm:$0xff] %v9361_v29  ;;  %v9364_v48 = vld [vmem:[#allocation2 + $0x2c0] sm:$0xff]  ;;  %v9367_v28 = vld [vmem:[#allocation2 + $0x2f0] sm:$0xff] }
 0x4e1   :  { %2389 = vmatpush2.msra.mxu0 %v9352_v31  ;;  %2458 = vmatpush2.msra.mxu1 %v9355_v60  ;;  %13557 = vst [vmem:[#allocation176_spill] sm:$0xff] %v9364_v48  ;;  %13558 = vst [vmem:[#allocation177_spill] sm:$0xff] %v9367_v28  ;;  %v9370_v31 = vld [vmem:[#allocation2 + $0x2a8] sm:$0xff]  ;;  %v9373_v60 = vld [vmem:[#allocation2 + $0x2d8] sm:$0xff] }
 0x4e2   :  { %2390 = vmatprep.subr.mxu0 %v9358_v8  ;;  %2459 = vmatprep.subr.mxu1 %v9361_v29  ;;  %13559 = vst [vmem:[#allocation178_spill] sm:$0xff] %v9370_v31  ;;  %13560 = vst [vmem:[#allocation179_spill] sm:$0xff] %v9373_v60  ;;  %v9376_v8 = vld [vmem:[#allocation2 + $0x2a0] sm:$0xff]  ;;  %v9379_v29 = vld [vmem:[#allocation2 + $0x2d0] sm:$0xff] }
 0x4e3   :  { %2391 = vmatpush2.msra.mxu0 %v9364_v48  ;;  %2460 = vmatpush2.msra.mxu1 %v9367_v28  ;;  %13561 = vst [vmem:[#allocation180_spill] sm:$0xff] %v9376_v8  ;;  %13562 = vst [vmem:[#allocation181_spill] sm:$0xff] %v9379_v29  ;;  %v9382_v48 = vld [vmem:[#allocation2 + $0x288] sm:$0xff]  ;;  %v9385_v28 = vld [vmem:[#allocation2 + $0x2b8] sm:$0xff] }
 0x4e4   :  { %2392 = vmatprep.subr.mxu0 %v9370_v31  ;;  %2461 = vmatprep.subr.mxu1 %v9373_v60  ;;  %13563 = vst [vmem:[#allocation182_spill] sm:$0xff] %v9382_v48  ;;  %13564 = vst [vmem:[#allocation183_spill] sm:$0xff] %v9385_v28  ;;  %v9388_v31 = vld [vmem:[#allocation2 + $0x280] sm:$0xff]  ;;  %v9391_v60 = vld [vmem:[#allocation2 + $0x2b0] sm:$0xff] }
 0x4e5   :  { %2393 = vmatpush2.msra.mxu0 %v9376_v8  ;;  %2462 = vmatpush2.msra.mxu1 %v9379_v29  ;;  %13565 = vst [vmem:[#allocation184_spill] sm:$0xff] %v9388_v31  ;;  %13566 = vst [vmem:[#allocation185_spill] sm:$0xff] %v9391_v60  ;;  %v9394_v8 = vld [vmem:[#allocation2 + $0x268] sm:$0xff]  ;;  %v9397_v29 = vld [vmem:[#allocation2 + $0x298] sm:$0xff] }
 0x4e6   :  { %2394 = vmatprep.subr.mxu0 %v9382_v48  ;;  %2463 = vmatprep.subr.mxu1 %v9385_v28  ;;  %13567 = vst [vmem:[#allocation186_spill] sm:$0xff] %v9394_v8  ;;  %13568 = vst [vmem:[#allocation187_spill] sm:$0xff] %v9397_v29  ;;  %v9400_v48 = vld [vmem:[#allocation2 + $0x260] sm:$0xff]  ;;  %v9403_v28 = vld [vmem:[#allocation2 + $0x290] sm:$0xff] }
 0x4e7   :  { %2395 = vmatpush2.msra.mxu0 %v9388_v31  ;;  %2464 = vmatpush2.msra.mxu1 %v9391_v60  ;;  %13569 = vst [vmem:[#allocation188_spill] sm:$0xff] %v9400_v48  ;;  %13570 = vst [vmem:[#allocation189_spill] sm:$0xff] %v9403_v28  ;;  %v9406_v31 = vld [vmem:[#allocation2 + $0x248] sm:$0xff]  ;;  %v9409_v60 = vld [vmem:[#allocation2 + $0x278] sm:$0xff] }
 0x4e8   :  { %2396 = vmatprep.subr.mxu0 %v9394_v8  ;;  %2465 = vmatprep.subr.mxu1 %v9397_v29  ;;  %13571 = vst [vmem:[#allocation190_spill] sm:$0xff] %v9406_v31  ;;  %13572 = vst [vmem:[#allocation191_spill] sm:$0xff] %v9409_v60  ;;  %v9412_v8 = vld [vmem:[#allocation2 + $0x240] sm:$0xff]  ;;  %v9415_v29 = vld [vmem:[#allocation2 + $0x270] sm:$0xff] }
 0x4e9   :  { %2397 = vmatpush2.msra.mxu0 %v9400_v48  ;;  %2466 = vmatpush2.msra.mxu1 %v9403_v28  ;;  %13573 = vst [vmem:[#allocation192_spill] sm:$0xff] %v9412_v8  ;;  %13574 = vst [vmem:[#allocation193_spill] sm:$0xff] %v9415_v29  ;;  %v9418_v48 = vld [vmem:[#allocation2 + $0x228] sm:$0xff]  ;;  %v9421_v28 = vld [vmem:[#allocation2 + $0x258] sm:$0xff] }
 0x4ea   :  { %2398 = vmatprep.subr.mxu0 %v9406_v31  ;;  %2467 = vmatprep.subr.mxu1 %v9409_v60  ;;  %13575 = vst [vmem:[#allocation194_spill] sm:$0xff] %v9418_v48  ;;  %13576 = vst [vmem:[#allocation195_spill] sm:$0xff] %v9421_v28  ;;  %v9424_v31 = vld [vmem:[#allocation2 + $0x220] sm:$0xff]  ;;  %v9430_v60 = vld [vmem:[#allocation2 + $0x250] sm:$0xff] }
 0x4eb   :  { %2399 = vmatpush2.msra.mxu0 %v9412_v8  ;;  %2468 = vmatpush2.msra.mxu1 %v9415_v29  ;;  %13577 = vst [vmem:[#allocation196_spill] sm:$0xff] %v9424_v31  ;;  %v5628_v8 = vld [vmem:[%s11964_s0 + $0xc] sm:$0xf]  ;;  %13578 = vst [vmem:[#allocation197_spill] sm:$0xff] %v9430_v60 }
 0x4ec   :  { %2400 = vmatprep.subr.mxu0 %v9418_v48  ;;  %2469 = vmatprep.subr.mxu1 %v9421_v28  ;;  %v9433_v29 = vld [vmem:[#allocation2 + $0x208] sm:$0xff]  ;;  %v9436_v48 = vld [vmem:[#allocation2 + $0x238] sm:$0xff]  ;;  %v9439_v28 = vld [vmem:[#allocation2 + $0x200] sm:$0xff]  ;;  %13583 = vst [vmem:[#allocation202_spill] sm:$0xff] %v9445_v39 }
 0x4ed   :  { %2401 = vmatpush2.msra.mxu0 %v9424_v31  ;;  %2470 = vmatpush2.msra.mxu1 %v9430_v60  ;;  %13579 = vst [vmem:[#allocation198_spill] sm:$0xff] %v9433_v29  ;;  %13580 = vst [vmem:[#allocation199_spill] sm:$0xff] %v9436_v48  ;;  %v9442_v31 = vld [vmem:[#allocation2 + $0x230] sm:$0xff] }
 0x4ee   :  { %2402 = vmatprep.subr.mxu0 %v9433_v29  ;;  %2471 = vmatprep.subr.mxu1 %v9436_v48  ;;  %13581 = vst [vmem:[#allocation200_spill] sm:$0xff] %v9439_v28  ;;  %13582 = vst [vmem:[#allocation201_spill] sm:$0xff] %v9442_v31  ;;  %v9448_v60 = vld [vmem:[#allocation2 + $0x210] sm:$0xff]  ;;  %v9451_v29 = vld [vmem:[#allocation7 + $0x1e8] sm:$0xff] }
 0x4ef   :  { %2403 = vmatpush2.msra.mxu0 %v9439_v28  ;;  %2472 = vmatpush2.msra.mxu1 %v9442_v31  ;;  %13584 = vst [vmem:[#allocation203_spill] sm:$0xff] %v9448_v60  ;;  %13585 = vst [vmem:[#allocation204_spill] sm:$0xff] %v9451_v29  ;;  %v9454_v48 = vld [vmem:[#allocation7 + $0x1f8] sm:$0xff]  ;;  %v9457_v28 = vld [vmem:[#allocation7 + $0x1e0] sm:$0xff] }
 0x4f0   :  { %2405 = vmatmul.mubr.f32.vlgmr.msra.gmra.mxu0 %v5628_v8  ;;  %2473 = vmatprep.subr.mxu1 %v9445_v39  ;;  %13586 = vst [vmem:[#allocation205_spill] sm:$0xff] %v9454_v48  ;;  %13587 = vst [vmem:[#allocation206_spill] sm:$0xff] %v9457_v28  ;;  %v9460_v31 = vld [vmem:[#allocation7 + $0x1f0] sm:$0xff]  ;;  %v9463_v39 = vld [vmem:[#allocation7 + $0x1c8] sm:$0xff] }
 0x4f1   :  { %2474 = vmatpush2.msra.mxu1 %v9448_v60  ;;  %2509 = vmatprep.subr.mxu0 %v9451_v29  ;;  %13588 = vst [vmem:[#allocation207_spill] sm:$0xff] %v9460_v31  ;;  %13589 = vst [vmem:[#allocation208_spill] sm:$0xff] %v9463_v39  ;;  %v9466_v60 = vld [vmem:[#allocation7 + $0x1d8] sm:$0xff] }
 0x4f2   :  { %2476 = vmatmul.mubr.f32.vlgmr.msra.gmra.mxu1 %v5628_v8  ;;  %2580 = vmatprep.subr.mxu1 %v9454_v48  ;;  %13590 = vst [vmem:[#allocation209_spill] sm:$0xff] %v9466_v60  ;;  %v9469_v8 = vld [vmem:[#allocation7 + $0x1c0] sm:$0xff]  ;;  %v9472_v48 = vld [vmem:[#allocation7 + $0x1d0] sm:$0xff] }
 0x4f3   :  { %2510 = vmatpush1.msra.mxu0 %v9457_v28  ;;  %2581 = vmatpush1.msra.mxu1 %v9460_v31  ;;  %13591 = vst [vmem:[#allocation210_spill] sm:$0xff] %v9469_v8  ;;  %13592 = vst [vmem:[#allocation211_spill] sm:$0xff] %v9472_v48  ;;  %v9475_v28 = vld [vmem:[#allocation7 + $0x1a8] sm:$0xff]  ;;  %v9478_v31 = vld [vmem:[#allocation7 + $0x1b8] sm:$0xff] }
 0x4f4   :  { %2511 = vmatprep.subr.mxu0 %v9463_v39  ;;  %2582 = vmatprep.subr.mxu1 %v9466_v60  ;;  %13593 = vst [vmem:[#allocation212_spill] sm:$0xff] %v9475_v28  ;;  %13594 = vst [vmem:[#allocation213_spill] sm:$0xff] %v9478_v31  ;;  %v9481_v39 = vld [vmem:[#allocation7 + $0x1a0] sm:$0xff]  ;;  %v9484_v60 = vld [vmem:[#allocation7 + $0x1b0] sm:$0xff] }
 0x4f5   :  { %2512 = vmatpush1.msra.mxu0 %v9469_v8  ;;  %2583 = vmatpush1.msra.mxu1 %v9472_v48  ;;  %13595 = vst [vmem:[#allocation214_spill] sm:$0xff] %v9481_v39  ;;  %13596 = vst [vmem:[#allocation215_spill] sm:$0xff] %v9484_v60  ;;  %v9487_v8 = vld [vmem:[#allocation7 + $0x188] sm:$0xff]  ;;  %v9490_v48 = vld [vmem:[#allocation7 + $0x198] sm:$0xff] }
 0x4f6   :  { %2513 = vmatprep.subr.mxu0 %v9475_v28  ;;  %2584 = vmatprep.subr.mxu1 %v9478_v31  ;;  %13597 = vst [vmem:[#allocation216_spill] sm:$0xff] %v9487_v8  ;;  %13598 = vst [vmem:[#allocation217_spill] sm:$0xff] %v9490_v48  ;;  %v9493_v28 = vld [vmem:[#allocation7 + $0x180] sm:$0xff]  ;;  %v9496_v31 = vld [vmem:[#allocation7 + $0x190] sm:$0xff] }
 0x4f7   :  { %2514 = vmatpush1.msra.mxu0 %v9481_v39  ;;  %2585 = vmatpush1.msra.mxu1 %v9484_v60  ;;  %13599 = vst [vmem:[#allocation218_spill] sm:$0xff] %v9493_v28  ;;  %13600 = vst [vmem:[#allocation219_spill] sm:$0xff] %v9496_v31  ;;  %v9499_v39 = vld [vmem:[#allocation7 + $0x168] sm:$0xff]  ;;  %v9502_v60 = vld [vmem:[#allocation7 + $0x178] sm:$0xff] }
 0x4f8   :  { %2515 = vmatprep.subr.mxu0 %v9487_v8  ;;  %2586 = vmatprep.subr.mxu1 %v9490_v48  ;;  %13601 = vst [vmem:[#allocation220_spill] sm:$0xff] %v9499_v39  ;;  %13602 = vst [vmem:[#allocation221_spill] sm:$0xff] %v9502_v60  ;;  %v9505_v8 = vld [vmem:[#allocation7 + $0x160] sm:$0xff]  ;;  %v9508_v48 = vld [vmem:[#allocation7 + $0x170] sm:$0xff] }
 0x4f9   :  { %2516 = vmatpush1.msra.mxu0 %v9493_v28  ;;  %2587 = vmatpush1.msra.mxu1 %v9496_v31  ;;  %13603 = vst [vmem:[#allocation222_spill] sm:$0xff] %v9505_v8  ;;  %13604 = vst [vmem:[#allocation223_spill] sm:$0xff] %v9508_v48  ;;  %v9511_v28 = vld [vmem:[#allocation7 + $0x148] sm:$0xff]  ;;  %v9514_v31 = vld [vmem:[#allocation7 + $0x158] sm:$0xff] }
 0x4fa   :  { %2517 = vmatprep.subr.mxu0 %v9499_v39  ;;  %2588 = vmatprep.subr.mxu1 %v9502_v60  ;;  %13605 = vst [vmem:[#allocation224_spill] sm:$0xff] %v9511_v28  ;;  %13606 = vst [vmem:[#allocation225_spill] sm:$0xff] %v9514_v31  ;;  %v9517_v39 = vld [vmem:[#allocation7 + $0x140] sm:$0xff]  ;;  %v9520_v60 = vld [vmem:[#allocation7 + $0x150] sm:$0xff] }
 0x4fb   :  { %2518 = vmatpush1.msra.mxu0 %v9505_v8  ;;  %2589 = vmatpush1.msra.mxu1 %v9508_v48  ;;  %13607 = vst [vmem:[#allocation226_spill] sm:$0xff] %v9517_v39  ;;  %13608 = vst [vmem:[#allocation227_spill] sm:$0xff] %v9520_v60  ;;  %v9523_v8 = vld [vmem:[#allocation7 + $0x128] sm:$0xff]  ;;  %v9526_v48 = vld [vmem:[#allocation7 + $0x138] sm:$0xff] }
 0x4fc   :  { %2519 = vmatprep.subr.mxu0 %v9511_v28  ;;  %2590 = vmatprep.subr.mxu1 %v9514_v31  ;;  %13609 = vst [vmem:[#allocation228_spill] sm:$0xff] %v9523_v8  ;;  %13610 = vst [vmem:[#allocation229_spill] sm:$0xff] %v9526_v48  ;;  %v9529_v28 = vld [vmem:[#allocation7 + $0x120] sm:$0xff]  ;;  %v9532_v31 = vld [vmem:[#allocation7 + $0x130] sm:$0xff] }
 0x4fd   :  { %2520 = vmatpush1.msra.mxu0 %v9517_v39  ;;  %2591 = vmatpush1.msra.mxu1 %v9520_v60  ;;  %13611 = vst [vmem:[#allocation230_spill] sm:$0xff] %v9529_v28  ;;  %13612 = vst [vmem:[#allocation231_spill] sm:$0xff] %v9532_v31  ;;  %v9535_v39 = vld [vmem:[#allocation7 + $0x108] sm:$0xff]  ;;  %v9538_v60 = vld [vmem:[#allocation7 + $0x118] sm:$0xff] }
 0x4fe   :  { %2521 = vmatprep.subr.mxu0 %v9523_v8  ;;  %2592 = vmatprep.subr.mxu1 %v9526_v48  ;;  %13613 = vst [vmem:[#allocation232_spill] sm:$0xff] %v9535_v39  ;;  %13614 = vst [vmem:[#allocation233_spill] sm:$0xff] %v9538_v60  ;;  %v9541_v8 = vld [vmem:[#allocation7 + $0x100] sm:$0xff]  ;;  %v9544_v48 = vld [vmem:[#allocation7 + $0x110] sm:$0xff] }
 0x4ff   :  { %2522 = vmatpush1.msra.mxu0 %v9529_v28  ;;  %2593 = vmatpush1.msra.mxu1 %v9532_v31  ;;  %13615 = vst [vmem:[#allocation234_spill] sm:$0xff] %v9541_v8  ;;  %13616 = vst [vmem:[#allocation235_spill] sm:$0xff] %v9544_v48  ;;  %v9547_v28 = vld [vmem:[#allocation7 + $0xe8] sm:$0xff]  ;;  %v9550_v31 = vld [vmem:[#allocation7 + $0xf8] sm:$0xff] }
 0x500   :  { %2523 = vmatprep.subr.mxu0 %v9535_v39  ;;  %2594 = vmatprep.subr.mxu1 %v9538_v60  ;;  %13617 = vst [vmem:[#allocation236_spill] sm:$0xff] %v9547_v28  ;;  %13618 = vst [vmem:[#allocation237_spill] sm:$0xff] %v9550_v31  ;;  %v9553_v39 = vld [vmem:[#allocation7 + $0xe0] sm:$0xff]  ;;  %v9556_v60 = vld [vmem:[#allocation7 + $0xf0] sm:$0xff] }
 0x501   :  { %2524 = vmatpush1.msra.mxu0 %v9541_v8  ;;  %2595 = vmatpush1.msra.mxu1 %v9544_v48  ;;  %13619 = vst [vmem:[#allocation238_spill] sm:$0xff] %v9553_v39  ;;  %13620 = vst [vmem:[#allocation239_spill] sm:$0xff] %v9556_v60  ;;  %v9559_v8 = vld [vmem:[#allocation7 + $0xc8] sm:$0xff]  ;;  %v9562_v48 = vld [vmem:[#allocation7 + $0xd8] sm:$0xff] }
 0x502   :  { %2525 = vmatprep.subr.mxu0 %v9547_v28  ;;  %2596 = vmatprep.subr.mxu1 %v9550_v31  ;;  %13621 = vst [vmem:[#allocation240_spill] sm:$0xff] %v9559_v8  ;;  %13622 = vst [vmem:[#allocation241_spill] sm:$0xff] %v9562_v48  ;;  %v9565_v28 = vld [vmem:[#allocation7 + $0xc0] sm:$0xff]  ;;  %v9568_v31 = vld [vmem:[#allocation7 + $0xd0] sm:$0xff] }
 0x503   :  { %2526 = vmatpush1.msra.mxu0 %v9553_v39  ;;  %2597 = vmatpush1.msra.mxu1 %v9556_v60  ;;  %13623 = vst [vmem:[#allocation242_spill] sm:$0xff] %v9565_v28  ;;  %13624 = vst [vmem:[#allocation243_spill] sm:$0xff] %v9568_v31  ;;  %v9571_v39 = vld [vmem:[#allocation7 + $0xa8] sm:$0xff]  ;;  %v9574_v60 = vld [vmem:[#allocation7 + $0xb8] sm:$0xff] }
 0x504   :  { %2527 = vmatprep.subr.mxu0 %v9559_v8  ;;  %2598 = vmatprep.subr.mxu1 %v9562_v48  ;;  %13625 = vst [vmem:[#allocation244_spill] sm:$0xff] %v9571_v39  ;;  %13626 = vst [vmem:[#allocation245_spill] sm:$0xff] %v9574_v60  ;;  %v9577_v8 = vld [vmem:[#allocation7 + $0xa0] sm:$0xff]  ;;  %v9580_v48 = vld [vmem:[#allocation7 + $0xb0] sm:$0xff] }
 0x505   :  { %2528 = vmatpush1.msra.mxu0 %v9565_v28  ;;  %2599 = vmatpush1.msra.mxu1 %v9568_v31  ;;  %13627 = vst [vmem:[#allocation246_spill] sm:$0xff] %v9577_v8  ;;  %13628 = vst [vmem:[#allocation247_spill] sm:$0xff] %v9580_v48  ;;  %v9583_v28 = vld [vmem:[#allocation7 + $0x88] sm:$0xff]  ;;  %v9586_v31 = vld [vmem:[#allocation7 + $0x98] sm:$0xff] }
 0x506   :  { %2529 = vmatprep.subr.mxu0 %v9571_v39  ;;  %2600 = vmatprep.subr.mxu1 %v9574_v60  ;;  %13629 = vst [vmem:[#allocation248_spill] sm:$0xff] %v9583_v28  ;;  %13630 = vst [vmem:[#allocation249_spill] sm:$0xff] %v9586_v31  ;;  %v9589_v39 = vld [vmem:[#allocation7 + $0x80] sm:$0xff]  ;;  %v9592_v60 = vld [vmem:[#allocation7 + $0x90] sm:$0xff] }
 0x507   :  { %2530 = vmatpush1.msra.mxu0 %v9577_v8  ;;  %2601 = vmatpush1.msra.mxu1 %v9580_v48  ;;  %13631 = vst [vmem:[#allocation250_spill] sm:$0xff] %v9589_v39  ;;  %13632 = vst [vmem:[#allocation251_spill] sm:$0xff] %v9592_v60  ;;  %v9595_v8 = vld [vmem:[#allocation7 + $0x68] sm:$0xff]  ;;  %v9598_v48 = vld [vmem:[#allocation7 + $0x78] sm:$0xff] }
 0x508   :  { %2531 = vmatprep.subr.mxu0 %v9583_v28  ;;  %2602 = vmatprep.subr.mxu1 %v9586_v31  ;;  %13633 = vst [vmem:[#allocation252_spill] sm:$0xff] %v9595_v8  ;;  %13634 = vst [vmem:[#allocation253_spill] sm:$0xff] %v9598_v48  ;;  %v9601_v28 = vld [vmem:[#allocation7 + $0x60] sm:$0xff]  ;;  %v9604_v31 = vld [vmem:[#allocation7 + $0x70] sm:$0xff] }
 0x509   :  { %2532 = vmatpush1.msra.mxu0 %v9589_v39  ;;  %2603 = vmatpush1.msra.mxu1 %v9592_v60  ;;  %13635 = vst [vmem:[#allocation254_spill] sm:$0xff] %v9601_v28  ;;  %13636 = vst [vmem:[#allocation255_spill] sm:$0xff] %v9604_v31  ;;  %v9607_v39 = vld [vmem:[#allocation7 + $0x48] sm:$0xff]  ;;  %v9610_v60 = vld [vmem:[#allocation7 + $0x58] sm:$0xff] }
 0x50a   :  { %2533 = vmatprep.subr.mxu0 %v9595_v8  ;;  %2604 = vmatprep.subr.mxu1 %v9598_v48  ;;  %13637 = vst [vmem:[#allocation256_spill] sm:$0xff] %v9607_v39  ;;  %13638 = vst [vmem:[#allocation257_spill] sm:$0xff] %v9610_v60  ;;  %v9613_v8 = vld [vmem:[#allocation7 + $0x40] sm:$0xff]  ;;  %v9616_v48 = vld [vmem:[#allocation7 + $0x50] sm:$0xff] }
 0x50b   :  { %2534 = vmatpush1.msra.mxu0 %v9601_v28  ;;  %2605 = vmatpush1.msra.mxu1 %v9604_v31  ;;  %13639 = vst [vmem:[#allocation258_spill] sm:$0xff] %v9613_v8  ;;  %13640 = vst [vmem:[#allocation259_spill] sm:$0xff] %v9616_v48  ;;  %v9619_v28 = vld [vmem:[#allocation7 + $0x28] sm:$0xff]  ;;  %v9622_v31 = vld [vmem:[#allocation7 + $0x38] sm:$0xff] }
 0x50c   :  { %2535 = vmatprep.subr.mxu0 %v9607_v39  ;;  %2606 = vmatprep.subr.mxu1 %v9610_v60  ;;  %13641 = vst [vmem:[#allocation260_spill] sm:$0xff] %v9619_v28  ;;  %13642 = vst [vmem:[#allocation261_spill] sm:$0xff] %v9622_v31  ;;  %v9625_v39 = vld [vmem:[#allocation7 + $0x20] sm:$0xff]  ;;  %v9628_v60 = vld [vmem:[#allocation7 + $0x30] sm:$0xff] }
 0x50d   :  { %2536 = vmatpush1.msra.mxu0 %v9613_v8  ;;  %2607 = vmatpush1.msra.mxu1 %v9616_v48  ;;  %13643 = vst [vmem:[#allocation262_spill] sm:$0xff] %v9625_v39  ;;  %13644 = vst [vmem:[#allocation15_spill] sm:$0xff] %v9628_v60  ;;  %v9631_v8 = vld [vmem:[#allocation7 + $0x8] sm:$0xff]  ;;  %v9634_v48 = vld [vmem:[#allocation7 + $0x18] sm:$0xff] }
 0x50e   :  { %2537 = vmatprep.subr.mxu0 %v9619_v28  ;;  %2608 = vmatprep.subr.mxu1 %v9622_v31  ;;  %13645 = vst [vmem:[#allocation263_spill] sm:$0xff] %v9631_v8  ;;  %13646 = vst [vmem:[#allocation264_spill] sm:$0xff] %v9634_v48  ;;  %v9637_v28 = vld [vmem:[#allocation7] sm:$0xff] }
 0x50f   :  { %2538 = vmatpush1.msra.mxu0 %v9625_v39  ;;  %2609 = vmatpush1.msra.mxu1 %v9628_v60  ;;  %13647 = vst [vmem:[#allocation265_spill] sm:$0xff] %v9637_v28  ;;  %v9643_v39 = vld [vmem:[#allocation5 + $0x1e8] sm:$0xff]  ;;  %v9646_v60 = vld [vmem:[#allocation5 + $0x1f8] sm:$0xff] }
 0x510   :  { %2539 = vmatprep.subr.mxu0 %v9631_v8  ;;  %2610 = vmatprep.subr.mxu1 %v9634_v48  ;;  %13648 = vst [vmem:[#allocation266_spill] sm:$0xff] %v9643_v39  ;;  %13649 = vst [vmem:[#allocation267_spill] sm:$0xff] %v9646_v60 }
 0x511   :  { %2540 = vmatpush1.msra.mxu0 %v9637_v28  ;;  %2611 = vmatpush1.msra.mxu1 %v8721_v34 }
 0x512   :  { %2573 = vmatprep.mubr.f32.mxu0 %v12905_v24  ;;  %2644 = vmatprep.mubr.f32.mxu1 %v12905_v24 }
 0x513   :  { %2651 = vmatprep.subr.mxu0 %v9643_v39  ;;  %2722 = vmatprep.subr.mxu1 %v9646_v60 }
 0x52c   :  { %v1946_v8 = vpop.f32.mrf.mxu0  ;;  %v2017_v48 = vpop.f32.mrf.mxu1 }
 0x52e   :  { %v1948_v31 = vpop.f32.mrf.mxu0  ;;  %v2019_v29 = vpop.f32.mrf.mxu1 }
 0x54d   :  { %v2088_v32 = vpop.f32.mrf.mxu0  ;;  %v2159_v28 = vpop.f32.mrf.mxu1 }
 0x54e   :  { %v2089_v11 = vadd.f32 %v2088_v32, %v1946_v8  ;;  %v2160_v34 = vadd.f32 %v2159_v28, %v2017_v48 }
 0x54f   :  { %v2090_v26 = vpop.f32.mrf.mxu0  ;;  %v2161_v27 = vpop.f32.mrf.mxu1 }
 0x550   :  { %v2091_v2 = vadd.f32 %v2090_v26, %v1948_v31  ;;  %v2162_v1 = vadd.f32 %v2161_v27, %v2019_v29 }
 0x56f   :  { %v2230_v63 = vpop.f32.mrf.mxu0  ;;  %v2301_v62 = vpop.f32.mrf.mxu1 }
 0x570   :  { %v2306_v15 = vadd.f32 %v2230_v63, %v2089_v11  ;;  %v2308_v39 = vadd.f32 %v2301_v62, %v2160_v34 }
 0x571   :  { %v2232_v0 = vpop.f32.mrf.mxu0  ;;  %v2303_v21 = vpop.f32.mrf.mxu1 }
 0x572   :  { %v2310_v60 = vadd.f32 %v2306_v15, %v8283_v43  ;;  %v2307_v20 = vadd.f32 %v2232_v0, %v2091_v2  ;;  %v9650_v18 = vadd.f32 %v2303_v21, %v2162_v1  ;;  %v2312_v26 = vadd.f32 %v2308_v39, %v8297_v14 }
 0x574   :  { %v5625_v40 = vmul.f32 -1.442695, %v2310_v60  ;;  %v2311_v13 = vadd.f32 %v2307_v20, %v8288_v19 }
 0x576   :  { %5805 = vpow2.f32 %v5625_v40  ;;  %v5626_v28 = vmul.f32 -1.442695, %v2311_v13 }
 0x578   :  { %5807 = vpow2.f32 %v5626_v28 }
 0x579   :  { %5809 = vtanh.f32 %v2312_v26 }
 0x583   :  { %v5806_v27 = vpop.eup %5805 }
 0x584   :  { %v2317_v32 = vadd.f32 1.0, %v5806_v27 }
 0x585   :  { %v5808_v31 = vpop.eup %5807 }
 0x586   :  { %5811 = vrcp.f32 %v2317_v32  ;;  %v2323_v62 = vadd.f32 1.0, %v5808_v31  ;;  %v5810_v63 = vpop.eup %5809 }
 0x588   :  { %5813 = vrcp.f32 %v2323_v62 }
 0x593   :  { %v5812_v15 = vpop.eup %5811 }
 0x594   :  { %v2334_v0 = vmul.f32 %v5812_v15, %v5810_v63 }
 0x595   :  { %v5814_v21 = vpop.eup %5813 }
 0x596   :  { %v2333_v1 = vmul.f32 %v5814_v21, %v8734_v30 }
 0x598   :  { %v9655_v2 = vadd.f32 %v2334_v0, %v2333_v1 }
 0x5b0   :  { %v2406_v40 = vpop.f32.mrf.mxu0 }
 0x5b1   :  { %v2407_v13 = vadd.f32 %v2406_v40, %v7384_v12 }
 0x5b2   :  { %v2408_v20 = vpop.f32.mrf.mxu0  ;;  %v2477_v48 = vpop.f32.mrf.mxu1 }
 0x5b3   :  { %v5629_v11 = vmul.f32 -1.442695, %v2407_v13  ;;  %v2409_v39 = vadd.f32 %v2408_v20, %v13373_v36  ;;  %v2478_v34 = vadd.f32 %v2477_v48, %v7400_v25  ;;  %v9671_v48 = vld [vmem:[#allocation5 + $0x1f0] sm:$0xff] }
 0x5b4   :  { %v2479_v60 = vpop.f32.mrf.mxu1 }
 0x5b5   :  { %5815 = vpow2.f32 %v5629_v11  ;;  %v5630_v29 = vmul.f32 -1.442695, %v2409_v39  ;;  %v2480_v8 = vadd.f32 %v2479_v60, %v7396_v23  ;;  %v9677_v60 = vld [vmem:[#allocation5 + $0x1d8] sm:$0xff] }
 0x5b7   :  { %5817 = vpow2.f32 %v5630_v29  ;;  %v5631_v28 = vmul.f32 -1.442695, %v2480_v8  ;;  %v9668_v29 = vld [vmem:[#allocation5 + $0x1e0] sm:$0xff] }
 0x5b8   :  { %5819 = vtanh.f32 %v2478_v34  ;;  %v9680_v8 = vld [vmem:[#allocation5 + $0x1c0] sm:$0xff]  ;;  %v9683_v34 = vld [vmem:[#allocation5 + $0x1d0] sm:$0xff] }
 0x5b9   :  { %5821 = vpow2.f32 %v5631_v28  ;;  %v9686_v28 = vld [vmem:[#allocation5 + $0x1a8] sm:$0xff] }
 0x5c2   :  { %v5816_v30 = vpop.eup %5815 }
 0x5c3   :  { %v2485_v26 = vadd.f32 1.0, %v5816_v30  ;;  %v9689_v30 = vld [vmem:[#allocation5 + $0x1b8] sm:$0xff] }
 0x5c4   :  { %v5818_v27 = vpop.eup %5817 }
 0x5c5   :  { %5823 = vrcp.f32 %v2485_v26  ;;  %v2491_v32 = vadd.f32 1.0, %v5818_v27  ;;  %v5820_v31 = vpop.eup %5819  ;;  %v9692_v26 = vld [vmem:[#allocation5 + $0x1a0] sm:$0xff]  ;;  %v9695_v27 = vld [vmem:[#allocation5 + $0x1b0] sm:$0xff] }
 0x5c6   :  { %v5822_v62 = vpop.eup %5821 }
 0x5c7   :  { %5825 = vrcp.f32 %v2491_v32  ;;  %v2498_v0 = vadd.f32 1.0, %v5822_v62  ;;  %v9698_v32 = vld [vmem:[#allocation5 + $0x188] sm:$0xff]  ;;  %v9704_v62 = vld [vmem:[#allocation5 + $0x180] sm:$0xff] }
 0x5c9   :  { %5827 = vrcp.f32 %v2498_v0  ;;  %v9713_v0 = vld [vmem:[#allocation5 + $0x178] sm:$0xff] }
 0x5ca   :  { %13650 = vst [vmem:[#allocation268_spill] sm:$0xff] %v9713_v0 }
 0x5d2   :  { %v5824_v63 = vpop.eup %5823 }
 0x5d3   :  { %v2502_v1 = vmul.f32 %v5824_v63, %v5820_v31  ;;  %v9701_v31 = vld [vmem:[#allocation5 + $0x198] sm:$0xff]  ;;  %v9707_v63 = vld [vmem:[#allocation5 + $0x190] sm:$0xff] }
 0x5d4   :  { %v5826_v15 = vpop.eup %5825 }
 0x5d5   :  { %v2501_v21 = vmul.f32 %v5826_v15, %v8741_v56  ;;  %v9674_v56 = vld [vmem:[#allocation5 + $0x1c8] sm:$0xff] }
 0x5d6   :  { %v5828_v13 = vpop.eup %5827  ;;  %v9710_v15 = vld [vmem:[#allocation5 + $0x168] sm:$0xff] }
 0x5d7   :  { %v9662_v40 = vadd.f32 %v2502_v1, %v2501_v21  ;;  %v9716_v21 = vld [vmem:[#allocation5 + $0x160] sm:$0xff]  ;;  %v9719_v1 = vld [vmem:[#allocation5 + $0x170] sm:$0xff] }
 0x5d8   :  { %13651 = vst [vmem:[#allocation269_spill] sm:$0xff] %v9716_v21  ;;  %13652 = vst [vmem:[#allocation270_spill] sm:$0xff] %v9719_v1 }
 0x5d9   :  { %5829 = vtanh.f32 %v9662_v40 }
 0x5e6   :  { %v5830_v20 = vpop.eup %5829 }
 0x5e7   :  { %v9665_v11 = vmul.f32 %v5830_v20, %v5828_v13  ;;  %v9722_v13 = vld [vmem:[#allocation5 + $0x148] sm:$0xff]  ;;  %v9725_v20 = vld [vmem:[#allocation5 + $0x158] sm:$0xff] }
 0x5e8   :  { %13653 = vst [vmem:[#allocation271_spill] sm:$0xff] %v9722_v13  ;;  %13654 = vst [vmem:[#allocation272_spill] sm:$0xff] %v9725_v20 }
 0x5e9   :  { %v2507_v39 = vrot.slane %v9665_v11, 2 }
 0x5eb   :  { %2574 = vmatmul.mubr.f32.vlgmr.msra.gmra.mxu0 %v2507_v39  ;;  %2645 = vmatmul.mubr.f32.vlgmr.msra.gmra.mxu1 %v2507_v39  ;;  %v9728_v39 = vld [vmem:[#allocation5 + $0x140] sm:$0xff] }
 0x5ec   :  { %2652 = vmatpush1.msra.mxu0 %v9668_v29  ;;  %2723 = vmatpush1.msra.mxu1 %v9671_v48  ;;  %13655 = vst [vmem:[#allocation273_spill] sm:$0xff] %v9728_v39 }
 0x5ed   :  { %2653 = vmatprep.subr.mxu0 %v9674_v56  ;;  %2724 = vmatprep.subr.mxu1 %v9677_v60 }
 0x5ee   :  { %2654 = vmatpush1.msra.mxu0 %v9680_v8  ;;  %2725 = vmatpush1.msra.mxu1 %v9683_v34 }
 0x5ef   :  { %2655 = vmatprep.subr.mxu0 %v9686_v28  ;;  %2726 = vmatprep.subr.mxu1 %v9689_v30 }
 0x5f0   :  { %2656 = vmatpush1.msra.mxu0 %v9692_v26  ;;  %2727 = vmatpush1.msra.mxu1 %v9695_v27 }
 0x5f1   :  { %2657 = vmatprep.subr.mxu0 %v9698_v32  ;;  %2728 = vmatprep.subr.mxu1 %v9701_v31 }
 0x5f2   :  { %2658 = vmatpush1.msra.mxu0 %v9704_v62  ;;  %2729 = vmatpush1.msra.mxu1 %v9707_v63 }
 0x5f3   :  { %2659 = vmatprep.subr.mxu0 %v9710_v15  ;;  %2730 = vmatprep.subr.mxu1 %v9713_v0  ;;  %v9731_v0 = vld [vmem:[#allocation5 + $0x150] sm:$0xff] }
 0x5f4   :  { %2660 = vmatpush1.msra.mxu0 %v9716_v21  ;;  %2731 = vmatpush1.msra.mxu1 %v9719_v1  ;;  %13656 = vst [vmem:[#allocation274_spill] sm:$0xff] %v9731_v0  ;;  %v9734_v21 = vld [vmem:[#allocation5 + $0x128] sm:$0xff]  ;;  %v9737_v1 = vld [vmem:[#allocation5 + $0x138] sm:$0xff] }
 0x5f5   :  { %2661 = vmatprep.subr.mxu0 %v9722_v13  ;;  %2732 = vmatprep.subr.mxu1 %v9725_v20  ;;  %13657 = vst [vmem:[#allocation275_spill] sm:$0xff] %v9734_v21  ;;  %13658 = vst [vmem:[#allocation276_spill] sm:$0xff] %v9737_v1  ;;  %v9740_v13 = vld [vmem:[#allocation5 + $0x120] sm:$0xff]  ;;  %v9743_v20 = vld [vmem:[#allocation5 + $0x130] sm:$0xff] }
 0x5f6   :  { %2662 = vmatpush1.msra.mxu0 %v9728_v39  ;;  %2733 = vmatpush1.msra.mxu1 %v9731_v0  ;;  %13659 = vst [vmem:[#allocation277_spill] sm:$0xff] %v9740_v13  ;;  %13660 = vst [vmem:[#allocation278_spill] sm:$0xff] %v9743_v20  ;;  %v9746_v39 = vld [vmem:[#allocation5 + $0x108] sm:$0xff]  ;;  %v9749_v0 = vld [vmem:[#allocation5 + $0x118] sm:$0xff] }
 0x5f7   :  { %2663 = vmatprep.subr.mxu0 %v9734_v21  ;;  %2734 = vmatprep.subr.mxu1 %v9737_v1  ;;  %13661 = vst [vmem:[#allocation279_spill] sm:$0xff] %v9746_v39  ;;  %13662 = vst [vmem:[#allocation280_spill] sm:$0xff] %v9749_v0  ;;  %v9752_v21 = vld [vmem:[#allocation5 + $0x100] sm:$0xff]  ;;  %v9755_v1 = vld [vmem:[#allocation5 + $0x110] sm:$0xff] }
 0x5f8   :  { %2664 = vmatpush1.msra.mxu0 %v9740_v13  ;;  %2735 = vmatpush1.msra.mxu1 %v9743_v20  ;;  %13663 = vst [vmem:[#allocation281_spill] sm:$0xff] %v9752_v21  ;;  %13664 = vst [vmem:[#allocation282_spill] sm:$0xff] %v9755_v1  ;;  %v9758_v13 = vld [vmem:[#allocation5 + $0xe8] sm:$0xff]  ;;  %v9761_v20 = vld [vmem:[#allocation5 + $0xf8] sm:$0xff] }
 0x5f9   :  { %2665 = vmatprep.subr.mxu0 %v9746_v39  ;;  %2736 = vmatprep.subr.mxu1 %v9749_v0  ;;  %v9764_v39 = vld [vmem:[#allocation5 + $0xe0] sm:$0xff]  ;;  %v9767_v0 = vld [vmem:[#allocation5 + $0xf0] sm:$0xff] }
 0x5fa   :  { %2666 = vmatpush1.msra.mxu0 %v9752_v21  ;;  %2737 = vmatpush1.msra.mxu1 %v9755_v1  ;;  %v9770_v21 = vld [vmem:[#allocation5 + $0xc8] sm:$0xff]  ;;  %v9773_v1 = vld [vmem:[#allocation5 + $0xd8] sm:$0xff] }
 0x5fb   :  { %2667 = vmatprep.subr.mxu0 %v9758_v13  ;;  %2738 = vmatprep.subr.mxu1 %v9761_v20  ;;  %13665 = vst [vmem:[#allocation283_spill] sm:$0xff] %v9770_v21 }
 0x5fc   :  { %2668 = vmatpush1.msra.mxu0 %v9764_v39  ;;  %2739 = vmatpush1.msra.mxu1 %v9767_v0 }
 0x5fd   :  { %2669 = vmatprep.subr.mxu0 %v9770_v21  ;;  %2740 = vmatprep.subr.mxu1 %v9773_v1  ;;  %v2313_v21 = vadd.f32 %v9650_v18, %v8424_v9  ;;  %v13693_v18 = vld [vmem:[#allocation43_spill] sm:$0xff] }
 0x5fe   :  { %2670 = vmatpush1.msra.mxu0 %v8783_v33  ;;  %2741 = vmatpush1.msra.mxu1 %v8786_v35  ;;  %v13666_v35 = vld [vmem:[#allocation16_spill] sm:$0xff] }
 0x5ff   :  { %2671 = vmatprep.subr.mxu0 %v8789_v37  ;;  %2742 = vmatprep.subr.mxu1 %v8792_v38  ;;  %v5627_v33 = vmul.f32 -1.442695, %v2313_v21  ;;  %v13667_v37 = vld [vmem:[#allocation17_spill] sm:$0xff]  ;;  %v13668_v38 = vld [vmem:[#allocation18_spill] sm:$0xff]  ;;  %v13694_v21 = vld [vmem:[#allocation44_spill] sm:$0xff] }
 0x600   :  { %2672 = vmatpush1.msra.mxu0 %v8795_v10  ;;  %2743 = vmatpush1.msra.mxu1 %v8798_v6  ;;  %v13669_v10 = vld [vmem:[#allocation19_spill] sm:$0xff]  ;;  %v13670_v6 = vld [vmem:[#allocation20_spill] sm:$0xff] }
 0x601   :  { %2673 = vmatprep.subr.mxu0 %v8801_v4  ;;  %2744 = vmatprep.subr.mxu1 %v8804_v16  ;;  %5831 = vpow2.f32 %v5627_v33  ;;  %v13671_v4 = vld [vmem:[#allocation21_spill] sm:$0xff]  ;;  %v13672_v16 = vld [vmem:[#allocation22_spill] sm:$0xff] }
 0x602   :  { %2674 = vmatpush1.msra.mxu0 %v8809_v41  ;;  %2745 = vmatpush1.msra.mxu1 %v8812_v42  ;;  %v13673_v41 = vld [vmem:[#allocation23_spill] sm:$0xff]  ;;  %v13674_v42 = vld [vmem:[#allocation24_spill] sm:$0xff]  ;;  %5833 = vtanh.f32 %v9655_v2  ;;  %v13695_v33 = vld [vmem:[#allocation45_spill] sm:$0xff] }
 0x603   :  { %2675 = vmatprep.subr.mxu0 %v8815_v44  ;;  %2746 = vmatprep.subr.mxu1 %v8818_v45  ;;  %v13675_v44 = vld [vmem:[#allocation25_spill] sm:$0xff]  ;;  %v13676_v45 = vld [vmem:[#allocation26_spill] sm:$0xff] }
 0x604   :  { %2676 = vmatpush1.msra.mxu0 %v8821_v5  ;;  %2747 = vmatpush1.msra.mxu1 %v8824_v59  ;;  %v13677_v5 = vld [vmem:[#allocation27_spill] sm:$0xff]  ;;  %v13678_v59 = vld [vmem:[#allocation28_spill] sm:$0xff] }
 0x605   :  { %2677 = vmatprep.subr.mxu0 %v8827_v46  ;;  %2748 = vmatprep.subr.mxu1 %v8830_v47  ;;  %v13679_v46 = vld [vmem:[#allocation29_spill] sm:$0xff]  ;;  %v13680_v47 = vld [vmem:[#allocation30_spill] sm:$0xff] }
 0x606   :  { %2678 = vmatpush1.msra.mxu0 %v8833_v49  ;;  %2749 = vmatpush1.msra.mxu1 %v8836_v50  ;;  %v13681_v49 = vld [vmem:[#allocation31_spill] sm:$0xff] }
 0x607   :  { %2679 = vmatprep.subr.mxu0 %v8839_v51  ;;  %2750 = vmatprep.subr.mxu1 %v8842_v52  ;;  %v13682_v51 = vld [vmem:[#allocation32_spill] sm:$0xff]  ;;  %v13683_v52 = vld [vmem:[#allocation33_spill] sm:$0xff] }
 0x608   :  { %2680 = vmatpush1.msra.mxu0 %v8845_v53  ;;  %2751 = vmatpush1.msra.mxu1 %v8848_v54  ;;  %v13684_v53 = vld [vmem:[#allocation34_spill] sm:$0xff]  ;;  %v13685_v54 = vld [vmem:[#allocation35_spill] sm:$0xff] }
 0x609   :  { %2681 = vmatprep.subr.mxu0 %v8851_v55  ;;  %2752 = vmatprep.subr.mxu1 %v8854_v57  ;;  %v13686_v55 = vld [vmem:[#allocation36_spill] sm:$0xff]  ;;  %v13687_v57 = vld [vmem:[#allocation37_spill] sm:$0xff] }
 0x60a   :  { %2682 = vmatpush1.msra.mxu0 %v8857_v58  ;;  %2715 = vmatprep.mubr.f32.mxu0 %v12905_v24 }
 0x60b   :  { %2753 = vmatpush1.msra.mxu1 %v8861_v7  ;;  %2786 = vmatprep.mubr.f32.mxu1 %v12905_v24  ;;  %v13688_v7 = vld [vmem:[#allocation38_spill] sm:$0xff] }
 0x60c   :  { %2716 = vmatmul.mubr.f32.vlgmr.msra.gmra.mxu0 %v9665_v11  ;;  %2787 = vmatmul.mubr.f32.vlgmr.msra.gmra.mxu1 %v9665_v11 }
 0x60d   :  { %2793 = vmatprep.subr.mxu0 %v8867_v3  ;;  %2864 = vmatprep.subr.mxu1 %v8870_v61  ;;  %v13689_v3 = vld [vmem:[#allocation39_spill] sm:$0xff]  ;;  %v13690_v61 = vld [vmem:[#allocation40_spill] sm:$0xff] }
 0x60e   :  { %2794 = vmatpush1.msra.mxu0 %v8873_v17  ;;  %2865 = vmatpush1.msra.mxu1 %v8876_v22  ;;  %v5832_v50 = vpop.eup %5831  ;;  %v13691_v17 = vld [vmem:[#allocation41_spill] sm:$0xff]  ;;  %v13692_v22 = vld [vmem:[#allocation42_spill] sm:$0xff] }
 0x60f   :  { %2795 = vmatprep.subr.mxu0 %v13666_v35  ;;  %2866 = vmatprep.subr.mxu1 %v13667_v37  ;;  %v2330_v58 = vadd.f32 1.0, %v5832_v50  ;;  %v13696_v35 = vld [vmem:[#allocation46_spill] sm:$0xff]  ;;  %v13697_v37 = vld [vmem:[#allocation47_spill] sm:$0xff] }
 0x610   :  { %2796 = vmatpush1.msra.mxu0 %v13668_v38  ;;  %2867 = vmatpush1.msra.mxu1 %v13669_v10  ;;  %v13698_v38 = vld [vmem:[#allocation48_spill] sm:$0xff]  ;;  %v13699_v10 = vld [vmem:[#allocation49_spill] sm:$0xff]  ;;  %v13712_v50 = vld [vmem:[#allocation62_spill] sm:$0xff] }
 0x611   :  { %2797 = vmatprep.subr.mxu0 %v13670_v6  ;;  %2868 = vmatprep.subr.mxu1 %v13671_v4  ;;  %5835 = vrcp.f32 %v2330_v58  ;;  %v13700_v6 = vld [vmem:[#allocation50_spill] sm:$0xff]  ;;  %v13701_v4 = vld [vmem:[#allocation51_spill] sm:$0xff]  ;;  %v13718_v58 = vld [vmem:[#allocation68_spill] sm:$0xff] }
 0x612   :  { %2798 = vmatpush1.msra.mxu0 %v13672_v16  ;;  %2869 = vmatpush1.msra.mxu1 %v13673_v41  ;;  %v13702_v16 = vld [vmem:[#allocation52_spill] sm:$0xff]  ;;  %v13703_v41 = vld [vmem:[#allocation53_spill] sm:$0xff] }
 0x613   :  { %2799 = vmatprep.subr.mxu0 %v13674_v42  ;;  %2870 = vmatprep.subr.mxu1 %v13675_v44  ;;  %v13704_v42 = vld [vmem:[#allocation54_spill] sm:$0xff]  ;;  %v13705_v44 = vld [vmem:[#allocation55_spill] sm:$0xff] }
 0x614   :  { %2800 = vmatpush1.msra.mxu0 %v13676_v45  ;;  %2871 = vmatpush1.msra.mxu1 %v13677_v5  ;;  %v13706_v45 = vld [vmem:[#allocation56_spill] sm:$0xff]  ;;  %v13707_v5 = vld [vmem:[#allocation57_spill] sm:$0xff] }
 0x615   :  { %2801 = vmatprep.subr.mxu0 %v13678_v59  ;;  %2872 = vmatprep.subr.mxu1 %v13679_v46  ;;  %v13708_v59 = vld [vmem:[#allocation58_spill] sm:$0xff]  ;;  %v13709_v46 = vld [vmem:[#allocation59_spill] sm:$0xff] }
 0x616   :  { %2802 = vmatpush1.msra.mxu0 %v13680_v47  ;;  %2873 = vmatpush1.msra.mxu1 %v13681_v49  ;;  %v13710_v47 = vld [vmem:[#allocation60_spill] sm:$0xff]  ;;  %v13711_v49 = vld [vmem:[#allocation61_spill] sm:$0xff] }
 0x617   :  { %2803 = vmatprep.subr.mxu0 %v13682_v51  ;;  %2874 = vmatprep.subr.mxu1 %v13683_v52  ;;  %v13713_v51 = vld [vmem:[#allocation63_spill] sm:$0xff]  ;;  %v13714_v52 = vld [vmem:[#allocation64_spill] sm:$0xff] }
 0x618   :  { %2804 = vmatpush1.msra.mxu0 %v13684_v53  ;;  %2875 = vmatpush1.msra.mxu1 %v13685_v54  ;;  %v13715_v53 = vld [vmem:[#allocation65_spill] sm:$0xff]  ;;  %v13716_v54 = vld [vmem:[#allocation66_spill] sm:$0xff] }
 0x619   :  { %2805 = vmatprep.subr.mxu0 %v13686_v55  ;;  %2876 = vmatprep.subr.mxu1 %v13687_v57  ;;  %v13717_v55 = vld [vmem:[#allocation67_spill] sm:$0xff]  ;;  %v5834_v57 = vpop.eup %5833 }
 0x61a   :  { %2806 = vmatpush1.msra.mxu0 %v13688_v7  ;;  %2877 = vmatpush1.msra.mxu1 %v13689_v3  ;;  %v13719_v7 = vld [vmem:[#allocation69_spill] sm:$0xff]  ;;  %v13720_v3 = vld [vmem:[#allocation70_spill] sm:$0xff] }
 0x61b   :  { %2807 = vmatprep.subr.mxu0 %v13690_v61  ;;  %2878 = vmatprep.subr.mxu1 %v13691_v17  ;;  %v13721_v61 = vld [vmem:[#allocation71_spill] sm:$0xff] }
 0x61c   :  { %2808 = vmatpush1.msra.mxu0 %v13692_v22  ;;  %2879 = vmatpush1.msra.mxu1 %v13693_v18  ;;  %v13722_v22 = vld [vmem:[#allocation72_spill] sm:$0xff]  ;;  %v13723_v18 = vld [vmem:[#allocation73_spill] sm:$0xff] }
 0x61d   :  { %2809 = vmatprep.subr.mxu0 %v13694_v21  ;;  %2880 = vmatprep.subr.mxu1 %v13695_v33  ;;  %v13724_v21 = vld [vmem:[#allocation74_spill] sm:$0xff] }
 0x61e   :  { %2810 = vmatpush1.msra.mxu0 %v13696_v35  ;;  %2881 = vmatpush1.msra.mxu1 %v13697_v37  ;;  %v5836_v17 = vpop.eup %5835  ;;  %v13725_v35 = vld [vmem:[#allocation75_spill] sm:$0xff]  ;;  %v13726_v37 = vld [vmem:[#allocation76_spill] sm:$0xff] }
 0x61f   :  { %2811 = vmatprep.subr.mxu0 %v13698_v38  ;;  %2882 = vmatprep.subr.mxu1 %v13699_v10  ;;  %v2337_v33 = vmul.f32 %v5836_v17, %v5834_v57  ;;  %v13727_v38 = vld [vmem:[#allocation77_spill] sm:$0xff]  ;;  %v13728_v10 = vld [vmem:[#allocation78_spill] sm:$0xff]  ;;  %v13753_v17 = vld [vmem:[#allocation103_spill] sm:$0xff] }
 0x620   :  { %2812 = vmatpush1.msra.mxu0 %v13700_v6  ;;  %2883 = vmatpush1.msra.mxu1 %v13701_v4  ;;  %v13729_v6 = vld [vmem:[#allocation79_spill] sm:$0xff]  ;;  %v13730_v4 = vld [vmem:[#allocation80_spill] sm:$0xff]  ;;  %v13748_v57 = vld [vmem:[#allocation98_spill] sm:$0xff] }
 0x621   :  { %2813 = vmatprep.subr.mxu0 %v13702_v16  ;;  %2884 = vmatprep.subr.mxu1 %v13703_v41  ;;  %v13731_v16 = vld [vmem:[#allocation81_spill] sm:$0xff]  ;;  %v13732_v41 = vld [vmem:[#allocation82_spill] sm:$0xff] }
 0x622   :  { %2814 = vmatpush1.msra.mxu0 %v13704_v42  ;;  %2885 = vmatpush1.msra.mxu1 %v13705_v44  ;;  %v13733_v42 = vld [vmem:[#allocation83_spill] sm:$0xff]  ;;  %v13734_v44 = vld [vmem:[#allocation84_spill] sm:$0xff] }
 0x623   :  { %2815 = vmatprep.subr.mxu0 %v13706_v45  ;;  %2886 = vmatprep.subr.mxu1 %v13707_v5  ;;  %v13735_v45 = vld [vmem:[#allocation85_spill] sm:$0xff]  ;;  %v13736_v5 = vld [vmem:[#allocation86_spill] sm:$0xff] }
 0x624   :  { %2816 = vmatpush1.msra.mxu0 %v13708_v59  ;;  %2887 = vmatpush1.msra.mxu1 %v13709_v46  ;;  %v13737_v59 = vld [vmem:[#allocation87_spill] sm:$0xff]  ;;  %v13739_v46 = vld [vmem:[#allocation89_spill] sm:$0xff] }
 0x625   :  { %2817 = vmatprep.subr.mxu0 %v13710_v47  ;;  %2888 = vmatprep.subr.mxu1 %v13711_v49  ;;  %v13740_v47 = vld [vmem:[#allocation90_spill] sm:$0xff]  ;;  %v13741_v49 = vld [vmem:[#allocation91_spill] sm:$0xff] }
 0x626   :  { %2818 = vmatpush1.msra.mxu0 %v13712_v50  ;;  %2889 = vmatpush1.msra.mxu1 %v13713_v51  ;;  %v13742_v50 = vld [vmem:[#allocation92_spill] sm:$0xff]  ;;  %v13743_v51 = vld [vmem:[#allocation93_spill] sm:$0xff] }
 0x627   :  { %2819 = vmatprep.subr.mxu0 %v13714_v52  ;;  %2890 = vmatprep.subr.mxu1 %v13715_v53  ;;  %v13744_v52 = vld [vmem:[#allocation94_spill] sm:$0xff]  ;;  %v13745_v53 = vld [vmem:[#allocation95_spill] sm:$0xff] }
 0x628   :  { %2820 = vmatpush1.msra.mxu0 %v13716_v54  ;;  %2891 = vmatpush1.msra.mxu1 %v13717_v55  ;;  %v13746_v54 = vld [vmem:[#allocation96_spill] sm:$0xff]  ;;  %v13747_v55 = vld [vmem:[#allocation97_spill] sm:$0xff] }
 0x629   :  { %2821 = vmatprep.subr.mxu0 %v13718_v58  ;;  %2892 = vmatprep.subr.mxu1 %v13719_v7  ;;  %v13749_v58 = vld [vmem:[#allocation99_spill] sm:$0xff]  ;;  %v13750_v7 = vld [vmem:[#allocation100_spill] sm:$0xff] }
 0x62a   :  { %2822 = vmatpush1.msra.mxu0 %v13720_v3  ;;  %2893 = vmatpush1.msra.mxu1 %v13721_v61  ;;  %v13751_v3 = vld [vmem:[#allocation101_spill] sm:$0xff]  ;;  %v13752_v61 = vld [vmem:[#allocation102_spill] sm:$0xff] }
 0x62b   :  { %2823 = vmatprep.subr.mxu0 %v13722_v22  ;;  %2894 = vmatprep.subr.mxu1 %v13723_v18  ;;  %v13754_v22 = vld [vmem:[#allocation104_spill] sm:$0xff]  ;;  %v13755_v18 = vld [vmem:[#allocation105_spill] sm:$0xff] }
 0x62c   :  { %2824 = vmatpush1.msra.mxu0 %v13724_v21  ;;  %2857 = vmatprep.mubr.f32.mxu0 %v12905_v24  ;;  %v13756_v21 = vld [vmem:[#allocation106_spill] sm:$0xff] }
 0x62d   :  { %2895 = vmatpush1.msra.mxu1 %v13725_v35  ;;  %2928 = vmatprep.mubr.f32.mxu1 %v12905_v24  ;;  %v13758_v35 = vld [vmem:[#allocation108_spill] sm:$0xff] }
 0x62e   :  { %2858 = vmatmul.mubr.f32.vlgmr.msra.gmra.mxu0 %v2337_v33  ;;  %2929 = vmatmul.mubr.f32.vlgmr.msra.gmra.mxu1 %v2337_v33  ;;  %v13757_v33 = vld [vmem:[#allocation107_spill] sm:$0xff] }
 0x62f   :  { %2969 = vmatprep.subr.mxu0 %v13726_v37  ;;  %3033 = vmatprep.mubr.f32.mxu0 %v9665_v11  ;;  %v13759_v37 = vld [vmem:[#allocation109_spill] sm:$0xff] }
 0x630   :  { %2970 = vmatpush1.msra.mxu0 %v13727_v38  ;;  %3104 = vmatprep.mubr.f32.mxu1 %v9665_v11  ;;  %v13738_v11 = vld [vmem:[#allocation88_spill] sm:$0xff]  ;;  %v13760_v38 = vld [vmem:[#allocation110_spill] sm:$0xff] }
 0x631   :  { %2971 = vmatprep.subr.mxu0 %v13728_v10  ;;  %3040 = vmatprep.subr.mxu1 %v13729_v6  ;;  %v13761_v10 = vld [vmem:[#allocation111_spill] sm:$0xff]  ;;  %v13762_v6 = vld [vmem:[#allocation112_spill] sm:$0xff] }
 0x632   :  { %2972 = vmatpush1.msra.mxu0 %v13730_v4  ;;  %3041 = vmatpush1.msra.mxu1 %v13731_v16  ;;  %v13763_v4 = vld [vmem:[#allocation113_spill] sm:$0xff]  ;;  %v13764_v16 = vld [vmem:[#allocation114_spill] sm:$0xff] }
 0x633   :  { %2973 = vmatprep.subr.mxu0 %v13732_v41  ;;  %3042 = vmatprep.subr.mxu1 %v13733_v42  ;;  %v13765_v41 = vld [vmem:[#allocation115_spill] sm:$0xff]  ;;  %v13766_v42 = vld [vmem:[#allocation116_spill] sm:$0xff] }
 0x634   :  { %2974 = vmatpush1.msra.mxu0 %v13734_v44  ;;  %3043 = vmatpush1.msra.mxu1 %v13735_v45  ;;  %v13767_v44 = vld [vmem:[#allocation117_spill] sm:$0xff]  ;;  %v13768_v45 = vld [vmem:[#allocation118_spill] sm:$0xff] }
 0x635   :  { %2975 = vmatprep.subr.mxu0 %v13736_v5  ;;  %3044 = vmatprep.subr.mxu1 %v13737_v59  ;;  %v13769_v5 = vld [vmem:[#allocation119_spill] sm:$0xff]  ;;  %v13770_v59 = vld [vmem:[#allocation120_spill] sm:$0xff] }
 0x636   :  { %2976 = vmatpush1.msra.mxu0 %v13738_v11  ;;  %3045 = vmatpush1.msra.mxu1 %v13739_v46  ;;  %v13771_v11 = vld [vmem:[#allocation121_spill] sm:$0xff]  ;;  %v13772_v46 = vld [vmem:[#allocation122_spill] sm:$0xff] }
 0x637   :  { %2977 = vmatprep.subr.mxu0 %v13740_v47  ;;  %3046 = vmatprep.subr.mxu1 %v13741_v49  ;;  %v13773_v47 = vld [vmem:[#allocation123_spill] sm:$0xff]  ;;  %v13774_v49 = vld [vmem:[#allocation124_spill] sm:$0xff] }
 0x638   :  { %2978 = vmatpush1.msra.mxu0 %v13742_v50  ;;  %3047 = vmatpush1.msra.mxu1 %v13743_v51  ;;  %v13775_v50 = vld [vmem:[#allocation125_spill] sm:$0xff]  ;;  %v13776_v51 = vld [vmem:[#allocation126_spill] sm:$0xff] }
 0x639   :  { %2979 = vmatprep.subr.mxu0 %v13744_v52  ;;  %3048 = vmatprep.subr.mxu1 %v13745_v53  ;;  %v13777_v52 = vld [vmem:[#allocation127_spill] sm:$0xff]  ;;  %v13778_v53 = vld [vmem:[#allocation128_spill] sm:$0xff] }
 0x63a   :  { %2980 = vmatpush1.msra.mxu0 %v13746_v54  ;;  %3049 = vmatpush1.msra.mxu1 %v13747_v55  ;;  %v13779_v54 = vld [vmem:[#allocation129_spill] sm:$0xff]  ;;  %v13780_v55 = vld [vmem:[#allocation130_spill] sm:$0xff] }
 0x63b   :  { %2981 = vmatprep.subr.mxu0 %v13748_v57  ;;  %3050 = vmatprep.subr.mxu1 %v13749_v58  ;;  %v13781_v57 = vld [vmem:[#allocation131_spill] sm:$0xff]  ;;  %v13782_v58 = vld [vmem:[#allocation132_spill] sm:$0xff] }
 0x63c   :  { %2982 = vmatpush1.msra.mxu0 %v13750_v7  ;;  %3051 = vmatpush1.msra.mxu1 %v13751_v3  ;;  %v13783_v7 = vld [vmem:[#allocation133_spill] sm:$0xff]  ;;  %v13784_v3 = vld [vmem:[#allocation134_spill] sm:$0xff] }
 0x63d   :  { %2983 = vmatprep.subr.mxu0 %v13752_v61  ;;  %3052 = vmatprep.subr.mxu1 %v13753_v17  ;;  %v13785_v61 = vld [vmem:[#allocation135_spill] sm:$0xff]  ;;  %v13786_v17 = vld [vmem:[#allocation136_spill] sm:$0xff] }
 0x63e   :  { %2984 = vmatpush1.msra.mxu0 %v13754_v22  ;;  %3053 = vmatpush1.msra.mxu1 %v13755_v18  ;;  %v13787_v22 = vld [vmem:[#allocation137_spill] sm:$0xff]  ;;  %v13788_v18 = vld [vmem:[#allocation138_spill] sm:$0xff] }
 0x63f   :  { %2985 = vmatprep.subr.mxu0 %v13756_v21  ;;  %3054 = vmatprep.subr.mxu1 %v13757_v33  ;;  %v13789_v21 = vld [vmem:[#allocation139_spill] sm:$0xff]  ;;  %v13790_v33 = vld [vmem:[#allocation140_spill] sm:$0xff] }
 0x640   :  { %2986 = vmatpush1.msra.mxu0 %v13758_v35  ;;  %3055 = vmatpush1.msra.mxu1 %v13759_v37  ;;  %v13791_v35 = vld [vmem:[#allocation141_spill] sm:$0xff]  ;;  %v13792_v37 = vld [vmem:[#allocation142_spill] sm:$0xff] }
 0x641   :  { %2987 = vmatprep.subr.mxu0 %v13760_v38  ;;  %3056 = vmatprep.subr.mxu1 %v13761_v10  ;;  %v13793_v38 = vld [vmem:[#allocation143_spill] sm:$0xff]  ;;  %v13794_v10 = vld [vmem:[#allocation144_spill] sm:$0xff] }
 0x642   :  { %2988 = vmatpush1.msra.mxu0 %v13762_v6  ;;  %3057 = vmatpush1.msra.mxu1 %v13763_v4  ;;  %v13795_v6 = vld [vmem:[#allocation145_spill] sm:$0xff]  ;;  %v13796_v4 = vld [vmem:[#allocation146_spill] sm:$0xff] }
 0x643   :  { %2989 = vmatprep.subr.mxu0 %v13764_v16  ;;  %3058 = vmatprep.subr.mxu1 %v13765_v41  ;;  %v13797_v16 = vld [vmem:[#allocation147_spill] sm:$0xff]  ;;  %v13798_v41 = vld [vmem:[#allocation148_spill] sm:$0xff] }
 0x644   :  { %2990 = vmatpush1.msra.mxu0 %v13766_v42  ;;  %3059 = vmatpush1.msra.mxu1 %v13767_v44  ;;  %v13799_v42 = vld [vmem:[#allocation149_spill] sm:$0xff]  ;;  %v13800_v44 = vld [vmem:[#allocation150_spill] sm:$0xff] }
 0x645   :  { %2991 = vmatprep.subr.mxu0 %v13768_v45  ;;  %3060 = vmatprep.subr.mxu1 %v13769_v5  ;;  %v13801_v45 = vld [vmem:[#allocation151_spill] sm:$0xff]  ;;  %v13802_v5 = vld [vmem:[#allocation152_spill] sm:$0xff] }
 0x646   :  { %2992 = vmatpush1.msra.mxu0 %v13770_v59  ;;  %3061 = vmatpush1.msra.mxu1 %v13771_v11  ;;  %v13803_v59 = vld [vmem:[#allocation153_spill] sm:$0xff]  ;;  %v13804_v11 = vld [vmem:[#allocation154_spill] sm:$0xff] }
 0x647   :  { %2993 = vmatprep.subr.mxu0 %v13772_v46  ;;  %3062 = vmatprep.subr.mxu1 %v13773_v47  ;;  %v13805_v46 = vld [vmem:[#allocation155_spill] sm:$0xff]  ;;  %v13806_v47 = vld [vmem:[#allocation156_spill] sm:$0xff] }
 0x648   :  { %2994 = vmatpush1.msra.mxu0 %v13774_v49  ;;  %3063 = vmatpush1.msra.mxu1 %v13775_v50  ;;  %v13807_v49 = vld [vmem:[#allocation157_spill] sm:$0xff]  ;;  %v13808_v50 = vld [vmem:[#allocation158_spill] sm:$0xff] }
 0x649   :  { %2995 = vmatprep.subr.mxu0 %v13776_v51  ;;  %3064 = vmatprep.subr.mxu1 %v13777_v52  ;;  %v13809_v51 = vld [vmem:[#allocation159_spill] sm:$0xff]  ;;  %v13810_v52 = vld [vmem:[#allocation160_spill] sm:$0xff] }
 0x64a   :  { %2996 = vmatpush1.msra.mxu0 %v13778_v53  ;;  %3065 = vmatpush1.msra.mxu1 %v13779_v54  ;;  %v13811_v53 = vld [vmem:[#allocation161_spill] sm:$0xff]  ;;  %v13812_v54 = vld [vmem:[#allocation162_spill] sm:$0xff] }
 0x64b   :  { %2997 = vmatprep.subr.mxu0 %v13780_v55  ;;  %3066 = vmatprep.subr.mxu1 %v13781_v57  ;;  %v13813_v55 = vld [vmem:[#allocation163_spill] sm:$0xff]  ;;  %v13814_v57 = vld [vmem:[#allocation164_spill] sm:$0xff] }
 0x64c   :  { %2998 = vmatpush1.msra.mxu0 %v13782_v58  ;;  %3067 = vmatpush1.msra.mxu1 %v13783_v7  ;;  %v13815_v58 = vld [vmem:[#allocation165_spill] sm:$0xff]  ;;  %v13816_v7 = vld [vmem:[#allocation166_spill] sm:$0xff] }
 0x64d   :  { %2999 = vmatprep.subr.mxu0 %v13784_v3  ;;  %3068 = vmatprep.subr.mxu1 %v13785_v61  ;;  %v13817_v3 = vld [vmem:[#allocation167_spill] sm:$0xff]  ;;  %v13818_v61 = vld [vmem:[#allocation168_spill] sm:$0xff] }
 0x64e   :  { %3000 = vmatpush1.msra.mxu0 %v13786_v17  ;;  %3069 = vmatpush1.msra.mxu1 %v13787_v22  ;;  %v13819_v17 = vld [vmem:[#allocation169_spill] sm:$0xff]  ;;  %v13820_v22 = vld [vmem:[#allocation170_spill] sm:$0xff] }
 0x64f   :  { %3001 = vmatprep.subr.mxu0 %v13788_v18  ;;  %3070 = vmatprep.subr.mxu1 %v13789_v21  ;;  %v13821_v18 = vld [vmem:[#allocation171_spill] sm:$0xff]  ;;  %v13822_v21 = vld [vmem:[#allocation172_spill] sm:$0xff] }
 0x650   :  { %3002 = vmatpush2.msra.mxu0 %v13790_v33  ;;  %3071 = vmatpush1.msra.mxu1 %v13791_v35  ;;  %v13823_v33 = vld [vmem:[#allocation173_spill] sm:$0xff]  ;;  %v13824_v35 = vld [vmem:[#allocation174_spill] sm:$0xff] }
 0x651   :  { %3003 = vmatprep.subr.mxu0 %v13792_v37  ;;  %3072 = vmatprep.subr.mxu1 %v13793_v38  ;;  %v13825_v37 = vld [vmem:[#allocation175_spill] sm:$0xff]  ;;  %v13826_v38 = vld [vmem:[#allocation176_spill] sm:$0xff] }
 0x652   :  { %3004 = vmatpush2.msra.mxu0 %v13794_v10  ;;  %3073 = vmatpush2.msra.mxu1 %v13795_v6  ;;  %v13827_v10 = vld [vmem:[#allocation177_spill] sm:$0xff]  ;;  %v13828_v6 = vld [vmem:[#allocation178_spill] sm:$0xff] }
 0x653   :  { %3005 = vmatprep.subr.mxu0 %v13796_v4  ;;  %3074 = vmatprep.subr.mxu1 %v13797_v16  ;;  %v13829_v4 = vld [vmem:[#allocation179_spill] sm:$0xff]  ;;  %v13830_v16 = vld [vmem:[#allocation180_spill] sm:$0xff] }
 0x654   :  { %3006 = vmatpush2.msra.mxu0 %v13798_v41  ;;  %3075 = vmatpush2.msra.mxu1 %v13799_v42  ;;  %v13831_v41 = vld [vmem:[#allocation181_spill] sm:$0xff]  ;;  %v13832_v42 = vld [vmem:[#allocation182_spill] sm:$0xff] }
 0x655   :  { %3007 = vmatprep.subr.mxu0 %v13800_v44  ;;  %3076 = vmatprep.subr.mxu1 %v13801_v45  ;;  %v13833_v44 = vld [vmem:[#allocation183_spill] sm:$0xff]  ;;  %v13834_v45 = vld [vmem:[#allocation184_spill] sm:$0xff] }
 0x656   :  { %3008 = vmatpush2.msra.mxu0 %v13802_v5  ;;  %3077 = vmatpush2.msra.mxu1 %v13803_v59  ;;  %v13835_v5 = vld [vmem:[#allocation185_spill] sm:$0xff]  ;;  %v13836_v59 = vld [vmem:[#allocation186_spill] sm:$0xff] }
 0x657   :  { %3009 = vmatprep.subr.mxu0 %v13804_v11  ;;  %3078 = vmatprep.subr.mxu1 %v13805_v46  ;;  %v13837_v11 = vld [vmem:[#allocation187_spill] sm:$0xff]  ;;  %v13838_v46 = vld [vmem:[#allocation188_spill] sm:$0xff] }
 0x658   :  { %3010 = vmatpush2.msra.mxu0 %v13806_v47  ;;  %3079 = vmatpush2.msra.mxu1 %v13807_v49  ;;  %v13839_v47 = vld [vmem:[#allocation189_spill] sm:$0xff]  ;;  %v13840_v49 = vld [vmem:[#allocation190_spill] sm:$0xff] }
 0x659   :  { %3011 = vmatprep.subr.mxu0 %v13808_v50  ;;  %3080 = vmatprep.subr.mxu1 %v13809_v51  ;;  %v13841_v50 = vld [vmem:[#allocation191_spill] sm:$0xff]  ;;  %v13842_v51 = vld [vmem:[#allocation192_spill] sm:$0xff] }
 0x65a   :  { %3012 = vmatpush2.msra.mxu0 %v13810_v52  ;;  %3081 = vmatpush2.msra.mxu1 %v13811_v53  ;;  %v13843_v52 = vld [vmem:[#allocation193_spill] sm:$0xff]  ;;  %v13844_v53 = vld [vmem:[#allocation194_spill] sm:$0xff] }
 0x65b   :  { %3013 = vmatprep.subr.mxu0 %v13812_v54  ;;  %3082 = vmatprep.subr.mxu1 %v13813_v55  ;;  %v13845_v54 = vld [vmem:[#allocation195_spill] sm:$0xff]  ;;  %v13846_v55 = vld [vmem:[#allocation196_spill] sm:$0xff] }
 0x65c   :  { %3014 = vmatpush2.msra.mxu0 %v13814_v57  ;;  %3083 = vmatpush2.msra.mxu1 %v13815_v58  ;;  %v5635_v57 = vld [vmem:[%s11964_s0 + $0x10] sm:$0xf] }
 0x65d   :  { %3015 = vmatprep.subr.mxu0 %v13816_v7  ;;  %3084 = vmatprep.subr.mxu1 %v13817_v3  ;;  %v13847_v58 = vld [vmem:[#allocation197_spill] sm:$0xff]  ;;  %v13848_v7 = vld [vmem:[#allocation198_spill] sm:$0xff]  ;;  %v13849_v3 = vld [vmem:[#allocation199_spill] sm:$0xff] }
 0x65e   :  { %3016 = vmatpush2.msra.mxu0 %v13818_v61  ;;  %3085 = vmatpush2.msra.mxu1 %v13819_v17  ;;  %v13850_v61 = vld [vmem:[#allocation200_spill] sm:$0xff]  ;;  %v13851_v17 = vld [vmem:[#allocation201_spill] sm:$0xff] }
 0x65f   :  { %3017 = vmatprep.subr.mxu0 %v13820_v22  ;;  %3086 = vmatprep.subr.mxu1 %v13821_v18  ;;  %v13852_v22 = vld [vmem:[#allocation202_spill] sm:$0xff]  ;;  %v13853_v18 = vld [vmem:[#allocation203_spill] sm:$0xff] }
 0x660   :  { %3018 = vmatpush2.msra.mxu0 %v13822_v21  ;;  %3087 = vmatpush2.msra.mxu1 %v13823_v33  ;;  %v13854_v21 = vld [vmem:[#allocation204_spill] sm:$0xff]  ;;  %v13855_v33 = vld [vmem:[#allocation205_spill] sm:$0xff] }
 0x661   :  { %3019 = vmatprep.subr.mxu0 %v13824_v35  ;;  %3088 = vmatprep.subr.mxu1 %v13825_v37  ;;  %v13856_v35 = vld [vmem:[#allocation206_spill] sm:$0xff]  ;;  %v13857_v37 = vld [vmem:[#allocation207_spill] sm:$0xff] }
 0x662   :  { %3020 = vmatpush2.msra.mxu0 %v13826_v38  ;;  %3089 = vmatpush2.msra.mxu1 %v13827_v10  ;;  %v13858_v38 = vld [vmem:[#allocation208_spill] sm:$0xff]  ;;  %v13859_v10 = vld [vmem:[#allocation209_spill] sm:$0xff] }
 0x663   :  { %3021 = vmatprep.subr.mxu0 %v13828_v6  ;;  %3090 = vmatprep.subr.mxu1 %v13829_v4  ;;  %v13860_v6 = vld [vmem:[#allocation210_spill] sm:$0xff]  ;;  %v13861_v4 = vld [vmem:[#allocation211_spill] sm:$0xff] }
 0x664   :  { %3022 = vmatpush2.msra.mxu0 %v13830_v16  ;;  %3091 = vmatpush2.msra.mxu1 %v13831_v41  ;;  %v13862_v16 = vld [vmem:[#allocation212_spill] sm:$0xff]  ;;  %v13863_v41 = vld [vmem:[#allocation213_spill] sm:$0xff] }
 0x665   :  { %3023 = vmatprep.subr.mxu0 %v13832_v42  ;;  %3092 = vmatprep.subr.mxu1 %v13833_v44  ;;  %v13864_v42 = vld [vmem:[#allocation214_spill] sm:$0xff]  ;;  %v13865_v44 = vld [vmem:[#allocation215_spill] sm:$0xff] }
 0x666   :  { %3024 = vmatpush2.msra.mxu0 %v13834_v45  ;;  %3093 = vmatpush2.msra.mxu1 %v13835_v5  ;;  %v13866_v45 = vld [vmem:[#allocation216_spill] sm:$0xff]  ;;  %v13867_v5 = vld [vmem:[#allocation217_spill] sm:$0xff] }
 0x667   :  { %3025 = vmatprep.subr.mxu0 %v13836_v59  ;;  %3094 = vmatprep.subr.mxu1 %v13837_v11  ;;  %v13868_v59 = vld [vmem:[#allocation218_spill] sm:$0xff]  ;;  %v13869_v11 = vld [vmem:[#allocation219_spill] sm:$0xff] }
 0x668   :  { %3026 = vmatpush2.msra.mxu0 %v13838_v46  ;;  %3095 = vmatpush2.msra.mxu1 %v13839_v47  ;;  %v13870_v46 = vld [vmem:[#allocation220_spill] sm:$0xff]  ;;  %v13871_v47 = vld [vmem:[#allocation221_spill] sm:$0xff] }
 0x669   :  { %3027 = vmatprep.subr.mxu0 %v13840_v49  ;;  %3096 = vmatprep.subr.mxu1 %v13841_v50  ;;  %v13872_v49 = vld [vmem:[#allocation222_spill] sm:$0xff]  ;;  %v13873_v50 = vld [vmem:[#allocation223_spill] sm:$0xff] }
 0x66a   :  { %3028 = vmatpush2.msra.mxu0 %v13842_v51  ;;  %3097 = vmatpush2.msra.mxu1 %v13843_v52  ;;  %v13874_v51 = vld [vmem:[#allocation224_spill] sm:$0xff]  ;;  %v13875_v52 = vld [vmem:[#allocation225_spill] sm:$0xff] }
 0x66b   :  { %3029 = vmatprep.subr.mxu0 %v13844_v53  ;;  %3098 = vmatprep.subr.mxu1 %v13845_v54  ;;  %v13876_v53 = vld [vmem:[#allocation226_spill] sm:$0xff]  ;;  %v13877_v54 = vld [vmem:[#allocation227_spill] sm:$0xff] }
 0x66c   :  { %3030 = vmatpush2.msra.mxu0 %v13846_v55  ;;  %3099 = vmatpush2.msra.mxu1 %v13847_v58  ;;  %v13878_v55 = vld [vmem:[#allocation228_spill] sm:$0xff]  ;;  %v13880_v58 = vld [vmem:[#allocation230_spill] sm:$0xff] }
 0x66d   :  { %3031 = vmatprep.subr.mxu0 %v13848_v7  ;;  %3100 = vmatprep.subr.mxu1 %v13849_v3  ;;  %v13881_v7 = vld [vmem:[#allocation231_spill] sm:$0xff]  ;;  %v13882_v3 = vld [vmem:[#allocation232_spill] sm:$0xff] }
 0x66e   :  { %3032 = vmatpush2.msra.mxu0 %v13850_v61  ;;  %3101 = vmatpush2.msra.mxu1 %v13851_v17  ;;  %v13883_v61 = vld [vmem:[#allocation233_spill] sm:$0xff]  ;;  %v13884_v17 = vld [vmem:[#allocation234_spill] sm:$0xff] }
 0x66f   :  { %3034 = vmatmul.mubr.f32.vlgmr.msra.gmra.mxu0 %v5635_v57  ;;  %3102 = vmatprep.subr.mxu1 %v13852_v22  ;;  %v13885_v22 = vld [vmem:[#allocation235_spill] sm:$0xff] }
 0x670   :  { %3103 = vmatpush2.msra.mxu1 %v13853_v18  ;;  %3138 = vmatprep.subr.mxu0 %v13854_v21  ;;  %v13886_v18 = vld [vmem:[#allocation236_spill] sm:$0xff]  ;;  %v13887_v21 = vld [vmem:[#allocation237_spill] sm:$0xff] }
 0x671   :  { %3105 = vmatmul.mubr.f32.vlgmr.msra.gmra.mxu1 %v5635_v57  ;;  %3209 = vmatprep.subr.mxu1 %v13855_v33  ;;  %v13879_v57 = vld [vmem:[#allocation229_spill] sm:$0xff]  ;;  %v13888_v33 = vld [vmem:[#allocation238_spill] sm:$0xff] }
 0x672   :  { %3139 = vmatpush1.msra.mxu0 %v13856_v35  ;;  %3210 = vmatpush1.msra.mxu1 %v13857_v37  ;;  %v13889_v35 = vld [vmem:[#allocation239_spill] sm:$0xff]  ;;  %v13890_v37 = vld [vmem:[#allocation240_spill] sm:$0xff] }
 0x673   :  { %3140 = vmatprep.subr.mxu0 %v13858_v38  ;;  %3211 = vmatprep.subr.mxu1 %v13859_v10  ;;  %v13891_v38 = vld [vmem:[#allocation241_spill] sm:$0xff]  ;;  %v13892_v10 = vld [vmem:[#allocation242_spill] sm:$0xff] }
 0x674   :  { %3141 = vmatpush1.msra.mxu0 %v13860_v6  ;;  %3212 = vmatpush1.msra.mxu1 %v13861_v4  ;;  %v13893_v6 = vld [vmem:[#allocation243_spill] sm:$0xff]  ;;  %v13894_v4 = vld [vmem:[#allocation244_spill] sm:$0xff] }
 0x675   :  { %3142 = vmatprep.subr.mxu0 %v13862_v16  ;;  %3213 = vmatprep.subr.mxu1 %v13863_v41  ;;  %v13895_v16 = vld [vmem:[#allocation245_spill] sm:$0xff]  ;;  %v13896_v41 = vld [vmem:[#allocation246_spill] sm:$0xff] }
 0x676   :  { %3143 = vmatpush1.msra.mxu0 %v13864_v42  ;;  %3214 = vmatpush1.msra.mxu1 %v13865_v44  ;;  %v13897_v42 = vld [vmem:[#allocation247_spill] sm:$0xff]  ;;  %v13898_v44 = vld [vmem:[#allocation248_spill] sm:$0xff] }
 0x677   :  { %3144 = vmatprep.subr.mxu0 %v13866_v45  ;;  %3215 = vmatprep.subr.mxu1 %v13867_v5  ;;  %v13899_v45 = vld [vmem:[#allocation249_spill] sm:$0xff]  ;;  %v13900_v5 = vld [vmem:[#allocation250_spill] sm:$0xff] }
 0x678   :  { %3145 = vmatpush1.msra.mxu0 %v13868_v59  ;;  %3216 = vmatpush1.msra.mxu1 %v13869_v11  ;;  %v13901_v59 = vld [vmem:[#allocation251_spill] sm:$0xff]  ;;  %v13902_v11 = vld [vmem:[#allocation252_spill] sm:$0xff] }
 0x679   :  { %3146 = vmatprep.subr.mxu0 %v13870_v46  ;;  %3217 = vmatprep.subr.mxu1 %v13871_v47  ;;  %v13903_v46 = vld [vmem:[#allocation253_spill] sm:$0xff]  ;;  %v13904_v47 = vld [vmem:[#allocation254_spill] sm:$0xff] }
 0x67a   :  { %3147 = vmatpush1.msra.mxu0 %v13872_v49  ;;  %3218 = vmatpush1.msra.mxu1 %v13873_v50  ;;  %v13905_v49 = vld [vmem:[#allocation255_spill] sm:$0xff]  ;;  %v13906_v50 = vld [vmem:[#allocation256_spill] sm:$0xff] }
 0x67b   :  { %3148 = vmatprep.subr.mxu0 %v13874_v51  ;;  %3219 = vmatprep.subr.mxu1 %v13875_v52  ;;  %v13907_v51 = vld [vmem:[#allocation257_spill] sm:$0xff]  ;;  %v13908_v52 = vld [vmem:[#allocation258_spill] sm:$0xff] }
 0x67c   :  { %3149 = vmatpush1.msra.mxu0 %v13876_v53  ;;  %3220 = vmatpush1.msra.mxu1 %v13877_v54  ;;  %v13909_v53 = vld [vmem:[#allocation259_spill] sm:$0xff]  ;;  %v13910_v54 = vld [vmem:[#allocation260_spill] sm:$0xff] }
 0x67d   :  { %3150 = vmatprep.subr.mxu0 %v13878_v55  ;;  %3221 = vmatprep.subr.mxu1 %v13879_v57  ;;  %v13911_v55 = vld [vmem:[#allocation261_spill] sm:$0xff]  ;;  %v13912_v57 = vld [vmem:[#allocation262_spill] sm:$0xff] }
 0x67e   :  { %3151 = vmatpush1.msra.mxu0 %v13880_v58  ;;  %3222 = vmatpush1.msra.mxu1 %v13881_v7  ;;  %v13913_v58 = vld [vmem:[#allocation15_spill] sm:$0xff] }
 0x67f   :  { %3152 = vmatprep.subr.mxu0 %v13882_v3  ;;  %3223 = vmatprep.subr.mxu1 %v13883_v61  ;;  %v13914_v7 = vld [vmem:[#allocation263_spill] sm:$0xff]  ;;  %v13915_v3 = vld [vmem:[#allocation264_spill] sm:$0xff]  ;;  %v13916_v61 = vld [vmem:[#allocation265_spill] sm:$0xff] }
 0x680   :  { %3153 = vmatpush1.msra.mxu0 %v13884_v17  ;;  %3224 = vmatpush1.msra.mxu1 %v13885_v22  ;;  %v10071_v17 = vld [vmem:[#allocation7 + $0x10] sm:$0xff]  ;;  %v13917_v22 = vld [vmem:[#allocation266_spill] sm:$0xff] }
 0x681   :  { %3154 = vmatprep.subr.mxu0 %v13886_v18  ;;  %3225 = vmatprep.subr.mxu1 %v13887_v21  ;;  %v13918_v18 = vld [vmem:[#allocation267_spill] sm:$0xff] }
 0x682   :  { %3155 = vmatpush1.msra.mxu0 %v13888_v33  ;;  %3226 = vmatpush1.msra.mxu1 %v13889_v35 }
 0x683   :  { %3156 = vmatprep.subr.mxu0 %v13890_v37  ;;  %3227 = vmatprep.subr.mxu1 %v13891_v38 }
 0x684   :  { %3157 = vmatpush1.msra.mxu0 %v13892_v10  ;;  %3228 = vmatpush1.msra.mxu1 %v13893_v6 }
 0x685   :  { %3158 = vmatprep.subr.mxu0 %v13894_v4  ;;  %3229 = vmatprep.subr.mxu1 %v13895_v16 }
 0x686   :  { %3159 = vmatpush1.msra.mxu0 %v13896_v41  ;;  %3230 = vmatpush1.msra.mxu1 %v13897_v42 }
 0x687   :  { %3160 = vmatprep.subr.mxu0 %v13898_v44  ;;  %3231 = vmatprep.subr.mxu1 %v13899_v45 }
 0x688   :  { %3161 = vmatpush1.msra.mxu0 %v13900_v5  ;;  %3232 = vmatpush1.msra.mxu1 %v13901_v59 }
 0x689   :  { %3162 = vmatprep.subr.mxu0 %v13902_v11  ;;  %3233 = vmatprep.subr.mxu1 %v13903_v46 }
 0x68a   :  { %3163 = vmatpush1.msra.mxu0 %v13904_v47  ;;  %3234 = vmatpush1.msra.mxu1 %v13905_v49 }
 0x68b   :  { %3164 = vmatprep.subr.mxu0 %v13906_v50  ;;  %3235 = vmatprep.subr.mxu1 %v13907_v51 }
 0x68c   :  { %3165 = vmatpush1.msra.mxu0 %v13908_v52  ;;  %3236 = vmatpush1.msra.mxu1 %v13909_v53 }
 0x68d   :  { %3166 = vmatprep.subr.mxu0 %v13910_v54  ;;  %3237 = vmatprep.subr.mxu1 %v13911_v55 }
 0x68e   :  { %3167 = vmatpush1.msra.mxu0 %v13912_v57  ;;  %3238 = vmatpush1.msra.mxu1 %v13913_v58 }
 0x68f   :  { %3168 = vmatprep.subr.mxu0 %v13914_v7  ;;  %3239 = vmatprep.subr.mxu1 %v13915_v3 }
 0x690   :  { %3169 = vmatpush1.msra.mxu0 %v13916_v61  ;;  %3240 = vmatpush1.msra.mxu1 %v10071_v17 }
 0x691   :  { %3202 = vmatprep.mubr.f32.mxu0 %v12905_v24  ;;  %3273 = vmatprep.mubr.f32.mxu1 %v12905_v24 }
 0x692   :  { %3280 = vmatprep.subr.mxu0 %v13917_v22  ;;  %3351 = vmatprep.subr.mxu1 %v13918_v18 }
 0x6ab   :  { %v2575_v21 = vpop.f32.mrf.mxu0  ;;  %v2646_v33 = vpop.f32.mrf.mxu1 }
 0x6ad   :  { %v2577_v35 = vpop.f32.mrf.mxu0  ;;  %v2648_v37 = vpop.f32.mrf.mxu1 }
 0x6cc   :  { %v2717_v38 = vpop.f32.mrf.mxu0  ;;  %v2788_v10 = vpop.f32.mrf.mxu1 }
 0x6cd   :  { %v2718_v6 = vadd.f32 %v2717_v38, %v2575_v21  ;;  %v2789_v4 = vadd.f32 %v2788_v10, %v2646_v33 }
 0x6ce   :  { %v2719_v16 = vpop.f32.mrf.mxu0  ;;  %v2790_v41 = vpop.f32.mrf.mxu1 }
 0x6cf   :  { %v2720_v42 = vadd.f32 %v2719_v16, %v2577_v35  ;;  %v2791_v44 = vadd.f32 %v2790_v41, %v2648_v37 }
 0x6ee   :  { %v2859_v45 = vpop.f32.mrf.mxu0  ;;  %v2930_v5 = vpop.f32.mrf.mxu1 }
 0x6ef   :  { %v2935_v59 = vadd.f32 %v2859_v45, %v2718_v6  ;;  %v2937_v11 = vadd.f32 %v2930_v5, %v2789_v4 }
 0x6f0   :  { %v2861_v46 = vpop.f32.mrf.mxu0  ;;  %v2932_v47 = vpop.f32.mrf.mxu1 }
 0x6f1   :  { %v2939_v49 = vadd.f32 %v2935_v59, %v8283_v43  ;;  %v2936_v50 = vadd.f32 %v2861_v46, %v2720_v42  ;;  %v10079_v51 = vadd.f32 %v2932_v47, %v2791_v44  ;;  %v2941_v55 = vadd.f32 %v2937_v11, %v8297_v14 }
 0x6f3   :  { %v5632_v52 = vmul.f32 -1.442695, %v2939_v49  ;;  %v2940_v53 = vadd.f32 %v2936_v50, %v8288_v19 }
 0x6f5   :  { %5837 = vpow2.f32 %v5632_v52  ;;  %v5633_v54 = vmul.f32 -1.442695, %v2940_v53 }
 0x6f7   :  { %5839 = vpow2.f32 %v5633_v54 }
 0x6f8   :  { %5841 = vtanh.f32 %v2941_v55 }
 0x702   :  { %v5838_v57 = vpop.eup %5837 }
 0x703   :  { %v2946_v58 = vadd.f32 1.0, %v5838_v57 }
 0x704   :  { %v5840_v7 = vpop.eup %5839 }
 0x705   :  { %5843 = vrcp.f32 %v2946_v58  ;;  %v2952_v3 = vadd.f32 1.0, %v5840_v7  ;;  %v5842_v61 = vpop.eup %5841 }
 0x707   :  { %5845 = vrcp.f32 %v2952_v3 }
 0x712   :  { %v5844_v22 = vpop.eup %5843 }
 0x713   :  { %v2963_v18 = vmul.f32 %v5844_v22, %v5842_v61  ;;  %v10133_v22 = vld [vmem:[#allocation5 + $0xc0] sm:$0xff] }
 0x714   :  { %v5846_v21 = vpop.eup %5845 }
 0x715   :  { %v2962_v33 = vmul.f32 %v5846_v21, %v9655_v2  ;;  %v10139_v21 = vld [vmem:[#allocation5 + $0xa8] sm:$0xff] }
 0x717   :  { %v10084_v35 = vadd.f32 %v2963_v18, %v2962_v33  ;;  %v10136_v18 = vld [vmem:[#allocation5 + $0xd0] sm:$0xff]  ;;  %v2942_v33 = vadd.f32 %v10079_v51, %v8424_v9 }
 0x718   :  { %v10174_v51 = vld [vmem:[#allocation5 + $0x70] sm:$0xff] }
 0x72f   :  { %v3035_v37 = vpop.f32.mrf.mxu0 }
 0x730   :  { %v3036_v38 = vadd.f32 %v3035_v37, %v7384_v12  ;;  %v10159_v37 = vld [vmem:[#allocation5 + $0x80] sm:$0xff] }
 0x731   :  { %v3037_v10 = vpop.f32.mrf.mxu0  ;;  %v3106_v41 = vpop.f32.mrf.mxu1 }
 0x732   :  { %v5636_v6 = vmul.f32 -1.442695, %v3036_v38  ;;  %v3038_v4 = vadd.f32 %v3037_v10, %v13373_v36  ;;  %v3107_v45 = vadd.f32 %v3106_v41, %v7400_v25  ;;  %v10162_v38 = vld [vmem:[#allocation5 + $0x90] sm:$0xff]  ;;  %v10165_v10 = vld [vmem:[#allocation5 + $0x68] sm:$0xff]  ;;  %v10180_v41 = vld [vmem:[#allocation5 + $0x58] sm:$0xff] }
 0x733   :  { %v3108_v42 = vpop.f32.mrf.mxu1 }
 0x734   :  { %5847 = vpow2.f32 %v5636_v6  ;;  %v5637_v16 = vmul.f32 -1.442695, %v3038_v4  ;;  %v3109_v44 = vadd.f32 %v3108_v42, %v7396_v23  ;;  %v10168_v6 = vld [vmem:[#allocation5 + $0x78] sm:$0xff]  ;;  %v10171_v4 = vld [vmem:[#allocation5 + $0x60] sm:$0xff]  ;;  %v5634_v42 = vmul.f32 -1.442695, %v2942_v33 }
 0x735   :  { %v10283_v33 = vld [vmem:[#allocation8 + $0x140] sm:$0xff] }
 0x736   :  { %5849 = vpow2.f32 %v5637_v16  ;;  %v5638_v5 = vmul.f32 -1.442695, %v3109_v44  ;;  %v10177_v16 = vld [vmem:[#allocation5 + $0x48] sm:$0xff]  ;;  %v10183_v44 = vld [vmem:[#allocation5 + $0x40] sm:$0xff]  ;;  %13953 = vst [vmem:[#allocation32_spill] sm:$0xff] %v10283_v33 }
 0x737   :  { %5851 = vtanh.f32 %v3107_v45  ;;  %v10186_v45 = vld [vmem:[#allocation5 + $0x50] sm:$0xff] }
 0x738   :  { %5853 = vpow2.f32 %v5638_v5  ;;  %v10189_v5 = vld [vmem:[#allocation5 + $0x28] sm:$0xff] }
 0x741   :  { %v5848_v2 = vpop.eup %5847 }
 0x742   :  { %v3114_v59 = vadd.f32 1.0, %v5848_v2  ;;  %v10192_v2 = vld [vmem:[#allocation5 + $0x38] sm:$0xff] }
 0x743   :  { %v5850_v11 = vpop.eup %5849 }
 0x744   :  { %5855 = vrcp.f32 %v3114_v59  ;;  %v3120_v46 = vadd.f32 1.0, %v5850_v11  ;;  %v5852_v47 = vpop.eup %5851  ;;  %v10195_v59 = vld [vmem:[#allocation5 + $0x20] sm:$0xff]  ;;  %v10198_v11 = vld [vmem:[#allocation5 + $0x30] sm:$0xff] }
 0x745   :  { %v5854_v49 = vpop.eup %5853 }
 0x746   :  { %5857 = vrcp.f32 %v3120_v46  ;;  %v3127_v53 = vadd.f32 1.0, %v5854_v49  ;;  %v10201_v46 = vld [vmem:[#allocation5 + $0x8] sm:$0xff]  ;;  %v10207_v49 = vld [vmem:[#allocation5] sm:$0xff] }
 0x748   :  { %5859 = vrcp.f32 %v3127_v53  ;;  %v10220_v53 = vld [vmem:[#allocation8 + $0x1f8] sm:$0xff] }
 0x751   :  { %v5856_v50 = vpop.eup %5855 }
 0x752   :  { %v3131_v55 = vmul.f32 %v5856_v50, %v5852_v47  ;;  %v10204_v47 = vld [vmem:[#allocation5 + $0x18] sm:$0xff]  ;;  %v10211_v50 = vld [vmem:[#allocation5 + $0x10] sm:$0xff] }
 0x753   :  { %v5858_v52 = vpop.eup %5857 }
 0x754   :  { %v3130_v54 = vmul.f32 %v5858_v52, %v9662_v40  ;;  %v13919_v40 = vld [vmem:[#allocation268_spill] sm:$0xff] }
 0x755   :  { %v5860_v58 = vpop.eup %5859  ;;  %v10217_v52 = vld [vmem:[#allocation8 + $0x1e8] sm:$0xff] }
 0x756   :  { %v10091_v57 = vadd.f32 %v3131_v55, %v3130_v54  ;;  %v10223_v54 = vld [vmem:[#allocation8 + $0x1e0] sm:$0xff]  ;;  %v10226_v55 = vld [vmem:[#allocation8 + $0x1f0] sm:$0xff] }
 0x758   :  { %5861 = vtanh.f32 %v10091_v57 }
 0x759   :  { %5863 = vpow2.f32 %v5634_v42  ;;  %v10286_v42 = vld [vmem:[#allocation8 + $0x150] sm:$0xff] }
 0x75a   :  { %13954 = vst [vmem:[#allocation33_spill] sm:$0xff] %v10286_v42  ;;  %5865 = vtanh.f32 %v10084_v35 }
 0x765   :  { %v5862_v7 = vpop.eup %5861 }
 0x766   :  { %v10094_v3 = vmul.f32 %v5862_v7, %v5860_v58  ;;  %v10229_v58 = vld [vmem:[#allocation8 + $0x1c8] sm:$0xff]  ;;  %v10232_v7 = vld [vmem:[#allocation8 + $0x1d8] sm:$0xff] }
 0x767   :  { %13935 = vst [vmem:[#allocation284_spill] sm:$0xff] %v10229_v58  ;;  %13936 = vst [vmem:[#allocation285_spill] sm:$0xff] %v10232_v7 }
 0x768   :  { %v3136_v61 = vrot.slane %v10094_v3, 2 }
 0x76a   :  { %3203 = vmatmul.mubr.f32.vlgmr.msra.gmra.mxu0 %v3136_v61  ;;  %3274 = vmatmul.mubr.f32.vlgmr.msra.gmra.mxu1 %v3136_v61  ;;  %v10235_v61 = vld [vmem:[#allocation8 + $0x1c0] sm:$0xff] }
 0x76b   :  { %3281 = vmatpush1.msra.mxu0 %v9668_v29  ;;  %3352 = vmatpush1.msra.mxu1 %v9671_v48  ;;  %v13920_v29 = vld [vmem:[#allocation269_spill] sm:$0xff]  ;;  %v13921_v48 = vld [vmem:[#allocation270_spill] sm:$0xff]  ;;  %13937 = vst [vmem:[#allocation16_spill] sm:$0xff] %v10235_v61 }
 0x76c   :  { %3282 = vmatprep.subr.mxu0 %v9674_v56  ;;  %3353 = vmatprep.subr.mxu1 %v9677_v60  ;;  %v13922_v56 = vld [vmem:[#allocation271_spill] sm:$0xff]  ;;  %v13923_v60 = vld [vmem:[#allocation272_spill] sm:$0xff] }
 0x76d   :  { %3283 = vmatpush1.msra.mxu0 %v9680_v8  ;;  %3354 = vmatpush1.msra.mxu1 %v9683_v34  ;;  %v13924_v8 = vld [vmem:[#allocation273_spill] sm:$0xff]  ;;  %v13925_v34 = vld [vmem:[#allocation274_spill] sm:$0xff] }
 0x76e   :  { %3284 = vmatprep.subr.mxu0 %v9686_v28  ;;  %3355 = vmatprep.subr.mxu1 %v9689_v30  ;;  %v13926_v28 = vld [vmem:[#allocation275_spill] sm:$0xff]  ;;  %v13927_v30 = vld [vmem:[#allocation276_spill] sm:$0xff] }
 0x76f   :  { %3285 = vmatpush1.msra.mxu0 %v9692_v26  ;;  %3356 = vmatpush1.msra.mxu1 %v9695_v27  ;;  %v13928_v26 = vld [vmem:[#allocation277_spill] sm:$0xff]  ;;  %v13929_v27 = vld [vmem:[#allocation278_spill] sm:$0xff] }
 0x770   :  { %3286 = vmatprep.subr.mxu0 %v9698_v32  ;;  %3357 = vmatprep.subr.mxu1 %v9701_v31  ;;  %v13930_v32 = vld [vmem:[#allocation279_spill] sm:$0xff]  ;;  %v13931_v31 = vld [vmem:[#allocation280_spill] sm:$0xff] }
 0x771   :  { %3287 = vmatpush1.msra.mxu0 %v9704_v62  ;;  %3358 = vmatpush1.msra.mxu1 %v9707_v63  ;;  %v13932_v62 = vld [vmem:[#allocation281_spill] sm:$0xff]  ;;  %v13933_v63 = vld [vmem:[#allocation282_spill] sm:$0xff] }
 0x772   :  { %3288 = vmatprep.subr.mxu0 %v9710_v15  ;;  %3359 = vmatprep.subr.mxu1 %v13919_v40  ;;  %v13934_v15 = vld [vmem:[#allocation283_spill] sm:$0xff]  ;;  %v10238_v40 = vld [vmem:[#allocation8 + $0x1d0] sm:$0xff] }
 0x773   :  { %3289 = vmatpush1.msra.mxu0 %v13920_v29  ;;  %3360 = vmatpush1.msra.mxu1 %v13921_v48  ;;  %13938 = vst [vmem:[#allocation17_spill] sm:$0xff] %v10238_v40  ;;  %v10241_v29 = vld [vmem:[#allocation8 + $0x1a8] sm:$0xff]  ;;  %v10244_v48 = vld [vmem:[#allocation8 + $0x1b8] sm:$0xff] }
 0x774   :  { %3290 = vmatprep.subr.mxu0 %v13922_v56  ;;  %3361 = vmatprep.subr.mxu1 %v13923_v60  ;;  %13939 = vst [vmem:[#allocation18_spill] sm:$0xff] %v10241_v29  ;;  %13940 = vst [vmem:[#allocation19_spill] sm:$0xff] %v10244_v48  ;;  %v10247_v56 = vld [vmem:[#allocation8 + $0x1a0] sm:$0xff]  ;;  %v10250_v60 = vld [vmem:[#allocation8 + $0x1b0] sm:$0xff] }
 0x775   :  { %3291 = vmatpush1.msra.mxu0 %v13924_v8  ;;  %3362 = vmatpush1.msra.mxu1 %v13925_v34  ;;  %13941 = vst [vmem:[#allocation20_spill] sm:$0xff] %v10247_v56  ;;  %13942 = vst [vmem:[#allocation21_spill] sm:$0xff] %v10250_v60  ;;  %v10253_v8 = vld [vmem:[#allocation8 + $0x188] sm:$0xff]  ;;  %v10256_v34 = vld [vmem:[#allocation8 + $0x198] sm:$0xff] }
 0x776   :  { %3292 = vmatprep.subr.mxu0 %v13926_v28  ;;  %3363 = vmatprep.subr.mxu1 %v13927_v30  ;;  %13943 = vst [vmem:[#allocation22_spill] sm:$0xff] %v10253_v8  ;;  %13944 = vst [vmem:[#allocation23_spill] sm:$0xff] %v10256_v34  ;;  %v10259_v28 = vld [vmem:[#allocation8 + $0x180] sm:$0xff]  ;;  %v10262_v30 = vld [vmem:[#allocation8 + $0x190] sm:$0xff] }
 0x777   :  { %3293 = vmatpush1.msra.mxu0 %v13928_v26  ;;  %3364 = vmatpush1.msra.mxu1 %v13929_v27  ;;  %13945 = vst [vmem:[#allocation24_spill] sm:$0xff] %v10259_v28  ;;  %13946 = vst [vmem:[#allocation25_spill] sm:$0xff] %v10262_v30  ;;  %v10265_v26 = vld [vmem:[#allocation8 + $0x168] sm:$0xff]  ;;  %v10268_v27 = vld [vmem:[#allocation8 + $0x178] sm:$0xff] }
 0x778   :  { %3294 = vmatprep.subr.mxu0 %v13930_v32  ;;  %3365 = vmatprep.subr.mxu1 %v13931_v31  ;;  %13947 = vst [vmem:[#allocation26_spill] sm:$0xff] %v10265_v26  ;;  %13948 = vst [vmem:[#allocation27_spill] sm:$0xff] %v10268_v27  ;;  %v10271_v32 = vld [vmem:[#allocation8 + $0x160] sm:$0xff]  ;;  %v10274_v31 = vld [vmem:[#allocation8 + $0x170] sm:$0xff] }
 0x779   :  { %3295 = vmatpush1.msra.mxu0 %v13932_v62  ;;  %3366 = vmatpush1.msra.mxu1 %v13933_v63  ;;  %13949 = vst [vmem:[#allocation28_spill] sm:$0xff] %v10271_v32  ;;  %13950 = vst [vmem:[#allocation29_spill] sm:$0xff] %v10274_v31  ;;  %v5864_v62 = vpop.eup %5863  ;;  %v10277_v63 = vld [vmem:[#allocation8 + $0x148] sm:$0xff] }
 0x77a   :  { %3296 = vmatprep.subr.mxu0 %v9758_v13  ;;  %3367 = vmatprep.subr.mxu1 %v9761_v20  ;;  %v10142_v13 = vld [vmem:[#allocation5 + $0xb8] sm:$0xff]  ;;  %v10151_v20 = vld [vmem:[#allocation5 + $0x88] sm:$0xff]  ;;  %13951 = vst [vmem:[#allocation30_spill] sm:$0xff] %v10277_v63 }
 0x77b   :  { %3297 = vmatpush1.msra.mxu0 %v9764_v39  ;;  %3368 = vmatpush1.msra.mxu1 %v9767_v0  ;;  %v10145_v0 = vld [vmem:[#allocation5 + $0xa0] sm:$0xff]  ;;  %v10154_v39 = vld [vmem:[#allocation5 + $0x98] sm:$0xff] }
 0x77c   :  { %3298 = vmatprep.subr.mxu0 %v13934_v15  ;;  %3369 = vmatprep.subr.mxu1 %v9773_v1  ;;  %v10148_v1 = vld [vmem:[#allocation5 + $0xb0] sm:$0xff]  ;;  %v10280_v15 = vld [vmem:[#allocation8 + $0x158] sm:$0xff] }
 0x77d   :  { %3299 = vmatpush1.msra.mxu0 %v10133_v22  ;;  %3370 = vmatpush1.msra.mxu1 %v10136_v18  ;;  %13952 = vst [vmem:[#allocation31_spill] sm:$0xff] %v10280_v15 }
 0x77e   :  { %3300 = vmatprep.subr.mxu0 %v10139_v21  ;;  %3371 = vmatprep.subr.mxu1 %v10142_v13 }
 0x77f   :  { %3301 = vmatpush1.msra.mxu0 %v10145_v0  ;;  %3372 = vmatpush1.msra.mxu1 %v10148_v1 }
 0x780   :  { %3302 = vmatprep.subr.mxu0 %v10151_v20  ;;  %3373 = vmatprep.subr.mxu1 %v10154_v39 }
 0x781   :  { %3303 = vmatpush1.msra.mxu0 %v10159_v37  ;;  %3374 = vmatpush1.msra.mxu1 %v10162_v38 }
 0x782   :  { %3304 = vmatprep.subr.mxu0 %v10165_v10  ;;  %3375 = vmatprep.subr.mxu1 %v10168_v6 }
 0x783   :  { %3305 = vmatpush1.msra.mxu0 %v10171_v4  ;;  %3376 = vmatpush1.msra.mxu1 %v10174_v51 }
 0x784   :  { %3306 = vmatprep.subr.mxu0 %v10177_v16  ;;  %3377 = vmatprep.subr.mxu1 %v10180_v41 }
 0x785   :  { %3307 = vmatpush1.msra.mxu0 %v10183_v44  ;;  %3378 = vmatpush1.msra.mxu1 %v10186_v45 }
 0x786   :  { %3308 = vmatprep.subr.mxu0 %v10189_v5  ;;  %3379 = vmatprep.subr.mxu1 %v10192_v2 }
 0x787   :  { %3309 = vmatpush1.msra.mxu0 %v10195_v59  ;;  %3380 = vmatpush1.msra.mxu1 %v10198_v11 }
 0x788   :  { %3310 = vmatprep.subr.mxu0 %v10201_v46  ;;  %3381 = vmatprep.subr.mxu1 %v10204_v47 }
 0x789   :  { %3311 = vmatpush1.msra.mxu0 %v10207_v49  ;;  %3344 = vmatprep.mubr.f32.mxu0 %v12905_v24 }
 0x78a   :  { %3382 = vmatpush1.msra.mxu1 %v10211_v50  ;;  %3415 = vmatprep.mubr.f32.mxu1 %v12905_v24 }
 0x78b   :  { %3345 = vmatmul.mubr.f32.vlgmr.msra.gmra.mxu0 %v10094_v3  ;;  %3416 = vmatmul.mubr.f32.vlgmr.msra.gmra.mxu1 %v10094_v3 }
 0x78c   :  { %3422 = vmatprep.subr.mxu0 %v10217_v52  ;;  %3493 = vmatprep.subr.mxu1 %v10220_v53 }
 0x78d   :  { %3423 = vmatpush1.msra.mxu0 %v10223_v54  ;;  %3494 = vmatpush1.msra.mxu1 %v10226_v55 }
 0x78e   :  { %3424 = vmatprep.subr.mxu0 %v10229_v58  ;;  %3495 = vmatprep.subr.mxu1 %v10232_v7 }
 0x78f   :  { %3425 = vmatpush1.msra.mxu0 %v10235_v61  ;;  %3496 = vmatpush1.msra.mxu1 %v10238_v40 }
 0x790   :  { %3426 = vmatprep.subr.mxu0 %v10241_v29  ;;  %3497 = vmatprep.subr.mxu1 %v10244_v48 }
 0x791   :  { %3427 = vmatpush1.msra.mxu0 %v10247_v56  ;;  %3498 = vmatpush1.msra.mxu1 %v10250_v60 }
 0x792   :  { %3428 = vmatprep.subr.mxu0 %v10253_v8  ;;  %3499 = vmatprep.subr.mxu1 %v10256_v34 }
 0x793   :  { %3429 = vmatpush1.msra.mxu0 %v10259_v28  ;;  %3500 = vmatpush1.msra.mxu1 %v10262_v30 }
 0x794   :  { %3430 = vmatprep.subr.mxu0 %v10265_v26  ;;  %3501 = vmatprep.subr.mxu1 %v10268_v27  ;;  %v10295_v27 = vld [vmem:[#allocation8 + $0x120] sm:$0xff] }
 0x795   :  { %3431 = vmatpush1.msra.mxu0 %v10271_v32  ;;  %3502 = vmatpush1.msra.mxu1 %v10274_v31  ;;  %v10289_v32 = vld [vmem:[#allocation8 + $0x128] sm:$0xff]  ;;  %v10292_v31 = vld [vmem:[#allocation8 + $0x138] sm:$0xff]  ;;  %13957 = vst [vmem:[#allocation36_spill] sm:$0xff] %v10295_v27 }
 0x796   :  { %3432 = vmatprep.subr.mxu0 %v10277_v63  ;;  %3503 = vmatprep.subr.mxu1 %v10280_v15  ;;  %13955 = vst [vmem:[#allocation34_spill] sm:$0xff] %v10289_v32  ;;  %13956 = vst [vmem:[#allocation35_spill] sm:$0xff] %v10292_v31  ;;  %v2959_v63 = vadd.f32 1.0, %v5864_v62  ;;  %v10298_v15 = vld [vmem:[#allocation8 + $0x130] sm:$0xff] }
 0x797   :  { %3433 = vmatpush1.msra.mxu0 %v10283_v33  ;;  %3504 = vmatpush1.msra.mxu1 %v10286_v42  ;;  %13958 = vst [vmem:[#allocation37_spill] sm:$0xff] %v10298_v15  ;;  %v10301_v33 = vld [vmem:[#allocation8 + $0x108] sm:$0xff]  ;;  %v10304_v42 = vld [vmem:[#allocation8 + $0x118] sm:$0xff]  ;;  %v10310_v62 = vld [vmem:[#allocation8 + $0x110] sm:$0xff] }
 0x798   :  { %3434 = vmatprep.subr.mxu0 %v10289_v32  ;;  %3505 = vmatprep.subr.mxu1 %v10292_v31  ;;  %13959 = vst [vmem:[#allocation38_spill] sm:$0xff] %v10301_v33  ;;  %13960 = vst [vmem:[#allocation39_spill] sm:$0xff] %v10304_v42  ;;  %v10307_v32 = vld [vmem:[#allocation8 + $0x100] sm:$0xff]  ;;  %5867 = vrcp.f32 %v2959_v63  ;;  %v10335_v63 = vld [vmem:[#allocation8 + $0xd0] sm:$0xff] }
 0x799   :  { %3435 = vmatpush1.msra.mxu0 %v10295_v27  ;;  %3506 = vmatpush1.msra.mxu1 %v10298_v15  ;;  %13961 = vst [vmem:[#allocation40_spill] sm:$0xff] %v10307_v32  ;;  %13962 = vst [vmem:[#allocation41_spill] sm:$0xff] %v10310_v62  ;;  %v10314_v27 = vld [vmem:[#allocation8 + $0xe8] sm:$0xff]  ;;  %v10317_v15 = vld [vmem:[#allocation8 + $0xf8] sm:$0xff] }
 0x79a   :  { %3436 = vmatprep.subr.mxu0 %v10301_v33  ;;  %3507 = vmatprep.subr.mxu1 %v10304_v42  ;;  %13963 = vst [vmem:[#allocation42_spill] sm:$0xff] %v10314_v27  ;;  %13964 = vst [vmem:[#allocation43_spill] sm:$0xff] %v10317_v15  ;;  %v10320_v42 = vld [vmem:[#allocation8 + $0xe0] sm:$0xff]  ;;  %v10329_v33 = vld [vmem:[#allocation8 + $0xd8] sm:$0xff] }
 0x79b   :  { %3437 = vmatpush1.msra.mxu0 %v10307_v32  ;;  %3508 = vmatpush1.msra.mxu1 %v10310_v62  ;;  %13965 = vst [vmem:[#allocation44_spill] sm:$0xff] %v10320_v42  ;;  %v10323_v32 = vld [vmem:[#allocation8 + $0xf0] sm:$0xff]  ;;  %v10326_v62 = vld [vmem:[#allocation8 + $0xc8] sm:$0xff]  ;;  %13968 = vst [vmem:[#allocation47_spill] sm:$0xff] %v10329_v33 }
 0x79c   :  { %3438 = vmatprep.subr.mxu0 %v10314_v27  ;;  %3509 = vmatprep.subr.mxu1 %v10317_v15  ;;  %13966 = vst [vmem:[#allocation45_spill] sm:$0xff] %v10323_v32  ;;  %13967 = vst [vmem:[#allocation46_spill] sm:$0xff] %v10326_v62  ;;  %v10332_v27 = vld [vmem:[#allocation8 + $0xc0] sm:$0xff]  ;;  %v10386_v15 = vld [vmem:[#allocation8 + $0x28] sm:$0xff] }
 0x79d   :  { %3439 = vmatpush1.msra.mxu0 %v10320_v42  ;;  %3510 = vmatpush1.msra.mxu1 %v10323_v32  ;;  %13969 = vst [vmem:[#allocation48_spill] sm:$0xff] %v10332_v27  ;;  %13970 = vst [vmem:[#allocation49_spill] sm:$0xff] %v10335_v63  ;;  %v10338_v42 = vld [vmem:[#allocation8 + $0xa8] sm:$0xff]  ;;  %v10341_v32 = vld [vmem:[#allocation8 + $0xb8] sm:$0xff] }
 0x79e   :  { %3440 = vmatprep.subr.mxu0 %v10326_v62  ;;  %3511 = vmatprep.subr.mxu1 %v10329_v33  ;;  %13971 = vst [vmem:[#allocation50_spill] sm:$0xff] %v10338_v42  ;;  %13972 = vst [vmem:[#allocation51_spill] sm:$0xff] %v10341_v32  ;;  %v10344_v62 = vld [vmem:[#allocation8 + $0xa0] sm:$0xff]  ;;  %v10347_v33 = vld [vmem:[#allocation8 + $0xb0] sm:$0xff] }
 0x79f   :  { %3441 = vmatpush1.msra.mxu0 %v10332_v27  ;;  %3512 = vmatpush1.msra.mxu1 %v10335_v63  ;;  %13973 = vst [vmem:[#allocation52_spill] sm:$0xff] %v10344_v62  ;;  %13974 = vst [vmem:[#allocation53_spill] sm:$0xff] %v10347_v33  ;;  %v10350_v27 = vld [vmem:[#allocation8 + $0x88] sm:$0xff]  ;;  %v10353_v63 = vld [vmem:[#allocation8 + $0x98] sm:$0xff] }
 0x7a0   :  { %3442 = vmatprep.subr.mxu0 %v10338_v42  ;;  %3513 = vmatprep.subr.mxu1 %v10341_v32  ;;  %13975 = vst [vmem:[#allocation54_spill] sm:$0xff] %v10350_v27  ;;  %13976 = vst [vmem:[#allocation55_spill] sm:$0xff] %v10353_v63  ;;  %v10356_v42 = vld [vmem:[#allocation8 + $0x80] sm:$0xff]  ;;  %v10359_v32 = vld [vmem:[#allocation8 + $0x90] sm:$0xff] }
 0x7a1   :  { %3443 = vmatpush1.msra.mxu0 %v10344_v62  ;;  %3514 = vmatpush1.msra.mxu1 %v10347_v33  ;;  %13977 = vst [vmem:[#allocation56_spill] sm:$0xff] %v10356_v42  ;;  %13978 = vst [vmem:[#allocation57_spill] sm:$0xff] %v10359_v32  ;;  %v10362_v62 = vld [vmem:[#allocation8 + $0x68] sm:$0xff]  ;;  %v10365_v33 = vld [vmem:[#allocation8 + $0x78] sm:$0xff] }
 0x7a2   :  { %3444 = vmatprep.subr.mxu0 %v10350_v27  ;;  %3515 = vmatprep.subr.mxu1 %v10353_v63  ;;  %13979 = vst [vmem:[#allocation58_spill] sm:$0xff] %v10362_v62  ;;  %13980 = vst [vmem:[#allocation59_spill] sm:$0xff] %v10365_v33  ;;  %v10368_v27 = vld [vmem:[#allocation8 + $0x60] sm:$0xff]  ;;  %v10371_v63 = vld [vmem:[#allocation8 + $0x70] sm:$0xff] }
 0x7a3   :  { %3445 = vmatpush1.msra.mxu0 %v10356_v42  ;;  %3516 = vmatpush1.msra.mxu1 %v10359_v32  ;;  %13981 = vst [vmem:[#allocation60_spill] sm:$0xff] %v10368_v27  ;;  %13982 = vst [vmem:[#allocation61_spill] sm:$0xff] %v10371_v63  ;;  %v10374_v42 = vld [vmem:[#allocation8 + $0x48] sm:$0xff]  ;;  %v10377_v32 = vld [vmem:[#allocation8 + $0x58] sm:$0xff] }
 0x7a4   :  { %3446 = vmatprep.subr.mxu0 %v10362_v62  ;;  %3517 = vmatprep.subr.mxu1 %v10365_v33  ;;  %13983 = vst [vmem:[#allocation62_spill] sm:$0xff] %v10374_v42  ;;  %13984 = vst [vmem:[#allocation63_spill] sm:$0xff] %v10377_v32  ;;  %v10380_v62 = vld [vmem:[#allocation8 + $0x40] sm:$0xff]  ;;  %v10383_v33 = vld [vmem:[#allocation8 + $0x50] sm:$0xff] }
 0x7a5   :  { %3447 = vmatpush1.msra.mxu0 %v10368_v27  ;;  %3518 = vmatpush1.msra.mxu1 %v10371_v63  ;;  %13985 = vst [vmem:[#allocation64_spill] sm:$0xff] %v10380_v62  ;;  %13986 = vst [vmem:[#allocation65_spill] sm:$0xff] %v10383_v33  ;;  %v5866_v27 = vpop.eup %5865  ;;  %v10389_v63 = vld [vmem:[#allocation8 + $0x38] sm:$0xff]  ;;  %v10398_v31 = vld [vmem:[#allocation8 + $0x8] sm:$0xff] }
 0x7a6   :  { %3448 = vmatprep.subr.mxu0 %v10374_v42  ;;  %3519 = vmatprep.subr.mxu1 %v10377_v32  ;;  %13987 = vst [vmem:[#allocation66_spill] sm:$0xff] %v10386_v15  ;;  %13988 = vst [vmem:[#allocation67_spill] sm:$0xff] %v10389_v63  ;;  %v10392_v42 = vld [vmem:[#allocation8 + $0x20] sm:$0xff]  ;;  %v10395_v32 = vld [vmem:[#allocation8 + $0x30] sm:$0xff] }
 0x7a7   :  { %3449 = vmatpush1.msra.mxu0 %v10380_v62  ;;  %3520 = vmatpush1.msra.mxu1 %v10383_v33  ;;  %13989 = vst [vmem:[#allocation68_spill] sm:$0xff] %v10392_v42  ;;  %13990 = vst [vmem:[#allocation69_spill] sm:$0xff] %v10395_v32  ;;  %v5868_v62 = vpop.eup %5867  ;;  %v10401_v33 = vld [vmem:[#allocation8 + $0x18] sm:$0xff] }
 0x7a8   :  { %3450 = vmatprep.subr.mxu0 %v10386_v15  ;;  %3521 = vmatprep.subr.mxu1 %v10389_v63  ;;  %13991 = vst [vmem:[#allocation70_spill] sm:$0xff] %v10398_v31  ;;  %13992 = vst [vmem:[#allocation71_spill] sm:$0xff] %v10401_v33  ;;  %v10404_v15 = vld [vmem:[#allocation8] sm:$0xff]  ;;  %v10408_v63 = vld [vmem:[#allocation8 + $0x10] sm:$0xff] }
 0x7a9   :  { %3451 = vmatpush1.msra.mxu0 %v10392_v42  ;;  %3522 = vmatpush1.msra.mxu1 %v10395_v32  ;;  %13993 = vst [vmem:[#allocation72_spill] sm:$0xff] %v10404_v15  ;;  %v2966_v42 = vmul.f32 %v5868_v62, %v5866_v27  ;;  %13994 = vst [vmem:[#allocation73_spill] sm:$0xff] %v10408_v63  ;;  %v10420_v27 = vld [vmem:[#allocation2 + $0x1c8] sm:$0xff]  ;;  %v10423_v62 = vld [vmem:[#allocation2 + $0x1f8] sm:$0xff] }
 0x7aa   :  { %3452 = vmatprep.subr.mxu0 %v10398_v31  ;;  %3523 = vmatprep.subr.mxu1 %v10401_v33  ;;  %v10412_v31 = vld [vmem:[#allocation2 + $0x1e8] sm:$0xff]  ;;  %v10416_v33 = vld [vmem:[#allocation2 + $0x1e0] sm:$0xff]  ;;  %13997 = vst [vmem:[#allocation76_spill] sm:$0xff] %v10420_v27  ;;  %13998 = vst [vmem:[#allocation77_spill] sm:$0xff] %v10423_v62 }
 0x7ab   :  { %3453 = vmatpush1.msra.mxu0 %v10404_v15  ;;  %3486 = vmatprep.mubr.f32.mxu0 %v12905_v24  ;;  %13995 = vst [vmem:[#allocation74_spill] sm:$0xff] %v10412_v31  ;;  %13996 = vst [vmem:[#allocation75_spill] sm:$0xff] %v10416_v33 }
 0x7ac   :  { %3524 = vmatpush1.msra.mxu1 %v10408_v63  ;;  %3557 = vmatprep.mubr.f32.mxu1 %v12905_v24  ;;  %v10432_v63 = vld [vmem:[#allocation2 + $0x1a8] sm:$0xff] }
 0x7ad   :  { %3487 = vmatmul.mubr.f32.vlgmr.msra.gmra.mxu0 %v2966_v42  ;;  %3558 = vmatmul.mubr.f32.vlgmr.msra.gmra.mxu1 %v2966_v42  ;;  %v10426_v42 = vld [vmem:[#allocation2 + $0x1c0] sm:$0xff]  ;;  %14001 = vst [vmem:[#allocation80_spill] sm:$0xff] %v10432_v63 }
 0x7ae   :  { %3598 = vmatprep.subr.mxu0 %v10412_v31  ;;  %3662 = vmatprep.mubr.f32.mxu0 %v10094_v3  ;;  %13999 = vst [vmem:[#allocation78_spill] sm:$0xff] %v10426_v42  ;;  %v10429_v31 = vld [vmem:[#allocation2 + $0x1f0] sm:$0xff] }
 0x7af   :  { %3599 = vmatpush1.msra.mxu0 %v10416_v33  ;;  %3733 = vmatprep.mubr.f32.mxu1 %v10094_v3  ;;  %14000 = vst [vmem:[#allocation79_spill] sm:$0xff] %v10429_v31  ;;  %v10435_v3 = vld [vmem:[#allocation2 + $0x1d8] sm:$0xff] }
 0x7b0   :  { %3600 = vmatprep.subr.mxu0 %v10420_v27  ;;  %3669 = vmatprep.subr.mxu1 %v10423_v62  ;;  %14002 = vst [vmem:[#allocation81_spill] sm:$0xff] %v10435_v3  ;;  %v10438_v27 = vld [vmem:[#allocation2 + $0x1a0] sm:$0xff]  ;;  %v10441_v62 = vld [vmem:[#allocation2 + $0x1d0] sm:$0xff]  ;;  %v10795_v33 = vld [vmem:[#allocation2 + $0x218] sm:$0xff] }
 0x7b1   :  { %3601 = vmatpush1.msra.mxu0 %v10426_v42  ;;  %3670 = vmatpush1.msra.mxu1 %v10429_v31  ;;  %14003 = vst [vmem:[#allocation82_spill] sm:$0xff] %v10438_v27  ;;  %14004 = vst [vmem:[#allocation83_spill] sm:$0xff] %v10441_v62  ;;  %v10444_v42 = vld [vmem:[#allocation2 + $0x188] sm:$0xff]  ;;  %v10447_v31 = vld [vmem:[#allocation2 + $0x1b8] sm:$0xff] }
 0x7b2   :  { %3602 = vmatprep.subr.mxu0 %v10432_v63  ;;  %3671 = vmatprep.subr.mxu1 %v10435_v3  ;;  %14005 = vst [vmem:[#allocation84_spill] sm:$0xff] %v10444_v42  ;;  %14006 = vst [vmem:[#allocation85_spill] sm:$0xff] %v10447_v31  ;;  %v10450_v63 = vld [vmem:[#allocation2 + $0x180] sm:$0xff]  ;;  %v10453_v3 = vld [vmem:[#allocation2 + $0x1b0] sm:$0xff] }
 0x7b3   :  { %3603 = vmatpush1.msra.mxu0 %v10438_v27  ;;  %3672 = vmatpush1.msra.mxu1 %v10441_v62  ;;  %14007 = vst [vmem:[#allocation86_spill] sm:$0xff] %v10450_v63  ;;  %14008 = vst [vmem:[#allocation87_spill] sm:$0xff] %v10453_v3  ;;  %v10456_v27 = vld [vmem:[#allocation2 + $0x168] sm:$0xff]  ;;  %v10459_v62 = vld [vmem:[#allocation2 + $0x198] sm:$0xff] }
 0x7b4   :  { %3604 = vmatprep.subr.mxu0 %v10444_v42  ;;  %3673 = vmatprep.subr.mxu1 %v10447_v31  ;;  %14009 = vst [vmem:[#allocation88_spill] sm:$0xff] %v10456_v27  ;;  %14010 = vst [vmem:[#allocation89_spill] sm:$0xff] %v10459_v62  ;;  %v10462_v42 = vld [vmem:[#allocation2 + $0x160] sm:$0xff]  ;;  %v10465_v31 = vld [vmem:[#allocation2 + $0x190] sm:$0xff] }
 0x7b5   :  { %3605 = vmatpush1.msra.mxu0 %v10450_v63  ;;  %3674 = vmatpush1.msra.mxu1 %v10453_v3  ;;  %14011 = vst [vmem:[#allocation90_spill] sm:$0xff] %v10462_v42  ;;  %14012 = vst [vmem:[#allocation91_spill] sm:$0xff] %v10465_v31  ;;  %v10468_v63 = vld [vmem:[#allocation2 + $0x148] sm:$0xff]  ;;  %v10471_v3 = vld [vmem:[#allocation2 + $0x178] sm:$0xff] }
 0x7b6   :  { %3606 = vmatprep.subr.mxu0 %v10456_v27  ;;  %3675 = vmatprep.subr.mxu1 %v10459_v62  ;;  %14013 = vst [vmem:[#allocation92_spill] sm:$0xff] %v10468_v63  ;;  %14014 = vst [vmem:[#allocation93_spill] sm:$0xff] %v10471_v3  ;;  %v10474_v27 = vld [vmem:[#allocation2 + $0x140] sm:$0xff]  ;;  %v10477_v62 = vld [vmem:[#allocation2 + $0x170] sm:$0xff] }
 0x7b7   :  { %3607 = vmatpush1.msra.mxu0 %v10462_v42  ;;  %3676 = vmatpush1.msra.mxu1 %v10465_v31  ;;  %14015 = vst [vmem:[#allocation94_spill] sm:$0xff] %v10474_v27  ;;  %14016 = vst [vmem:[#allocation95_spill] sm:$0xff] %v10477_v62  ;;  %v10480_v42 = vld [vmem:[#allocation2 + $0x128] sm:$0xff]  ;;  %v10483_v31 = vld [vmem:[#allocation2 + $0x158] sm:$0xff] }
 0x7b8   :  { %3608 = vmatprep.subr.mxu0 %v10468_v63  ;;  %3677 = vmatprep.subr.mxu1 %v10471_v3  ;;  %14017 = vst [vmem:[#allocation96_spill] sm:$0xff] %v10480_v42  ;;  %14018 = vst [vmem:[#allocation97_spill] sm:$0xff] %v10483_v31  ;;  %v10486_v63 = vld [vmem:[#allocation2 + $0x120] sm:$0xff]  ;;  %v10489_v3 = vld [vmem:[#allocation2 + $0x150] sm:$0xff] }
 0x7b9   :  { %3609 = vmatpush1.msra.mxu0 %v10474_v27  ;;  %3678 = vmatpush1.msra.mxu1 %v10477_v62  ;;  %14019 = vst [vmem:[#allocation98_spill] sm:$0xff] %v10486_v63  ;;  %14020 = vst [vmem:[#allocation99_spill] sm:$0xff] %v10489_v3  ;;  %v10492_v27 = vld [vmem:[#allocation2 + $0x108] sm:$0xff]  ;;  %v10495_v62 = vld [vmem:[#allocation2 + $0x138] sm:$0xff] }
 0x7ba   :  { %3610 = vmatprep.subr.mxu0 %v10480_v42  ;;  %3679 = vmatprep.subr.mxu1 %v10483_v31  ;;  %14021 = vst [vmem:[#allocation100_spill] sm:$0xff] %v10492_v27  ;;  %14022 = vst [vmem:[#allocation101_spill] sm:$0xff] %v10495_v62  ;;  %v10498_v42 = vld [vmem:[#allocation2 + $0x100] sm:$0xff]  ;;  %v10501_v31 = vld [vmem:[#allocation2 + $0x130] sm:$0xff] }
 0x7bb   :  { %3611 = vmatpush1.msra.mxu0 %v10486_v63  ;;  %3680 = vmatpush1.msra.mxu1 %v10489_v3  ;;  %14023 = vst [vmem:[#allocation102_spill] sm:$0xff] %v10498_v42  ;;  %14024 = vst [vmem:[#allocation103_spill] sm:$0xff] %v10501_v31  ;;  %v10504_v63 = vld [vmem:[#allocation2 + $0xe8] sm:$0xff]  ;;  %v10507_v3 = vld [vmem:[#allocation2 + $0x118] sm:$0xff] }
 0x7bc   :  { %3612 = vmatprep.subr.mxu0 %v10492_v27  ;;  %3681 = vmatprep.subr.mxu1 %v10495_v62  ;;  %14025 = vst [vmem:[#allocation104_spill] sm:$0xff] %v10504_v63  ;;  %14026 = vst [vmem:[#allocation105_spill] sm:$0xff] %v10507_v3  ;;  %v10510_v27 = vld [vmem:[#allocation2 + $0xe0] sm:$0xff]  ;;  %v10513_v62 = vld [vmem:[#allocation2 + $0x110] sm:$0xff] }
 0x7bd   :  { %3613 = vmatpush1.msra.mxu0 %v10498_v42  ;;  %3682 = vmatpush1.msra.mxu1 %v10501_v31  ;;  %14027 = vst [vmem:[#allocation106_spill] sm:$0xff] %v10510_v27  ;;  %14028 = vst [vmem:[#allocation107_spill] sm:$0xff] %v10513_v62  ;;  %v10516_v42 = vld [vmem:[#allocation2 + $0xc8] sm:$0xff]  ;;  %v10519_v31 = vld [vmem:[#allocation2 + $0xf8] sm:$0xff] }
 0x7be   :  { %3614 = vmatprep.subr.mxu0 %v10504_v63  ;;  %3683 = vmatprep.subr.mxu1 %v10507_v3  ;;  %14029 = vst [vmem:[#allocation108_spill] sm:$0xff] %v10516_v42  ;;  %14030 = vst [vmem:[#allocation109_spill] sm:$0xff] %v10519_v31  ;;  %v10522_v63 = vld [vmem:[#allocation2 + $0xc0] sm:$0xff]  ;;  %v10525_v3 = vld [vmem:[#allocation2 + $0xf0] sm:$0xff] }
 0x7bf   :  { %3615 = vmatpush1.msra.mxu0 %v10510_v27  ;;  %3684 = vmatpush1.msra.mxu1 %v10513_v62  ;;  %14031 = vst [vmem:[#allocation110_spill] sm:$0xff] %v10522_v63  ;;  %14032 = vst [vmem:[#allocation111_spill] sm:$0xff] %v10525_v3  ;;  %v10528_v27 = vld [vmem:[#allocation2 + $0xa8] sm:$0xff]  ;;  %v10531_v62 = vld [vmem:[#allocation2 + $0xd8] sm:$0xff] }
 0x7c0   :  { %3616 = vmatprep.subr.mxu0 %v10516_v42  ;;  %3685 = vmatprep.subr.mxu1 %v10519_v31  ;;  %14033 = vst [vmem:[#allocation112_spill] sm:$0xff] %v10528_v27  ;;  %14034 = vst [vmem:[#allocation113_spill] sm:$0xff] %v10531_v62  ;;  %v10534_v42 = vld [vmem:[#allocation2 + $0xa0] sm:$0xff]  ;;  %v10537_v31 = vld [vmem:[#allocation2 + $0xd0] sm:$0xff] }
 0x7c1   :  { %3617 = vmatpush1.msra.mxu0 %v10522_v63  ;;  %3686 = vmatpush1.msra.mxu1 %v10525_v3  ;;  %14035 = vst [vmem:[#allocation114_spill] sm:$0xff] %v10534_v42  ;;  %14036 = vst [vmem:[#allocation115_spill] sm:$0xff] %v10537_v31  ;;  %v10540_v63 = vld [vmem:[#allocation2 + $0x88] sm:$0xff]  ;;  %v10543_v3 = vld [vmem:[#allocation2 + $0xb8] sm:$0xff] }
 0x7c2   :  { %3618 = vmatprep.subr.mxu0 %v10528_v27  ;;  %3687 = vmatprep.subr.mxu1 %v10531_v62  ;;  %14037 = vst [vmem:[#allocation116_spill] sm:$0xff] %v10540_v63  ;;  %14038 = vst [vmem:[#allocation117_spill] sm:$0xff] %v10543_v3  ;;  %v10546_v27 = vld [vmem:[#allocation2 + $0x80] sm:$0xff]  ;;  %v10549_v62 = vld [vmem:[#allocation2 + $0xb0] sm:$0xff] }
 0x7c3   :  { %3619 = vmatpush1.msra.mxu0 %v10534_v42  ;;  %3688 = vmatpush1.msra.mxu1 %v10537_v31  ;;  %14039 = vst [vmem:[#allocation118_spill] sm:$0xff] %v10546_v27  ;;  %14040 = vst [vmem:[#allocation119_spill] sm:$0xff] %v10549_v62  ;;  %v10552_v42 = vld [vmem:[#allocation2 + $0x68] sm:$0xff]  ;;  %v10555_v31 = vld [vmem:[#allocation2 + $0x98] sm:$0xff] }
 0x7c4   :  { %3620 = vmatprep.subr.mxu0 %v10540_v63  ;;  %3689 = vmatprep.subr.mxu1 %v10543_v3  ;;  %14041 = vst [vmem:[#allocation120_spill] sm:$0xff] %v10552_v42  ;;  %14042 = vst [vmem:[#allocation121_spill] sm:$0xff] %v10555_v31  ;;  %v10558_v63 = vld [vmem:[#allocation2 + $0x60] sm:$0xff]  ;;  %v10561_v3 = vld [vmem:[#allocation2 + $0x90] sm:$0xff] }
 0x7c5   :  { %3621 = vmatpush1.msra.mxu0 %v10546_v27  ;;  %3690 = vmatpush1.msra.mxu1 %v10549_v62  ;;  %14043 = vst [vmem:[#allocation122_spill] sm:$0xff] %v10558_v63  ;;  %14044 = vst [vmem:[#allocation123_spill] sm:$0xff] %v10561_v3  ;;  %v10564_v27 = vld [vmem:[#allocation2 + $0x48] sm:$0xff]  ;;  %v10567_v62 = vld [vmem:[#allocation2 + $0x78] sm:$0xff] }
 0x7c6   :  { %3622 = vmatprep.subr.mxu0 %v10552_v42  ;;  %3691 = vmatprep.subr.mxu1 %v10555_v31  ;;  %14045 = vst [vmem:[#allocation124_spill] sm:$0xff] %v10564_v27  ;;  %14046 = vst [vmem:[#allocation125_spill] sm:$0xff] %v10567_v62  ;;  %v10570_v42 = vld [vmem:[#allocation2 + $0x40] sm:$0xff]  ;;  %v10573_v31 = vld [vmem:[#allocation2 + $0x70] sm:$0xff] }
 0x7c7   :  { %3623 = vmatpush1.msra.mxu0 %v10558_v63  ;;  %3692 = vmatpush1.msra.mxu1 %v10561_v3  ;;  %14047 = vst [vmem:[#allocation126_spill] sm:$0xff] %v10570_v42  ;;  %14048 = vst [vmem:[#allocation127_spill] sm:$0xff] %v10573_v31  ;;  %v10576_v63 = vld [vmem:[#allocation2 + $0x28] sm:$0xff]  ;;  %v10579_v3 = vld [vmem:[#allocation2 + $0x58] sm:$0xff] }
 0x7c8   :  { %3624 = vmatprep.subr.mxu0 %v10564_v27  ;;  %3693 = vmatprep.subr.mxu1 %v10567_v62  ;;  %14049 = vst [vmem:[#allocation128_spill] sm:$0xff] %v10576_v63  ;;  %14050 = vst [vmem:[#allocation129_spill] sm:$0xff] %v10579_v3  ;;  %v10582_v27 = vld [vmem:[#allocation2 + $0x20] sm:$0xff]  ;;  %v10585_v62 = vld [vmem:[#allocation2 + $0x50] sm:$0xff] }
 0x7c9   :  { %3625 = vmatpush1.msra.mxu0 %v10570_v42  ;;  %3694 = vmatpush1.msra.mxu1 %v10573_v31  ;;  %14051 = vst [vmem:[#allocation130_spill] sm:$0xff] %v10582_v27  ;;  %14052 = vst [vmem:[#allocation131_spill] sm:$0xff] %v10585_v62  ;;  %v10588_v42 = vld [vmem:[#allocation2 + $0x8] sm:$0xff]  ;;  %v10591_v31 = vld [vmem:[#allocation2 + $0x38] sm:$0xff] }
 0x7ca   :  { %3626 = vmatprep.subr.mxu0 %v10576_v63  ;;  %3695 = vmatprep.subr.mxu1 %v10579_v3  ;;  %14053 = vst [vmem:[#allocation132_spill] sm:$0xff] %v10588_v42  ;;  %14054 = vst [vmem:[#allocation133_spill] sm:$0xff] %v10591_v31  ;;  %v10594_v63 = vld [vmem:[#allocation2] sm:$0xff]  ;;  %v10597_v3 = vld [vmem:[#allocation2 + $0x30] sm:$0xff] }
 0x7cb   :  { %3627 = vmatpush1.msra.mxu0 %v10582_v27  ;;  %3696 = vmatpush1.msra.mxu1 %v10585_v62  ;;  %14055 = vst [vmem:[#allocation134_spill] sm:$0xff] %v10594_v63  ;;  %14056 = vst [vmem:[#allocation135_spill] sm:$0xff] %v10597_v3  ;;  %v10600_v27 = vld [vmem:[#allocation2 + $0x3e8] sm:$0xff]  ;;  %v10603_v62 = vld [vmem:[#allocation2 + $0x18] sm:$0xff] }
 0x7cc   :  { %3628 = vmatprep.subr.mxu0 %v10588_v42  ;;  %3697 = vmatprep.subr.mxu1 %v10591_v31  ;;  %14057 = vst [vmem:[#allocation136_spill] sm:$0xff] %v10600_v27  ;;  %14058 = vst [vmem:[#allocation137_spill] sm:$0xff] %v10603_v62  ;;  %v10606_v42 = vld [vmem:[#allocation2 + $0x3e0] sm:$0xff]  ;;  %v10609_v31 = vld [vmem:[#allocation2 + $0x10] sm:$0xff] }
 0x7cd   :  { %3629 = vmatpush1.msra.mxu0 %v10594_v63  ;;  %3698 = vmatpush1.msra.mxu1 %v10597_v3  ;;  %14059 = vst [vmem:[#allocation138_spill] sm:$0xff] %v10606_v42  ;;  %14060 = vst [vmem:[#allocation139_spill] sm:$0xff] %v10609_v31  ;;  %v10612_v63 = vld [vmem:[#allocation2 + $0x3c8] sm:$0xff]  ;;  %v10615_v3 = vld [vmem:[#allocation2 + $0x3f8] sm:$0xff] }
 0x7ce   :  { %3630 = vmatprep.subr.mxu0 %v10600_v27  ;;  %3699 = vmatprep.subr.mxu1 %v10603_v62  ;;  %14061 = vst [vmem:[#allocation140_spill] sm:$0xff] %v10612_v63  ;;  %14062 = vst [vmem:[#allocation141_spill] sm:$0xff] %v10615_v3  ;;  %v10618_v27 = vld [vmem:[#allocation2 + $0x3c0] sm:$0xff]  ;;  %v10621_v62 = vld [vmem:[#allocation2 + $0x3f0] sm:$0xff] }
 0x7cf   :  { %3631 = vmatpush2.msra.mxu0 %v10606_v42  ;;  %3700 = vmatpush1.msra.mxu1 %v10609_v31  ;;  %14063 = vst [vmem:[#allocation142_spill] sm:$0xff] %v10618_v27  ;;  %14064 = vst [vmem:[#allocation143_spill] sm:$0xff] %v10621_v62  ;;  %v10624_v42 = vld [vmem:[#allocation2 + $0x3a8] sm:$0xff]  ;;  %v10627_v31 = vld [vmem:[#allocation2 + $0x3d8] sm:$0xff] }
 0x7d0   :  { %3632 = vmatprep.subr.mxu0 %v10612_v63  ;;  %3701 = vmatprep.subr.mxu1 %v10615_v3  ;;  %14065 = vst [vmem:[#allocation144_spill] sm:$0xff] %v10624_v42  ;;  %14066 = vst [vmem:[#allocation145_spill] sm:$0xff] %v10627_v31  ;;  %v10630_v63 = vld [vmem:[#allocation2 + $0x3a0] sm:$0xff]  ;;  %v10633_v3 = vld [vmem:[#allocation2 + $0x3d0] sm:$0xff] }
 0x7d1   :  { %3633 = vmatpush2.msra.mxu0 %v10618_v27  ;;  %3702 = vmatpush2.msra.mxu1 %v10621_v62  ;;  %14067 = vst [vmem:[#allocation146_spill] sm:$0xff] %v10630_v63  ;;  %14068 = vst [vmem:[#allocation147_spill] sm:$0xff] %v10633_v3  ;;  %v10636_v27 = vld [vmem:[#allocation2 + $0x388] sm:$0xff]  ;;  %v10639_v62 = vld [vmem:[#allocation2 + $0x3b8] sm:$0xff] }
 0x7d2   :  { %3634 = vmatprep.subr.mxu0 %v10624_v42  ;;  %3703 = vmatprep.subr.mxu1 %v10627_v31  ;;  %14069 = vst [vmem:[#allocation148_spill] sm:$0xff] %v10636_v27  ;;  %14070 = vst [vmem:[#allocation149_spill] sm:$0xff] %v10639_v62  ;;  %v10642_v42 = vld [vmem:[#allocation2 + $0x380] sm:$0xff]  ;;  %v10645_v31 = vld [vmem:[#allocation2 + $0x3b0] sm:$0xff] }
 0x7d3   :  { %3635 = vmatpush2.msra.mxu0 %v10630_v63  ;;  %3704 = vmatpush2.msra.mxu1 %v10633_v3  ;;  %14071 = vst [vmem:[#allocation150_spill] sm:$0xff] %v10642_v42  ;;  %14072 = vst [vmem:[#allocation151_spill] sm:$0xff] %v10645_v31  ;;  %v10648_v63 = vld [vmem:[#allocation2 + $0x368] sm:$0xff]  ;;  %v10651_v3 = vld [vmem:[#allocation2 + $0x398] sm:$0xff] }
 0x7d4   :  { %3636 = vmatprep.subr.mxu0 %v10636_v27  ;;  %3705 = vmatprep.subr.mxu1 %v10639_v62  ;;  %14073 = vst [vmem:[#allocation152_spill] sm:$0xff] %v10648_v63  ;;  %14074 = vst [vmem:[#allocation153_spill] sm:$0xff] %v10651_v3  ;;  %v10654_v27 = vld [vmem:[#allocation2 + $0x360] sm:$0xff]  ;;  %v10657_v62 = vld [vmem:[#allocation2 + $0x390] sm:$0xff] }
 0x7d5   :  { %3637 = vmatpush2.msra.mxu0 %v10642_v42  ;;  %3706 = vmatpush2.msra.mxu1 %v10645_v31  ;;  %14075 = vst [vmem:[#allocation154_spill] sm:$0xff] %v10654_v27  ;;  %14076 = vst [vmem:[#allocation155_spill] sm:$0xff] %v10657_v62  ;;  %v10660_v42 = vld [vmem:[#allocation2 + $0x348] sm:$0xff]  ;;  %v10663_v31 = vld [vmem:[#allocation2 + $0x378] sm:$0xff] }
 0x7d6   :  { %3638 = vmatprep.subr.mxu0 %v10648_v63  ;;  %3707 = vmatprep.subr.mxu1 %v10651_v3  ;;  %14077 = vst [vmem:[#allocation156_spill] sm:$0xff] %v10660_v42  ;;  %14078 = vst [vmem:[#allocation157_spill] sm:$0xff] %v10663_v31  ;;  %v10666_v63 = vld [vmem:[#allocation2 + $0x340] sm:$0xff]  ;;  %v10669_v3 = vld [vmem:[#allocation2 + $0x370] sm:$0xff] }
 0x7d7   :  { %3639 = vmatpush2.msra.mxu0 %v10654_v27  ;;  %3708 = vmatpush2.msra.mxu1 %v10657_v62  ;;  %14079 = vst [vmem:[#allocation158_spill] sm:$0xff] %v10666_v63  ;;  %14080 = vst [vmem:[#allocation159_spill] sm:$0xff] %v10669_v3  ;;  %v10672_v27 = vld [vmem:[#allocation2 + $0x328] sm:$0xff]  ;;  %v10675_v62 = vld [vmem:[#allocation2 + $0x358] sm:$0xff] }
 0x7d8   :  { %3640 = vmatprep.subr.mxu0 %v10660_v42  ;;  %3709 = vmatprep.subr.mxu1 %v10663_v31  ;;  %14081 = vst [vmem:[#allocation160_spill] sm:$0xff] %v10672_v27  ;;  %14082 = vst [vmem:[#allocation161_spill] sm:$0xff] %v10675_v62  ;;  %v10678_v42 = vld [vmem:[#allocation2 + $0x320] sm:$0xff]  ;;  %v10681_v31 = vld [vmem:[#allocation2 + $0x350] sm:$0xff] }
 0x7d9   :  { %3641 = vmatpush2.msra.mxu0 %v10666_v63  ;;  %3710 = vmatpush2.msra.mxu1 %v10669_v3  ;;  %14083 = vst [vmem:[#allocation162_spill] sm:$0xff] %v10678_v42  ;;  %14084 = vst [vmem:[#allocation163_spill] sm:$0xff] %v10681_v31  ;;  %v10684_v63 = vld [vmem:[#allocation2 + $0x308] sm:$0xff]  ;;  %v10687_v3 = vld [vmem:[#allocation2 + $0x338] sm:$0xff] }
 0x7da   :  { %3642 = vmatprep.subr.mxu0 %v10672_v27  ;;  %3711 = vmatprep.subr.mxu1 %v10675_v62  ;;  %14085 = vst [vmem:[#allocation164_spill] sm:$0xff] %v10684_v63  ;;  %14086 = vst [vmem:[#allocation165_spill] sm:$0xff] %v10687_v3  ;;  %v10690_v27 = vld [vmem:[#allocation2 + $0x300] sm:$0xff]  ;;  %v10693_v62 = vld [vmem:[#allocation2 + $0x330] sm:$0xff] }
 0x7db   :  { %3643 = vmatpush2.msra.mxu0 %v10678_v42  ;;  %3712 = vmatpush2.msra.mxu1 %v10681_v31  ;;  %14087 = vst [vmem:[#allocation166_spill] sm:$0xff] %v10690_v27  ;;  %14088 = vst [vmem:[#allocation167_spill] sm:$0xff] %v10693_v62  ;;  %v10696_v42 = vld [vmem:[#allocation2 + $0x2e8] sm:$0xff]  ;;  %v10699_v31 = vld [vmem:[#allocation2 + $0x318] sm:$0xff] }
 0x7dc   :  { %3644 = vmatprep.subr.mxu0 %v10684_v63  ;;  %3713 = vmatprep.subr.mxu1 %v10687_v3  ;;  %14089 = vst [vmem:[#allocation168_spill] sm:$0xff] %v10696_v42  ;;  %14090 = vst [vmem:[#allocation169_spill] sm:$0xff] %v10699_v31  ;;  %v10702_v63 = vld [vmem:[#allocation2 + $0x2e0] sm:$0xff]  ;;  %v10705_v3 = vld [vmem:[#allocation2 + $0x310] sm:$0xff] }
 0x7dd   :  { %3645 = vmatpush2.msra.mxu0 %v10690_v27  ;;  %3714 = vmatpush2.msra.mxu1 %v10693_v62  ;;  %14091 = vst [vmem:[#allocation170_spill] sm:$0xff] %v10702_v63  ;;  %14092 = vst [vmem:[#allocation171_spill] sm:$0xff] %v10705_v3  ;;  %v10708_v27 = vld [vmem:[#allocation2 + $0x2c8] sm:$0xff]  ;;  %v10711_v62 = vld [vmem:[#allocation2 + $0x2f8] sm:$0xff] }
 0x7de   :  { %3646 = vmatprep.subr.mxu0 %v10696_v42  ;;  %3715 = vmatprep.subr.mxu1 %v10699_v31  ;;  %14093 = vst [vmem:[#allocation172_spill] sm:$0xff] %v10708_v27  ;;  %14094 = vst [vmem:[#allocation173_spill] sm:$0xff] %v10711_v62  ;;  %v10714_v42 = vld [vmem:[#allocation2 + $0x2c0] sm:$0xff]  ;;  %v10717_v31 = vld [vmem:[#allocation2 + $0x2f0] sm:$0xff] }
 0x7df   :  { %3647 = vmatpush2.msra.mxu0 %v10702_v63  ;;  %3716 = vmatpush2.msra.mxu1 %v10705_v3  ;;  %14095 = vst [vmem:[#allocation174_spill] sm:$0xff] %v10714_v42  ;;  %14096 = vst [vmem:[#allocation175_spill] sm:$0xff] %v10717_v31  ;;  %v10720_v63 = vld [vmem:[#allocation2 + $0x2a8] sm:$0xff]  ;;  %v10723_v3 = vld [vmem:[#allocation2 + $0x2d8] sm:$0xff] }
 0x7e0   :  { %3648 = vmatprep.subr.mxu0 %v10708_v27  ;;  %3717 = vmatprep.subr.mxu1 %v10711_v62  ;;  %14097 = vst [vmem:[#allocation176_spill] sm:$0xff] %v10720_v63  ;;  %14098 = vst [vmem:[#allocation177_spill] sm:$0xff] %v10723_v3  ;;  %v10726_v27 = vld [vmem:[#allocation2 + $0x2a0] sm:$0xff]  ;;  %v10729_v62 = vld [vmem:[#allocation2 + $0x2d0] sm:$0xff] }
 0x7e1   :  { %3649 = vmatpush2.msra.mxu0 %v10714_v42  ;;  %3718 = vmatpush2.msra.mxu1 %v10717_v31  ;;  %14099 = vst [vmem:[#allocation178_spill] sm:$0xff] %v10726_v27  ;;  %14100 = vst [vmem:[#allocation179_spill] sm:$0xff] %v10729_v62  ;;  %v10732_v42 = vld [vmem:[#allocation2 + $0x288] sm:$0xff]  ;;  %v10735_v31 = vld [vmem:[#allocation2 + $0x2b8] sm:$0xff] }
 0x7e2   :  { %3650 = vmatprep.subr.mxu0 %v10720_v63  ;;  %3719 = vmatprep.subr.mxu1 %v10723_v3  ;;  %14101 = vst [vmem:[#allocation180_spill] sm:$0xff] %v10732_v42  ;;  %14102 = vst [vmem:[#allocation181_spill] sm:$0xff] %v10735_v31  ;;  %v10738_v63 = vld [vmem:[#allocation2 + $0x280] sm:$0xff]  ;;  %v10741_v3 = vld [vmem:[#allocation2 + $0x2b0] sm:$0xff] }
 0x7e3   :  { %3651 = vmatpush2.msra.mxu0 %v10726_v27  ;;  %3720 = vmatpush2.msra.mxu1 %v10729_v62  ;;  %14103 = vst [vmem:[#allocation182_spill] sm:$0xff] %v10738_v63  ;;  %14104 = vst [vmem:[#allocation183_spill] sm:$0xff] %v10741_v3  ;;  %v10744_v27 = vld [vmem:[#allocation2 + $0x268] sm:$0xff]  ;;  %v10747_v62 = vld [vmem:[#allocation2 + $0x298] sm:$0xff] }
 0x7e4   :  { %3652 = vmatprep.subr.mxu0 %v10732_v42  ;;  %3721 = vmatprep.subr.mxu1 %v10735_v31  ;;  %14105 = vst [vmem:[#allocation184_spill] sm:$0xff] %v10744_v27  ;;  %14106 = vst [vmem:[#allocation185_spill] sm:$0xff] %v10747_v62  ;;  %v10750_v42 = vld [vmem:[#allocation2 + $0x260] sm:$0xff]  ;;  %v10753_v31 = vld [vmem:[#allocation2 + $0x290] sm:$0xff] }
 0x7e5   :  { %3653 = vmatpush2.msra.mxu0 %v10738_v63  ;;  %3722 = vmatpush2.msra.mxu1 %v10741_v3  ;;  %14107 = vst [vmem:[#allocation186_spill] sm:$0xff] %v10750_v42  ;;  %14108 = vst [vmem:[#allocation187_spill] sm:$0xff] %v10753_v31  ;;  %v10756_v63 = vld [vmem:[#allocation2 + $0x248] sm:$0xff]  ;;  %v10759_v3 = vld [vmem:[#allocation2 + $0x278] sm:$0xff] }
 0x7e6   :  { %3654 = vmatprep.subr.mxu0 %v10744_v27  ;;  %3723 = vmatprep.subr.mxu1 %v10747_v62  ;;  %14109 = vst [vmem:[#allocation188_spill] sm:$0xff] %v10756_v63  ;;  %14110 = vst [vmem:[#allocation189_spill] sm:$0xff] %v10759_v3  ;;  %v10762_v27 = vld [vmem:[#allocation2 + $0x240] sm:$0xff]  ;;  %v10765_v62 = vld [vmem:[#allocation2 + $0x270] sm:$0xff] }
 0x7e7   :  { %3655 = vmatpush2.msra.mxu0 %v10750_v42  ;;  %3724 = vmatpush2.msra.mxu1 %v10753_v31  ;;  %14111 = vst [vmem:[#allocation190_spill] sm:$0xff] %v10762_v27  ;;  %14112 = vst [vmem:[#allocation191_spill] sm:$0xff] %v10765_v62  ;;  %v10768_v42 = vld [vmem:[#allocation2 + $0x228] sm:$0xff]  ;;  %v10771_v31 = vld [vmem:[#allocation2 + $0x258] sm:$0xff] }
 0x7e8   :  { %3656 = vmatprep.subr.mxu0 %v10756_v63  ;;  %3725 = vmatprep.subr.mxu1 %v10759_v3  ;;  %14113 = vst [vmem:[#allocation192_spill] sm:$0xff] %v10768_v42  ;;  %14114 = vst [vmem:[#allocation193_spill] sm:$0xff] %v10771_v31  ;;  %v10774_v63 = vld [vmem:[#allocation2 + $0x220] sm:$0xff]  ;;  %v10780_v3 = vld [vmem:[#allocation2 + $0x250] sm:$0xff] }
 0x7e9   :  { %3657 = vmatpush2.msra.mxu0 %v10762_v27  ;;  %3726 = vmatpush2.msra.mxu1 %v10765_v62  ;;  %14115 = vst [vmem:[#allocation194_spill] sm:$0xff] %v10774_v63  ;;  %v5642_v27 = vld [vmem:[%s11964_s0 + $0x14] sm:$0xf]  ;;  %14116 = vst [vmem:[#allocation195_spill] sm:$0xff] %v10780_v3  ;;  %v10783_v62 = vld [vmem:[#allocation2 + $0x208] sm:$0xff] }
 0x7ea   :  { %3658 = vmatprep.subr.mxu0 %v10768_v42  ;;  %3727 = vmatprep.subr.mxu1 %v10771_v31  ;;  %14117 = vst [vmem:[#allocation196_spill] sm:$0xff] %v10783_v62  ;;  %v10786_v42 = vld [vmem:[#allocation2 + $0x238] sm:$0xff]  ;;  %v10789_v31 = vld [vmem:[#allocation2 + $0x200] sm:$0xff]  ;;  %14121 = vst [vmem:[#allocation200_spill] sm:$0xff] %v10795_v33 }
 0x7eb   :  { %3659 = vmatpush2.msra.mxu0 %v10774_v63  ;;  %3728 = vmatpush2.msra.mxu1 %v10780_v3  ;;  %14118 = vst [vmem:[#allocation197_spill] sm:$0xff] %v10786_v42  ;;  %14119 = vst [vmem:[#allocation198_spill] sm:$0xff] %v10789_v31  ;;  %v10792_v63 = vld [vmem:[#allocation2 + $0x230] sm:$0xff] }
 0x7ec   :  { %3660 = vmatprep.subr.mxu0 %v10783_v62  ;;  %3729 = vmatprep.subr.mxu1 %v10786_v42  ;;  %14120 = vst [vmem:[#allocation199_spill] sm:$0xff] %v10792_v63  ;;  %v10798_v3 = vld [vmem:[#allocation2 + $0x210] sm:$0xff]  ;;  %v10801_v62 = vld [vmem:[#allocation7 + $0x1e8] sm:$0xff]  ;;  %v10804_v42 = vld [vmem:[#allocation7 + $0x1f8] sm:$0xff] }
 0x7ed   :  { %3661 = vmatpush2.msra.mxu0 %v10789_v31  ;;  %3730 = vmatpush2.msra.mxu1 %v10792_v63  ;;  %14122 = vst [vmem:[#allocation201_spill] sm:$0xff] %v10798_v3  ;;  %14123 = vst [vmem:[#allocation202_spill] sm:$0xff] %v10801_v62  ;;  %v10807_v31 = vld [vmem:[#allocation7 + $0x1e0] sm:$0xff]  ;;  %v10810_v63 = vld [vmem:[#allocation7 + $0x1f0] sm:$0xff] }
 0x7ee   :  { %3663 = vmatmul.mubr.f32.vlgmr.msra.gmra.mxu0 %v5642_v27  ;;  %3731 = vmatprep.subr.mxu1 %v10795_v33  ;;  %14124 = vst [vmem:[#allocation203_spill] sm:$0xff] %v10804_v42  ;;  %14125 = vst [vmem:[#allocation204_spill] sm:$0xff] %v10807_v31  ;;  %v10813_v33 = vld [vmem:[#allocation7 + $0x1c8] sm:$0xff] }
 0x7ef   :  { %3732 = vmatpush2.msra.mxu1 %v10798_v3  ;;  %3767 = vmatprep.subr.mxu0 %v10801_v62  ;;  %14126 = vst [vmem:[#allocation205_spill] sm:$0xff] %v10810_v63  ;;  %14127 = vst [vmem:[#allocation206_spill] sm:$0xff] %v10813_v33  ;;  %v10816_v3 = vld [vmem:[#allocation7 + $0x1d8] sm:$0xff] }
 0x7f0   :  { %3734 = vmatmul.mubr.f32.vlgmr.msra.gmra.mxu1 %v5642_v27  ;;  %3838 = vmatprep.subr.mxu1 %v10804_v42  ;;  %14128 = vst [vmem:[#allocation207_spill] sm:$0xff] %v10816_v3  ;;  %v10819_v27 = vld [vmem:[#allocation7 + $0x1c0] sm:$0xff]  ;;  %v10822_v42 = vld [vmem:[#allocation7 + $0x1d0] sm:$0xff] }
 0x7f1   :  { %3768 = vmatpush1.msra.mxu0 %v10807_v31  ;;  %3839 = vmatpush1.msra.mxu1 %v10810_v63  ;;  %14129 = vst [vmem:[#allocation208_spill] sm:$0xff] %v10819_v27  ;;  %14130 = vst [vmem:[#allocation209_spill] sm:$0xff] %v10822_v42  ;;  %v10825_v31 = vld [vmem:[#allocation7 + $0x1a8] sm:$0xff]  ;;  %v10828_v63 = vld [vmem:[#allocation7 + $0x1b8] sm:$0xff] }
 0x7f2   :  { %3769 = vmatprep.subr.mxu0 %v10813_v33  ;;  %3840 = vmatprep.subr.mxu1 %v10816_v3  ;;  %14131 = vst [vmem:[#allocation210_spill] sm:$0xff] %v10825_v31  ;;  %14132 = vst [vmem:[#allocation211_spill] sm:$0xff] %v10828_v63  ;;  %v10831_v33 = vld [vmem:[#allocation7 + $0x1a0] sm:$0xff]  ;;  %v10834_v3 = vld [vmem:[#allocation7 + $0x1b0] sm:$0xff] }
 0x7f3   :  { %3770 = vmatpush1.msra.mxu0 %v10819_v27  ;;  %3841 = vmatpush1.msra.mxu1 %v10822_v42  ;;  %14133 = vst [vmem:[#allocation212_spill] sm:$0xff] %v10831_v33  ;;  %14134 = vst [vmem:[#allocation213_spill] sm:$0xff] %v10834_v3  ;;  %v10837_v27 = vld [vmem:[#allocation7 + $0x188] sm:$0xff]  ;;  %v10840_v42 = vld [vmem:[#allocation7 + $0x198] sm:$0xff] }
 0x7f4   :  { %3771 = vmatprep.subr.mxu0 %v10825_v31  ;;  %3842 = vmatprep.subr.mxu1 %v10828_v63  ;;  %14135 = vst [vmem:[#allocation214_spill] sm:$0xff] %v10837_v27  ;;  %14136 = vst [vmem:[#allocation215_spill] sm:$0xff] %v10840_v42  ;;  %v10843_v31 = vld [vmem:[#allocation7 + $0x180] sm:$0xff]  ;;  %v10846_v63 = vld [vmem:[#allocation7 + $0x190] sm:$0xff] }
 0x7f5   :  { %3772 = vmatpush1.msra.mxu0 %v10831_v33  ;;  %3843 = vmatpush1.msra.mxu1 %v10834_v3  ;;  %14137 = vst [vmem:[#allocation216_spill] sm:$0xff] %v10843_v31  ;;  %14138 = vst [vmem:[#allocation217_spill] sm:$0xff] %v10846_v63  ;;  %v10849_v33 = vld [vmem:[#allocation7 + $0x168] sm:$0xff]  ;;  %v10852_v3 = vld [vmem:[#allocation7 + $0x178] sm:$0xff] }
 0x7f6   :  { %3773 = vmatprep.subr.mxu0 %v10837_v27  ;;  %3844 = vmatprep.subr.mxu1 %v10840_v42  ;;  %14139 = vst [vmem:[#allocation218_spill] sm:$0xff] %v10849_v33  ;;  %14140 = vst [vmem:[#allocation219_spill] sm:$0xff] %v10852_v3  ;;  %v10855_v27 = vld [vmem:[#allocation7 + $0x160] sm:$0xff]  ;;  %v10858_v42 = vld [vmem:[#allocation7 + $0x170] sm:$0xff] }
 0x7f7   :  { %3774 = vmatpush1.msra.mxu0 %v10843_v31  ;;  %3845 = vmatpush1.msra.mxu1 %v10846_v63  ;;  %14141 = vst [vmem:[#allocation220_spill] sm:$0xff] %v10855_v27  ;;  %14142 = vst [vmem:[#allocation221_spill] sm:$0xff] %v10858_v42  ;;  %v10861_v31 = vld [vmem:[#allocation7 + $0x148] sm:$0xff]  ;;  %v10864_v63 = vld [vmem:[#allocation7 + $0x158] sm:$0xff] }
 0x7f8   :  { %3775 = vmatprep.subr.mxu0 %v10849_v33  ;;  %3846 = vmatprep.subr.mxu1 %v10852_v3  ;;  %14143 = vst [vmem:[#allocation222_spill] sm:$0xff] %v10861_v31  ;;  %14144 = vst [vmem:[#allocation223_spill] sm:$0xff] %v10864_v63  ;;  %v10867_v33 = vld [vmem:[#allocation7 + $0x140] sm:$0xff]  ;;  %v10870_v3 = vld [vmem:[#allocation7 + $0x150] sm:$0xff] }
 0x7f9   :  { %3776 = vmatpush1.msra.mxu0 %v10855_v27  ;;  %3847 = vmatpush1.msra.mxu1 %v10858_v42  ;;  %14145 = vst [vmem:[#allocation224_spill] sm:$0xff] %v10867_v33  ;;  %14146 = vst [vmem:[#allocation225_spill] sm:$0xff] %v10870_v3  ;;  %v10873_v27 = vld [vmem:[#allocation7 + $0x128] sm:$0xff]  ;;  %v10876_v42 = vld [vmem:[#allocation7 + $0x138] sm:$0xff] }
 0x7fa   :  { %3777 = vmatprep.subr.mxu0 %v10861_v31  ;;  %3848 = vmatprep.subr.mxu1 %v10864_v63  ;;  %14147 = vst [vmem:[#allocation226_spill] sm:$0xff] %v10873_v27  ;;  %14148 = vst [vmem:[#allocation227_spill] sm:$0xff] %v10876_v42  ;;  %v10879_v31 = vld [vmem:[#allocation7 + $0x120] sm:$0xff]  ;;  %v10882_v63 = vld [vmem:[#allocation7 + $0x130] sm:$0xff] }
 0x7fb   :  { %3778 = vmatpush1.msra.mxu0 %v10867_v33  ;;  %3849 = vmatpush1.msra.mxu1 %v10870_v3  ;;  %14149 = vst [vmem:[#allocation228_spill] sm:$0xff] %v10879_v31  ;;  %14150 = vst [vmem:[#allocation229_spill] sm:$0xff] %v10882_v63  ;;  %v10885_v33 = vld [vmem:[#allocation7 + $0x108] sm:$0xff]  ;;  %v10888_v3 = vld [vmem:[#allocation7 + $0x118] sm:$0xff] }
 0x7fc   :  { %3779 = vmatprep.subr.mxu0 %v10873_v27  ;;  %3850 = vmatprep.subr.mxu1 %v10876_v42  ;;  %14151 = vst [vmem:[#allocation230_spill] sm:$0xff] %v10885_v33  ;;  %14152 = vst [vmem:[#allocation231_spill] sm:$0xff] %v10888_v3  ;;  %v10891_v27 = vld [vmem:[#allocation7 + $0x100] sm:$0xff]  ;;  %v10894_v42 = vld [vmem:[#allocation7 + $0x110] sm:$0xff] }
 0x7fd   :  { %3780 = vmatpush1.msra.mxu0 %v10879_v31  ;;  %3851 = vmatpush1.msra.mxu1 %v10882_v63  ;;  %14153 = vst [vmem:[#allocation232_spill] sm:$0xff] %v10891_v27  ;;  %14154 = vst [vmem:[#allocation233_spill] sm:$0xff] %v10894_v42  ;;  %v10897_v31 = vld [vmem:[#allocation7 + $0xe8] sm:$0xff]  ;;  %v10900_v63 = vld [vmem:[#allocation7 + $0xf8] sm:$0xff] }
 0x7fe   :  { %3781 = vmatprep.subr.mxu0 %v10885_v33  ;;  %3852 = vmatprep.subr.mxu1 %v10888_v3  ;;  %14155 = vst [vmem:[#allocation234_spill] sm:$0xff] %v10897_v31  ;;  %14156 = vst [vmem:[#allocation235_spill] sm:$0xff] %v10900_v63  ;;  %v10903_v33 = vld [vmem:[#allocation7 + $0xe0] sm:$0xff]  ;;  %v10906_v3 = vld [vmem:[#allocation7 + $0xf0] sm:$0xff] }
 0x7ff   :  { %3782 = vmatpush1.msra.mxu0 %v10891_v27  ;;  %3853 = vmatpush1.msra.mxu1 %v10894_v42  ;;  %14157 = vst [vmem:[#allocation236_spill] sm:$0xff] %v10903_v33  ;;  %14158 = vst [vmem:[#allocation237_spill] sm:$0xff] %v10906_v3  ;;  %v10909_v27 = vld [vmem:[#allocation7 + $0xc8] sm:$0xff]  ;;  %v10912_v42 = vld [vmem:[#allocation7 + $0xd8] sm:$0xff] }
 0x800   :  { %3783 = vmatprep.subr.mxu0 %v10897_v31  ;;  %3854 = vmatprep.subr.mxu1 %v10900_v63  ;;  %14159 = vst [vmem:[#allocation238_spill] sm:$0xff] %v10909_v27  ;;  %14160 = vst [vmem:[#allocation239_spill] sm:$0xff] %v10912_v42  ;;  %v10915_v31 = vld [vmem:[#allocation7 + $0xc0] sm:$0xff]  ;;  %v10918_v63 = vld [vmem:[#allocation7 + $0xd0] sm:$0xff] }
 0x801   :  { %3784 = vmatpush1.msra.mxu0 %v10903_v33  ;;  %3855 = vmatpush1.msra.mxu1 %v10906_v3  ;;  %14161 = vst [vmem:[#allocation240_spill] sm:$0xff] %v10915_v31  ;;  %14162 = vst [vmem:[#allocation241_spill] sm:$0xff] %v10918_v63  ;;  %v10921_v33 = vld [vmem:[#allocation7 + $0xa8] sm:$0xff]  ;;  %v10924_v3 = vld [vmem:[#allocation7 + $0xb8] sm:$0xff] }
 0x802   :  { %3785 = vmatprep.subr.mxu0 %v10909_v27  ;;  %3856 = vmatprep.subr.mxu1 %v10912_v42  ;;  %14163 = vst [vmem:[#allocation242_spill] sm:$0xff] %v10921_v33  ;;  %14164 = vst [vmem:[#allocation243_spill] sm:$0xff] %v10924_v3  ;;  %v10927_v27 = vld [vmem:[#allocation7 + $0xa0] sm:$0xff]  ;;  %v10930_v42 = vld [vmem:[#allocation7 + $0xb0] sm:$0xff] }
 0x803   :  { %3786 = vmatpush1.msra.mxu0 %v10915_v31  ;;  %3857 = vmatpush1.msra.mxu1 %v10918_v63  ;;  %14165 = vst [vmem:[#allocation244_spill] sm:$0xff] %v10927_v27  ;;  %14166 = vst [vmem:[#allocation245_spill] sm:$0xff] %v10930_v42  ;;  %v10933_v31 = vld [vmem:[#allocation7 + $0x88] sm:$0xff]  ;;  %v10936_v63 = vld [vmem:[#allocation7 + $0x98] sm:$0xff] }
 0x804   :  { %3787 = vmatprep.subr.mxu0 %v10921_v33  ;;  %3858 = vmatprep.subr.mxu1 %v10924_v3  ;;  %14167 = vst [vmem:[#allocation246_spill] sm:$0xff] %v10933_v31  ;;  %14168 = vst [vmem:[#allocation247_spill] sm:$0xff] %v10936_v63  ;;  %v10939_v33 = vld [vmem:[#allocation7 + $0x80] sm:$0xff]  ;;  %v10942_v3 = vld [vmem:[#allocation7 + $0x90] sm:$0xff] }
 0x805   :  { %3788 = vmatpush1.msra.mxu0 %v10927_v27  ;;  %3859 = vmatpush1.msra.mxu1 %v10930_v42  ;;  %14169 = vst [vmem:[#allocation248_spill] sm:$0xff] %v10939_v33  ;;  %14170 = vst [vmem:[#allocation249_spill] sm:$0xff] %v10942_v3  ;;  %v10945_v27 = vld [vmem:[#allocation7 + $0x68] sm:$0xff]  ;;  %v10948_v42 = vld [vmem:[#allocation7 + $0x78] sm:$0xff] }
 0x806   :  { %3789 = vmatprep.subr.mxu0 %v10933_v31  ;;  %3860 = vmatprep.subr.mxu1 %v10936_v63  ;;  %14171 = vst [vmem:[#allocation250_spill] sm:$0xff] %v10945_v27  ;;  %14172 = vst [vmem:[#allocation251_spill] sm:$0xff] %v10948_v42  ;;  %v10951_v31 = vld [vmem:[#allocation7 + $0x60] sm:$0xff]  ;;  %v10954_v63 = vld [vmem:[#allocation7 + $0x70] sm:$0xff] }
 0x807   :  { %3790 = vmatpush1.msra.mxu0 %v10939_v33  ;;  %3861 = vmatpush1.msra.mxu1 %v10942_v3  ;;  %14173 = vst [vmem:[#allocation252_spill] sm:$0xff] %v10951_v31  ;;  %14174 = vst [vmem:[#allocation253_spill] sm:$0xff] %v10954_v63  ;;  %v10957_v33 = vld [vmem:[#allocation7 + $0x48] sm:$0xff]  ;;  %v10960_v3 = vld [vmem:[#allocation7 + $0x58] sm:$0xff] }
 0x808   :  { %3791 = vmatprep.subr.mxu0 %v10945_v27  ;;  %3862 = vmatprep.subr.mxu1 %v10948_v42  ;;  %14175 = vst [vmem:[#allocation254_spill] sm:$0xff] %v10957_v33  ;;  %14176 = vst [vmem:[#allocation255_spill] sm:$0xff] %v10960_v3  ;;  %v10963_v27 = vld [vmem:[#allocation7 + $0x40] sm:$0xff]  ;;  %v10966_v42 = vld [vmem:[#allocation7 + $0x50] sm:$0xff] }
 0x809   :  { %3792 = vmatpush1.msra.mxu0 %v10951_v31  ;;  %3863 = vmatpush1.msra.mxu1 %v10954_v63  ;;  %14177 = vst [vmem:[#allocation256_spill] sm:$0xff] %v10963_v27  ;;  %14178 = vst [vmem:[#allocation257_spill] sm:$0xff] %v10966_v42  ;;  %v10969_v31 = vld [vmem:[#allocation7 + $0x28] sm:$0xff]  ;;  %v10972_v63 = vld [vmem:[#allocation7 + $0x38] sm:$0xff] }
 0x80a   :  { %3793 = vmatprep.subr.mxu0 %v10957_v33  ;;  %3864 = vmatprep.subr.mxu1 %v10960_v3  ;;  %14179 = vst [vmem:[#allocation258_spill] sm:$0xff] %v10969_v31  ;;  %14180 = vst [vmem:[#allocation259_spill] sm:$0xff] %v10972_v63  ;;  %v10975_v33 = vld [vmem:[#allocation7 + $0x20] sm:$0xff]  ;;  %v10978_v3 = vld [vmem:[#allocation7 + $0x30] sm:$0xff] }
 0x80b   :  { %3794 = vmatpush1.msra.mxu0 %v10963_v27  ;;  %3865 = vmatpush1.msra.mxu1 %v10966_v42  ;;  %14181 = vst [vmem:[#allocation260_spill] sm:$0xff] %v10975_v33  ;;  %14182 = vst [vmem:[#allocation261_spill] sm:$0xff] %v10978_v3  ;;  %v10981_v27 = vld [vmem:[#allocation7 + $0x8] sm:$0xff]  ;;  %v10984_v42 = vld [vmem:[#allocation7 + $0x18] sm:$0xff] }
 0x80c   :  { %3795 = vmatprep.subr.mxu0 %v10969_v31  ;;  %3866 = vmatprep.subr.mxu1 %v10972_v63  ;;  %14183 = vst [vmem:[#allocation262_spill] sm:$0xff] %v10981_v27  ;;  %14184 = vst [vmem:[#allocation15_spill] sm:$0xff] %v10984_v42  ;;  %v10987_v31 = vld [vmem:[#allocation7] sm:$0xff] }
 0x80d   :  { %3796 = vmatpush1.msra.mxu0 %v10975_v33  ;;  %3867 = vmatpush1.msra.mxu1 %v10978_v3  ;;  %14185 = vst [vmem:[#allocation263_spill] sm:$0xff] %v10987_v31  ;;  %v10993_v33 = vld [vmem:[#allocation5 + $0x1e8] sm:$0xff]  ;;  %v10996_v3 = vld [vmem:[#allocation5 + $0x1f8] sm:$0xff] }
 0x80e   :  { %3797 = vmatprep.subr.mxu0 %v10981_v27  ;;  %3868 = vmatprep.subr.mxu1 %v10984_v42  ;;  %14186 = vst [vmem:[#allocation264_spill] sm:$0xff] %v10993_v33  ;;  %14187 = vst [vmem:[#allocation265_spill] sm:$0xff] %v10996_v3 }
 0x80f   :  { %3798 = vmatpush1.msra.mxu0 %v10987_v31  ;;  %3869 = vmatpush1.msra.mxu1 %v10071_v17 }
 0x810   :  { %3831 = vmatprep.mubr.f32.mxu0 %v12905_v24  ;;  %3902 = vmatprep.mubr.f32.mxu1 %v12905_v24 }
 0x811   :  { %3909 = vmatprep.subr.mxu0 %v10993_v33  ;;  %3980 = vmatprep.subr.mxu1 %v10996_v3 }
 0x82a   :  { %v3204_v27 = vpop.f32.mrf.mxu0  ;;  %v3275_v42 = vpop.f32.mrf.mxu1 }
 0x82c   :  { %v3206_v63 = vpop.f32.mrf.mxu0  ;;  %v3277_v62 = vpop.f32.mrf.mxu1 }
 0x84b   :  { %v3346_v15 = vpop.f32.mrf.mxu0  ;;  %v3417_v31 = vpop.f32.mrf.mxu1 }
 0x84c   :  { %v3347_v32 = vadd.f32 %v3346_v15, %v3204_v27  ;;  %v3418_v17 = vadd.f32 %v3417_v31, %v3275_v42 }
 0x84d   :  { %v3348_v26 = vpop.f32.mrf.mxu0  ;;  %v3419_v30 = vpop.f32.mrf.mxu1 }
 0x84e   :  { %v3349_v28 = vadd.f32 %v3348_v26, %v3206_v63  ;;  %v3420_v34 = vadd.f32 %v3419_v30, %v3277_v62 }
 0x86d   :  { %v3488_v8 = vpop.f32.mrf.mxu0  ;;  %v3559_v60 = vpop.f32.mrf.mxu1 }
 0x86e   :  { %v3564_v56 = vadd.f32 %v3488_v8, %v3347_v32  ;;  %v3566_v33 = vadd.f32 %v3559_v60, %v3418_v17 }
 0x86f   :  { %v3490_v48 = vpop.f32.mrf.mxu0  ;;  %v3561_v29 = vpop.f32.mrf.mxu1 }
 0x870   :  { %v3568_v3 = vadd.f32 %v3564_v56, %v8283_v43  ;;  %v3565_v40 = vadd.f32 %v3490_v48, %v3349_v28  ;;  %v11000_v61 = vadd.f32 %v3561_v29, %v3420_v34  ;;  %v3570_v26 = vadd.f32 %v3566_v33, %v8297_v14 }
 0x872   :  { %v5639_v7 = vmul.f32 -1.442695, %v3568_v3  ;;  %v3569_v58 = vadd.f32 %v3565_v40, %v8288_v19 }
 0x874   :  { %5869 = vpow2.f32 %v5639_v7  ;;  %v5640_v31 = vmul.f32 -1.442695, %v3569_v58 }
 0x876   :  { %5871 = vpow2.f32 %v5640_v31 }
 0x877   :  { %5873 = vtanh.f32 %v3570_v26 }
 0x881   :  { %v5870_v30 = vpop.eup %5869 }
 0x882   :  { %v3575_v15 = vadd.f32 1.0, %v5870_v30 }
 0x883   :  { %v5872_v63 = vpop.eup %5871 }
 0x884   :  { %5875 = vrcp.f32 %v3575_v15  ;;  %v3581_v60 = vadd.f32 1.0, %v5872_v63  ;;  %v5874_v8 = vpop.eup %5873 }
 0x886   :  { %5877 = vrcp.f32 %v3581_v60 }
 0x891   :  { %v5876_v56 = vpop.eup %5875 }
 0x892   :  { %v3592_v48 = vmul.f32 %v5876_v56, %v5874_v8 }
 0x893   :  { %v5878_v29 = vpop.eup %5877 }
 0x894   :  { %v3591_v34 = vmul.f32 %v5878_v29, %v10084_v35 }
 0x896   :  { %v11005_v28 = vadd.f32 %v3592_v48, %v3591_v34 }
 0x8ae   :  { %v3664_v7 = vpop.f32.mrf.mxu0 }
 0x8af   :  { %v3665_v58 = vadd.f32 %v3664_v7, %v7384_v12 }
 0x8b0   :  { %v3666_v40 = vpop.f32.mrf.mxu0  ;;  %v3735_v42 = vpop.f32.mrf.mxu1 }
 0x8b1   :  { %v5643_v32 = vmul.f32 -1.442695, %v3665_v58  ;;  %v3667_v33 = vadd.f32 %v3666_v40, %v13373_v36  ;;  %v3736_v17 = vadd.f32 %v3735_v42, %v7400_v25  ;;  %v11021_v42 = vld [vmem:[#allocation5 + $0x1f0] sm:$0xff] }
 0x8b2   :  { %v3737_v3 = vpop.f32.mrf.mxu1 }
 0x8b3   :  { %5879 = vpow2.f32 %v5643_v32  ;;  %v5644_v62 = vmul.f32 -1.442695, %v3667_v33  ;;  %v3738_v27 = vadd.f32 %v3737_v3, %v7396_v23  ;;  %v11027_v3 = vld [vmem:[#allocation5 + $0x1d8] sm:$0xff] }
 0x8b5   :  { %5881 = vpow2.f32 %v5644_v62  ;;  %v5645_v31 = vmul.f32 -1.442695, %v3738_v27  ;;  %v11018_v62 = vld [vmem:[#allocation5 + $0x1e0] sm:$0xff] }
 0x8b6   :  { %5883 = vtanh.f32 %v3736_v17  ;;  %v11030_v27 = vld [vmem:[#allocation5 + $0x1c0] sm:$0xff]  ;;  %v11033_v17 = vld [vmem:[#allocation5 + $0x1d0] sm:$0xff] }
 0x8b7   :  { %5885 = vpow2.f32 %v5645_v31  ;;  %v11036_v31 = vld [vmem:[#allocation5 + $0x1a8] sm:$0xff] }
 0x8c0   :  { %v5880_v35 = vpop.eup %5879 }
 0x8c1   :  { %v3743_v26 = vadd.f32 1.0, %v5880_v35  ;;  %v11039_v35 = vld [vmem:[#allocation5 + $0x1b8] sm:$0xff] }
 0x8c2   :  { %v5882_v30 = vpop.eup %5881 }
 0x8c3   :  { %5887 = vrcp.f32 %v3743_v26  ;;  %v3749_v15 = vadd.f32 1.0, %v5882_v30  ;;  %v5884_v63 = vpop.eup %5883  ;;  %v11042_v26 = vld [vmem:[#allocation5 + $0x1a0] sm:$0xff]  ;;  %v11045_v30 = vld [vmem:[#allocation5 + $0x1b0] sm:$0xff] }
 0x8c4   :  { %v5886_v60 = vpop.eup %5885 }
 0x8c5   :  { %5889 = vrcp.f32 %v3749_v15  ;;  %v3756_v48 = vadd.f32 1.0, %v5886_v60  ;;  %v11048_v15 = vld [vmem:[#allocation5 + $0x188] sm:$0xff]  ;;  %v11054_v60 = vld [vmem:[#allocation5 + $0x180] sm:$0xff] }
 0x8c7   :  { %5891 = vrcp.f32 %v3756_v48  ;;  %v11063_v48 = vld [vmem:[#allocation5 + $0x178] sm:$0xff] }
 0x8c8   :  { %14188 = vst [vmem:[#allocation266_spill] sm:$0xff] %v11063_v48 }
 0x8d0   :  { %v5888_v8 = vpop.eup %5887 }
 0x8d1   :  { %v3760_v34 = vmul.f32 %v5888_v8, %v5884_v63  ;;  %v11051_v63 = vld [vmem:[#allocation5 + $0x198] sm:$0xff]  ;;  %v11057_v8 = vld [vmem:[#allocation5 + $0x190] sm:$0xff] }
 0x8d2   :  { %v5890_v56 = vpop.eup %5889 }
 0x8d3   :  { %v3759_v29 = vmul.f32 %v5890_v56, %v10091_v57  ;;  %v11024_v57 = vld [vmem:[#allocation5 + $0x1c8] sm:$0xff] }
 0x8d4   :  { %v5892_v58 = vpop.eup %5891  ;;  %v11060_v56 = vld [vmem:[#allocation5 + $0x168] sm:$0xff] }
 0x8d5   :  { %v11012_v7 = vadd.f32 %v3760_v34, %v3759_v29  ;;  %v11066_v29 = vld [vmem:[#allocation5 + $0x160] sm:$0xff]  ;;  %v11069_v34 = vld [vmem:[#allocation5 + $0x170] sm:$0xff] }
 0x8d6   :  { %14189 = vst [vmem:[#allocation267_spill] sm:$0xff] %v11066_v29  ;;  %14190 = vst [vmem:[#allocation268_spill] sm:$0xff] %v11069_v34 }
 0x8d7   :  { %5893 = vtanh.f32 %v11012_v7 }
 0x8e4   :  { %v5894_v40 = vpop.eup %5893 }
 0x8e5   :  { %v11015_v32 = vmul.f32 %v5894_v40, %v5892_v58  ;;  %v11072_v58 = vld [vmem:[#allocation5 + $0x148] sm:$0xff]  ;;  %v11075_v40 = vld [vmem:[#allocation5 + $0x158] sm:$0xff] }
 0x8e6   :  { %14191 = vst [vmem:[#allocation269_spill] sm:$0xff] %v11072_v58  ;;  %14192 = vst [vmem:[#allocation270_spill] sm:$0xff] %v11075_v40 }
 0x8e7   :  { %v3765_v33 = vrot.slane %v11015_v32, 2 }
 0x8e9   :  { %3832 = vmatmul.mubr.f32.vlgmr.msra.gmra.mxu0 %v3765_v33  ;;  %3903 = vmatmul.mubr.f32.vlgmr.msra.gmra.mxu1 %v3765_v33  ;;  %v11078_v33 = vld [vmem:[#allocation5 + $0x140] sm:$0xff] }
 0x8ea   :  { %3910 = vmatpush1.msra.mxu0 %v11018_v62  ;;  %3981 = vmatpush1.msra.mxu1 %v11021_v42  ;;  %14193 = vst [vmem:[#allocation271_spill] sm:$0xff] %v11078_v33 }
 0x8eb   :  { %3911 = vmatprep.subr.mxu0 %v11024_v57  ;;  %3982 = vmatprep.subr.mxu1 %v11027_v3 }
 0x8ec   :  { %3912 = vmatpush1.msra.mxu0 %v11030_v27  ;;  %3983 = vmatpush1.msra.mxu1 %v11033_v17 }
 0x8ed   :  { %3913 = vmatprep.subr.mxu0 %v11036_v31  ;;  %3984 = vmatprep.subr.mxu1 %v11039_v35 }
 0x8ee   :  { %3914 = vmatpush1.msra.mxu0 %v11042_v26  ;;  %3985 = vmatpush1.msra.mxu1 %v11045_v30 }
 0x8ef   :  { %3915 = vmatprep.subr.mxu0 %v11048_v15  ;;  %3986 = vmatprep.subr.mxu1 %v11051_v63 }
 0x8f0   :  { %3916 = vmatpush1.msra.mxu0 %v11054_v60  ;;  %3987 = vmatpush1.msra.mxu1 %v11057_v8 }
 0x8f1   :  { %3917 = vmatprep.subr.mxu0 %v11060_v56  ;;  %3988 = vmatprep.subr.mxu1 %v11063_v48  ;;  %v11081_v48 = vld [vmem:[#allocation5 + $0x150] sm:$0xff] }
 0x8f2   :  { %3918 = vmatpush1.msra.mxu0 %v11066_v29  ;;  %3989 = vmatpush1.msra.mxu1 %v11069_v34  ;;  %14194 = vst [vmem:[#allocation272_spill] sm:$0xff] %v11081_v48  ;;  %v11084_v29 = vld [vmem:[#allocation5 + $0x128] sm:$0xff]  ;;  %v11087_v34 = vld [vmem:[#allocation5 + $0x138] sm:$0xff] }
 0x8f3   :  { %3919 = vmatprep.subr.mxu0 %v11072_v58  ;;  %3990 = vmatprep.subr.mxu1 %v11075_v40  ;;  %14195 = vst [vmem:[#allocation273_spill] sm:$0xff] %v11084_v29  ;;  %14196 = vst [vmem:[#allocation274_spill] sm:$0xff] %v11087_v34  ;;  %v11090_v58 = vld [vmem:[#allocation5 + $0x120] sm:$0xff]  ;;  %v11093_v40 = vld [vmem:[#allocation5 + $0x130] sm:$0xff] }
 0x8f4   :  { %3920 = vmatpush1.msra.mxu0 %v11078_v33  ;;  %3991 = vmatpush1.msra.mxu1 %v11081_v48  ;;  %14197 = vst [vmem:[#allocation275_spill] sm:$0xff] %v11090_v58  ;;  %14198 = vst [vmem:[#allocation276_spill] sm:$0xff] %v11093_v40  ;;  %v11096_v33 = vld [vmem:[#allocation5 + $0x108] sm:$0xff]  ;;  %v11099_v48 = vld [vmem:[#allocation5 + $0x118] sm:$0xff] }
 0x8f5   :  { %3921 = vmatprep.subr.mxu0 %v11084_v29  ;;  %3992 = vmatprep.subr.mxu1 %v11087_v34  ;;  %14199 = vst [vmem:[#allocation277_spill] sm:$0xff] %v11096_v33  ;;  %14200 = vst [vmem:[#allocation278_spill] sm:$0xff] %v11099_v48  ;;  %v11102_v29 = vld [vmem:[#allocation5 + $0x100] sm:$0xff]  ;;  %v11105_v34 = vld [vmem:[#allocation5 + $0x110] sm:$0xff] }
 0x8f6   :  { %3922 = vmatpush1.msra.mxu0 %v11090_v58  ;;  %3993 = vmatpush1.msra.mxu1 %v11093_v40  ;;  %14201 = vst [vmem:[#allocation279_spill] sm:$0xff] %v11102_v29  ;;  %14202 = vst [vmem:[#allocation280_spill] sm:$0xff] %v11105_v34  ;;  %v11108_v58 = vld [vmem:[#allocation5 + $0xe8] sm:$0xff]  ;;  %v11111_v40 = vld [vmem:[#allocation5 + $0xf8] sm:$0xff] }
 0x8f7   :  { %3923 = vmatprep.subr.mxu0 %v11096_v33  ;;  %3994 = vmatprep.subr.mxu1 %v11099_v48  ;;  %v11114_v33 = vld [vmem:[#allocation5 + $0xe0] sm:$0xff]  ;;  %v11117_v48 = vld [vmem:[#allocation5 + $0xf0] sm:$0xff] }
 0x8f8   :  { %3924 = vmatpush1.msra.mxu0 %v11102_v29  ;;  %3995 = vmatpush1.msra.mxu1 %v11105_v34  ;;  %v11120_v29 = vld [vmem:[#allocation5 + $0xc8] sm:$0xff]  ;;  %v11123_v34 = vld [vmem:[#allocation5 + $0xd8] sm:$0xff] }
 0x8f9   :  { %3925 = vmatprep.subr.mxu0 %v11108_v58  ;;  %3996 = vmatprep.subr.mxu1 %v11111_v40  ;;  %14203 = vst [vmem:[#allocation281_spill] sm:$0xff] %v11120_v29 }
 0x8fa   :  { %3926 = vmatpush1.msra.mxu0 %v11114_v33  ;;  %3997 = vmatpush1.msra.mxu1 %v11117_v48 }
 0x8fb   :  { %3927 = vmatprep.subr.mxu0 %v11120_v29  ;;  %3998 = vmatprep.subr.mxu1 %v11123_v34  ;;  %v3571_v29 = vadd.f32 %v11000_v61, %v8424_v9  ;;  %v14231_v61 = vld [vmem:[#allocation41_spill] sm:$0xff] }
 0x8fc   :  { %3928 = vmatpush1.msra.mxu0 %v10133_v22  ;;  %3999 = vmatpush1.msra.mxu1 %v10136_v18  ;;  %v14204_v18 = vld [vmem:[#allocation284_spill] sm:$0xff] }
 0x8fd   :  { %3929 = vmatprep.subr.mxu0 %v10139_v21  ;;  %4000 = vmatprep.subr.mxu1 %v10142_v13  ;;  %v5641_v22 = vmul.f32 -1.442695, %v3571_v29  ;;  %v14205_v21 = vld [vmem:[#allocation285_spill] sm:$0xff]  ;;  %v14206_v13 = vld [vmem:[#allocation16_spill] sm:$0xff]  ;;  %v14232_v29 = vld [vmem:[#allocation42_spill] sm:$0xff] }
 0x8fe   :  { %3930 = vmatpush1.msra.mxu0 %v10145_v0  ;;  %4001 = vmatpush1.msra.mxu1 %v10148_v1  ;;  %v14207_v0 = vld [vmem:[#allocation17_spill] sm:$0xff]  ;;  %v14208_v1 = vld [vmem:[#allocation18_spill] sm:$0xff] }
 0x8ff   :  { %3931 = vmatprep.subr.mxu0 %v10151_v20  ;;  %4002 = vmatprep.subr.mxu1 %v10154_v39  ;;  %5895 = vpow2.f32 %v5641_v22  ;;  %v14209_v20 = vld [vmem:[#allocation19_spill] sm:$0xff]  ;;  %v14210_v39 = vld [vmem:[#allocation20_spill] sm:$0xff] }
 0x900   :  { %3932 = vmatpush1.msra.mxu0 %v10159_v37  ;;  %4003 = vmatpush1.msra.mxu1 %v10162_v38  ;;  %v14211_v37 = vld [vmem:[#allocation21_spill] sm:$0xff]  ;;  %v14212_v38 = vld [vmem:[#allocation22_spill] sm:$0xff]  ;;  %5897 = vtanh.f32 %v11005_v28  ;;  %v14233_v22 = vld [vmem:[#allocation43_spill] sm:$0xff] }
 0x901   :  { %3933 = vmatprep.subr.mxu0 %v10165_v10  ;;  %4004 = vmatprep.subr.mxu1 %v10168_v6  ;;  %v14213_v10 = vld [vmem:[#allocation23_spill] sm:$0xff]  ;;  %v14214_v6 = vld [vmem:[#allocation24_spill] sm:$0xff] }
 0x902   :  { %3934 = vmatpush1.msra.mxu0 %v10171_v4  ;;  %4005 = vmatpush1.msra.mxu1 %v10174_v51  ;;  %v14215_v4 = vld [vmem:[#allocation25_spill] sm:$0xff]  ;;  %v14216_v51 = vld [vmem:[#allocation26_spill] sm:$0xff] }
 0x903   :  { %3935 = vmatprep.subr.mxu0 %v10177_v16  ;;  %4006 = vmatprep.subr.mxu1 %v10180_v41  ;;  %v14217_v16 = vld [vmem:[#allocation27_spill] sm:$0xff]  ;;  %v14218_v41 = vld [vmem:[#allocation28_spill] sm:$0xff] }
 0x904   :  { %3936 = vmatpush1.msra.mxu0 %v10183_v44  ;;  %4007 = vmatpush1.msra.mxu1 %v10186_v45  ;;  %v14219_v44 = vld [vmem:[#allocation29_spill] sm:$0xff] }
 0x905   :  { %3937 = vmatprep.subr.mxu0 %v10189_v5  ;;  %4008 = vmatprep.subr.mxu1 %v10192_v2  ;;  %v14220_v5 = vld [vmem:[#allocation30_spill] sm:$0xff]  ;;  %v14221_v2 = vld [vmem:[#allocation31_spill] sm:$0xff] }
 0x906   :  { %3938 = vmatpush1.msra.mxu0 %v10195_v59  ;;  %4009 = vmatpush1.msra.mxu1 %v10198_v11  ;;  %v14222_v59 = vld [vmem:[#allocation32_spill] sm:$0xff]  ;;  %v14223_v11 = vld [vmem:[#allocation33_spill] sm:$0xff] }
 0x907   :  { %3939 = vmatprep.subr.mxu0 %v10201_v46  ;;  %4010 = vmatprep.subr.mxu1 %v10204_v47  ;;  %v14224_v46 = vld [vmem:[#allocation34_spill] sm:$0xff]  ;;  %v14225_v47 = vld [vmem:[#allocation35_spill] sm:$0xff] }
 0x908   :  { %3940 = vmatpush1.msra.mxu0 %v10207_v49  ;;  %3973 = vmatprep.mubr.f32.mxu0 %v12905_v24 }
 0x909   :  { %4011 = vmatpush1.msra.mxu1 %v10211_v50  ;;  %4044 = vmatprep.mubr.f32.mxu1 %v12905_v24  ;;  %v14226_v50 = vld [vmem:[#allocation36_spill] sm:$0xff] }
 0x90a   :  { %3974 = vmatmul.mubr.f32.vlgmr.msra.gmra.mxu0 %v11015_v32  ;;  %4045 = vmatmul.mubr.f32.vlgmr.msra.gmra.mxu1 %v11015_v32 }
 0x90b   :  { %4051 = vmatprep.subr.mxu0 %v10217_v52  ;;  %4122 = vmatprep.subr.mxu1 %v10220_v53  ;;  %v14227_v52 = vld [vmem:[#allocation37_spill] sm:$0xff]  ;;  %v14228_v53 = vld [vmem:[#allocation38_spill] sm:$0xff] }
 0x90c   :  { %4052 = vmatpush1.msra.mxu0 %v10223_v54  ;;  %4123 = vmatpush1.msra.mxu1 %v10226_v55  ;;  %v5896_v45 = vpop.eup %5895  ;;  %v14229_v54 = vld [vmem:[#allocation39_spill] sm:$0xff]  ;;  %v14230_v55 = vld [vmem:[#allocation40_spill] sm:$0xff] }
 0x90d   :  { %4053 = vmatprep.subr.mxu0 %v14204_v18  ;;  %4124 = vmatprep.subr.mxu1 %v14205_v21  ;;  %v3588_v49 = vadd.f32 1.0, %v5896_v45  ;;  %v14234_v18 = vld [vmem:[#allocation44_spill] sm:$0xff]  ;;  %v14235_v21 = vld [vmem:[#allocation45_spill] sm:$0xff] }
 0x90e   :  { %4054 = vmatpush1.msra.mxu0 %v14206_v13  ;;  %4125 = vmatpush1.msra.mxu1 %v14207_v0  ;;  %v14236_v13 = vld [vmem:[#allocation46_spill] sm:$0xff]  ;;  %v14237_v0 = vld [vmem:[#allocation47_spill] sm:$0xff]  ;;  %v14250_v45 = vld [vmem:[#allocation60_spill] sm:$0xff] }
 0x90f   :  { %4055 = vmatprep.subr.mxu0 %v14208_v1  ;;  %4126 = vmatprep.subr.mxu1 %v14209_v20  ;;  %5899 = vrcp.f32 %v3588_v49  ;;  %v14238_v1 = vld [vmem:[#allocation48_spill] sm:$0xff]  ;;  %v14239_v20 = vld [vmem:[#allocation49_spill] sm:$0xff]  ;;  %v14256_v49 = vld [vmem:[#allocation66_spill] sm:$0xff] }
 0x910   :  { %4056 = vmatpush1.msra.mxu0 %v14210_v39  ;;  %4127 = vmatpush1.msra.mxu1 %v14211_v37  ;;  %v14240_v39 = vld [vmem:[#allocation50_spill] sm:$0xff]  ;;  %v14241_v37 = vld [vmem:[#allocation51_spill] sm:$0xff] }
 0x911   :  { %4057 = vmatprep.subr.mxu0 %v14212_v38  ;;  %4128 = vmatprep.subr.mxu1 %v14213_v10  ;;  %v14242_v38 = vld [vmem:[#allocation52_spill] sm:$0xff]  ;;  %v14243_v10 = vld [vmem:[#allocation53_spill] sm:$0xff] }
 0x912   :  { %4058 = vmatpush1.msra.mxu0 %v14214_v6  ;;  %4129 = vmatpush1.msra.mxu1 %v14215_v4  ;;  %v14244_v6 = vld [vmem:[#allocation54_spill] sm:$0xff]  ;;  %v14245_v4 = vld [vmem:[#allocation55_spill] sm:$0xff] }
 0x913   :  { %4059 = vmatprep.subr.mxu0 %v14216_v51  ;;  %4130 = vmatprep.subr.mxu1 %v14217_v16  ;;  %v14246_v51 = vld [vmem:[#allocation56_spill] sm:$0xff]  ;;  %v14247_v16 = vld [vmem:[#allocation57_spill] sm:$0xff] }
 0x914   :  { %4060 = vmatpush1.msra.mxu0 %v14218_v41  ;;  %4131 = vmatpush1.msra.mxu1 %v14219_v44  ;;  %v14248_v41 = vld [vmem:[#allocation58_spill] sm:$0xff]  ;;  %v14249_v44 = vld [vmem:[#allocation59_spill] sm:$0xff] }
 0x915   :  { %4061 = vmatprep.subr.mxu0 %v14220_v5  ;;  %4132 = vmatprep.subr.mxu1 %v14221_v2  ;;  %v14251_v5 = vld [vmem:[#allocation61_spill] sm:$0xff]  ;;  %v14252_v2 = vld [vmem:[#allocation62_spill] sm:$0xff] }
 0x916   :  { %4062 = vmatpush1.msra.mxu0 %v14222_v59  ;;  %4133 = vmatpush1.msra.mxu1 %v14223_v11  ;;  %v14253_v59 = vld [vmem:[#allocation63_spill] sm:$0xff]  ;;  %v14254_v11 = vld [vmem:[#allocation64_spill] sm:$0xff] }
 0x917   :  { %4063 = vmatprep.subr.mxu0 %v14224_v46  ;;  %4134 = vmatprep.subr.mxu1 %v14225_v47  ;;  %v14255_v46 = vld [vmem:[#allocation65_spill] sm:$0xff]  ;;  %v5898_v47 = vpop.eup %5897 }
 0x918   :  { %4064 = vmatpush1.msra.mxu0 %v14226_v50  ;;  %4135 = vmatpush1.msra.mxu1 %v14227_v52  ;;  %v14257_v50 = vld [vmem:[#allocation67_spill] sm:$0xff]  ;;  %v14258_v52 = vld [vmem:[#allocation68_spill] sm:$0xff] }
 0x919   :  { %4065 = vmatprep.subr.mxu0 %v14228_v53  ;;  %4136 = vmatprep.subr.mxu1 %v14229_v54  ;;  %v14259_v53 = vld [vmem:[#allocation69_spill] sm:$0xff] }
 0x91a   :  { %4066 = vmatpush1.msra.mxu0 %v14230_v55  ;;  %4137 = vmatpush1.msra.mxu1 %v14231_v61  ;;  %v14260_v55 = vld [vmem:[#allocation70_spill] sm:$0xff]  ;;  %v14261_v61 = vld [vmem:[#allocation71_spill] sm:$0xff] }
 0x91b   :  { %4067 = vmatprep.subr.mxu0 %v14232_v29  ;;  %4138 = vmatprep.subr.mxu1 %v14233_v22  ;;  %v14262_v29 = vld [vmem:[#allocation72_spill] sm:$0xff] }
 0x91c   :  { %4068 = vmatpush1.msra.mxu0 %v14234_v18  ;;  %4139 = vmatpush1.msra.mxu1 %v14235_v21  ;;  %v5900_v54 = vpop.eup %5899  ;;  %v14263_v18 = vld [vmem:[#allocation73_spill] sm:$0xff]  ;;  %v14264_v21 = vld [vmem:[#allocation74_spill] sm:$0xff] }
 0x91d   :  { %4069 = vmatprep.subr.mxu0 %v14236_v13  ;;  %4140 = vmatprep.subr.mxu1 %v14237_v0  ;;  %v3595_v22 = vmul.f32 %v5900_v54, %v5898_v47  ;;  %v14265_v13 = vld [vmem:[#allocation75_spill] sm:$0xff]  ;;  %v14266_v0 = vld [vmem:[#allocation76_spill] sm:$0xff]  ;;  %v14291_v54 = vld [vmem:[#allocation101_spill] sm:$0xff] }
 0x91e   :  { %4070 = vmatpush1.msra.mxu0 %v14238_v1  ;;  %4141 = vmatpush1.msra.mxu1 %v14239_v20  ;;  %v14267_v1 = vld [vmem:[#allocation77_spill] sm:$0xff]  ;;  %v14268_v20 = vld [vmem:[#allocation78_spill] sm:$0xff]  ;;  %v14286_v47 = vld [vmem:[#allocation96_spill] sm:$0xff] }
 0x91f   :  { %4071 = vmatprep.subr.mxu0 %v14240_v39  ;;  %4142 = vmatprep.subr.mxu1 %v14241_v37  ;;  %v14269_v39 = vld [vmem:[#allocation79_spill] sm:$0xff]  ;;  %v14270_v37 = vld [vmem:[#allocation80_spill] sm:$0xff] }
 0x920   :  { %4072 = vmatpush1.msra.mxu0 %v14242_v38  ;;  %4143 = vmatpush1.msra.mxu1 %v14243_v10  ;;  %v14271_v38 = vld [vmem:[#allocation81_spill] sm:$0xff]  ;;  %v14272_v10 = vld [vmem:[#allocation82_spill] sm:$0xff] }
 0x921   :  { %4073 = vmatprep.subr.mxu0 %v14244_v6  ;;  %4144 = vmatprep.subr.mxu1 %v14245_v4  ;;  %v14273_v6 = vld [vmem:[#allocation83_spill] sm:$0xff]  ;;  %v14274_v4 = vld [vmem:[#allocation84_spill] sm:$0xff] }
 0x922   :  { %4074 = vmatpush1.msra.mxu0 %v14246_v51  ;;  %4145 = vmatpush1.msra.mxu1 %v14247_v16  ;;  %v14275_v51 = vld [vmem:[#allocation85_spill] sm:$0xff]  ;;  %v14277_v16 = vld [vmem:[#allocation87_spill] sm:$0xff] }
 0x923   :  { %4075 = vmatprep.subr.mxu0 %v14248_v41  ;;  %4146 = vmatprep.subr.mxu1 %v14249_v44  ;;  %v14278_v41 = vld [vmem:[#allocation88_spill] sm:$0xff]  ;;  %v14279_v44 = vld [vmem:[#allocation89_spill] sm:$0xff] }
 0x924   :  { %4076 = vmatpush1.msra.mxu0 %v14250_v45  ;;  %4147 = vmatpush1.msra.mxu1 %v14251_v5  ;;  %v14280_v45 = vld [vmem:[#allocation90_spill] sm:$0xff]  ;;  %v14281_v5 = vld [vmem:[#allocation91_spill] sm:$0xff] }
 0x925   :  { %4077 = vmatprep.subr.mxu0 %v14252_v2  ;;  %4148 = vmatprep.subr.mxu1 %v14253_v59  ;;  %v14282_v2 = vld [vmem:[#allocation92_spill] sm:$0xff]  ;;  %v14283_v59 = vld [vmem:[#allocation93_spill] sm:$0xff] }
 0x926   :  { %4078 = vmatpush1.msra.mxu0 %v14254_v11  ;;  %4149 = vmatpush1.msra.mxu1 %v14255_v46  ;;  %v14284_v11 = vld [vmem:[#allocation94_spill] sm:$0xff]  ;;  %v14285_v46 = vld [vmem:[#allocation95_spill] sm:$0xff] }
 0x927   :  { %4079 = vmatprep.subr.mxu0 %v14256_v49  ;;  %4150 = vmatprep.subr.mxu1 %v14257_v50  ;;  %v14287_v49 = vld [vmem:[#allocation97_spill] sm:$0xff]  ;;  %v14288_v50 = vld [vmem:[#allocation98_spill] sm:$0xff] }
 0x928   :  { %4080 = vmatpush1.msra.mxu0 %v14258_v52  ;;  %4151 = vmatpush1.msra.mxu1 %v14259_v53  ;;  %v14289_v52 = vld [vmem:[#allocation99_spill] sm:$0xff]  ;;  %v14290_v53 = vld [vmem:[#allocation100_spill] sm:$0xff] }
 0x929   :  { %4081 = vmatprep.subr.mxu0 %v14260_v55  ;;  %4152 = vmatprep.subr.mxu1 %v14261_v61  ;;  %v14292_v55 = vld [vmem:[#allocation102_spill] sm:$0xff]  ;;  %v14293_v61 = vld [vmem:[#allocation103_spill] sm:$0xff] }
 0x92a   :  { %4082 = vmatpush1.msra.mxu0 %v14262_v29  ;;  %4115 = vmatprep.mubr.f32.mxu0 %v12905_v24  ;;  %v14294_v29 = vld [vmem:[#allocation104_spill] sm:$0xff] }
 0x92b   :  { %4153 = vmatpush1.msra.mxu1 %v14263_v18  ;;  %4186 = vmatprep.mubr.f32.mxu1 %v12905_v24  ;;  %v14296_v18 = vld [vmem:[#allocation106_spill] sm:$0xff] }
 0x92c   :  { %4116 = vmatmul.mubr.f32.vlgmr.msra.gmra.mxu0 %v3595_v22  ;;  %4187 = vmatmul.mubr.f32.vlgmr.msra.gmra.mxu1 %v3595_v22  ;;  %v14295_v22 = vld [vmem:[#allocation105_spill] sm:$0xff] }
 0x92d   :  { %4227 = vmatprep.subr.mxu0 %v14264_v21  ;;  %4291 = vmatprep.mubr.f32.mxu0 %v11015_v32  ;;  %v14297_v21 = vld [vmem:[#allocation107_spill] sm:$0xff] }
 0x92e   :  { %4228 = vmatpush1.msra.mxu0 %v14265_v13  ;;  %4362 = vmatprep.mubr.f32.mxu1 %v11015_v32  ;;  %v14276_v32 = vld [vmem:[#allocation86_spill] sm:$0xff]  ;;  %v14298_v13 = vld [vmem:[#allocation108_spill] sm:$0xff] }
 0x92f   :  { %4229 = vmatprep.subr.mxu0 %v14266_v0  ;;  %4298 = vmatprep.subr.mxu1 %v14267_v1  ;;  %v14299_v0 = vld [vmem:[#allocation109_spill] sm:$0xff]  ;;  %v14300_v1 = vld [vmem:[#allocation110_spill] sm:$0xff] }
 0x930   :  { %4230 = vmatpush1.msra.mxu0 %v14268_v20  ;;  %4299 = vmatpush1.msra.mxu1 %v14269_v39  ;;  %v14301_v20 = vld [vmem:[#allocation111_spill] sm:$0xff]  ;;  %v14302_v39 = vld [vmem:[#allocation112_spill] sm:$0xff] }
 0x931   :  { %4231 = vmatprep.subr.mxu0 %v14270_v37  ;;  %4300 = vmatprep.subr.mxu1 %v14271_v38  ;;  %v14303_v37 = vld [vmem:[#allocation113_spill] sm:$0xff]  ;;  %v14304_v38 = vld [vmem:[#allocation114_spill] sm:$0xff] }
 0x932   :  { %4232 = vmatpush1.msra.mxu0 %v14272_v10  ;;  %4301 = vmatpush1.msra.mxu1 %v14273_v6  ;;  %v14305_v10 = vld [vmem:[#allocation115_spill] sm:$0xff]  ;;  %v14306_v6 = vld [vmem:[#allocation116_spill] sm:$0xff] }
 0x933   :  { %4233 = vmatprep.subr.mxu0 %v14274_v4  ;;  %4302 = vmatprep.subr.mxu1 %v14275_v51  ;;  %v14307_v4 = vld [vmem:[#allocation117_spill] sm:$0xff]  ;;  %v14308_v51 = vld [vmem:[#allocation118_spill] sm:$0xff] }
 0x934   :  { %4234 = vmatpush1.msra.mxu0 %v14276_v32  ;;  %4303 = vmatpush1.msra.mxu1 %v14277_v16  ;;  %v14309_v32 = vld [vmem:[#allocation119_spill] sm:$0xff]  ;;  %v14310_v16 = vld [vmem:[#allocation120_spill] sm:$0xff] }
 0x935   :  { %4235 = vmatprep.subr.mxu0 %v14278_v41  ;;  %4304 = vmatprep.subr.mxu1 %v14279_v44  ;;  %v14311_v41 = vld [vmem:[#allocation121_spill] sm:$0xff]  ;;  %v14312_v44 = vld [vmem:[#allocation122_spill] sm:$0xff] }
 0x936   :  { %4236 = vmatpush1.msra.mxu0 %v14280_v45  ;;  %4305 = vmatpush1.msra.mxu1 %v14281_v5  ;;  %v14313_v45 = vld [vmem:[#allocation123_spill] sm:$0xff]  ;;  %v14314_v5 = vld [vmem:[#allocation124_spill] sm:$0xff] }
 0x937   :  { %4237 = vmatprep.subr.mxu0 %v14282_v2  ;;  %4306 = vmatprep.subr.mxu1 %v14283_v59  ;;  %v14315_v2 = vld [vmem:[#allocation125_spill] sm:$0xff]  ;;  %v14316_v59 = vld [vmem:[#allocation126_spill] sm:$0xff] }
 0x938   :  { %4238 = vmatpush1.msra.mxu0 %v14284_v11  ;;  %4307 = vmatpush1.msra.mxu1 %v14285_v46  ;;  %v14317_v11 = vld [vmem:[#allocation127_spill] sm:$0xff]  ;;  %v14318_v46 = vld [vmem:[#allocation128_spill] sm:$0xff] }
 0x939   :  { %4239 = vmatprep.subr.mxu0 %v14286_v47  ;;  %4308 = vmatprep.subr.mxu1 %v14287_v49  ;;  %v14319_v47 = vld [vmem:[#allocation129_spill] sm:$0xff]  ;;  %v14320_v49 = vld [vmem:[#allocation130_spill] sm:$0xff] }
 0x93a   :  { %4240 = vmatpush1.msra.mxu0 %v14288_v50  ;;  %4309 = vmatpush1.msra.mxu1 %v14289_v52  ;;  %v14321_v50 = vld [vmem:[#allocation131_spill] sm:$0xff]  ;;  %v14322_v52 = vld [vmem:[#allocation132_spill] sm:$0xff] }
 0x93b   :  { %4241 = vmatprep.subr.mxu0 %v14290_v53  ;;  %4310 = vmatprep.subr.mxu1 %v14291_v54  ;;  %v14323_v53 = vld [vmem:[#allocation133_spill] sm:$0xff]  ;;  %v14324_v54 = vld [vmem:[#allocation134_spill] sm:$0xff] }
 0x93c   :  { %4242 = vmatpush1.msra.mxu0 %v14292_v55  ;;  %4311 = vmatpush1.msra.mxu1 %v14293_v61  ;;  %v14325_v55 = vld [vmem:[#allocation135_spill] sm:$0xff]  ;;  %v14326_v61 = vld [vmem:[#allocation136_spill] sm:$0xff] }
 0x93d   :  { %4243 = vmatprep.subr.mxu0 %v14294_v29  ;;  %4312 = vmatprep.subr.mxu1 %v14295_v22  ;;  %v14327_v29 = vld [vmem:[#allocation137_spill] sm:$0xff]  ;;  %v14328_v22 = vld [vmem:[#allocation138_spill] sm:$0xff] }
 0x93e   :  { %4244 = vmatpush1.msra.mxu0 %v14296_v18  ;;  %4313 = vmatpush1.msra.mxu1 %v14297_v21  ;;  %v14329_v18 = vld [vmem:[#allocation139_spill] sm:$0xff]  ;;  %v14330_v21 = vld [vmem:[#allocation140_spill] sm:$0xff] }
 0x93f   :  { %4245 = vmatprep.subr.mxu0 %v14298_v13  ;;  %4314 = vmatprep.subr.mxu1 %v14299_v0  ;;  %v14331_v13 = vld [vmem:[#allocation141_spill] sm:$0xff]  ;;  %v14332_v0 = vld [vmem:[#allocation142_spill] sm:$0xff] }
 0x940   :  { %4246 = vmatpush1.msra.mxu0 %v14300_v1  ;;  %4315 = vmatpush1.msra.mxu1 %v14301_v20  ;;  %v14333_v1 = vld [vmem:[#allocation143_spill] sm:$0xff]  ;;  %v14334_v20 = vld [vmem:[#allocation144_spill] sm:$0xff] }
 0x941   :  { %4247 = vmatprep.subr.mxu0 %v14302_v39  ;;  %4316 = vmatprep.subr.mxu1 %v14303_v37  ;;  %v14335_v39 = vld [vmem:[#allocation145_spill] sm:$0xff]  ;;  %v14336_v37 = vld [vmem:[#allocation146_spill] sm:$0xff] }
 0x942   :  { %4248 = vmatpush1.msra.mxu0 %v14304_v38  ;;  %4317 = vmatpush1.msra.mxu1 %v14305_v10  ;;  %v14337_v38 = vld [vmem:[#allocation147_spill] sm:$0xff]  ;;  %v14338_v10 = vld [vmem:[#allocation148_spill] sm:$0xff] }
 0x943   :  { %4249 = vmatprep.subr.mxu0 %v14306_v6  ;;  %4318 = vmatprep.subr.mxu1 %v14307_v4  ;;  %v14339_v6 = vld [vmem:[#allocation149_spill] sm:$0xff]  ;;  %v14340_v4 = vld [vmem:[#allocation150_spill] sm:$0xff] }
 0x944   :  { %4250 = vmatpush1.msra.mxu0 %v14308_v51  ;;  %4319 = vmatpush1.msra.mxu1 %v14309_v32  ;;  %v14341_v51 = vld [vmem:[#allocation151_spill] sm:$0xff]  ;;  %v14342_v32 = vld [vmem:[#allocation152_spill] sm:$0xff] }
 0x945   :  { %4251 = vmatprep.subr.mxu0 %v14310_v16  ;;  %4320 = vmatprep.subr.mxu1 %v14311_v41  ;;  %v14343_v16 = vld [vmem:[#allocation153_spill] sm:$0xff]  ;;  %v14344_v41 = vld [vmem:[#allocation154_spill] sm:$0xff] }
 0x946   :  { %4252 = vmatpush1.msra.mxu0 %v14312_v44  ;;  %4321 = vmatpush1.msra.mxu1 %v14313_v45  ;;  %v14345_v44 = vld [vmem:[#allocation155_spill] sm:$0xff]  ;;  %v14346_v45 = vld [vmem:[#allocation156_spill] sm:$0xff] }
 0x947   :  { %4253 = vmatprep.subr.mxu0 %v14314_v5  ;;  %4322 = vmatprep.subr.mxu1 %v14315_v2  ;;  %v14347_v5 = vld [vmem:[#allocation157_spill] sm:$0xff]  ;;  %v14348_v2 = vld [vmem:[#allocation158_spill] sm:$0xff] }
 0x948   :  { %4254 = vmatpush1.msra.mxu0 %v14316_v59  ;;  %4323 = vmatpush1.msra.mxu1 %v14317_v11  ;;  %v14349_v59 = vld [vmem:[#allocation159_spill] sm:$0xff]  ;;  %v14350_v11 = vld [vmem:[#allocation160_spill] sm:$0xff] }
 0x949   :  { %4255 = vmatprep.subr.mxu0 %v14318_v46  ;;  %4324 = vmatprep.subr.mxu1 %v14319_v47  ;;  %v14351_v46 = vld [vmem:[#allocation161_spill] sm:$0xff]  ;;  %v14352_v47 = vld [vmem:[#allocation162_spill] sm:$0xff] }
 0x94a   :  { %4256 = vmatpush1.msra.mxu0 %v14320_v49  ;;  %4325 = vmatpush1.msra.mxu1 %v14321_v50  ;;  %v14353_v49 = vld [vmem:[#allocation163_spill] sm:$0xff]  ;;  %v14354_v50 = vld [vmem:[#allocation164_spill] sm:$0xff] }
 0x94b   :  { %4257 = vmatprep.subr.mxu0 %v14322_v52  ;;  %4326 = vmatprep.subr.mxu1 %v14323_v53  ;;  %v14355_v52 = vld [vmem:[#allocation165_spill] sm:$0xff]  ;;  %v14356_v53 = vld [vmem:[#allocation166_spill] sm:$0xff] }
 0x94c   :  { %4258 = vmatpush1.msra.mxu0 %v14324_v54  ;;  %4327 = vmatpush1.msra.mxu1 %v14325_v55  ;;  %v14357_v54 = vld [vmem:[#allocation167_spill] sm:$0xff]  ;;  %v14358_v55 = vld [vmem:[#allocation168_spill] sm:$0xff] }
 0x94d   :  { %4259 = vmatprep.subr.mxu0 %v14326_v61  ;;  %4328 = vmatprep.subr.mxu1 %v14327_v29  ;;  %v14359_v61 = vld [vmem:[#allocation169_spill] sm:$0xff]  ;;  %v14360_v29 = vld [vmem:[#allocation170_spill] sm:$0xff] }
 0x94e   :  { %4260 = vmatpush2.msra.mxu0 %v14328_v22  ;;  %4329 = vmatpush1.msra.mxu1 %v14329_v18  ;;  %v14361_v22 = vld [vmem:[#allocation171_spill] sm:$0xff]  ;;  %v14362_v18 = vld [vmem:[#allocation172_spill] sm:$0xff] }
 0x94f   :  { %4261 = vmatprep.subr.mxu0 %v14330_v21  ;;  %4330 = vmatprep.subr.mxu1 %v14331_v13  ;;  %v14363_v21 = vld [vmem:[#allocation173_spill] sm:$0xff]  ;;  %v14364_v13 = vld [vmem:[#allocation174_spill] sm:$0xff] }
 0x950   :  { %4262 = vmatpush2.msra.mxu0 %v14332_v0  ;;  %4331 = vmatpush2.msra.mxu1 %v14333_v1  ;;  %v14365_v0 = vld [vmem:[#allocation175_spill] sm:$0xff]  ;;  %v14366_v1 = vld [vmem:[#allocation176_spill] sm:$0xff] }
 0x951   :  { %4263 = vmatprep.subr.mxu0 %v14334_v20  ;;  %4332 = vmatprep.subr.mxu1 %v14335_v39  ;;  %v14367_v20 = vld [vmem:[#allocation177_spill] sm:$0xff]  ;;  %v14368_v39 = vld [vmem:[#allocation178_spill] sm:$0xff] }
 0x952   :  { %4264 = vmatpush2.msra.mxu0 %v14336_v37  ;;  %4333 = vmatpush2.msra.mxu1 %v14337_v38  ;;  %v14369_v37 = vld [vmem:[#allocation179_spill] sm:$0xff]  ;;  %v14370_v38 = vld [vmem:[#allocation180_spill] sm:$0xff] }
 0x953   :  { %4265 = vmatprep.subr.mxu0 %v14338_v10  ;;  %4334 = vmatprep.subr.mxu1 %v14339_v6  ;;  %v14371_v10 = vld [vmem:[#allocation181_spill] sm:$0xff]  ;;  %v14372_v6 = vld [vmem:[#allocation182_spill] sm:$0xff] }
 0x954   :  { %4266 = vmatpush2.msra.mxu0 %v14340_v4  ;;  %4335 = vmatpush2.msra.mxu1 %v14341_v51  ;;  %v14373_v4 = vld [vmem:[#allocation183_spill] sm:$0xff]  ;;  %v14374_v51 = vld [vmem:[#allocation184_spill] sm:$0xff] }
 0x955   :  { %4267 = vmatprep.subr.mxu0 %v14342_v32  ;;  %4336 = vmatprep.subr.mxu1 %v14343_v16  ;;  %v14375_v32 = vld [vmem:[#allocation185_spill] sm:$0xff]  ;;  %v14376_v16 = vld [vmem:[#allocation186_spill] sm:$0xff] }
 0x956   :  { %4268 = vmatpush2.msra.mxu0 %v14344_v41  ;;  %4337 = vmatpush2.msra.mxu1 %v14345_v44  ;;  %v14377_v41 = vld [vmem:[#allocation187_spill] sm:$0xff]  ;;  %v14378_v44 = vld [vmem:[#allocation188_spill] sm:$0xff] }
 0x957   :  { %4269 = vmatprep.subr.mxu0 %v14346_v45  ;;  %4338 = vmatprep.subr.mxu1 %v14347_v5  ;;  %v14379_v45 = vld [vmem:[#allocation189_spill] sm:$0xff]  ;;  %v14380_v5 = vld [vmem:[#allocation190_spill] sm:$0xff] }
 0x958   :  { %4270 = vmatpush2.msra.mxu0 %v14348_v2  ;;  %4339 = vmatpush2.msra.mxu1 %v14349_v59  ;;  %v14381_v2 = vld [vmem:[#allocation191_spill] sm:$0xff]  ;;  %v14382_v59 = vld [vmem:[#allocation192_spill] sm:$0xff] }
 0x959   :  { %4271 = vmatprep.subr.mxu0 %v14350_v11  ;;  %4340 = vmatprep.subr.mxu1 %v14351_v46  ;;  %v14383_v11 = vld [vmem:[#allocation193_spill] sm:$0xff]  ;;  %v14384_v46 = vld [vmem:[#allocation194_spill] sm:$0xff] }
 0x95a   :  { %4272 = vmatpush2.msra.mxu0 %v14352_v47  ;;  %4341 = vmatpush2.msra.mxu1 %v14353_v49  ;;  %v5649_v47 = vld [vmem:[%s11964_s0 + $0x18] sm:$0xf]  ;;  %v14385_v49 = vld [vmem:[#allocation195_spill] sm:$0xff] }
 0x95b   :  { %4273 = vmatprep.subr.mxu0 %v14354_v50  ;;  %4342 = vmatprep.subr.mxu1 %v14355_v52  ;;  %v14386_v50 = vld [vmem:[#allocation196_spill] sm:$0xff]  ;;  %v14387_v52 = vld [vmem:[#allocation197_spill] sm:$0xff] }
 0x95c   :  { %4274 = vmatpush2.msra.mxu0 %v14356_v53  ;;  %4343 = vmatpush2.msra.mxu1 %v14357_v54  ;;  %v14388_v53 = vld [vmem:[#allocation198_spill] sm:$0xff]  ;;  %v14389_v54 = vld [vmem:[#allocation199_spill] sm:$0xff] }
 0x95d   :  { %4275 = vmatprep.subr.mxu0 %v14358_v55  ;;  %4344 = vmatprep.subr.mxu1 %v14359_v61  ;;  %v14390_v55 = vld [vmem:[#allocation200_spill] sm:$0xff]  ;;  %v14391_v61 = vld [vmem:[#allocation201_spill] sm:$0xff] }
 0x95e   :  { %4276 = vmatpush2.msra.mxu0 %v14360_v29  ;;  %4345 = vmatpush2.msra.mxu1 %v14361_v22  ;;  %v14392_v29 = vld [vmem:[#allocation202_spill] sm:$0xff]  ;;  %v14393_v22 = vld [vmem:[#allocation203_spill] sm:$0xff] }
 0x95f   :  { %4277 = vmatprep.subr.mxu0 %v14362_v18  ;;  %4346 = vmatprep.subr.mxu1 %v14363_v21  ;;  %v14394_v18 = vld [vmem:[#allocation204_spill] sm:$0xff]  ;;  %v14395_v21 = vld [vmem:[#allocation205_spill] sm:$0xff] }
 0x960   :  { %4278 = vmatpush2.msra.mxu0 %v14364_v13  ;;  %4347 = vmatpush2.msra.mxu1 %v14365_v0  ;;  %v14396_v13 = vld [vmem:[#allocation206_spill] sm:$0xff]  ;;  %v14397_v0 = vld [vmem:[#allocation207_spill] sm:$0xff] }
 0x961   :  { %4279 = vmatprep.subr.mxu0 %v14366_v1  ;;  %4348 = vmatprep.subr.mxu1 %v14367_v20  ;;  %v14398_v1 = vld [vmem:[#allocation208_spill] sm:$0xff]  ;;  %v14399_v20 = vld [vmem:[#allocation209_spill] sm:$0xff] }
 0x962   :  { %4280 = vmatpush2.msra.mxu0 %v14368_v39  ;;  %4349 = vmatpush2.msra.mxu1 %v14369_v37  ;;  %v14400_v39 = vld [vmem:[#allocation210_spill] sm:$0xff]  ;;  %v14401_v37 = vld [vmem:[#allocation211_spill] sm:$0xff] }
 0x963   :  { %4281 = vmatprep.subr.mxu0 %v14370_v38  ;;  %4350 = vmatprep.subr.mxu1 %v14371_v10  ;;  %v14402_v38 = vld [vmem:[#allocation212_spill] sm:$0xff]  ;;  %v14403_v10 = vld [vmem:[#allocation213_spill] sm:$0xff] }
 0x964   :  { %4282 = vmatpush2.msra.mxu0 %v14372_v6  ;;  %4351 = vmatpush2.msra.mxu1 %v14373_v4  ;;  %v14404_v6 = vld [vmem:[#allocation214_spill] sm:$0xff]  ;;  %v14405_v4 = vld [vmem:[#allocation215_spill] sm:$0xff] }
 0x965   :  { %4283 = vmatprep.subr.mxu0 %v14374_v51  ;;  %4352 = vmatprep.subr.mxu1 %v14375_v32  ;;  %v14406_v51 = vld [vmem:[#allocation216_spill] sm:$0xff]  ;;  %v14407_v32 = vld [vmem:[#allocation217_spill] sm:$0xff] }
 0x966   :  { %4284 = vmatpush2.msra.mxu0 %v14376_v16  ;;  %4353 = vmatpush2.msra.mxu1 %v14377_v41  ;;  %v14408_v16 = vld [vmem:[#allocation218_spill] sm:$0xff]  ;;  %v14409_v41 = vld [vmem:[#allocation219_spill] sm:$0xff] }
 0x967   :  { %4285 = vmatprep.subr.mxu0 %v14378_v44  ;;  %4354 = vmatprep.subr.mxu1 %v14379_v45  ;;  %v14410_v44 = vld [vmem:[#allocation220_spill] sm:$0xff]  ;;  %v14411_v45 = vld [vmem:[#allocation221_spill] sm:$0xff] }
 0x968   :  { %4286 = vmatpush2.msra.mxu0 %v14380_v5  ;;  %4355 = vmatpush2.msra.mxu1 %v14381_v2  ;;  %v14412_v5 = vld [vmem:[#allocation222_spill] sm:$0xff]  ;;  %v14413_v2 = vld [vmem:[#allocation223_spill] sm:$0xff] }
 0x969   :  { %4287 = vmatprep.subr.mxu0 %v14382_v59  ;;  %4356 = vmatprep.subr.mxu1 %v14383_v11  ;;  %v14414_v59 = vld [vmem:[#allocation224_spill] sm:$0xff]  ;;  %v14415_v11 = vld [vmem:[#allocation225_spill] sm:$0xff] }
 0x96a   :  { %4288 = vmatpush2.msra.mxu0 %v14384_v46  ;;  %4357 = vmatpush2.msra.mxu1 %v14385_v49  ;;  %v14416_v46 = vld [vmem:[#allocation226_spill] sm:$0xff]  ;;  %v14418_v49 = vld [vmem:[#allocation228_spill] sm:$0xff] }
 0x96b   :  { %4289 = vmatprep.subr.mxu0 %v14386_v50  ;;  %4358 = vmatprep.subr.mxu1 %v14387_v52  ;;  %v14419_v50 = vld [vmem:[#allocation229_spill] sm:$0xff]  ;;  %v14420_v52 = vld [vmem:[#allocation230_spill] sm:$0xff] }
 0x96c   :  { %4290 = vmatpush2.msra.mxu0 %v14388_v53  ;;  %4359 = vmatpush2.msra.mxu1 %v14389_v54  ;;  %v14421_v53 = vld [vmem:[#allocation231_spill] sm:$0xff]  ;;  %v14422_v54 = vld [vmem:[#allocation232_spill] sm:$0xff] }
 0x96d   :  { %4292 = vmatmul.mubr.f32.vlgmr.msra.gmra.mxu0 %v5649_v47  ;;  %4360 = vmatprep.subr.mxu1 %v14390_v55  ;;  %v14423_v55 = vld [vmem:[#allocation233_spill] sm:$0xff] }
 0x96e   :  { %4361 = vmatpush2.msra.mxu1 %v14391_v61  ;;  %4396 = vmatprep.subr.mxu0 %v14392_v29  ;;  %v14424_v61 = vld [vmem:[#allocation234_spill] sm:$0xff]  ;;  %v14425_v29 = vld [vmem:[#allocation235_spill] sm:$0xff] }
 0x96f   :  { %4363 = vmatmul.mubr.f32.vlgmr.msra.gmra.mxu1 %v5649_v47  ;;  %4467 = vmatprep.subr.mxu1 %v14393_v22  ;;  %v14417_v47 = vld [vmem:[#allocation227_spill] sm:$0xff]  ;;  %v14426_v22 = vld [vmem:[#allocation236_spill] sm:$0xff] }
 0x970   :  { %4397 = vmatpush1.msra.mxu0 %v14394_v18  ;;  %4468 = vmatpush1.msra.mxu1 %v14395_v21  ;;  %v14427_v18 = vld [vmem:[#allocation237_spill] sm:$0xff]  ;;  %v14428_v21 = vld [vmem:[#allocation238_spill] sm:$0xff] }
 0x971   :  { %4398 = vmatprep.subr.mxu0 %v14396_v13  ;;  %4469 = vmatprep.subr.mxu1 %v14397_v0  ;;  %v14429_v13 = vld [vmem:[#allocation239_spill] sm:$0xff]  ;;  %v14430_v0 = vld [vmem:[#allocation240_spill] sm:$0xff] }
 0x972   :  { %4399 = vmatpush1.msra.mxu0 %v14398_v1  ;;  %4470 = vmatpush1.msra.mxu1 %v14399_v20  ;;  %v14431_v1 = vld [vmem:[#allocation241_spill] sm:$0xff]  ;;  %v14432_v20 = vld [vmem:[#allocation242_spill] sm:$0xff] }
 0x973   :  { %4400 = vmatprep.subr.mxu0 %v14400_v39  ;;  %4471 = vmatprep.subr.mxu1 %v14401_v37  ;;  %v14433_v39 = vld [vmem:[#allocation243_spill] sm:$0xff]  ;;  %v14434_v37 = vld [vmem:[#allocation244_spill] sm:$0xff] }
 0x974   :  { %4401 = vmatpush1.msra.mxu0 %v14402_v38  ;;  %4472 = vmatpush1.msra.mxu1 %v14403_v10  ;;  %v14435_v38 = vld [vmem:[#allocation245_spill] sm:$0xff]  ;;  %v14436_v10 = vld [vmem:[#allocation246_spill] sm:$0xff] }
 0x975   :  { %4402 = vmatprep.subr.mxu0 %v14404_v6  ;;  %4473 = vmatprep.subr.mxu1 %v14405_v4  ;;  %v14437_v6 = vld [vmem:[#allocation247_spill] sm:$0xff]  ;;  %v14438_v4 = vld [vmem:[#allocation248_spill] sm:$0xff] }
 0x976   :  { %4403 = vmatpush1.msra.mxu0 %v14406_v51  ;;  %4474 = vmatpush1.msra.mxu1 %v14407_v32  ;;  %v14439_v51 = vld [vmem:[#allocation249_spill] sm:$0xff]  ;;  %v14440_v32 = vld [vmem:[#allocation250_spill] sm:$0xff] }
 0x977   :  { %4404 = vmatprep.subr.mxu0 %v14408_v16  ;;  %4475 = vmatprep.subr.mxu1 %v14409_v41  ;;  %v14441_v16 = vld [vmem:[#allocation251_spill] sm:$0xff]  ;;  %v14442_v41 = vld [vmem:[#allocation252_spill] sm:$0xff] }
 0x978   :  { %4405 = vmatpush1.msra.mxu0 %v14410_v44  ;;  %4476 = vmatpush1.msra.mxu1 %v14411_v45  ;;  %v14443_v44 = vld [vmem:[#allocation253_spill] sm:$0xff]  ;;  %v14444_v45 = vld [vmem:[#allocation254_spill] sm:$0xff] }
 0x979   :  { %4406 = vmatprep.subr.mxu0 %v14412_v5  ;;  %4477 = vmatprep.subr.mxu1 %v14413_v2  ;;  %v14445_v5 = vld [vmem:[#allocation255_spill] sm:$0xff]  ;;  %v14446_v2 = vld [vmem:[#allocation256_spill] sm:$0xff] }
 0x97a   :  { %4407 = vmatpush1.msra.mxu0 %v14414_v59  ;;  %4478 = vmatpush1.msra.mxu1 %v14415_v11  ;;  %v14447_v59 = vld [vmem:[#allocation257_spill] sm:$0xff]  ;;  %v14448_v11 = vld [vmem:[#allocation258_spill] sm:$0xff] }
 0x97b   :  { %4408 = vmatprep.subr.mxu0 %v14416_v46  ;;  %4479 = vmatprep.subr.mxu1 %v14417_v47  ;;  %v14449_v46 = vld [vmem:[#allocation259_spill] sm:$0xff]  ;;  %v14450_v47 = vld [vmem:[#allocation260_spill] sm:$0xff] }
 0x97c   :  { %4409 = vmatpush1.msra.mxu0 %v14418_v49  ;;  %4480 = vmatpush1.msra.mxu1 %v14419_v50  ;;  %v14451_v49 = vld [vmem:[#allocation261_spill] sm:$0xff]  ;;  %v14452_v50 = vld [vmem:[#allocation262_spill] sm:$0xff] }
 0x97d   :  { %4410 = vmatprep.subr.mxu0 %v14420_v52  ;;  %4481 = vmatprep.subr.mxu1 %v14421_v53  ;;  %v14453_v52 = vld [vmem:[#allocation15_spill] sm:$0xff] }
 0x97e   :  { %4411 = vmatpush1.msra.mxu0 %v14422_v54  ;;  %4482 = vmatpush1.msra.mxu1 %v14423_v55  ;;  %v14454_v53 = vld [vmem:[#allocation263_spill] sm:$0xff]  ;;  %v11421_v54 = vld [vmem:[#allocation7 + $0x10] sm:$0xff] }
 0x97f   :  { %4412 = vmatprep.subr.mxu0 %v14424_v61  ;;  %4483 = vmatprep.subr.mxu1 %v14425_v29  ;;  %v14455_v55 = vld [vmem:[#allocation264_spill] sm:$0xff]  ;;  %v14456_v61 = vld [vmem:[#allocation265_spill] sm:$0xff] }
 0x980   :  { %4413 = vmatpush1.msra.mxu0 %v14426_v22  ;;  %4484 = vmatpush1.msra.mxu1 %v14427_v18 }
 0x981   :  { %4414 = vmatprep.subr.mxu0 %v14428_v21  ;;  %4485 = vmatprep.subr.mxu1 %v14429_v13 }
 0x982   :  { %4415 = vmatpush1.msra.mxu0 %v14430_v0  ;;  %4486 = vmatpush1.msra.mxu1 %v14431_v1 }
 0x983   :  { %4416 = vmatprep.subr.mxu0 %v14432_v20  ;;  %4487 = vmatprep.subr.mxu1 %v14433_v39 }
 0x984   :  { %4417 = vmatpush1.msra.mxu0 %v14434_v37  ;;  %4488 = vmatpush1.msra.mxu1 %v14435_v38 }
 0x985   :  { %4418 = vmatprep.subr.mxu0 %v14436_v10  ;;  %4489 = vmatprep.subr.mxu1 %v14437_v6 }
 0x986   :  { %4419 = vmatpush1.msra.mxu0 %v14438_v4  ;;  %4490 = vmatpush1.msra.mxu1 %v14439_v51 }
 0x987   :  { %4420 = vmatprep.subr.mxu0 %v14440_v32  ;;  %4491 = vmatprep.subr.mxu1 %v14441_v16 }
 0x988   :  { %4421 = vmatpush1.msra.mxu0 %v14442_v41  ;;  %4492 = vmatpush1.msra.mxu1 %v14443_v44 }
 0x989   :  { %4422 = vmatprep.subr.mxu0 %v14444_v45  ;;  %4493 = vmatprep.subr.mxu1 %v14445_v5 }
 0x98a   :  { %4423 = vmatpush1.msra.mxu0 %v14446_v2  ;;  %4494 = vmatpush1.msra.mxu1 %v14447_v59 }
 0x98b   :  { %4424 = vmatprep.subr.mxu0 %v14448_v11  ;;  %4495 = vmatprep.subr.mxu1 %v14449_v46 }
 0x98c   :  { %4425 = vmatpush1.msra.mxu0 %v14450_v47  ;;  %4496 = vmatpush1.msra.mxu1 %v14451_v49 }
 0x98d   :  { %4426 = vmatprep.subr.mxu0 %v14452_v50  ;;  %4497 = vmatprep.subr.mxu1 %v14453_v52 }
 0x98e   :  { %4427 = vmatpush1.msra.mxu0 %v14454_v53  ;;  %4498 = vmatpush1.msra.mxu1 %v11421_v54 }
 0x98f   :  { %4460 = vmatprep.mubr.f32.mxu0 %v12905_v24  ;;  %4531 = vmatprep.mubr.f32.mxu1 %v12905_v24 }
 0x990   :  { %4538 = vmatprep.subr.mxu0 %v14455_v55  ;;  %4609 = vmatprep.subr.mxu1 %v14456_v61 }
 0x9a9   :  { %v3833_v29 = vpop.f32.mrf.mxu0  ;;  %v3904_v22 = vpop.f32.mrf.mxu1 }
 0x9ab   :  { %v3835_v18 = vpop.f32.mrf.mxu0  ;;  %v3906_v21 = vpop.f32.mrf.mxu1 }
 0x9ca   :  { %v3975_v13 = vpop.f32.mrf.mxu0  ;;  %v4046_v0 = vpop.f32.mrf.mxu1 }
 0x9cb   :  { %v3976_v1 = vadd.f32 %v3975_v13, %v3833_v29  ;;  %v4047_v20 = vadd.f32 %v4046_v0, %v3904_v22 }
 0x9cc   :  { %v3977_v39 = vpop.f32.mrf.mxu0  ;;  %v4048_v37 = vpop.f32.mrf.mxu1 }
 0x9cd   :  { %v3978_v38 = vadd.f32 %v3977_v39, %v3835_v18  ;;  %v4049_v10 = vadd.f32 %v4048_v37, %v3906_v21 }
 0x9ec   :  { %v4117_v6 = vpop.f32.mrf.mxu0  ;;  %v4188_v4 = vpop.f32.mrf.mxu1 }
 0x9ed   :  { %v4193_v51 = vadd.f32 %v4117_v6, %v3976_v1  ;;  %v4195_v32 = vadd.f32 %v4188_v4, %v4047_v20 }
 0x9ee   :  { %v4119_v16 = vpop.f32.mrf.mxu0  ;;  %v4190_v41 = vpop.f32.mrf.mxu1 }
 0x9ef   :  { %v4197_v44 = vadd.f32 %v4193_v51, %v8283_v43  ;;  %v4194_v45 = vadd.f32 %v4119_v16, %v3978_v38  ;;  %v11429_v5 = vadd.f32 %v4190_v41, %v4049_v10  ;;  %v4199_v46 = vadd.f32 %v4195_v32, %v8297_v14 }
 0x9f1   :  { %v5646_v2 = vmul.f32 -1.442695, %v4197_v44  ;;  %v4198_v59 = vadd.f32 %v4194_v45, %v8288_v19 }
 0x9f3   :  { %5901 = vpow2.f32 %v5646_v2  ;;  %v5647_v11 = vmul.f32 -1.442695, %v4198_v59 }
 0x9f5   :  { %5903 = vpow2.f32 %v5647_v11 }
 0x9f6   :  { %5905 = vtanh.f32 %v4199_v46 }
 0xa00   :  { %v5902_v47 = vpop.eup %5901 }
 0xa01   :  { %v4204_v49 = vadd.f32 1.0, %v5902_v47 }
 0xa02   :  { %v5904_v50 = vpop.eup %5903 }
 0xa03   :  { %5907 = vrcp.f32 %v4204_v49  ;;  %v4210_v52 = vadd.f32 1.0, %v5904_v50  ;;  %v5906_v53 = vpop.eup %5905 }
 0xa05   :  { %5909 = vrcp.f32 %v4210_v52 }
 0xa10   :  { %v5908_v55 = vpop.eup %5907 }
 0xa11   :  { %v4221_v61 = vmul.f32 %v5908_v55, %v5906_v53  ;;  %v11483_v55 = vld [vmem:[#allocation5 + $0xc0] sm:$0xff] }
 0xa12   :  { %v5910_v29 = vpop.eup %5909 }
 0xa13   :  { %v4220_v22 = vmul.f32 %v5910_v29, %v11005_v28  ;;  %v11489_v29 = vld [vmem:[#allocation5 + $0xa8] sm:$0xff] }
 0xa15   :  { %v11434_v18 = vadd.f32 %v4221_v61, %v4220_v22  ;;  %v11486_v61 = vld [vmem:[#allocation5 + $0xd0] sm:$0xff]  ;;  %v4200_v22 = vadd.f32 %v11429_v5, %v8424_v9 }
 0xa16   :  { %v11524_v5 = vld [vmem:[#allocation5 + $0x70] sm:$0xff] }
 0xa2d   :  { %v4293_v21 = vpop.f32.mrf.mxu0 }
 0xa2e   :  { %v4294_v13 = vadd.f32 %v4293_v21, %v7384_v12  ;;  %v11509_v21 = vld [vmem:[#allocation5 + $0x80] sm:$0xff] }
 0xa2f   :  { %v4295_v0 = vpop.f32.mrf.mxu0  ;;  %v4364_v37 = vpop.f32.mrf.mxu1 }
 0xa30   :  { %v5650_v1 = vmul.f32 -1.442695, %v4294_v13  ;;  %v4296_v20 = vadd.f32 %v4295_v0, %v13373_v36  ;;  %v4365_v6 = vadd.f32 %v4364_v37, %v7400_v25  ;;  %v11512_v13 = vld [vmem:[#allocation5 + $0x90] sm:$0xff]  ;;  %v11515_v0 = vld [vmem:[#allocation5 + $0x68] sm:$0xff]  ;;  %v11530_v37 = vld [vmem:[#allocation5 + $0x58] sm:$0xff] }
 0xa31   :  { %v4366_v38 = vpop.f32.mrf.mxu1 }
 0xa32   :  { %5911 = vpow2.f32 %v5650_v1  ;;  %v5651_v39 = vmul.f32 -1.442695, %v4296_v20  ;;  %v4367_v10 = vadd.f32 %v4366_v38, %v7396_v23  ;;  %v11518_v1 = vld [vmem:[#allocation5 + $0x78] sm:$0xff]  ;;  %v11521_v20 = vld [vmem:[#allocation5 + $0x60] sm:$0xff]  ;;  %v5648_v38 = vmul.f32 -1.442695, %v4200_v22 }
 0xa33   :  { %v11633_v22 = vld [vmem:[#allocation8 + $0x140] sm:$0xff] }
 0xa34   :  { %5913 = vpow2.f32 %v5651_v39  ;;  %v5652_v4 = vmul.f32 -1.442695, %v4367_v10  ;;  %v11527_v39 = vld [vmem:[#allocation5 + $0x48] sm:$0xff]  ;;  %v11533_v10 = vld [vmem:[#allocation5 + $0x40] sm:$0xff]  ;;  %14491 = vst [vmem:[#allocation30_spill] sm:$0xff] %v11633_v22 }
 0xa35   :  { %5915 = vtanh.f32 %v4365_v6  ;;  %v11536_v6 = vld [vmem:[#allocation5 + $0x50] sm:$0xff] }
 0xa36   :  { %5917 = vpow2.f32 %v5652_v4  ;;  %v11539_v4 = vld [vmem:[#allocation5 + $0x28] sm:$0xff] }
 0xa3f   :  { %v5912_v28 = vpop.eup %5911 }
 0xa40   :  { %v4372_v51 = vadd.f32 1.0, %v5912_v28  ;;  %v11542_v28 = vld [vmem:[#allocation5 + $0x38] sm:$0xff] }
 0xa41   :  { %v5914_v32 = vpop.eup %5913 }
 0xa42   :  { %5919 = vrcp.f32 %v4372_v51  ;;  %v4378_v16 = vadd.f32 1.0, %v5914_v32  ;;  %v5916_v41 = vpop.eup %5915  ;;  %v11545_v51 = vld [vmem:[#allocation5 + $0x20] sm:$0xff]  ;;  %v11548_v32 = vld [vmem:[#allocation5 + $0x30] sm:$0xff] }
 0xa43   :  { %v5918_v44 = vpop.eup %5917 }
 0xa44   :  { %5921 = vrcp.f32 %v4378_v16  ;;  %v4385_v59 = vadd.f32 1.0, %v5918_v44  ;;  %v11551_v16 = vld [vmem:[#allocation5 + $0x8] sm:$0xff]  ;;  %v11557_v44 = vld [vmem:[#allocation5] sm:$0xff] }
 0xa46   :  { %5923 = vrcp.f32 %v4385_v59  ;;  %v11570_v59 = vld [vmem:[#allocation8 + $0x1f8] sm:$0xff] }
 0xa4f   :  { %v5920_v45 = vpop.eup %5919 }
 0xa50   :  { %v4389_v46 = vmul.f32 %v5920_v45, %v5916_v41  ;;  %v11554_v41 = vld [vmem:[#allocation5 + $0x18] sm:$0xff]  ;;  %v11561_v45 = vld [vmem:[#allocation5 + $0x10] sm:$0xff] }
 0xa51   :  { %v5922_v2 = vpop.eup %5921 }
 0xa52   :  { %v4388_v11 = vmul.f32 %v5922_v2, %v11012_v7  ;;  %v14457_v7 = vld [vmem:[#allocation266_spill] sm:$0xff]  ;;  %v11567_v2 = vld [vmem:[#allocation8 + $0x1e8] sm:$0xff] }
 0xa53   :  { %v5924_v49 = vpop.eup %5923 }
 0xa54   :  { %v11441_v47 = vadd.f32 %v4389_v46, %v4388_v11  ;;  %v11573_v11 = vld [vmem:[#allocation8 + $0x1e0] sm:$0xff]  ;;  %v11576_v46 = vld [vmem:[#allocation8 + $0x1f0] sm:$0xff] }
 0xa56   :  { %5925 = vtanh.f32 %v11441_v47 }
 0xa57   :  { %5927 = vpow2.f32 %v5648_v38  ;;  %v11636_v38 = vld [vmem:[#allocation8 + $0x150] sm:$0xff] }
 0xa58   :  { %14492 = vst [vmem:[#allocation31_spill] sm:$0xff] %v11636_v38  ;;  %5929 = vtanh.f32 %v11434_v18 }
 0xa63   :  { %v5926_v50 = vpop.eup %5925 }
 0xa64   :  { %v11444_v52 = vmul.f32 %v5926_v50, %v5924_v49  ;;  %v11579_v49 = vld [vmem:[#allocation8 + $0x1c8] sm:$0xff]  ;;  %v11582_v50 = vld [vmem:[#allocation8 + $0x1d8] sm:$0xff] }
 0xa65   :  { %14473 = vst [vmem:[#allocation282_spill] sm:$0xff] %v11579_v49  ;;  %14474 = vst [vmem:[#allocation283_spill] sm:$0xff] %v11582_v50 }
 0xa66   :  { %v4394_v53 = vrot.slane %v11444_v52, 2 }
 0xa68   :  { %4461 = vmatmul.mubr.f32.vlgmr.msra.gmra.mxu0 %v4394_v53  ;;  %4532 = vmatmul.mubr.f32.vlgmr.msra.gmra.mxu1 %v4394_v53  ;;  %v11585_v53 = vld [vmem:[#allocation8 + $0x1c0] sm:$0xff] }
 0xa69   :  { %4539 = vmatpush1.msra.mxu0 %v11018_v62  ;;  %4610 = vmatpush1.msra.mxu1 %v11021_v42  ;;  %v14458_v62 = vld [vmem:[#allocation267_spill] sm:$0xff]  ;;  %v14459_v42 = vld [vmem:[#allocation268_spill] sm:$0xff]  ;;  %14475 = vst [vmem:[#allocation284_spill] sm:$0xff] %v11585_v53 }
 0xa6a   :  { %4540 = vmatprep.subr.mxu0 %v11024_v57  ;;  %4611 = vmatprep.subr.mxu1 %v11027_v3  ;;  %v14460_v57 = vld [vmem:[#allocation269_spill] sm:$0xff]  ;;  %v14461_v3 = vld [vmem:[#allocation270_spill] sm:$0xff] }
 0xa6b   :  { %4541 = vmatpush1.msra.mxu0 %v11030_v27  ;;  %4612 = vmatpush1.msra.mxu1 %v11033_v17  ;;  %v14462_v27 = vld [vmem:[#allocation271_spill] sm:$0xff]  ;;  %v14463_v17 = vld [vmem:[#allocation272_spill] sm:$0xff] }
 0xa6c   :  { %4542 = vmatprep.subr.mxu0 %v11036_v31  ;;  %4613 = vmatprep.subr.mxu1 %v11039_v35  ;;  %v14464_v31 = vld [vmem:[#allocation273_spill] sm:$0xff]  ;;  %v14465_v35 = vld [vmem:[#allocation274_spill] sm:$0xff] }
 0xa6d   :  { %4543 = vmatpush1.msra.mxu0 %v11042_v26  ;;  %4614 = vmatpush1.msra.mxu1 %v11045_v30  ;;  %v14466_v26 = vld [vmem:[#allocation275_spill] sm:$0xff]  ;;  %v14467_v30 = vld [vmem:[#allocation276_spill] sm:$0xff] }
 0xa6e   :  { %4544 = vmatprep.subr.mxu0 %v11048_v15  ;;  %4615 = vmatprep.subr.mxu1 %v11051_v63  ;;  %v14468_v15 = vld [vmem:[#allocation277_spill] sm:$0xff]  ;;  %v14469_v63 = vld [vmem:[#allocation278_spill] sm:$0xff] }
 0xa6f   :  { %4545 = vmatpush1.msra.mxu0 %v11054_v60  ;;  %4616 = vmatpush1.msra.mxu1 %v11057_v8  ;;  %v14470_v60 = vld [vmem:[#allocation279_spill] sm:$0xff]  ;;  %v14471_v8 = vld [vmem:[#allocation280_spill] sm:$0xff] }
 0xa70   :  { %4546 = vmatprep.subr.mxu0 %v11060_v56  ;;  %4617 = vmatprep.subr.mxu1 %v14457_v7  ;;  %v14472_v56 = vld [vmem:[#allocation281_spill] sm:$0xff] }
 0xa71   :  { %4547 = vmatpush1.msra.mxu0 %v14458_v62  ;;  %4618 = vmatpush1.msra.mxu1 %v14459_v42  ;;  %v11588_v7 = vld [vmem:[#allocation8 + $0x1d0] sm:$0xff]  ;;  %v11591_v62 = vld [vmem:[#allocation8 + $0x1a8] sm:$0xff]  ;;  %v11594_v42 = vld [vmem:[#allocation8 + $0x1b8] sm:$0xff] }
 0xa72   :  { %4548 = vmatprep.subr.mxu0 %v14460_v57  ;;  %4619 = vmatprep.subr.mxu1 %v14461_v3  ;;  %14476 = vst [vmem:[#allocation285_spill] sm:$0xff] %v11588_v7  ;;  %14477 = vst [vmem:[#allocation16_spill] sm:$0xff] %v11591_v62  ;;  %v11597_v57 = vld [vmem:[#allocation8 + $0x1a0] sm:$0xff]  ;;  %v11600_v3 = vld [vmem:[#allocation8 + $0x1b0] sm:$0xff] }
 0xa73   :  { %4549 = vmatpush1.msra.mxu0 %v14462_v27  ;;  %4620 = vmatpush1.msra.mxu1 %v14463_v17  ;;  %14478 = vst [vmem:[#allocation17_spill] sm:$0xff] %v11594_v42  ;;  %14479 = vst [vmem:[#allocation18_spill] sm:$0xff] %v11597_v57  ;;  %v11603_v27 = vld [vmem:[#allocation8 + $0x188] sm:$0xff]  ;;  %v11606_v17 = vld [vmem:[#allocation8 + $0x198] sm:$0xff] }
 0xa74   :  { %4550 = vmatprep.subr.mxu0 %v14464_v31  ;;  %4621 = vmatprep.subr.mxu1 %v14465_v35  ;;  %14480 = vst [vmem:[#allocation19_spill] sm:$0xff] %v11600_v3  ;;  %14481 = vst [vmem:[#allocation20_spill] sm:$0xff] %v11603_v27  ;;  %v11609_v31 = vld [vmem:[#allocation8 + $0x180] sm:$0xff]  ;;  %v11612_v35 = vld [vmem:[#allocation8 + $0x190] sm:$0xff] }
 0xa75   :  { %4551 = vmatpush1.msra.mxu0 %v14466_v26  ;;  %4622 = vmatpush1.msra.mxu1 %v14467_v30  ;;  %14482 = vst [vmem:[#allocation21_spill] sm:$0xff] %v11606_v17  ;;  %14483 = vst [vmem:[#allocation22_spill] sm:$0xff] %v11609_v31  ;;  %v11615_v26 = vld [vmem:[#allocation8 + $0x168] sm:$0xff]  ;;  %v11618_v30 = vld [vmem:[#allocation8 + $0x178] sm:$0xff] }
 0xa76   :  { %4552 = vmatprep.subr.mxu0 %v14468_v15  ;;  %4623 = vmatprep.subr.mxu1 %v14469_v63  ;;  %14484 = vst [vmem:[#allocation23_spill] sm:$0xff] %v11612_v35  ;;  %14485 = vst [vmem:[#allocation24_spill] sm:$0xff] %v11615_v26  ;;  %v11621_v15 = vld [vmem:[#allocation8 + $0x160] sm:$0xff]  ;;  %v11624_v63 = vld [vmem:[#allocation8 + $0x170] sm:$0xff] }
 0xa77   :  { %4553 = vmatpush1.msra.mxu0 %v14470_v60  ;;  %4624 = vmatpush1.msra.mxu1 %v14471_v8  ;;  %14486 = vst [vmem:[#allocation25_spill] sm:$0xff] %v11618_v30  ;;  %14487 = vst [vmem:[#allocation26_spill] sm:$0xff] %v11621_v15  ;;  %v5928_v60 = vpop.eup %5927  ;;  %v11627_v8 = vld [vmem:[#allocation8 + $0x148] sm:$0xff] }
 0xa78   :  { %4554 = vmatprep.subr.mxu0 %v11108_v58  ;;  %4625 = vmatprep.subr.mxu1 %v11111_v40  ;;  %v11492_v58 = vld [vmem:[#allocation5 + $0xb8] sm:$0xff]  ;;  %v11501_v40 = vld [vmem:[#allocation5 + $0x88] sm:$0xff]  ;;  %14488 = vst [vmem:[#allocation27_spill] sm:$0xff] %v11624_v63  ;;  %14489 = vst [vmem:[#allocation28_spill] sm:$0xff] %v11627_v8 }
 0xa79   :  { %4555 = vmatpush1.msra.mxu0 %v11114_v33  ;;  %4626 = vmatpush1.msra.mxu1 %v11117_v48  ;;  %v11495_v48 = vld [vmem:[#allocation5 + $0xa0] sm:$0xff]  ;;  %v11504_v33 = vld [vmem:[#allocation5 + $0x98] sm:$0xff] }
 0xa7a   :  { %4556 = vmatprep.subr.mxu0 %v14472_v56  ;;  %4627 = vmatprep.subr.mxu1 %v11123_v34  ;;  %v11498_v34 = vld [vmem:[#allocation5 + $0xb0] sm:$0xff]  ;;  %v11630_v56 = vld [vmem:[#allocation8 + $0x158] sm:$0xff] }
 0xa7b   :  { %4557 = vmatpush1.msra.mxu0 %v11483_v55  ;;  %4628 = vmatpush1.msra.mxu1 %v11486_v61  ;;  %14490 = vst [vmem:[#allocation29_spill] sm:$0xff] %v11630_v56 }
 0xa7c   :  { %4558 = vmatprep.subr.mxu0 %v11489_v29  ;;  %4629 = vmatprep.subr.mxu1 %v11492_v58 }
 0xa7d   :  { %4559 = vmatpush1.msra.mxu0 %v11495_v48  ;;  %4630 = vmatpush1.msra.mxu1 %v11498_v34 }
 0xa7e   :  { %4560 = vmatprep.subr.mxu0 %v11501_v40  ;;  %4631 = vmatprep.subr.mxu1 %v11504_v33 }
 0xa7f   :  { %4561 = vmatpush1.msra.mxu0 %v11509_v21  ;;  %4632 = vmatpush1.msra.mxu1 %v11512_v13 }
 0xa80   :  { %4562 = vmatprep.subr.mxu0 %v11515_v0  ;;  %4633 = vmatprep.subr.mxu1 %v11518_v1 }
 0xa81   :  { %4563 = vmatpush1.msra.mxu0 %v11521_v20  ;;  %4634 = vmatpush1.msra.mxu1 %v11524_v5 }
 0xa82   :  { %4564 = vmatprep.subr.mxu0 %v11527_v39  ;;  %4635 = vmatprep.subr.mxu1 %v11530_v37 }
 0xa83   :  { %4565 = vmatpush1.msra.mxu0 %v11533_v10  ;;  %4636 = vmatpush1.msra.mxu1 %v11536_v6 }
 0xa84   :  { %4566 = vmatprep.subr.mxu0 %v11539_v4  ;;  %4637 = vmatprep.subr.mxu1 %v11542_v28 }
 0xa85   :  { %4567 = vmatpush1.msra.mxu0 %v11545_v51  ;;  %4638 = vmatpush1.msra.mxu1 %v11548_v32 }
 0xa86   :  { %4568 = vmatprep.subr.mxu0 %v11551_v16  ;;  %4639 = vmatprep.subr.mxu1 %v11554_v41 }
 0xa87   :  { %4569 = vmatpush1.msra.mxu0 %v11557_v44  ;;  %4602 = vmatprep.mubr.f32.mxu0 %v12905_v24 }
 0xa88   :  { %4640 = vmatpush1.msra.mxu1 %v11561_v45  ;;  %4673 = vmatprep.mubr.f32.mxu1 %v12905_v24 }
 0xa89   :  { %4603 = vmatmul.mubr.f32.vlgmr.msra.gmra.mxu0 %v11444_v52  ;;  %4674 = vmatmul.mubr.f32.vlgmr.msra.gmra.mxu1 %v11444_v52 }
 0xa8a   :  { %4680 = vmatprep.subr.mxu0 %v11567_v2  ;;  %4751 = vmatprep.subr.mxu1 %v11570_v59 }
 0xa8b   :  { %4681 = vmatpush1.msra.mxu0 %v11573_v11  ;;  %4752 = vmatpush1.msra.mxu1 %v11576_v46 }
 0xa8c   :  { %4682 = vmatprep.subr.mxu0 %v11579_v49  ;;  %4753 = vmatprep.subr.mxu1 %v11582_v50 }
 0xa8d   :  { %4683 = vmatpush1.msra.mxu0 %v11585_v53  ;;  %4754 = vmatpush1.msra.mxu1 %v11588_v7 }
 0xa8e   :  { %4684 = vmatprep.subr.mxu0 %v11591_v62  ;;  %4755 = vmatprep.subr.mxu1 %v11594_v42 }
 0xa8f   :  { %4685 = vmatpush1.msra.mxu0 %v11597_v57  ;;  %4756 = vmatpush1.msra.mxu1 %v11600_v3 }
 0xa90   :  { %4686 = vmatprep.subr.mxu0 %v11603_v27  ;;  %4757 = vmatprep.subr.mxu1 %v11606_v17 }
 0xa91   :  { %4687 = vmatpush1.msra.mxu0 %v11609_v31  ;;  %4758 = vmatpush1.msra.mxu1 %v11612_v35  ;;  %v6955_v35 = vld [vmem:[#allocation2 + $0x188] sm:$0xff] }
 0xa92   :  { %4688 = vmatprep.subr.mxu0 %v11615_v26  ;;  %4759 = vmatprep.subr.mxu1 %v11618_v30  ;;  %v11645_v30 = vld [vmem:[#allocation8 + $0x120] sm:$0xff]  ;;  %v6952_v26 = vld [vmem:[#allocation2 + $0x1d8] sm:$0xff] }
 0xa93   :  { %4689 = vmatpush1.msra.mxu0 %v11621_v15  ;;  %4760 = vmatpush1.msra.mxu1 %v11624_v63  ;;  %v11639_v15 = vld [vmem:[#allocation8 + $0x128] sm:$0xff]  ;;  %v11642_v63 = vld [vmem:[#allocation8 + $0x138] sm:$0xff]  ;;  %14495 = vst [vmem:[#allocation34_spill] sm:$0xff] %v11645_v30 }
 0xa94   :  { %4690 = vmatprep.subr.mxu0 %v11627_v8  ;;  %4761 = vmatprep.subr.mxu1 %v11630_v56  ;;  %14493 = vst [vmem:[#allocation32_spill] sm:$0xff] %v11639_v15  ;;  %14494 = vst [vmem:[#allocation33_spill] sm:$0xff] %v11642_v63  ;;  %v4217_v8 = vadd.f32 1.0, %v5928_v60  ;;  %v11648_v56 = vld [vmem:[#allocation8 + $0x130] sm:$0xff] }
 0xa95   :  { %4691 = vmatpush1.msra.mxu0 %v11633_v22  ;;  %4762 = vmatpush1.msra.mxu1 %v11636_v38  ;;  %14496 = vst [vmem:[#allocation35_spill] sm:$0xff] %v11648_v56  ;;  %v11651_v22 = vld [vmem:[#allocation8 + $0x108] sm:$0xff]  ;;  %v11654_v38 = vld [vmem:[#allocation8 + $0x118] sm:$0xff]  ;;  %v11660_v60 = vld [vmem:[#allocation8 + $0x110] sm:$0xff] }
 0xa96   :  { %4692 = vmatprep.subr.mxu0 %v11639_v15  ;;  %4763 = vmatprep.subr.mxu1 %v11642_v63  ;;  %14497 = vst [vmem:[#allocation36_spill] sm:$0xff] %v11651_v22  ;;  %14498 = vst [vmem:[#allocation37_spill] sm:$0xff] %v11654_v38  ;;  %v11657_v15 = vld [vmem:[#allocation8 + $0x100] sm:$0xff]  ;;  %5931 = vrcp.f32 %v4217_v8  ;;  %v11685_v8 = vld [vmem:[#allocation8 + $0xd0] sm:$0xff] }
 0xa97   :  { %4693 = vmatpush1.msra.mxu0 %v11645_v30  ;;  %4764 = vmatpush1.msra.mxu1 %v11648_v56  ;;  %14499 = vst [vmem:[#allocation38_spill] sm:$0xff] %v11657_v15  ;;  %14500 = vst [vmem:[#allocation39_spill] sm:$0xff] %v11660_v60  ;;  %v11664_v30 = vld [vmem:[#allocation8 + $0xe8] sm:$0xff]  ;;  %v11667_v56 = vld [vmem:[#allocation8 + $0xf8] sm:$0xff] }
 0xa98   :  { %4694 = vmatprep.subr.mxu0 %v11651_v22  ;;  %4765 = vmatprep.subr.mxu1 %v11654_v38  ;;  %14501 = vst [vmem:[#allocation40_spill] sm:$0xff] %v11664_v30  ;;  %14502 = vst [vmem:[#allocation41_spill] sm:$0xff] %v11667_v56  ;;  %v11670_v38 = vld [vmem:[#allocation8 + $0xe0] sm:$0xff]  ;;  %v11679_v22 = vld [vmem:[#allocation8 + $0xd8] sm:$0xff] }
 0xa99   :  { %4695 = vmatpush1.msra.mxu0 %v11657_v15  ;;  %4766 = vmatpush1.msra.mxu1 %v11660_v60  ;;  %14503 = vst [vmem:[#allocation42_spill] sm:$0xff] %v11670_v38  ;;  %v11673_v15 = vld [vmem:[#allocation8 + $0xf0] sm:$0xff]  ;;  %v11676_v60 = vld [vmem:[#allocation8 + $0xc8] sm:$0xff]  ;;  %14506 = vst [vmem:[#allocation45_spill] sm:$0xff] %v11679_v22 }
 0xa9a   :  { %4696 = vmatprep.subr.mxu0 %v11664_v30  ;;  %4767 = vmatprep.subr.mxu1 %v11667_v56  ;;  %14504 = vst [vmem:[#allocation43_spill] sm:$0xff] %v11673_v15  ;;  %14505 = vst [vmem:[#allocation44_spill] sm:$0xff] %v11676_v60  ;;  %v11682_v30 = vld [vmem:[#allocation8 + $0xc0] sm:$0xff]  ;;  %v11736_v56 = vld [vmem:[#allocation8 + $0x28] sm:$0xff] }
 0xa9b   :  { %4697 = vmatpush1.msra.mxu0 %v11670_v38  ;;  %4768 = vmatpush1.msra.mxu1 %v11673_v15  ;;  %14507 = vst [vmem:[#allocation46_spill] sm:$0xff] %v11682_v30  ;;  %14508 = vst [vmem:[#allocation47_spill] sm:$0xff] %v11685_v8  ;;  %v11688_v38 = vld [vmem:[#allocation8 + $0xa8] sm:$0xff]  ;;  %v11691_v15 = vld [vmem:[#allocation8 + $0xb8] sm:$0xff] }
 0xa9c   :  { %4698 = vmatprep.subr.mxu0 %v11676_v60  ;;  %4769 = vmatprep.subr.mxu1 %v11679_v22  ;;  %14509 = vst [vmem:[#allocation48_spill] sm:$0xff] %v11688_v38  ;;  %14510 = vst [vmem:[#allocation49_spill] sm:$0xff] %v11691_v15  ;;  %v11694_v60 = vld [vmem:[#allocation8 + $0xa0] sm:$0xff]  ;;  %v11697_v22 = vld [vmem:[#allocation8 + $0xb0] sm:$0xff] }
 0xa9d   :  { %4699 = vmatpush1.msra.mxu0 %v11682_v30  ;;  %4770 = vmatpush1.msra.mxu1 %v11685_v8  ;;  %14511 = vst [vmem:[#allocation50_spill] sm:$0xff] %v11694_v60  ;;  %14512 = vst [vmem:[#allocation51_spill] sm:$0xff] %v11697_v22  ;;  %v11700_v30 = vld [vmem:[#allocation8 + $0x88] sm:$0xff]  ;;  %v11703_v8 = vld [vmem:[#allocation8 + $0x98] sm:$0xff] }
 0xa9e   :  { %4700 = vmatprep.subr.mxu0 %v11688_v38  ;;  %4771 = vmatprep.subr.mxu1 %v11691_v15  ;;  %14513 = vst [vmem:[#allocation52_spill] sm:$0xff] %v11700_v30  ;;  %14514 = vst [vmem:[#allocation53_spill] sm:$0xff] %v11703_v8  ;;  %v11706_v38 = vld [vmem:[#allocation8 + $0x80] sm:$0xff]  ;;  %v11709_v15 = vld [vmem:[#allocation8 + $0x90] sm:$0xff] }
 0xa9f   :  { %4701 = vmatpush1.msra.mxu0 %v11694_v60  ;;  %4772 = vmatpush1.msra.mxu1 %v11697_v22  ;;  %14515 = vst [vmem:[#allocation54_spill] sm:$0xff] %v11706_v38  ;;  %14516 = vst [vmem:[#allocation55_spill] sm:$0xff] %v11709_v15  ;;  %v11712_v60 = vld [vmem:[#allocation8 + $0x68] sm:$0xff]  ;;  %v11715_v22 = vld [vmem:[#allocation8 + $0x78] sm:$0xff] }
 0xaa0   :  { %4702 = vmatprep.subr.mxu0 %v11700_v30  ;;  %4773 = vmatprep.subr.mxu1 %v11703_v8  ;;  %14517 = vst [vmem:[#allocation56_spill] sm:$0xff] %v11712_v60  ;;  %14518 = vst [vmem:[#allocation57_spill] sm:$0xff] %v11715_v22  ;;  %v11718_v30 = vld [vmem:[#allocation8 + $0x60] sm:$0xff]  ;;  %v11721_v8 = vld [vmem:[#allocation8 + $0x70] sm:$0xff] }
 0xaa1   :  { %4703 = vmatpush1.msra.mxu0 %v11706_v38  ;;  %4774 = vmatpush1.msra.mxu1 %v11709_v15  ;;  %14519 = vst [vmem:[#allocation58_spill] sm:$0xff] %v11718_v30  ;;  %14520 = vst [vmem:[#allocation59_spill] sm:$0xff] %v11721_v8  ;;  %v11724_v38 = vld [vmem:[#allocation8 + $0x48] sm:$0xff]  ;;  %v11727_v15 = vld [vmem:[#allocation8 + $0x58] sm:$0xff] }
 0xaa2   :  { %4704 = vmatprep.subr.mxu0 %v11712_v60  ;;  %4775 = vmatprep.subr.mxu1 %v11715_v22  ;;  %14521 = vst [vmem:[#allocation60_spill] sm:$0xff] %v11724_v38  ;;  %14522 = vst [vmem:[#allocation61_spill] sm:$0xff] %v11727_v15  ;;  %v11730_v60 = vld [vmem:[#allocation8 + $0x40] sm:$0xff]  ;;  %v11733_v22 = vld [vmem:[#allocation8 + $0x50] sm:$0xff] }
 0xaa3   :  { %4705 = vmatpush1.msra.mxu0 %v11718_v30  ;;  %4776 = vmatpush1.msra.mxu1 %v11721_v8  ;;  %14523 = vst [vmem:[#allocation62_spill] sm:$0xff] %v11730_v60  ;;  %14524 = vst [vmem:[#allocation63_spill] sm:$0xff] %v11733_v22  ;;  %v5930_v30 = vpop.eup %5929  ;;  %v11739_v8 = vld [vmem:[#allocation8 + $0x38] sm:$0xff]  ;;  %v11748_v63 = vld [vmem:[#allocation8 + $0x8] sm:$0xff] }
 0xaa4   :  { %4706 = vmatprep.subr.mxu0 %v11724_v38  ;;  %4777 = vmatprep.subr.mxu1 %v11727_v15  ;;  %14525 = vst [vmem:[#allocation64_spill] sm:$0xff] %v11736_v56  ;;  %14526 = vst [vmem:[#allocation65_spill] sm:$0xff] %v11739_v8  ;;  %v11742_v38 = vld [vmem:[#allocation8 + $0x20] sm:$0xff]  ;;  %v11745_v15 = vld [vmem:[#allocation8 + $0x30] sm:$0xff] }
 0xaa5   :  { %4707 = vmatpush1.msra.mxu0 %v11730_v60  ;;  %4778 = vmatpush1.msra.mxu1 %v11733_v22  ;;  %14527 = vst [vmem:[#allocation66_spill] sm:$0xff] %v11742_v38  ;;  %14528 = vst [vmem:[#allocation67_spill] sm:$0xff] %v11745_v15  ;;  %v5932_v60 = vpop.eup %5931  ;;  %v11751_v22 = vld [vmem:[#allocation8 + $0x18] sm:$0xff] }
 0xaa6   :  { %4708 = vmatprep.subr.mxu0 %v11736_v56  ;;  %4779 = vmatprep.subr.mxu1 %v11739_v8  ;;  %14529 = vst [vmem:[#allocation68_spill] sm:$0xff] %v11748_v63  ;;  %14530 = vst [vmem:[#allocation69_spill] sm:$0xff] %v11751_v22  ;;  %v11754_v56 = vld [vmem:[#allocation8] sm:$0xff]  ;;  %v11758_v8 = vld [vmem:[#allocation8 + $0x10] sm:$0xff] }
 0xaa7   :  { %4709 = vmatpush1.msra.mxu0 %v11742_v38  ;;  %4780 = vmatpush1.msra.mxu1 %v11745_v15  ;;  %14531 = vst [vmem:[#allocation70_spill] sm:$0xff] %v11754_v56  ;;  %v4224_v38 = vmul.f32 %v5932_v60, %v5930_v30  ;;  %14532 = vst [vmem:[#allocation71_spill] sm:$0xff] %v11758_v8  ;;  %v6948_v15 = vld [vmem:[#allocation2 + $0x1f8] sm:$0xff]  ;;  %v6949_v30 = vld [vmem:[#allocation2 + $0x1c0] sm:$0xff] }
 0xaa8   :  { %4710 = vmatprep.subr.mxu0 %v11748_v63  ;;  %4781 = vmatprep.subr.mxu1 %v11751_v22  ;;  %v6945_v63 = vld [vmem:[#allocation2 + $0x1e8] sm:$0xff]  ;;  %v6946_v22 = vld [vmem:[#allocation2 + $0x1e0] sm:$0xff]  ;;  %v6950_v60 = vld [vmem:[#allocation2 + $0x1f0] sm:$0xff] }
 0xaa9   :  { %4711 = vmatpush1.msra.mxu0 %v11754_v56  ;;  %4744 = vmatprep.mubr.f32.mxu0 %v12905_v24  ;;  %v6947_v56 = vld [vmem:[#allocation2 + $0x1c8] sm:$0xff] }
 0xaaa   :  { %4782 = vmatpush1.msra.mxu1 %v11758_v8  ;;  %4815 = vmatprep.mubr.f32.mxu1 %v12905_v24  ;;  %v6951_v8 = vld [vmem:[#allocation2 + $0x1a8] sm:$0xff] }
 0xaab   :  { %4745 = vmatmul.mubr.f32.vlgmr.msra.gmra.mxu0 %v4224_v38  ;;  %4816 = vmatmul.mubr.f32.vlgmr.msra.gmra.mxu1 %v4224_v38  ;;  %v6953_v38 = vld [vmem:[#allocation2 + $0x1a0] sm:$0xff] }
 0xaac   :  { %4856 = vmatprep.subr.mxu0 %v6945_v63  ;;  %4920 = vmatprep.mubr.f32.mxu0 %v11444_v52  ;;  %v6954_v63 = vld [vmem:[#allocation2 + $0x1d0] sm:$0xff] }
 0xaad   :  { %4857 = vmatpush1.msra.mxu0 %v6946_v22  ;;  %4991 = vmatprep.mubr.f32.mxu1 %v11444_v52  ;;  %v6956_v22 = vld [vmem:[#allocation2 + $0x1b8] sm:$0xff]  ;;  %v6957_v52 = vld [vmem:[#allocation2 + $0x180] sm:$0xff] }
 0xaae   :  { %4858 = vmatprep.subr.mxu0 %v6947_v56  ;;  %4927 = vmatprep.subr.mxu1 %v6948_v15  ;;  %v6958_v56 = vld [vmem:[#allocation2 + $0x1b0] sm:$0xff]  ;;  %v6959_v15 = vld [vmem:[#allocation2 + $0x168] sm:$0xff] }
 0xaaf   :  { %4859 = vmatpush1.msra.mxu0 %v6949_v30  ;;  %4928 = vmatpush1.msra.mxu1 %v6950_v60  ;;  %v6960_v30 = vld [vmem:[#allocation2 + $0x198] sm:$0xff]  ;;  %v6961_v60 = vld [vmem:[#allocation2 + $0x160] sm:$0xff] }
 0xab0   :  { %4860 = vmatprep.subr.mxu0 %v6951_v8  ;;  %4929 = vmatprep.subr.mxu1 %v6952_v26  ;;  %v6962_v8 = vld [vmem:[#allocation2 + $0x190] sm:$0xff]  ;;  %v6963_v26 = vld [vmem:[#allocation2 + $0x148] sm:$0xff] }
 0xab1   :  { %4861 = vmatpush1.msra.mxu0 %v6953_v38  ;;  %4930 = vmatpush1.msra.mxu1 %v6954_v63  ;;  %v6964_v38 = vld [vmem:[#allocation2 + $0x178] sm:$0xff]  ;;  %v6965_v63 = vld [vmem:[#allocation2 + $0x140] sm:$0xff] }
 0xab2   :  { %4862 = vmatprep.subr.mxu0 %v6955_v35  ;;  %4931 = vmatprep.subr.mxu1 %v6956_v22  ;;  %v6966_v35 = vld [vmem:[#allocation2 + $0x170] sm:$0xff]  ;;  %v6967_v22 = vld [vmem:[#allocation2 + $0x128] sm:$0xff] }
 0xab3   :  { %4863 = vmatpush1.msra.mxu0 %v6957_v52  ;;  %4932 = vmatpush1.msra.mxu1 %v6958_v56  ;;  %v6968_v52 = vld [vmem:[#allocation2 + $0x158] sm:$0xff]  ;;  %v6969_v56 = vld [vmem:[#allocation2 + $0x120] sm:$0xff] }
 0xab4   :  { %4864 = vmatprep.subr.mxu0 %v6959_v15  ;;  %4933 = vmatprep.subr.mxu1 %v6960_v30  ;;  %v6970_v15 = vld [vmem:[#allocation2 + $0x150] sm:$0xff]  ;;  %v6971_v30 = vld [vmem:[#allocation2 + $0x108] sm:$0xff] }
 0xab5   :  { %4865 = vmatpush1.msra.mxu0 %v6961_v60  ;;  %4934 = vmatpush1.msra.mxu1 %v6962_v8  ;;  %v6972_v60 = vld [vmem:[#allocation2 + $0x138] sm:$0xff]  ;;  %v6973_v8 = vld [vmem:[#allocation2 + $0x100] sm:$0xff] }
 0xab6   :  { %4866 = vmatprep.subr.mxu0 %v6963_v26  ;;  %4935 = vmatprep.subr.mxu1 %v6964_v38  ;;  %v6974_v26 = vld [vmem:[#allocation2 + $0x130] sm:$0xff]  ;;  %v6975_v38 = vld [vmem:[#allocation2 + $0xe8] sm:$0xff] }
 0xab7   :  { %4867 = vmatpush1.msra.mxu0 %v6965_v63  ;;  %4936 = vmatpush1.msra.mxu1 %v6966_v35  ;;  %v6976_v63 = vld [vmem:[#allocation2 + $0x118] sm:$0xff]  ;;  %v6977_v35 = vld [vmem:[#allocation2 + $0xe0] sm:$0xff] }
 0xab8   :  { %4868 = vmatprep.subr.mxu0 %v6967_v22  ;;  %4937 = vmatprep.subr.mxu1 %v6968_v52  ;;  %v6978_v22 = vld [vmem:[#allocation2 + $0x110] sm:$0xff]  ;;  %v6979_v52 = vld [vmem:[#allocation2 + $0xc8] sm:$0xff] }
 0xab9   :  { %4869 = vmatpush1.msra.mxu0 %v6969_v56  ;;  %4938 = vmatpush1.msra.mxu1 %v6970_v15  ;;  %v6980_v56 = vld [vmem:[#allocation2 + $0xf8] sm:$0xff]  ;;  %v6981_v15 = vld [vmem:[#allocation2 + $0xc0] sm:$0xff] }
 0xaba   :  { %4870 = vmatprep.subr.mxu0 %v6971_v30  ;;  %4939 = vmatprep.subr.mxu1 %v6972_v60  ;;  %v6982_v30 = vld [vmem:[#allocation2 + $0xf0] sm:$0xff]  ;;  %v6983_v60 = vld [vmem:[#allocation2 + $0xa8] sm:$0xff] }
 0xabb   :  { %4871 = vmatpush1.msra.mxu0 %v6973_v8  ;;  %4940 = vmatpush1.msra.mxu1 %v6974_v26  ;;  %v6984_v8 = vld [vmem:[#allocation2 + $0xd8] sm:$0xff]  ;;  %v6985_v26 = vld [vmem:[#allocation2 + $0xa0] sm:$0xff] }
 0xabc   :  { %4872 = vmatprep.subr.mxu0 %v6975_v38  ;;  %4941 = vmatprep.subr.mxu1 %v6976_v63  ;;  %v6986_v38 = vld [vmem:[#allocation2 + $0xd0] sm:$0xff]  ;;  %v6987_v63 = vld [vmem:[#allocation2 + $0x88] sm:$0xff] }
 0xabd   :  { %4873 = vmatpush1.msra.mxu0 %v6977_v35  ;;  %4942 = vmatpush1.msra.mxu1 %v6978_v22  ;;  %v6988_v35 = vld [vmem:[#allocation2 + $0xb8] sm:$0xff]  ;;  %v6989_v22 = vld [vmem:[#allocation2 + $0x80] sm:$0xff] }
 0xabe   :  { %4874 = vmatprep.subr.mxu0 %v6979_v52  ;;  %4943 = vmatprep.subr.mxu1 %v6980_v56  ;;  %v6990_v52 = vld [vmem:[#allocation2 + $0xb0] sm:$0xff]  ;;  %v6991_v56 = vld [vmem:[#allocation2 + $0x68] sm:$0xff] }
 0xabf   :  { %4875 = vmatpush1.msra.mxu0 %v6981_v15  ;;  %4944 = vmatpush1.msra.mxu1 %v6982_v30  ;;  %v6992_v15 = vld [vmem:[#allocation2 + $0x98] sm:$0xff]  ;;  %v6993_v30 = vld [vmem:[#allocation2 + $0x60] sm:$0xff] }
 0xac0   :  { %4876 = vmatprep.subr.mxu0 %v6983_v60  ;;  %4945 = vmatprep.subr.mxu1 %v6984_v8  ;;  %v6994_v60 = vld [vmem:[#allocation2 + $0x90] sm:$0xff]  ;;  %v6995_v8 = vld [vmem:[#allocation2 + $0x48] sm:$0xff] }
 0xac1   :  { %4877 = vmatpush1.msra.mxu0 %v6985_v26  ;;  %4946 = vmatpush1.msra.mxu1 %v6986_v38  ;;  %v6996_v26 = vld [vmem:[#allocation2 + $0x78] sm:$0xff]  ;;  %v6997_v38 = vld [vmem:[#allocation2 + $0x40] sm:$0xff] }
 0xac2   :  { %4878 = vmatprep.subr.mxu0 %v6987_v63  ;;  %4947 = vmatprep.subr.mxu1 %v6988_v35  ;;  %v6998_v63 = vld [vmem:[#allocation2 + $0x70] sm:$0xff]  ;;  %v6999_v35 = vld [vmem:[#allocation2 + $0x28] sm:$0xff] }
 0xac3   :  { %4879 = vmatpush1.msra.mxu0 %v6989_v22  ;;  %4948 = vmatpush1.msra.mxu1 %v6990_v52  ;;  %v7000_v22 = vld [vmem:[#allocation2 + $0x58] sm:$0xff]  ;;  %v7001_v52 = vld [vmem:[#allocation2 + $0x20] sm:$0xff] }
 0xac4   :  { %4880 = vmatprep.subr.mxu0 %v6991_v56  ;;  %4949 = vmatprep.subr.mxu1 %v6992_v15  ;;  %v7002_v56 = vld [vmem:[#allocation2 + $0x50] sm:$0xff]  ;;  %v7003_v15 = vld [vmem:[#allocation2 + $0x8] sm:$0xff] }
 0xac5   :  { %4881 = vmatpush1.msra.mxu0 %v6993_v30  ;;  %4950 = vmatpush1.msra.mxu1 %v6994_v60  ;;  %v7004_v30 = vld [vmem:[#allocation2 + $0x38] sm:$0xff]  ;;  %v7005_v60 = vld [vmem:[#allocation2] sm:$0xff] }
 0xac6   :  { %4882 = vmatprep.subr.mxu0 %v6995_v8  ;;  %4951 = vmatprep.subr.mxu1 %v6996_v26  ;;  %v7006_v8 = vld [vmem:[#allocation2 + $0x30] sm:$0xff]  ;;  %v7007_v26 = vld [vmem:[#allocation2 + $0x3e8] sm:$0xff] }
 0xac7   :  { %4883 = vmatpush1.msra.mxu0 %v6997_v38  ;;  %4952 = vmatpush1.msra.mxu1 %v6998_v63  ;;  %v7008_v38 = vld [vmem:[#allocation2 + $0x18] sm:$0xff]  ;;  %v7009_v63 = vld [vmem:[#allocation2 + $0x3e0] sm:$0xff] }
 0xac8   :  { %4884 = vmatprep.subr.mxu0 %v6999_v35  ;;  %4953 = vmatprep.subr.mxu1 %v7000_v22  ;;  %v7010_v35 = vld [vmem:[#allocation2 + $0x10] sm:$0xff]  ;;  %v7011_v22 = vld [vmem:[#allocation2 + $0x3c8] sm:$0xff] }
 0xac9   :  { %4885 = vmatpush1.msra.mxu0 %v7001_v52  ;;  %4954 = vmatpush1.msra.mxu1 %v7002_v56  ;;  %v7012_v52 = vld [vmem:[#allocation2 + $0x3f8] sm:$0xff]  ;;  %v7013_v56 = vld [vmem:[#allocation2 + $0x3c0] sm:$0xff] }
 0xaca   :  { %4886 = vmatprep.subr.mxu0 %v7003_v15  ;;  %4955 = vmatprep.subr.mxu1 %v7004_v30  ;;  %v7014_v15 = vld [vmem:[#allocation2 + $0x3f0] sm:$0xff]  ;;  %v7015_v30 = vld [vmem:[#allocation2 + $0x3a8] sm:$0xff] }
 0xacb   :  { %4887 = vmatpush1.msra.mxu0 %v7005_v60  ;;  %4956 = vmatpush1.msra.mxu1 %v7006_v8  ;;  %v7016_v60 = vld [vmem:[#allocation2 + $0x3d8] sm:$0xff]  ;;  %v7017_v8 = vld [vmem:[#allocation2 + $0x3a0] sm:$0xff] }
 0xacc   :  { %4888 = vmatprep.subr.mxu0 %v7007_v26  ;;  %4957 = vmatprep.subr.mxu1 %v7008_v38  ;;  %v7018_v26 = vld [vmem:[#allocation2 + $0x3d0] sm:$0xff]  ;;  %v7019_v38 = vld [vmem:[#allocation2 + $0x388] sm:$0xff] }
 0xacd   :  { %4889 = vmatpush2.msra.mxu0 %v7009_v63  ;;  %4958 = vmatpush1.msra.mxu1 %v7010_v35  ;;  %v7020_v63 = vld [vmem:[#allocation2 + $0x3b8] sm:$0xff]  ;;  %v7021_v35 = vld [vmem:[#allocation2 + $0x380] sm:$0xff] }
 0xace   :  { %4890 = vmatprep.subr.mxu0 %v7011_v22  ;;  %4959 = vmatprep.subr.mxu1 %v7012_v52  ;;  %v7022_v22 = vld [vmem:[#allocation2 + $0x3b0] sm:$0xff]  ;;  %v7023_v52 = vld [vmem:[#allocation2 + $0x368] sm:$0xff] }
 0xacf   :  { %4891 = vmatpush2.msra.mxu0 %v7013_v56  ;;  %4960 = vmatpush2.msra.mxu1 %v7014_v15  ;;  %v7024_v56 = vld [vmem:[#allocation2 + $0x398] sm:$0xff]  ;;  %v7025_v15 = vld [vmem:[#allocation2 + $0x360] sm:$0xff] }
 0xad0   :  { %4892 = vmatprep.subr.mxu0 %v7015_v30  ;;  %4961 = vmatprep.subr.mxu1 %v7016_v60  ;;  %v7026_v30 = vld [vmem:[#allocation2 + $0x390] sm:$0xff]  ;;  %v7027_v60 = vld [vmem:[#allocation2 + $0x348] sm:$0xff] }
 0xad1   :  { %4893 = vmatpush2.msra.mxu0 %v7017_v8  ;;  %4962 = vmatpush2.msra.mxu1 %v7018_v26  ;;  %v7028_v8 = vld [vmem:[#allocation2 + $0x378] sm:$0xff]  ;;  %v7029_v26 = vld [vmem:[#allocation2 + $0x340] sm:$0xff] }
 0xad2   :  { %4894 = vmatprep.subr.mxu0 %v7019_v38  ;;  %4963 = vmatprep.subr.mxu1 %v7020_v63  ;;  %v7030_v38 = vld [vmem:[#allocation2 + $0x370] sm:$0xff]  ;;  %v7031_v63 = vld [vmem:[#allocation2 + $0x328] sm:$0xff] }
 0xad3   :  { %4895 = vmatpush2.msra.mxu0 %v7021_v35  ;;  %4964 = vmatpush2.msra.mxu1 %v7022_v22  ;;  %v7032_v35 = vld [vmem:[#allocation2 + $0x358] sm:$0xff]  ;;  %v7033_v22 = vld [vmem:[#allocation2 + $0x320] sm:$0xff] }
 0xad4   :  { %4896 = vmatprep.subr.mxu0 %v7023_v52  ;;  %4965 = vmatprep.subr.mxu1 %v7024_v56  ;;  %v7034_v52 = vld [vmem:[#allocation2 + $0x350] sm:$0xff]  ;;  %v7035_v56 = vld [vmem:[#allocation2 + $0x308] sm:$0xff] }
 0xad5   :  { %4897 = vmatpush2.msra.mxu0 %v7025_v15  ;;  %4966 = vmatpush2.msra.mxu1 %v7026_v30  ;;  %v7036_v15 = vld [vmem:[#allocation2 + $0x338] sm:$0xff]  ;;  %v7037_v30 = vld [vmem:[#allocation2 + $0x300] sm:$0xff] }
 0xad6   :  { %4898 = vmatprep.subr.mxu0 %v7027_v60  ;;  %4967 = vmatprep.subr.mxu1 %v7028_v8  ;;  %v7038_v60 = vld [vmem:[#allocation2 + $0x330] sm:$0xff]  ;;  %v7039_v8 = vld [vmem:[#allocation2 + $0x2e8] sm:$0xff] }
 0xad7   :  { %4899 = vmatpush2.msra.mxu0 %v7029_v26  ;;  %4968 = vmatpush2.msra.mxu1 %v7030_v38  ;;  %v7040_v26 = vld [vmem:[#allocation2 + $0x318] sm:$0xff]  ;;  %v7041_v38 = vld [vmem:[#allocation2 + $0x2e0] sm:$0xff] }
 0xad8   :  { %4900 = vmatprep.subr.mxu0 %v7031_v63  ;;  %4969 = vmatprep.subr.mxu1 %v7032_v35  ;;  %v7042_v63 = vld [vmem:[#allocation2 + $0x310] sm:$0xff]  ;;  %v7043_v35 = vld [vmem:[#allocation2 + $0x2c8] sm:$0xff] }
 0xad9   :  { %4901 = vmatpush2.msra.mxu0 %v7033_v22  ;;  %4970 = vmatpush2.msra.mxu1 %v7034_v52  ;;  %v7044_v22 = vld [vmem:[#allocation2 + $0x2f8] sm:$0xff]  ;;  %v7045_v52 = vld [vmem:[#allocation2 + $0x2c0] sm:$0xff] }
 0xada   :  { %4902 = vmatprep.subr.mxu0 %v7035_v56  ;;  %4971 = vmatprep.subr.mxu1 %v7036_v15  ;;  %v7046_v56 = vld [vmem:[#allocation2 + $0x2f0] sm:$0xff]  ;;  %v7047_v15 = vld [vmem:[#allocation2 + $0x2a8] sm:$0xff] }
 0xadb   :  { %4903 = vmatpush2.msra.mxu0 %v7037_v30  ;;  %4972 = vmatpush2.msra.mxu1 %v7038_v60  ;;  %v7048_v30 = vld [vmem:[#allocation2 + $0x2d8] sm:$0xff]  ;;  %v7049_v60 = vld [vmem:[#allocation2 + $0x2a0] sm:$0xff] }
 0xadc   :  { %4904 = vmatprep.subr.mxu0 %v7039_v8  ;;  %4973 = vmatprep.subr.mxu1 %v7040_v26  ;;  %v7050_v8 = vld [vmem:[#allocation2 + $0x2d0] sm:$0xff]  ;;  %v7051_v26 = vld [vmem:[#allocation2 + $0x288] sm:$0xff] }
 0xadd   :  { %4905 = vmatpush2.msra.mxu0 %v7041_v38  ;;  %4974 = vmatpush2.msra.mxu1 %v7042_v63  ;;  %v7052_v38 = vld [vmem:[#allocation2 + $0x2b8] sm:$0xff]  ;;  %v7053_v63 = vld [vmem:[#allocation2 + $0x280] sm:$0xff] }
 0xade   :  { %4906 = vmatprep.subr.mxu0 %v7043_v35  ;;  %4975 = vmatprep.subr.mxu1 %v7044_v22  ;;  %v7054_v35 = vld [vmem:[#allocation2 + $0x2b0] sm:$0xff]  ;;  %v7055_v22 = vld [vmem:[#allocation2 + $0x268] sm:$0xff] }
 0xadf   :  { %4907 = vmatpush2.msra.mxu0 %v7045_v52  ;;  %4976 = vmatpush2.msra.mxu1 %v7046_v56  ;;  %v7056_v52 = vld [vmem:[#allocation2 + $0x298] sm:$0xff]  ;;  %v7057_v56 = vld [vmem:[#allocation2 + $0x260] sm:$0xff] }
 0xae0   :  { %4908 = vmatprep.subr.mxu0 %v7047_v15  ;;  %4977 = vmatprep.subr.mxu1 %v7048_v30  ;;  %v7058_v15 = vld [vmem:[#allocation2 + $0x290] sm:$0xff]  ;;  %v7059_v30 = vld [vmem:[#allocation2 + $0x248] sm:$0xff] }
 0xae1   :  { %4909 = vmatpush2.msra.mxu0 %v7049_v60  ;;  %4978 = vmatpush2.msra.mxu1 %v7050_v8  ;;  %v7060_v60 = vld [vmem:[#allocation2 + $0x278] sm:$0xff]  ;;  %v7061_v8 = vld [vmem:[#allocation2 + $0x240] sm:$0xff] }
 0xae2   :  { %4910 = vmatprep.subr.mxu0 %v7051_v26  ;;  %4979 = vmatprep.subr.mxu1 %v7052_v38  ;;  %v7062_v26 = vld [vmem:[#allocation2 + $0x270] sm:$0xff]  ;;  %v7063_v38 = vld [vmem:[#allocation2 + $0x228] sm:$0xff] }
 0xae3   :  { %4911 = vmatpush2.msra.mxu0 %v7053_v63  ;;  %4980 = vmatpush2.msra.mxu1 %v7054_v35  ;;  %v7064_v63 = vld [vmem:[#allocation2 + $0x258] sm:$0xff]  ;;  %v7065_v35 = vld [vmem:[#allocation2 + $0x220] sm:$0xff] }
 0xae4   :  { %4912 = vmatprep.subr.mxu0 %v7055_v22  ;;  %4981 = vmatprep.subr.mxu1 %v7056_v52  ;;  %v5656_v22 = vld [vmem:[%s11964_s0 + $0x1c] sm:$0xf]  ;;  %v7066_v52 = vld [vmem:[#allocation2 + $0x250] sm:$0xff] }
 0xae5   :  { %4913 = vmatpush2.msra.mxu0 %v7057_v56  ;;  %4982 = vmatpush2.msra.mxu1 %v7058_v15  ;;  %v7067_v56 = vld [vmem:[#allocation2 + $0x208] sm:$0xff]  ;;  %v7068_v15 = vld [vmem:[#allocation2 + $0x238] sm:$0xff] }
 0xae6   :  { %4914 = vmatprep.subr.mxu0 %v7059_v30  ;;  %4983 = vmatprep.subr.mxu1 %v7060_v60  ;;  %v7069_v30 = vld [vmem:[#allocation2 + $0x200] sm:$0xff]  ;;  %v7070_v60 = vld [vmem:[#allocation2 + $0x230] sm:$0xff] }
 0xae7   :  { %4915 = vmatpush2.msra.mxu0 %v7061_v8  ;;  %4984 = vmatpush2.msra.mxu1 %v7062_v26  ;;  %v7071_v8 = vld [vmem:[#allocation2 + $0x218] sm:$0xff]  ;;  %v7072_v26 = vld [vmem:[#allocation2 + $0x210] sm:$0xff] }
 0xae8   :  { %4916 = vmatprep.subr.mxu0 %v7063_v38  ;;  %4985 = vmatprep.subr.mxu1 %v7064_v63  ;;  %v7073_v38 = vld [vmem:[#allocation7 + $0x1e8] sm:$0xff]  ;;  %v7074_v63 = vld [vmem:[#allocation7 + $0x1f8] sm:$0xff] }
 0xae9   :  { %4917 = vmatpush2.msra.mxu0 %v7065_v35  ;;  %4986 = vmatpush2.msra.mxu1 %v7066_v52  ;;  %v7075_v35 = vld [vmem:[#allocation7 + $0x1e0] sm:$0xff]  ;;  %v7076_v52 = vld [vmem:[#allocation7 + $0x1f0] sm:$0xff] }
 0xaea   :  { %4918 = vmatprep.subr.mxu0 %v7067_v56  ;;  %4987 = vmatprep.subr.mxu1 %v7068_v15  ;;  %v7077_v56 = vld [vmem:[#allocation7 + $0x1c8] sm:$0xff]  ;;  %v7078_v15 = vld [vmem:[#allocation7 + $0x1d8] sm:$0xff] }
 0xaeb   :  { %4919 = vmatpush2.msra.mxu0 %v7069_v30  ;;  %4988 = vmatpush2.msra.mxu1 %v7070_v60  ;;  %v7079_v30 = vld [vmem:[#allocation7 + $0x1c0] sm:$0xff]  ;;  %v7080_v60 = vld [vmem:[#allocation7 + $0x1d0] sm:$0xff] }
 0xaec   :  { %4921 = vmatmul.mubr.f32.vlgmr.msra.gmra.mxu0 %v5656_v22  ;;  %4989 = vmatprep.subr.mxu1 %v7071_v8  ;;  %v7081_v8 = vld [vmem:[#allocation7 + $0x1a8] sm:$0xff] }
 0xaed   :  { %4990 = vmatpush2.msra.mxu1 %v7072_v26  ;;  %5025 = vmatprep.subr.mxu0 %v7073_v38  ;;  %v7082_v26 = vld [vmem:[#allocation7 + $0x1b8] sm:$0xff]  ;;  %v7083_v38 = vld [vmem:[#allocation7 + $0x1a0] sm:$0xff] }
 0xaee   :  { %4992 = vmatmul.mubr.f32.vlgmr.msra.gmra.mxu1 %v5656_v22  ;;  %5096 = vmatprep.subr.mxu1 %v7074_v63  ;;  %v7084_v22 = vld [vmem:[#allocation7 + $0x1b0] sm:$0xff]  ;;  %v7085_v63 = vld [vmem:[#allocation7 + $0x188] sm:$0xff] }
 0xaef   :  { %5026 = vmatpush1.msra.mxu0 %v7075_v35  ;;  %5097 = vmatpush1.msra.mxu1 %v7076_v52  ;;  %v7086_v35 = vld [vmem:[#allocation7 + $0x198] sm:$0xff]  ;;  %v7087_v52 = vld [vmem:[#allocation7 + $0x180] sm:$0xff] }
 0xaf0   :  { %5027 = vmatprep.subr.mxu0 %v7077_v56  ;;  %5098 = vmatprep.subr.mxu1 %v7078_v15  ;;  %v7088_v56 = vld [vmem:[#allocation7 + $0x190] sm:$0xff]  ;;  %v7089_v15 = vld [vmem:[#allocation7 + $0x168] sm:$0xff] }
 0xaf1   :  { %5028 = vmatpush1.msra.mxu0 %v7079_v30  ;;  %5099 = vmatpush1.msra.mxu1 %v7080_v60  ;;  %v7090_v30 = vld [vmem:[#allocation7 + $0x178] sm:$0xff]  ;;  %v7091_v60 = vld [vmem:[#allocation7 + $0x160] sm:$0xff] }
 0xaf2   :  { %5029 = vmatprep.subr.mxu0 %v7081_v8  ;;  %5100 = vmatprep.subr.mxu1 %v7082_v26  ;;  %v7092_v8 = vld [vmem:[#allocation7 + $0x170] sm:$0xff]  ;;  %v7093_v26 = vld [vmem:[#allocation7 + $0x148] sm:$0xff] }
 0xaf3   :  { %5030 = vmatpush1.msra.mxu0 %v7083_v38  ;;  %5101 = vmatpush1.msra.mxu1 %v7084_v22  ;;  %v7094_v38 = vld [vmem:[#allocation7 + $0x158] sm:$0xff]  ;;  %v7095_v22 = vld [vmem:[#allocation7 + $0x140] sm:$0xff] }
 0xaf4   :  { %5031 = vmatprep.subr.mxu0 %v7085_v63  ;;  %5102 = vmatprep.subr.mxu1 %v7086_v35  ;;  %v7096_v63 = vld [vmem:[#allocation7 + $0x150] sm:$0xff]  ;;  %v7097_v35 = vld [vmem:[#allocation7 + $0x128] sm:$0xff] }
 0xaf5   :  { %5032 = vmatpush1.msra.mxu0 %v7087_v52  ;;  %5103 = vmatpush1.msra.mxu1 %v7088_v56  ;;  %v7098_v52 = vld [vmem:[#allocation7 + $0x138] sm:$0xff]  ;;  %v7099_v56 = vld [vmem:[#allocation7 + $0x120] sm:$0xff] }
 0xaf6   :  { %5033 = vmatprep.subr.mxu0 %v7089_v15  ;;  %5104 = vmatprep.subr.mxu1 %v7090_v30  ;;  %v7100_v15 = vld [vmem:[#allocation7 + $0x130] sm:$0xff]  ;;  %v7101_v30 = vld [vmem:[#allocation7 + $0x108] sm:$0xff] }
 0xaf7   :  { %5034 = vmatpush1.msra.mxu0 %v7091_v60  ;;  %5105 = vmatpush1.msra.mxu1 %v7092_v8  ;;  %v7102_v60 = vld [vmem:[#allocation7 + $0x118] sm:$0xff]  ;;  %v7103_v8 = vld [vmem:[#allocation7 + $0x100] sm:$0xff] }
 0xaf8   :  { %5035 = vmatprep.subr.mxu0 %v7093_v26  ;;  %5106 = vmatprep.subr.mxu1 %v7094_v38  ;;  %v7104_v26 = vld [vmem:[#allocation7 + $0x110] sm:$0xff]  ;;  %v7105_v38 = vld [vmem:[#allocation7 + $0xe8] sm:$0xff] }
 0xaf9   :  { %5036 = vmatpush1.msra.mxu0 %v7095_v22  ;;  %5107 = vmatpush1.msra.mxu1 %v7096_v63  ;;  %v7106_v22 = vld [vmem:[#allocation7 + $0xf8] sm:$0xff]  ;;  %v7107_v63 = vld [vmem:[#allocation7 + $0xe0] sm:$0xff] }
 0xafa   :  { %5037 = vmatprep.subr.mxu0 %v7097_v35  ;;  %5108 = vmatprep.subr.mxu1 %v7098_v52  ;;  %v7108_v35 = vld [vmem:[#allocation7 + $0xf0] sm:$0xff]  ;;  %v7109_v52 = vld [vmem:[#allocation7 + $0xc8] sm:$0xff] }
 0xafb   :  { %5038 = vmatpush1.msra.mxu0 %v7099_v56  ;;  %5109 = vmatpush1.msra.mxu1 %v7100_v15  ;;  %v7110_v56 = vld [vmem:[#allocation7 + $0xd8] sm:$0xff]  ;;  %v7111_v15 = vld [vmem:[#allocation7 + $0xc0] sm:$0xff] }
 0xafc   :  { %5039 = vmatprep.subr.mxu0 %v7101_v30  ;;  %5110 = vmatprep.subr.mxu1 %v7102_v60  ;;  %v7112_v30 = vld [vmem:[#allocation7 + $0xd0] sm:$0xff]  ;;  %v7113_v60 = vld [vmem:[#allocation7 + $0xa8] sm:$0xff] }
 0xafd   :  { %5040 = vmatpush1.msra.mxu0 %v7103_v8  ;;  %5111 = vmatpush1.msra.mxu1 %v7104_v26  ;;  %v7114_v8 = vld [vmem:[#allocation7 + $0xb8] sm:$0xff]  ;;  %v7115_v26 = vld [vmem:[#allocation7 + $0xa0] sm:$0xff] }
 0xafe   :  { %5041 = vmatprep.subr.mxu0 %v7105_v38  ;;  %5112 = vmatprep.subr.mxu1 %v7106_v22  ;;  %v7116_v38 = vld [vmem:[#allocation7 + $0xb0] sm:$0xff]  ;;  %v7117_v22 = vld [vmem:[#allocation7 + $0x88] sm:$0xff] }
 0xaff   :  { %5042 = vmatpush1.msra.mxu0 %v7107_v63  ;;  %5113 = vmatpush1.msra.mxu1 %v7108_v35  ;;  %v7118_v63 = vld [vmem:[#allocation7 + $0x98] sm:$0xff]  ;;  %v7119_v35 = vld [vmem:[#allocation7 + $0x80] sm:$0xff] }
 0xb00   :  { %5043 = vmatprep.subr.mxu0 %v7109_v52  ;;  %5114 = vmatprep.subr.mxu1 %v7110_v56  ;;  %v7120_v52 = vld [vmem:[#allocation7 + $0x90] sm:$0xff]  ;;  %v7121_v56 = vld [vmem:[#allocation7 + $0x68] sm:$0xff] }
 0xb01   :  { %5044 = vmatpush1.msra.mxu0 %v7111_v15  ;;  %5115 = vmatpush1.msra.mxu1 %v7112_v30  ;;  %v7122_v15 = vld [vmem:[#allocation7 + $0x78] sm:$0xff]  ;;  %v7123_v30 = vld [vmem:[#allocation7 + $0x60] sm:$0xff] }
 0xb02   :  { %5045 = vmatprep.subr.mxu0 %v7113_v60  ;;  %5116 = vmatprep.subr.mxu1 %v7114_v8  ;;  %v7124_v60 = vld [vmem:[#allocation7 + $0x70] sm:$0xff]  ;;  %v7125_v8 = vld [vmem:[#allocation7 + $0x48] sm:$0xff] }
 0xb03   :  { %5046 = vmatpush1.msra.mxu0 %v7115_v26  ;;  %5117 = vmatpush1.msra.mxu1 %v7116_v38  ;;  %v7126_v26 = vld [vmem:[#allocation7 + $0x58] sm:$0xff]  ;;  %v7127_v38 = vld [vmem:[#allocation7 + $0x40] sm:$0xff] }
 0xb04   :  { %5047 = vmatprep.subr.mxu0 %v7117_v22  ;;  %5118 = vmatprep.subr.mxu1 %v7118_v63  ;;  %v7128_v22 = vld [vmem:[#allocation7 + $0x50] sm:$0xff]  ;;  %v7129_v63 = vld [vmem:[#allocation7 + $0x28] sm:$0xff] }
 0xb05   :  { %5048 = vmatpush1.msra.mxu0 %v7119_v35  ;;  %5119 = vmatpush1.msra.mxu1 %v7120_v52  ;;  %v7130_v35 = vld [vmem:[#allocation7 + $0x38] sm:$0xff]  ;;  %v7131_v52 = vld [vmem:[#allocation7 + $0x20] sm:$0xff] }
 0xb06   :  { %5049 = vmatprep.subr.mxu0 %v7121_v56  ;;  %5120 = vmatprep.subr.mxu1 %v7122_v15  ;;  %v7132_v56 = vld [vmem:[#allocation7 + $0x30] sm:$0xff]  ;;  %v7133_v15 = vld [vmem:[#allocation7 + $0x8] sm:$0xff] }
 0xb07   :  { %5050 = vmatpush1.msra.mxu0 %v7123_v30  ;;  %5121 = vmatpush1.msra.mxu1 %v7124_v60  ;;  %v7134_v30 = vld [vmem:[#allocation7 + $0x18] sm:$0xff]  ;;  %v7135_v60 = vld [vmem:[#allocation7] sm:$0xff] }
 0xb08   :  { %5051 = vmatprep.subr.mxu0 %v7125_v8  ;;  %5122 = vmatprep.subr.mxu1 %v7126_v26  ;;  %v7136_v8 = vld [vmem:[#allocation5 + $0x1e8] sm:$0xff]  ;;  %v7137_v26 = vld [vmem:[#allocation5 + $0x1f8] sm:$0xff] }
 0xb09   :  { %5052 = vmatpush1.msra.mxu0 %v7127_v38  ;;  %5123 = vmatpush1.msra.mxu1 %v7128_v22 }
 0xb0a   :  { %5053 = vmatprep.subr.mxu0 %v7129_v63  ;;  %5124 = vmatprep.subr.mxu1 %v7130_v35 }
 0xb0b   :  { %5054 = vmatpush1.msra.mxu0 %v7131_v52  ;;  %5125 = vmatpush1.msra.mxu1 %v7132_v56 }
 0xb0c   :  { %5055 = vmatprep.subr.mxu0 %v7133_v15  ;;  %5126 = vmatprep.subr.mxu1 %v7134_v30 }
 0xb0d   :  { %5056 = vmatpush1.msra.mxu0 %v7135_v60  ;;  %5127 = vmatpush1.msra.mxu1 %v11421_v54 }
 0xb0e   :  { %5089 = vmatprep.mubr.f32.mxu0 %v12905_v24  ;;  %5160 = vmatprep.mubr.f32.mxu1 %v12905_v24 }
 0xb0f   :  { %5167 = vmatprep.subr.mxu0 %v7136_v8  ;;  %5238 = vmatprep.subr.mxu1 %v7137_v26 }
 0xb28   :  { %v4462_v38 = vpop.f32.mrf.mxu0  ;;  %v4533_v22 = vpop.f32.mrf.mxu1 }
 0xb2a   :  { %v4464_v63 = vpop.f32.mrf.mxu0  ;;  %v4535_v35 = vpop.f32.mrf.mxu1 }
 0xb49   :  { %v4604_v52 = vpop.f32.mrf.mxu0  ;;  %v4675_v56 = vpop.f32.mrf.mxu1 }
 0xb4a   :  { %v4605_v15 = vadd.f32 %v4604_v52, %v4462_v38  ;;  %v4676_v30 = vadd.f32 %v4675_v56, %v4533_v22 }
 0xb4b   :  { %v4606_v31 = vpop.f32.mrf.mxu0  ;;  %v4677_v60 = vpop.f32.mrf.mxu1 }
 0xb4c   :  { %v4607_v17 = vadd.f32 %v4606_v31, %v4464_v63  ;;  %v4678_v54 = vadd.f32 %v4677_v60, %v4535_v35 }
 0xb6b   :  { %v4746_v27 = vpop.f32.mrf.mxu0  ;;  %v4817_v3 = vpop.f32.mrf.mxu1 }
 0xb6c   :  { %v4822_v57 = vadd.f32 %v4746_v27, %v4605_v15  ;;  %v4824_v42 = vadd.f32 %v4817_v3, %v4676_v30 }
 0xb6d   :  { %v4748_v62 = vpop.f32.mrf.mxu0  ;;  %v4819_v8 = vpop.f32.mrf.mxu1 }
 0xb6e   :  { %v4826_v26 = vadd.f32 %v4822_v57, %v8283_v43  ;;  %v4823_v7 = vadd.f32 %v4748_v62, %v4607_v17  ;;  %v11771_v53 = vadd.f32 %v4819_v8, %v4678_v54  ;;  %v4828_v31 = vadd.f32 %v4824_v42, %v8297_v14 }
 0xb70   :  { %v5653_v50 = vmul.f32 -1.442695, %v4826_v26  ;;  %v4827_v49 = vadd.f32 %v4823_v7, %v8288_v19 }
 0xb72   :  { %5933 = vpow2.f32 %v5653_v50  ;;  %v5654_v38 = vmul.f32 -1.442695, %v4827_v49 }
 0xb74   :  { %5935 = vpow2.f32 %v5654_v38 }
 0xb75   :  { %5937 = vtanh.f32 %v4828_v31 }
 0xb7f   :  { %v5934_v22 = vpop.eup %5933 }
 0xb80   :  { %v4833_v63 = vadd.f32 1.0, %v5934_v22 }
 0xb81   :  { %v5936_v35 = vpop.eup %5935 }
 0xb82   :  { %5939 = vrcp.f32 %v4833_v63  ;;  %v4839_v3 = vadd.f32 1.0, %v5936_v35  ;;  %v5938_v27 = vpop.eup %5937 }
 0xb84   :  { %5941 = vrcp.f32 %v4839_v3 }
 0xb8f   :  { %v5940_v57 = vpop.eup %5939 }
 0xb90   :  { %v4850_v62 = vmul.f32 %v5940_v57, %v5938_v27 }
 0xb91   :  { %v5942_v17 = vpop.eup %5941 }
 0xb92   :  { %v4849_v52 = vmul.f32 %v5942_v17, %v11434_v18 }
 0xb94   :  { %v11776_v56 = vadd.f32 %v4850_v62, %v4849_v52 }
 0xbac   :  { %v4922_v50 = vpop.f32.mrf.mxu0 }
 0xbad   :  { %v4923_v49 = vadd.f32 %v4922_v50, %v7384_v12 }
 0xbae   :  { %v4924_v7 = vpop.f32.mrf.mxu0  ;;  %v4993_v60 = vpop.f32.mrf.mxu1 }
 0xbaf   :  { %v5657_v42 = vmul.f32 -1.442695, %v4923_v49  ;;  %v4925_v15 = vadd.f32 %v4924_v7, %v13373_v36  ;;  %v4994_v26 = vadd.f32 %v4993_v60, %v7400_v25  ;;  %v7138_v49 = vld [vmem:[#allocation5 + $0x1e0] sm:$0xff]  ;;  %v7139_v7 = vld [vmem:[#allocation5 + $0x1f0] sm:$0xff]  ;;  %v7144_v60 = vld [vmem:[#allocation5 + $0x1a8] sm:$0xff] }
 0xbb0   :  { %v4995_v54 = vpop.f32.mrf.mxu1 }
 0xbb1   :  { %5943 = vpow2.f32 %v5657_v42  ;;  %v5658_v30 = vmul.f32 -1.442695, %v4925_v15  ;;  %v4996_v8 = vadd.f32 %v4995_v54, %v7396_v23  ;;  %v7140_v42 = vld [vmem:[#allocation5 + $0x1c8] sm:$0xff]  ;;  %v7141_v15 = vld [vmem:[#allocation5 + $0x1d8] sm:$0xff] }
 0xbb2   :  { %v7145_v54 = vld [vmem:[#allocation5 + $0x1b8] sm:$0xff] }
 0xbb3   :  { %5945 = vpow2.f32 %v5658_v30  ;;  %v5659_v38 = vmul.f32 -1.442695, %v4996_v8  ;;  %v7143_v30 = vld [vmem:[#allocation5 + $0x1d0] sm:$0xff]  ;;  %v7146_v8 = vld [vmem:[#allocation5 + $0x1a0] sm:$0xff] }
 0xbb4   :  { %5947 = vtanh.f32 %v4994_v26  ;;  %v7147_v26 = vld [vmem:[#allocation5 + $0x1b0] sm:$0xff] }
 0xbb5   :  { %5949 = vpow2.f32 %v5659_v38  ;;  %v7148_v38 = vld [vmem:[#allocation5 + $0x188] sm:$0xff] }
 0xbbe   :  { %v5944_v18 = vpop.eup %5943 }
 0xbbf   :  { %v5001_v31 = vadd.f32 1.0, %v5944_v18  ;;  %v7149_v18 = vld [vmem:[#allocation5 + $0x198] sm:$0xff] }
 0xbc0   :  { %v5946_v22 = vpop.eup %5945 }
 0xbc1   :  { %5951 = vrcp.f32 %v5001_v31  ;;  %v5007_v12 = vadd.f32 1.0, %v5946_v22  ;;  %v5948_v63 = vpop.eup %5947  ;;  %v7150_v31 = vld [vmem:[#allocation5 + $0x180] sm:$0xff]  ;;  %v7151_v22 = vld [vmem:[#allocation5 + $0x190] sm:$0xff] }
 0xbc2   :  { %v5950_v36 = vpop.eup %5949 }
 0xbc3   :  { %5953 = vrcp.f32 %v5007_v12  ;;  %v5014_v27 = vadd.f32 1.0, %v5950_v36  ;;  %v7152_v12 = vld [vmem:[#allocation5 + $0x168] sm:$0xff]  ;;  %v7154_v36 = vld [vmem:[#allocation5 + $0x160] sm:$0xff] }
 0xbc5   :  { %5955 = vrcp.f32 %v5014_v27  ;;  %v7157_v27 = vld [vmem:[#allocation5 + $0x158] sm:$0xff] }
 0xbce   :  { %v5952_v35 = vpop.eup %5951 }
 0xbcf   :  { %v5018_v62 = vmul.f32 %v5952_v35, %v5948_v63  ;;  %v7153_v63 = vld [vmem:[#allocation5 + $0x178] sm:$0xff]  ;;  %v7155_v35 = vld [vmem:[#allocation5 + $0x170] sm:$0xff] }
 0xbd0   :  { %v5954_v3 = vpop.eup %5953 }
 0xbd1   :  { %v5017_v57 = vmul.f32 %v5954_v3, %v11441_v47  ;;  %v7142_v47 = vld [vmem:[#allocation5 + $0x1c0] sm:$0xff]  ;;  %v7156_v3 = vld [vmem:[#allocation5 + $0x148] sm:$0xff] }
 0xbd2   :  { %v5956_v25 = vpop.eup %5955 }
 0xbd3   :  { %v5019_v23 = vadd.f32 %v5018_v62, %v5017_v57  ;;  %v7158_v57 = vld [vmem:[#allocation5 + $0x140] sm:$0xff]  ;;  %v7159_v62 = vld [vmem:[#allocation5 + $0x150] sm:$0xff] }
 0xbd5   :  { %5957 = vtanh.f32 %v5019_v23  ;;  %v7160_v23 = vld [vmem:[#allocation5 + $0x128] sm:$0xff] }
 0xbe2   :  { %v5958_v17 = vpop.eup %5957 }
 0xbe3   :  { %v11783_v52 = vmul.f32 %v5958_v17, %v5956_v25  ;;  %v7161_v25 = vld [vmem:[#allocation5 + $0x138] sm:$0xff]  ;;  %v7162_v17 = vld [vmem:[#allocation5 + $0x120] sm:$0xff] }
 0xbe5   :  { %v5023_v50 = vrot.slane %v11783_v52, 2 }
 0xbe7   :  { %5090 = vmatmul.mubr.f32.vlgmr.msra.gmra.mxu0 %v5023_v50  ;;  %5161 = vmatmul.mubr.f32.vlgmr.msra.gmra.mxu1 %v5023_v50  ;;  %v7163_v50 = vld [vmem:[#allocation5 + $0x130] sm:$0xff] }
 0xbe8   :  { %5168 = vmatpush1.msra.mxu0 %v7138_v49  ;;  %5239 = vmatpush1.msra.mxu1 %v7139_v7  ;;  %v7164_v49 = vld [vmem:[#allocation5 + $0x108] sm:$0xff]  ;;  %v7165_v7 = vld [vmem:[#allocation5 + $0x118] sm:$0xff] }
 0xbe9   :  { %5169 = vmatprep.subr.mxu0 %v7140_v42  ;;  %5240 = vmatprep.subr.mxu1 %v7141_v15  ;;  %v7166_v42 = vld [vmem:[#allocation5 + $0x100] sm:$0xff]  ;;  %v7167_v15 = vld [vmem:[#allocation5 + $0x110] sm:$0xff] }
 0xbea   :  { %5170 = vmatpush1.msra.mxu0 %v7142_v47  ;;  %5241 = vmatpush1.msra.mxu1 %v7143_v30  ;;  %v7168_v47 = vld [vmem:[#allocation5 + $0xe8] sm:$0xff]  ;;  %v7169_v30 = vld [vmem:[#allocation5 + $0xf8] sm:$0xff] }
 0xbeb   :  { %5171 = vmatprep.subr.mxu0 %v7144_v60  ;;  %5242 = vmatprep.subr.mxu1 %v7145_v54  ;;  %v7170_v60 = vld [vmem:[#allocation5 + $0xe0] sm:$0xff]  ;;  %v7171_v54 = vld [vmem:[#allocation5 + $0xf0] sm:$0xff] }
 0xbec   :  { %5172 = vmatpush1.msra.mxu0 %v7146_v8  ;;  %5243 = vmatpush1.msra.mxu1 %v7147_v26  ;;  %v7172_v8 = vld [vmem:[#allocation5 + $0xc8] sm:$0xff]  ;;  %v7173_v26 = vld [vmem:[#allocation5 + $0xd8] sm:$0xff] }
 0xbed   :  { %5173 = vmatprep.subr.mxu0 %v7148_v38  ;;  %5244 = vmatprep.subr.mxu1 %v7149_v18  ;;  %v4829_v38 = vadd.f32 %v11771_v53, %v8424_v9  ;;  %v14560_v53 = vld [vmem:[#allocation39_spill] sm:$0xff]  ;;  %v14562_v18 = vld [vmem:[#allocation41_spill] sm:$0xff] }
 0xbee   :  { %5174 = vmatpush1.msra.mxu0 %v7150_v31  ;;  %5245 = vmatpush1.msra.mxu1 %v7151_v22  ;;  %v14563_v31 = vld [vmem:[#allocation42_spill] sm:$0xff]  ;;  %v14564_v22 = vld [vmem:[#allocation43_spill] sm:$0xff] }
 0xbef   :  { %5175 = vmatprep.subr.mxu0 %v7152_v12  ;;  %5246 = vmatprep.subr.mxu1 %v7153_v63  ;;  %v14565_v12 = vld [vmem:[#allocation44_spill] sm:$0xff]  ;;  %v14566_v63 = vld [vmem:[#allocation45_spill] sm:$0xff] }
 0xbf0   :  { %5176 = vmatpush1.msra.mxu0 %v7154_v36  ;;  %5247 = vmatpush1.msra.mxu1 %v7155_v35  ;;  %v14567_v36 = vld [vmem:[#allocation46_spill] sm:$0xff]  ;;  %v14568_v35 = vld [vmem:[#allocation47_spill] sm:$0xff] }
 0xbf1   :  { %5177 = vmatprep.subr.mxu0 %v7156_v3  ;;  %5248 = vmatprep.subr.mxu1 %v7157_v27  ;;  %v14569_v3 = vld [vmem:[#allocation48_spill] sm:$0xff]  ;;  %v14570_v27 = vld [vmem:[#allocation49_spill] sm:$0xff] }
 0xbf2   :  { %5178 = vmatpush1.msra.mxu0 %v7158_v57  ;;  %5249 = vmatpush1.msra.mxu1 %v7159_v62  ;;  %v14571_v57 = vld [vmem:[#allocation50_spill] sm:$0xff]  ;;  %v14572_v62 = vld [vmem:[#allocation51_spill] sm:$0xff] }
 0xbf3   :  { %5179 = vmatprep.subr.mxu0 %v7160_v23  ;;  %5250 = vmatprep.subr.mxu1 %v7161_v25  ;;  %v14573_v23 = vld [vmem:[#allocation52_spill] sm:$0xff]  ;;  %v14574_v25 = vld [vmem:[#allocation53_spill] sm:$0xff] }
 0xbf4   :  { %5180 = vmatpush1.msra.mxu0 %v7162_v17  ;;  %5251 = vmatpush1.msra.mxu1 %v7163_v50  ;;  %v14575_v17 = vld [vmem:[#allocation54_spill] sm:$0xff]  ;;  %v14576_v50 = vld [vmem:[#allocation55_spill] sm:$0xff] }
 0xbf5   :  { %5181 = vmatprep.subr.mxu0 %v7164_v49  ;;  %5252 = vmatprep.subr.mxu1 %v7165_v7  ;;  %v14577_v49 = vld [vmem:[#allocation56_spill] sm:$0xff]  ;;  %v14578_v7 = vld [vmem:[#allocation57_spill] sm:$0xff] }
 0xbf6   :  { %5182 = vmatpush1.msra.mxu0 %v7166_v42  ;;  %5253 = vmatpush1.msra.mxu1 %v7167_v15  ;;  %v14579_v42 = vld [vmem:[#allocation58_spill] sm:$0xff]  ;;  %v14580_v15 = vld [vmem:[#allocation59_spill] sm:$0xff] }
 0xbf7   :  { %5183 = vmatprep.subr.mxu0 %v7168_v47  ;;  %5254 = vmatprep.subr.mxu1 %v7169_v30  ;;  %v14581_v47 = vld [vmem:[#allocation60_spill] sm:$0xff]  ;;  %v14582_v30 = vld [vmem:[#allocation61_spill] sm:$0xff] }
 0xbf8   :  { %5184 = vmatpush1.msra.mxu0 %v7170_v60  ;;  %5255 = vmatpush1.msra.mxu1 %v7171_v54  ;;  %v14583_v60 = vld [vmem:[#allocation62_spill] sm:$0xff]  ;;  %v14584_v54 = vld [vmem:[#allocation63_spill] sm:$0xff] }
 0xbf9   :  { %5185 = vmatprep.subr.mxu0 %v7172_v8  ;;  %5256 = vmatprep.subr.mxu1 %v7173_v26  ;;  %v14585_v26 = vld [vmem:[#allocation64_spill] sm:$0xff] }
 0xbfa   :  { %5186 = vmatpush1.msra.mxu0 %v11483_v55  ;;  %5257 = vmatpush1.msra.mxu1 %v11486_v61  ;;  %v5655_v55 = vmul.f32 -1.442695, %v4829_v38  ;;  %v14533_v61 = vld [vmem:[#allocation282_spill] sm:$0xff]  ;;  %v14586_v38 = vld [vmem:[#allocation65_spill] sm:$0xff] }
 0xbfb   :  { %5187 = vmatprep.subr.mxu0 %v11489_v29  ;;  %5258 = vmatprep.subr.mxu1 %v11492_v58  ;;  %v14534_v29 = vld [vmem:[#allocation283_spill] sm:$0xff]  ;;  %v14535_v58 = vld [vmem:[#allocation284_spill] sm:$0xff] }
 0xbfc   :  { %5188 = vmatpush1.msra.mxu0 %v11495_v48  ;;  %5259 = vmatpush1.msra.mxu1 %v11498_v34  ;;  %5959 = vpow2.f32 %v5655_v55  ;;  %v14536_v48 = vld [vmem:[#allocation285_spill] sm:$0xff]  ;;  %v14537_v34 = vld [vmem:[#allocation16_spill] sm:$0xff]  ;;  %v14587_v55 = vld [vmem:[#allocation66_spill] sm:$0xff] }
 0xbfd   :  { %5189 = vmatprep.subr.mxu0 %v11501_v40  ;;  %5260 = vmatprep.subr.mxu1 %v11504_v33  ;;  %v14538_v40 = vld [vmem:[#allocation17_spill] sm:$0xff]  ;;  %v14539_v33 = vld [vmem:[#allocation18_spill] sm:$0xff]  ;;  %5961 = vtanh.f32 %v11776_v56 }
 0xbfe   :  { %5190 = vmatpush1.msra.mxu0 %v11509_v21  ;;  %5261 = vmatpush1.msra.mxu1 %v11512_v13  ;;  %v14540_v21 = vld [vmem:[#allocation19_spill] sm:$0xff]  ;;  %v14541_v13 = vld [vmem:[#allocation20_spill] sm:$0xff] }
 0xbff   :  { %5191 = vmatprep.subr.mxu0 %v11515_v0  ;;  %5262 = vmatprep.subr.mxu1 %v11518_v1  ;;  %v14542_v0 = vld [vmem:[#allocation21_spill] sm:$0xff]  ;;  %v14543_v1 = vld [vmem:[#allocation22_spill] sm:$0xff] }
 0xc00   :  { %5192 = vmatpush1.msra.mxu0 %v11521_v20  ;;  %5263 = vmatpush1.msra.mxu1 %v11524_v5  ;;  %v14544_v20 = vld [vmem:[#allocation23_spill] sm:$0xff]  ;;  %v14545_v5 = vld [vmem:[#allocation24_spill] sm:$0xff] }
 0xc01   :  { %5193 = vmatprep.subr.mxu0 %v11527_v39  ;;  %5264 = vmatprep.subr.mxu1 %v11530_v37  ;;  %v14546_v39 = vld [vmem:[#allocation25_spill] sm:$0xff]  ;;  %v14547_v37 = vld [vmem:[#allocation26_spill] sm:$0xff] }
 0xc02   :  { %5194 = vmatpush1.msra.mxu0 %v11533_v10  ;;  %5265 = vmatpush1.msra.mxu1 %v11536_v6  ;;  %v14548_v10 = vld [vmem:[#allocation27_spill] sm:$0xff] }
 0xc03   :  { %5195 = vmatprep.subr.mxu0 %v11539_v4  ;;  %5266 = vmatprep.subr.mxu1 %v11542_v28  ;;  %v14549_v4 = vld [vmem:[#allocation28_spill] sm:$0xff]  ;;  %v14550_v28 = vld [vmem:[#allocation29_spill] sm:$0xff] }
 0xc04   :  { %5196 = vmatpush1.msra.mxu0 %v11545_v51  ;;  %5267 = vmatpush1.msra.mxu1 %v11548_v32  ;;  %v14551_v51 = vld [vmem:[#allocation30_spill] sm:$0xff]  ;;  %v14552_v32 = vld [vmem:[#allocation31_spill] sm:$0xff] }
 0xc05   :  { %5197 = vmatprep.subr.mxu0 %v11551_v16  ;;  %5268 = vmatprep.subr.mxu1 %v11554_v41  ;;  %v14553_v16 = vld [vmem:[#allocation32_spill] sm:$0xff]  ;;  %v14554_v41 = vld [vmem:[#allocation33_spill] sm:$0xff] }
 0xc06   :  { %5198 = vmatpush1.msra.mxu0 %v11557_v44  ;;  %5231 = vmatprep.mubr.f32.mxu0 %v12905_v24 }
 0xc07   :  { %5269 = vmatpush1.msra.mxu1 %v11561_v45  ;;  %5302 = vmatprep.mubr.f32.mxu1 %v12905_v24  ;;  %v14555_v45 = vld [vmem:[#allocation34_spill] sm:$0xff] }
 0xc08   :  { %5232 = vmatmul.mubr.f32.vlgmr.msra.gmra.mxu0 %v11783_v52  ;;  %5303 = vmatmul.mubr.f32.vlgmr.msra.gmra.mxu1 %v11783_v52  ;;  %v14561_v52 = vld [vmem:[#allocation40_spill] sm:$0xff] }
 0xc09   :  { %5309 = vmatprep.subr.mxu0 %v11567_v2  ;;  %5380 = vmatprep.subr.mxu1 %v11570_v59  ;;  %v5960_v6 = vpop.eup %5959  ;;  %v14556_v2 = vld [vmem:[#allocation35_spill] sm:$0xff]  ;;  %v14557_v59 = vld [vmem:[#allocation36_spill] sm:$0xff] }
 0xc0a   :  { %5310 = vmatpush1.msra.mxu0 %v11573_v11  ;;  %5381 = vmatpush1.msra.mxu1 %v11576_v46  ;;  %v4846_v44 = vadd.f32 1.0, %v5960_v6  ;;  %v14558_v11 = vld [vmem:[#allocation37_spill] sm:$0xff]  ;;  %v14559_v46 = vld [vmem:[#allocation38_spill] sm:$0xff]  ;;  %v5962_v8 = vpop.eup %5961 }
 0xc0b   :  { %5311 = vmatprep.subr.mxu0 %v14533_v61  ;;  %5382 = vmatprep.subr.mxu1 %v14534_v29  ;;  %v14588_v61 = vld [vmem:[#allocation67_spill] sm:$0xff]  ;;  %v5489_v6 = vld [vmem:[%s11971_s7 + $0x30] sm:$0xff] }
 0xc0c   :  { %5312 = vmatpush1.msra.mxu0 %v14535_v58  ;;  %5383 = vmatpush1.msra.mxu1 %v14536_v48  ;;  %5963 = vrcp.f32 %v4846_v44  ;;  %v14589_v58 = vld [vmem:[#allocation68_spill] sm:$0xff]  ;;  %v14590_v48 = vld [vmem:[#allocation69_spill] sm:$0xff] }
 0xc0d   :  { %5313 = vmatprep.subr.mxu0 %v14537_v34  ;;  %5384 = vmatprep.subr.mxu1 %v14538_v40  ;;  %v14591_v34 = vld [vmem:[#allocation70_spill] sm:$0xff] }
 0xc0e   :  { %5314 = vmatpush1.msra.mxu0 %v14539_v33  ;;  %5385 = vmatpush1.msra.mxu1 %v14540_v21  ;;  %v14592_v33 = vld [vmem:[#allocation71_spill] sm:$0xff]  ;;  %v5498_v21 = vld [vmem:[%s11971_s7 + $0x78] sm:$0xff] }
 0xc0f   :  { %5315 = vmatprep.subr.mxu0 %v14541_v13  ;;  %5386 = vmatprep.subr.mxu1 %v14542_v0  ;;  %v5497_v13 = vld [vmem:[%s11971_s7 + $0x70] sm:$0xff]  ;;  %v5496_v0 = vld [vmem:[%s11971_s7 + $0x68] sm:$0xff] }
 0xc10   :  { %5316 = vmatpush1.msra.mxu0 %v14543_v1  ;;  %5387 = vmatpush1.msra.mxu1 %v14544_v20  ;;  %v5495_v1 = vld [vmem:[%s11971_s7 + $0x60] sm:$0xff]  ;;  %v5494_v20 = vld [vmem:[%s11971_s7 + $0x58] sm:$0xff] }
 0xc11   :  { %5317 = vmatprep.subr.mxu0 %v14545_v5  ;;  %5388 = vmatprep.subr.mxu1 %v14546_v39  ;;  %v5493_v5 = vld [vmem:[%s11971_s7 + $0x50] sm:$0xff]  ;;  %v5492_v39 = vld [vmem:[%s11971_s7 + $0x48] sm:$0xff] }
 0xc12   :  { %5318 = vmatpush1.msra.mxu0 %v14547_v37  ;;  %5389 = vmatpush1.msra.mxu1 %v14548_v10  ;;  %v5491_v37 = vld [vmem:[%s11971_s7 + $0x40] sm:$0xff]  ;;  %v5490_v10 = vld [vmem:[%s11971_s7 + $0x38] sm:$0xff] }
 0xc13   :  { %5319 = vmatprep.subr.mxu0 %v14549_v4  ;;  %5390 = vmatprep.subr.mxu1 %v14550_v28  ;;  %v5488_v4 = vld [vmem:[%s11971_s7 + $0x28] sm:$0xff]  ;;  %v5487_v28 = vld [vmem:[%s11971_s7 + $0x20] sm:$0xff] }
 0xc14   :  { %5320 = vmatpush1.msra.mxu0 %v14551_v51  ;;  %5391 = vmatpush1.msra.mxu1 %v14552_v32  ;;  %v5486_v51 = vld [vmem:[%s11971_s7 + $0x18] sm:$0xff]  ;;  %v5485_v32 = vld [vmem:[%s11971_s7 + $0x10] sm:$0xff] }
 0xc15   :  { %5321 = vmatprep.subr.mxu0 %v14553_v16  ;;  %5392 = vmatprep.subr.mxu1 %v14554_v41  ;;  %v5484_v16 = vld [vmem:[%s11971_s7 + $0x8] sm:$0xff]  ;;  %v5483_v41 = vld [vmem:[%s11971_s7] sm:$0xff] }
 0xc16   :  { %5322 = vmatpush1.msra.mxu0 %v14555_v45  ;;  %5393 = vmatpush1.msra.mxu1 %v14556_v2 }
 0xc17   :  { %5323 = vmatprep.subr.mxu0 %v14557_v59  ;;  %5394 = vmatprep.subr.mxu1 %v14558_v11 }
 0xc18   :  { %5324 = vmatpush1.msra.mxu0 %v14559_v46  ;;  %5395 = vmatpush1.msra.mxu1 %v14560_v53 }
 0xc19   :  { %5325 = vmatprep.subr.mxu0 %v14561_v52  ;;  %5396 = vmatprep.subr.mxu1 %v14562_v18  ;;  %v5964_v29 = vpop.eup %5963 }
 0xc1a   :  { %5326 = vmatpush1.msra.mxu0 %v14563_v31  ;;  %5397 = vmatpush1.msra.mxu1 %v14564_v22  ;;  %v4853_v40 = vmul.f32 %v5964_v29, %v5962_v8 }
 0xc1b   :  { %5327 = vmatprep.subr.mxu0 %v14565_v12  ;;  %5398 = vmatprep.subr.mxu1 %v14566_v63 }
 0xc1c   :  { %5328 = vmatpush1.msra.mxu0 %v14567_v36  ;;  %5399 = vmatpush1.msra.mxu1 %v14568_v35 }
 0xc1d   :  { %5329 = vmatprep.subr.mxu0 %v14569_v3  ;;  %5400 = vmatprep.subr.mxu1 %v14570_v27 }
 0xc1e   :  { %5330 = vmatpush1.msra.mxu0 %v14571_v57  ;;  %5401 = vmatpush1.msra.mxu1 %v14572_v62 }
 0xc1f   :  { %5331 = vmatprep.subr.mxu0 %v14573_v23  ;;  %5402 = vmatprep.subr.mxu1 %v14574_v25 }
 0xc20   :  { %5332 = vmatpush1.msra.mxu0 %v14575_v17  ;;  %5403 = vmatpush1.msra.mxu1 %v14576_v50 }
 0xc21   :  { %5333 = vmatprep.subr.mxu0 %v14577_v49  ;;  %5404 = vmatprep.subr.mxu1 %v14578_v7 }
 0xc22   :  { %5334 = vmatpush1.msra.mxu0 %v14579_v42  ;;  %5405 = vmatpush1.msra.mxu1 %v14580_v15 }
 0xc23   :  { %5335 = vmatprep.subr.mxu0 %v14581_v47  ;;  %5406 = vmatprep.subr.mxu1 %v14582_v30 }
 0xc24   :  { %5336 = vmatpush1.msra.mxu0 %v14583_v60  ;;  %5407 = vmatpush1.msra.mxu1 %v14584_v54 }
 0xc25   :  { %5337 = vmatprep.subr.mxu0 %v14585_v26  ;;  %5408 = vmatprep.subr.mxu1 %v14586_v38 }
 0xc26   :  { %5338 = vmatpush1.msra.mxu0 %v14587_v55  ;;  %5409 = vmatpush1.msra.mxu1 %v14588_v61 }
 0xc27   :  { %5339 = vmatprep.subr.mxu0 %v14589_v58  ;;  %5410 = vmatprep.subr.mxu1 %v14590_v48  ;;  %v5663_v58 = vld [vmem:[%s11972_s8] ss:$0 sm:$0xff]  ;;  %s7290_s8 = smov [#allocation10]  }
 0xc28   :  { %5340 = vmatpush1.msra.mxu0 %v14591_v34  ;;  %5373 = vmatprep.mubr.f32.mxu0 %v12905_v24  ;;  %s5597_s1 = sshll.u32 %s7290_s8, 4  ;;  %s5598_s1 = int_to_ptr.vmem [resolvable:$true] %s5597_s1 }
 0xc29   :  { %5411 = vmatpush1.msra.mxu1 %v14592_v33  ;;  %5444 = vmatprep.mubr.f32.mxu1 %v12905_v24  ;;  %s7254_s27 = scalar_lea.vmem %s5598_s1, 32  ;;  %p7259_p7 = scmp.lt.s32.totalorder %s5598_s1, %s5598_s1 }
 0xc2a   :  { %5374 = vmatmul.mubr.f32.vlgmr.msra.gmra.mxu0 %v4853_v40  ;;  %5445 = vmatmul.mubr.f32.vlgmr.msra.gmra.mxu1 %v4853_v40  ;;  %p7255_p6 = scmp.ne.s32.totalorder %s5598_s1, %s7254_s27  ;;  %p7260_p8 = scmp.lt.s32.totalorder %s7254_s27, %s7254_s27 }
 0xc2b   :  { %5681 = vmatprep.subr.mxu0 %v12905_v24  ;;  %5713 = vmatprep.mubr.msk.f32.mxu0 %vm7289_vm0, %v12905_v24 }
 0xc2c   :  { %5682 = vmatpush3.msra.mxu0 %v5498_v21  ;;  %p7261_p9 = por %p7260_p8, %p7259_p7 }
 0xc2d   :  { %5683 = vmatprep.subr.mxu0 %v12905_v24 }
 0xc2e   :  { %5684 = vmatpush3.msra.mxu0 %v5497_v13  ;;  %p7262_p10 = pnand %p7261_p9, %p7255_p6 }
 0xc2f   :  { %5685 = vmatprep.subr.mxu0 %v12905_v24 }
 0xc30   :  { %5686 = vmatpush3.msra.mxu0 %v5496_v0 }
 0xc31   :  { %5687 = vmatprep.subr.mxu0 %v12905_v24 }
 0xc32   :  { %5688 = vmatpush3.msra.mxu0 %v5495_v1 }
 0xc33   :  { %5689 = vmatprep.subr.mxu0 %v12905_v24 }
 0xc34   :  { %5690 = vmatpush3.msra.mxu0 %v5494_v20 }
 0xc35   :  { %5691 = vmatprep.subr.mxu0 %v12905_v24 }
 0xc36   :  { %5692 = vmatpush3.msra.mxu0 %v5493_v5 }
 0xc37   :  { %5693 = vmatprep.subr.mxu0 %v12905_v24 }
 0xc38   :  { %5694 = vmatpush3.msra.mxu0 %v5492_v39 }
 0xc39   :  { %5695 = vmatprep.subr.mxu0 %v12905_v24 }
 0xc3a   :  { %5696 = vmatpush3.msra.mxu0 %v5491_v37 }
 0xc3b   :  { %5697 = vmatprep.subr.mxu0 %v12905_v24 }
 0xc3c   :  { %5698 = vmatpush3.msra.mxu0 %v5490_v10 }
 0xc3d   :  { %5699 = vmatprep.subr.mxu0 %v12905_v24 }
 0xc3e   :  { %5700 = vmatpush3.msra.mxu0 %v5489_v6 }
 0xc3f   :  { %5701 = vmatprep.subr.mxu0 %v12905_v24 }
 0xc40   :  { %5702 = vmatpush3.msra.mxu0 %v5488_v4 }
 0xc41   :  { %5703 = vmatprep.subr.mxu0 %v12905_v24 }
 0xc42   :  { %5704 = vmatpush3.msra.mxu0 %v5487_v28 }
 0xc43   :  { %5705 = vmatprep.subr.mxu0 %v12905_v24 }
 0xc44   :  { %5706 = vmatpush3.msra.mxu0 %v5486_v51 }
 0xc45   :  { %5707 = vmatprep.subr.mxu0 %v12905_v24 }
 0xc46   :  { %5708 = vmatpush3.msra.mxu0 %v5485_v32 }
 0xc47   :  { %5709 = vmatprep.subr.mxu0 %v12905_v24 }
 0xc48   :  { %5710 = vmatpush3.msra.mxu0 %v5484_v16 }
 0xc49   :  { %5711 = vmatprep.subr.mxu0 %v12905_v24 }
 0xc4a   :  { %5712 = vmatpush3.msra.mxu0 %v5483_v41 }
 0xca7   :  { %v5091_v44 = vpop.f32.mrf.mxu0  ;;  %v5162_v45 = vpop.f32.mrf.mxu1 }
 0xca9   :  { %v5093_v2 = vpop.f32.mrf.mxu0  ;;  %v5164_v11 = vpop.f32.mrf.mxu1 }
 0xcc8   :  { %v5233_v59 = vpop.f32.mrf.mxu0  ;;  %v5304_v46 = vpop.f32.mrf.mxu1 }
 0xcc9   :  { %v5234_v52 = vadd.f32 %v5233_v59, %v5091_v44  ;;  %v5305_v17 = vadd.f32 %v5304_v46, %v5162_v45 }
 0xcca   :  { %v5235_v53 = vpop.f32.mrf.mxu0  ;;  %v5306_v22 = vpop.f32.mrf.mxu1 }
 0xccb   :  { %v5236_v31 = vadd.f32 %v5235_v53, %v5093_v2  ;;  %v5307_v23 = vadd.f32 %v5306_v22, %v5164_v11 }
 0xcea   :  { %v5375_v18 = vpop.f32.mrf.mxu0  ;;  %v5446_v35 = vpop.f32.mrf.mxu1 }
 0xceb   :  { %v5451_v12 = vadd.f32 %v5375_v18, %v5234_v52  ;;  %v5453_v49 = vadd.f32 %v5446_v35, %v5305_v17 }
 0xcec   :  { %v5377_v63 = vpop.f32.mrf.mxu0  ;;  %v5448_v62 = vpop.f32.mrf.mxu1 }
 0xced   :  { %v5455_v36 = vadd.f32 %v5451_v12, %v8283_v43  ;;  %v5452_v3 = vadd.f32 %v5377_v63, %v5236_v31  ;;  %v5454_v25 = vadd.f32 %v5448_v62, %v5307_v23  ;;  %v5457_v15 = vadd.f32 %v5453_v49, %v8297_v14 }
 0xcef   :  { %v5660_v27 = vmul.f32 -1.442695, %v5455_v36  ;;  %v5456_v24 = vadd.f32 %v5452_v3, %v8288_v19  ;;  %v5458_v50 = vadd.f32 %v5454_v25, %v8424_v9 }
 0xcf1   :  { %5965 = vpow2.f32 %v5660_v27  ;;  %v5661_v57 = vmul.f32 -1.442695, %v5456_v24  ;;  %v5662_v7 = vmul.f32 -1.442695, %v5458_v50 }
 0xcf3   :  { %5967 = vpow2.f32 %v5661_v57 }
 0xcf4   :  { %5969 = vpow2.f32 %v5662_v7 }
 0xcfe   :  { %v5966_v42 = vpop.eup %5965 }
 0xcff   :  { %v5462_v43 = vadd.f32 1.0, %v5966_v42 }
 0xd00   :  { %v5968_v47 = vpop.eup %5967 }
 0xd01   :  { %5971 = vrcp.f32 %v5462_v43  ;;  %v5468_v30 = vadd.f32 1.0, %v5968_v47  ;;  %v5970_v19 = vpop.eup %5969 }
 0xd02   :  { %5973 = vtanh.f32 %v5457_v15  ;;  %v5475_v26 = vadd.f32 1.0, %v5970_v19 }
 0xd03   :  { %5975 = vrcp.f32 %v5468_v30 }
 0xd04   :  { %5977 = vrcp.f32 %v5475_v26 }
 0xd0e   :  { %v5972_v60 = vpop.eup %5971 }
 0xd0f   :  { %v5974_v54 = vpop.eup %5973 }
 0xd10   :  { %v5976_v8 = vpop.eup %5975  ;;  %v5479_v38 = vmul.f32 %v5974_v54, %v5972_v60 }
 0xd11   :  { %v5478_v9 = vmul.f32 %v5976_v8, %v11776_v56  ;;  %v5978_v61 = vpop.eup %5977 }
 0xd13   :  { %v5480_v55 = vadd.f32 %v5479_v38, %v5478_v9 }
 0xd15   :  { %5979 = vtanh.f32 %v5480_v55 }
 0xd22   :  { %v5980_v14 = vpop.eup %5979 }
 0xd23   :  { %v5482_v29 = vmul.f32 %v5980_v14, %v5978_v61 }
 0xd25   :  { %5714 = vmatmul.mubr.f32.vlgmr.msra.gmra.mxu0 %v5482_v29 }
 0xde5   :  { %v5572_v48 = vpop.f32.mrf.mxu0 }
 0xde6   :  { %v5573_v34 = vadd.f32 %v5663_v58, %v5572_v48 }
 0xde7   :  { %v5715_v40 = vpop.f32.mrf.mxu0 }
 0xde8   :  { %v5577_v33 = vsel %vm5576_vm1, %v5573_v34, -inf }
 0xde9   :  { %5578 = vmax.xlane.f32.xlu0 %v5577_v33 }
 0xe72   :  { %v5579_v21 = vpop.xlane.xlu0 %5578 }
 0xe73   :  { %v5580_v56 = vsub.f32 %v5573_v34, %v5579_v21 }
 0xe75   :  { %v5581_v13 = vmul.f32 1.442695, %v5580_v56 }
 0xe77   :  { %5981 = vpow2.f32 %v5581_v13 }
 0xe84   :  { %v5982_v0 = vpop.eup %5981 }
 0xe85   :  { %v5583_v1 = vsel %vm5576_vm1, %v5982_v0, 0.0 }
 0xe86   :  { %5584 = vadd.xlane.f32.xlu0 %v5583_v1 }
 0xf0f   :  { %v5585_v20 = vpop.xlane.xlu0 %5584 }
 0xf10   :  { %5983 = vlog2.f32 %v5585_v20 }
 0xf1d   :  { %v5984_v5 = vpop.eup %5983 }
 0xf1e   :  { %v5587_v39 = vmul.f32 0.6931472, %v5984_v5 }
 0xf20   :  { %v5588_v37 = vadd.f32 %v5587_v39, %v5579_v21 }
 0xf22   :  { %v5589_v10 = vsub.f32 %v5573_v34, %v5588_v37 }
 0xf24   :  { %5590 = vst.msk [vmem:[#allocation10] sm:$0x3] %vm5576_vm1, %v5589_v10 }
 0xf25   :  { %7265 = shalt.err (!%p7262_p10)
}
 0xf26   :  { %5600 = dma.vmem_to_hbm [thread:$0]  %s5598_s1, 32, %s11973_s9, [#allocation4]  }
 0xf27   :  { %7280 = dma.done.wait [#allocation4], 32  }
 0xf28   :  { %7281 = vsyncadd [#allocation4], 4294967264 }
 0xf29   :  { %5604 = vsyncpa [#allocation3], 1 }
 0xf2a   :  { %5605 = vsyncpa [#allocation6], 1 }
 0xf2b   :  { %5606 = vsyncpa [#allocation9], 1 }
 0xf2c   :  { %5607 = vsyncpa [#allocation4], 1 }

</bundles_post_ra>
